<compile_context>
chip_gen: v7x
topology: tpu7x:2x2x1
jax: 0.10.0
libtpu: 0.0.40
codegen_flags: <defaults>
</compile_context>

<pallas_src>
import functools

import jax
import jax.numpy as jnp
from jax.experimental import pallas as pl
from jax.experimental.pallas import tpu as pltpu

_BN_EPS = 1e-5  # nn.BatchNorm2d default
_H = 8
_W = 8
_HW = _H * _W


def _vmem_spec():
    return pl.BlockSpec(memory_space=pltpu.MemorySpace.VMEM)


def _round_up(n, m):
    return ((n + m - 1) // m) * m


# ---------------------------------------------------------------------------
# Fused kernel
# ---------------------------------------------------------------------------
def _fused_forward_kernel(num_res_blocks, *refs):
    it = iter(refs)
    # ---- inputs -----------------------------------------------------------
    x_ref = next(it)                                        # (B, 8, 8, Cin) f32
    w_in_ref, g_in_ref, b_in_ref = next(it), next(it), next(it)
    blocks = [tuple(next(it) for _ in range(6)) for _ in range(num_res_blocks)]
    pw_ref, pg_ref, pb_ref = next(it), next(it), next(it)   # policy 1x1 conv + BN
    pfc_w0_ref, pfc_w1_ref, pfc_b_ref = next(it), next(it), next(it)
    vw_ref, vg_ref, vb_ref = next(it), next(it), next(it)   # value 1x1 conv + BN
    vfc1_w_ref, vfc1_b_ref = next(it), next(it)
    vfc2_w_ref, vfc2_b_ref = next(it), next(it)
    # ---- outputs ----------------------------------------------------------
    policy_ref, value_ref = next(it), next(it)              # (B, Mpad), (B, 1)
    # ---- scratch ----------------------------------------------------------
    pad_in_ref, pad_mid_ref = next(it), next(it)            # padded activations

    B, H, W, Cin = x_ref.shape
    HW = H * W
    R = B * HW

    def bdot(a, b):
        # bf16 matmul operands, f32 accumulation (MXU-native on all gens).
        return jnp.dot(a.astype(jnp.bfloat16), b.astype(jnp.bfloat16),
                       preferred_element_type=jnp.float32)

    def batchnorm(acc, gamma_ref, beta_ref):
        # Training-mode BN, one-pass stats folded into scale/shift (f32).
        mean = jnp.mean(acc, axis=0, keepdims=True)
        var = jnp.mean(acc * acc, axis=0, keepdims=True) - mean * mean
        scale = gamma_ref[...] * jax.lax.rsqrt(var + _BN_EPS)
        shift = beta_ref[...] - mean * scale
        return acc * scale + shift

    def conv3x3(act_flat, w_ref, pad_ref):
        # act_flat: (R, cin) f32.  3x3 conv (padding=1, no bias) via 9 shifted
        # matmuls against the zero-padded VMEM scratch.
        cin = act_flat.shape[-1]
        cout = w_ref.shape[-1]
        pad_ref[:, 1:H + 1, 1:W + 1, :] = act_flat.reshape(B, H, W, cin)
        w = w_ref[...]                                      # (3, 3, cin, cout) bf16
        acc = jnp.zeros((R, cout), jnp.float32)
        for dy in range(3):
            for dx in range(3):
                patch = pad_ref[:, dy:dy + H, dx:dx + W, :].reshape(R, cin)
                acc = acc + bdot(patch, w[dy, dx])
        return acc

    # Zero the padded scratch once; only the interior is rewritten per layer,
    # so the 1-pixel border stays zero for every conv.
    pad_in_ref[...] = jnp.zeros_like(pad_in_ref)
    pad_mid_ref[...] = jnp.zeros_like(pad_mid_ref)

    # ------------------------- trunk ---------------------------------------
    x = x_ref[...].reshape(R, Cin)
    out = jnp.maximum(
        batchnorm(conv3x3(x, w_in_ref, pad_in_ref), g_in_ref, b_in_ref), 0.0)
    for (w1, g1, b1, w2, g2, b2) in blocks:
        h = jnp.maximum(batchnorm(conv3x3(out, w1, pad_mid_ref), g1, b1), 0.0)
        h = batchnorm(conv3x3(h, w2, pad_mid_ref), g2, b2)
        out = jnp.maximum(h + out, 0.0)                     # residual + ReLU

    # Selector matrices for the NCHW-style flatten (gather-as-matmul):
    #   s_sel[r, s] = 1 iff (r mod HW) == s      -> (R, HW)
    #   b_sel[b, r] = 1 iff (r div HW) == b      -> (B, R)
    s_eq = (jax.lax.broadcasted_iota(jnp.int32, (B, HW, HW), 1) ==
            jax.lax.broadcasted_iota(jnp.int32, (B, HW, HW), 2))
    s_sel = s_eq.astype(jnp.float32).reshape(R, HW)
    b_idx = jax.lax.broadcasted_iota(jnp.int32, (B, R), 0)
    r_idx = jax.lax.broadcasted_iota(jnp.int32, (B, R), 1)
    b_sel = ((r_idx >= b_idx * HW) &
             (r_idx < (b_idx + 1) * HW)).astype(jnp.float32)

    # ------------------------- policy head ----------------------------------
    pfeat = bdot(out, pw_ref[...])                          # (R, 2) 1x1 conv
    pfeat = jnp.maximum(batchnorm(pfeat, pg_ref, pb_ref), 0.0)
    # P_c[b, s] = pfeat[b*HW + s, c]  (channel-major torch flatten)
    p0 = bdot(b_sel, pfeat[:, 0:1] * s_sel)                 # (B, HW)
    p1 = bdot(b_sel, pfeat[:, 1:2] * s_sel)                 # (B, HW)
    logits = bdot(p0, pfc_w0_ref[...]) + bdot(p1, pfc_w1_ref[...]) \
        + pfc_b_ref[...]                                    # (B, Mpad) lane-dense
    policy_ref[...] = logits

    # ------------------------- value head -----------------------------------
    vfeat = bdot(out, vw_ref[...])                          # (R, 1) 1x1 conv
    vfeat = jnp.maximum(batchnorm(vfeat, vg_ref, vb_ref), 0.0)
    v_g = bdot(b_sel, vfeat * s_sel)                        # (B, HW)
    hid = jnp.maximum(bdot(v_g, vfc1_w_ref[...]) + vfc1_b_ref[...], 0.0)
    val = jnp.tanh(bdot(hid, vfc2_w_ref[...]) + vfc2_b_ref[...])
    value_ref[...] = val


# ---------------------------------------------------------------------------
# Parameters (generated directly in kernel-friendly layout / dtypes)
# ---------------------------------------------------------------------------
def init_params(key, in_channels=14, num_channels=64, num_res_blocks=3,
                num_moves=4672):
    keys = iter(jax.random.split(key, 256))

    def nrm(shape, scale):
        return (scale * jax.random.normal(next(keys), shape)).astype(jnp.float32)

    def bn(c):
        gamma = (1.0 + 0.1 * jax.random.normal(next(keys), (1, c))).astype(jnp.float32)
        beta = (0.1 * jax.random.normal(next(keys), (1, c))).astype(jnp.float32)
        return gamma, beta

    mpad = _round_up(num_moves, 128)
    p = {}
    # conv weights stored as (3, 3, Cin, Cout) == torch weight.transpose(2,3,1,0), bf16
    p["conv_in_w"] = nrm((3, 3, in_channels, num_channels), 0.1).astype(jnp.bfloat16)
    p["bn_in_g"], p["bn_in_b"] = bn(num_channels)
    blocks = []
    for _ in range(num_res_blocks):
        blk = {}
        blk["w1"] = nrm((3, 3, num_channels, num_channels), 0.1).astype(jnp.bfloat16)
        blk["g1"], blk["b1"] = bn(num_channels)
        blk["w2"] = nrm((3, 3, num_channels, num_channels), 0.1).astype(jnp.bfloat16)
        blk["g2"], blk["b2"] = bn(num_channels)
        blocks.append(blk)
    p["res_blocks"] = blocks

    # policy head: 1x1 conv (Cin, 2); FC weight generated as torch weight.T
    # = (2*8*8, num_moves), then split per policy channel and zero-padded on
    # the output dim to a multiple of 128 for lane-dense stores.
    p["policy_w"] = nrm((num_channels, 2), 0.1).astype(jnp.bfloat16)
    p["policy_g"], p["policy_b"] = bn(2)
    pfc_w = nrm((2 * _HW, num_moves), 0.05)
    pfc_b = nrm((1, num_moves), 0.05)
    pad_n = mpad - num_moves
    p["policy_fc_w0"] = jnp.pad(pfc_w[:_HW], ((0, 0), (0, pad_n))).astype(jnp.bfloat16)
    p["policy_fc_w1"] = jnp.pad(pfc_w[_HW:], ((0, 0), (0, pad_n))).astype(jnp.bfloat16)
    p["policy_fc_b"] = jnp.pad(pfc_b, ((0, 0), (0, pad_n)))

    # value head
    p["value_w"] = nrm((num_channels, 1), 0.1).astype(jnp.bfloat16)
    p["value_g"], p["value_b"] = bn(1)
    p["value_fc1_w"] = nrm((_HW, 128), 0.05).astype(jnp.bfloat16)   # torch weight.T
    p["value_fc1_b"] = nrm((1, 128), 0.05)
    p["value_fc2_w"] = nrm((128, 1), 0.05).astype(jnp.bfloat16)     # torch weight.T
    p["value_fc2_b"] = nrm((1, 1), 0.05)
    return p


# ---------------------------------------------------------------------------
# Forward wrapper (single pallas_call)
# ---------------------------------------------------------------------------
def chess_model_forward(params, x_nchw, *, num_moves):
    """x_nchw: (B, in_channels, 8, 8) -> (policy_logits (B, num_moves), value (B, 1))."""
    x = jnp.transpose(x_nchw, (0, 2, 3, 1)).astype(jnp.float32)   # NCHW -> NHWC
    B, H, W, Cin = x.shape
    C = params["conv_in_w"].shape[-1]
    mpad = params["policy_fc_b"].shape[-1]
    num_res_blocks = len(params["res_blocks"])

    inputs = [x, params["conv_in_w"], params["bn_in_g"], params["bn_in_b"]]
    for blk in params["res_blocks"]:
        inputs += [blk["w1"], blk["g1"], blk["b1"],
                   blk["w2"], blk["g2"], blk["b2"]]
    inputs += [params["policy_w"], params["policy_g"], params["policy_b"],
               params["policy_fc_w0"], params["policy_fc_w1"], params["policy_fc_b"],
               params["value_w"], params["value_g"], params["value_b"],
               params["value_fc1_w"], params["value_fc1_b"],
               params["value_fc2_w"], params["value_fc2_b"]]

    policy_pad, value = pl.pallas_call(
        functools.partial(_fused_forward_kernel, num_res_blocks),
        out_shape=(jax.ShapeDtypeStruct((B, mpad), jnp.float32),
                   jax.ShapeDtypeStruct((B, 1), jnp.float32)),
        in_specs=[_vmem_spec()] * len(inputs),
        out_specs=(_vmem_spec(), _vmem_spec()),
        scratch_shapes=[
            pltpu.VMEM((B, H + 2, W + 2, Cin), jnp.float32),  # padded input
            pltpu.VMEM((B, H + 2, W + 2, C), jnp.float32),    # padded res-block acts
        ],
    )(*inputs)

    return policy_pad[:, :num_moves], value


if __name__ == "__main__":
    key = jax.random.PRNGKey(0)
    pkey, xkey = jax.random.split(key)

    BATCH = 2
    IN_CHANNELS = 14
    NUM_CHANNELS = 32
    NUM_RES_BLOCKS = 2
    NUM_MOVES = 512  # small stand-in for 4672; model is fully parametric

    params = init_params(pkey, IN_CHANNELS, NUM_CHANNELS, NUM_RES_BLOCKS,
                         NUM_MOVES)
    x = jax.random.normal(xkey, (BATCH, IN_CHANNELS, 8, 8), dtype=jnp.float32)

    fwd = jax.jit(functools.partial(chess_model_forward, num_moves=NUM_MOVES))
    policy_logits, value = fwd(params, x)
    jax.block_until_ready((policy_logits, value))

    assert policy_logits.shape == (BATCH, NUM_MOVES)
    assert value.shape == (BATCH, 1)
    assert bool(jnp.all(jnp.isfinite(policy_logits)))
    assert bool(jnp.all(jnp.abs(value) <= 1.0))
    print("KERNEL_OK")
</pallas_src>

<mosaic_0001>
module attributes {stable_mosaic.version = 11 : i64} {
  func.func @_fused_forward_kernel(%arg0: memref<2x8x8x14xf32, #tpu.memory_space<vmem>>, %arg1: memref<3x3x14x32xbf16, #tpu.memory_space<vmem>>, %arg2: memref<1x32xf32, #tpu.memory_space<vmem>>, %arg3: memref<1x32xf32, #tpu.memory_space<vmem>>, %arg4: memref<3x3x32x32xbf16, #tpu.memory_space<vmem>>, %arg5: memref<1x32xf32, #tpu.memory_space<vmem>>, %arg6: memref<1x32xf32, #tpu.memory_space<vmem>>, %arg7: memref<3x3x32x32xbf16, #tpu.memory_space<vmem>>, %arg8: memref<1x32xf32, #tpu.memory_space<vmem>>, %arg9: memref<1x32xf32, #tpu.memory_space<vmem>>, %arg10: memref<3x3x32x32xbf16, #tpu.memory_space<vmem>>, %arg11: memref<1x32xf32, #tpu.memory_space<vmem>>, %arg12: memref<1x32xf32, #tpu.memory_space<vmem>>, %arg13: memref<3x3x32x32xbf16, #tpu.memory_space<vmem>>, %arg14: memref<1x32xf32, #tpu.memory_space<vmem>>, %arg15: memref<1x32xf32, #tpu.memory_space<vmem>>, %arg16: memref<32x2xbf16, #tpu.memory_space<vmem>>, %arg17: memref<1x2xf32, #tpu.memory_space<vmem>>, %arg18: memref<1x2xf32, #tpu.memory_space<vmem>>, %arg19: memref<64x512xbf16, #tpu.memory_space<vmem>>, %arg20: memref<64x512xbf16, #tpu.memory_space<vmem>>, %arg21: memref<1x512xf32, #tpu.memory_space<vmem>>, %arg22: memref<32x1xbf16, #tpu.memory_space<vmem>>, %arg23: memref<1x1xf32, #tpu.memory_space<vmem>>, %arg24: memref<1x1xf32, #tpu.memory_space<vmem>>, %arg25: memref<64x128xbf16, #tpu.memory_space<vmem>>, %arg26: memref<1x128xf32, #tpu.memory_space<vmem>>, %arg27: memref<128x1xbf16, #tpu.memory_space<vmem>>, %arg28: memref<1x1xf32, #tpu.memory_space<vmem>>, %arg29: memref<2x512xf32, #tpu.memory_space<vmem>>, %arg30: memref<2x1xf32, #tpu.memory_space<vmem>>, %arg31: memref<2x10x10x14xf32, #tpu.memory_space<vmem>>, %arg32: memref<2x10x10x32xf32, #tpu.memory_space<vmem>>) attributes {dimension_semantics = [], scalar_prefetch = 0 : i64, scratch_operands = 2 : i64, tpu.core_type = #tpu.core_type<tc>} {
    %cst = arith.constant 0.000000e+00 : f32
    %0 = vector.broadcast %cst : f32 to vector<2x10x10x14xf32>
    %c0 = arith.constant 0 : index
    %c0_0 = arith.constant 0 : index
    %c0_1 = arith.constant 0 : index
    %c0_2 = arith.constant 0 : index
    %1 = vector.load %arg31[%c0, %c0_0, %c0_1, %c0_2] : memref<2x10x10x14xf32, #tpu.memory_space<vmem>>, vector<2x10x10x14xf32>
    tpu.vector_store %arg31[%c0, %c0_0, %c0_1, %c0_2], %0 {strides = array<i32>} : memref<2x10x10x14xf32, #tpu.memory_space<vmem>>, vector<2x10x10x14xf32>,
    %cst_3 = arith.constant 0.000000e+00 : f32
    %2 = vector.broadcast %cst_3 : f32 to vector<2x10x10x32xf32>
    %c0_4 = arith.constant 0 : index
    %c0_5 = arith.constant 0 : index
    %c0_6 = arith.constant 0 : index
    %c0_7 = arith.constant 0 : index
    %3 = vector.load %arg32[%c0_4, %c0_5, %c0_6, %c0_7] : memref<2x10x10x32xf32, #tpu.memory_space<vmem>>, vector<2x10x10x32xf32>
    tpu.vector_store %arg32[%c0_4, %c0_5, %c0_6, %c0_7], %2 {strides = array<i32>} : memref<2x10x10x32xf32, #tpu.memory_space<vmem>>, vector<2x10x10x32xf32>,
    %c0_8 = arith.constant 0 : index
    %c0_9 = arith.constant 0 : index
    %c0_10 = arith.constant 0 : index
    %c0_11 = arith.constant 0 : index
    %4 = vector.load %arg0[%c0_8, %c0_9, %c0_10, %c0_11] : memref<2x8x8x14xf32, #tpu.memory_space<vmem>>, vector<2x8x8x14xf32>
    %5 = vector.shape_cast %4 : vector<2x8x8x14xf32> to vector<128x14xf32>
    %6 = vector.shape_cast %5 : vector<128x14xf32> to vector<2x8x8x14xf32>
    %c0_12 = arith.constant 0 : index
    %c1 = arith.constant 1 : index
    %c1_13 = arith.constant 1 : index
    %c0_14 = arith.constant 0 : index
    %7 = vector.load %arg31[%c0_12, %c1, %c1_13, %c0_14] : memref<2x10x10x14xf32, #tpu.memory_space<vmem>>, vector<2x8x8x14xf32>
    tpu.vector_store %arg31[%c0_12, %c1, %c1_13, %c0_14], %6 {strides = array<i32>} : memref<2x10x10x14xf32, #tpu.memory_space<vmem>>, vector<2x8x8x14xf32>,
    %c0_15 = arith.constant 0 : index
    %c0_16 = arith.constant 0 : index
    %c0_17 = arith.constant 0 : index
    %c0_18 = arith.constant 0 : index
    %8 = vector.load %arg1[%c0_15, %c0_16, %c0_17, %c0_18] : memref<3x3x14x32xbf16, #tpu.memory_space<vmem>>, vector<3x3x14x32xbf16>
    %cst_19 = arith.constant 0.000000e+00 : f32
    %9 = vector.broadcast %cst_19 : f32 to vector<128x32xf32>
    %c0_20 = arith.constant 0 : index
    %c0_21 = arith.constant 0 : index
    %c0_22 = arith.constant 0 : index
    %c0_23 = arith.constant 0 : index
    %10 = vector.load %arg31[%c0_20, %c0_21, %c0_22, %c0_23] : memref<2x10x10x14xf32, #tpu.memory_space<vmem>>, vector<2x8x8x14xf32>
    %11 = vector.shape_cast %10 : vector<2x8x8x14xf32> to vector<128x14xf32>
    %12 = vector.extract_strided_slice %8 {offsets = [0, 0, 0, 0], sizes = [1, 1, 14, 32], strides = [1, 1, 1, 1]} : vector<3x3x14x32xbf16> to vector<1x1x14x32xbf16>
    %13 = vector.shape_cast %12 : vector<1x1x14x32xbf16> to vector<14x32xbf16>
    %14 = arith.truncf %11 : vector<128x14xf32> to vector<128x14xbf16>
    %cst_24 = arith.constant dense<0.000000e+00> : vector<128x32xf32>
    %15 = tpu.matmul %14, %13, %cst_24 {dimension_numbers = #tpu.dot_dimension_numbers<[1], [0], [0], [1], [0, 0, 1, 1], [], []>} : vector<128x14xbf16>, vector<14x32xbf16>, vector<128x32xf32> -> vector<128x32xf32>
    %16 = arith.addf %9, %15 : vector<128x32xf32>
    %c0_25 = arith.constant 0 : index
    %c0_26 = arith.constant 0 : index
    %c1_27 = arith.constant 1 : index
    %c0_28 = arith.constant 0 : index
    %17 = vector.load %arg31[%c0_25, %c0_26, %c1_27, %c0_28] : memref<2x10x10x14xf32, #tpu.memory_space<vmem>>, vector<2x8x8x14xf32>
    %18 = vector.shape_cast %17 : vector<2x8x8x14xf32> to vector<128x14xf32>
    %19 = vector.extract_strided_slice %8 {offsets = [0, 1, 0, 0], sizes = [1, 1, 14, 32], strides = [1, 1, 1, 1]} : vector<3x3x14x32xbf16> to vector<1x1x14x32xbf16>
    %20 = vector.shape_cast %19 : vector<1x1x14x32xbf16> to vector<14x32xbf16>
    %21 = arith.truncf %18 : vector<128x14xf32> to vector<128x14xbf16>
    %cst_29 = arith.constant dense<0.000000e+00> : vector<128x32xf32>
    %22 = tpu.matmul %21, %20, %cst_29 {dimension_numbers = #tpu.dot_dimension_numbers<[1], [0], [0], [1], [0, 0, 1, 1], [], []>} : vector<128x14xbf16>, vector<14x32xbf16>, vector<128x32xf32> -> vector<128x32xf32>
    %23 = arith.addf %16, %22 : vector<128x32xf32>
    %c0_30 = arith.constant 0 : index
    %c0_31 = arith.constant 0 : index
    %c2 = arith.constant 2 : index
    %c0_32 = arith.constant 0 : index
    %24 = vector.load %arg31[%c0_30, %c0_31, %c2, %c0_32] : memref<2x10x10x14xf32, #tpu.memory_space<vmem>>, vector<2x8x8x14xf32>
    %25 = vector.shape_cast %24 : vector<2x8x8x14xf32> to vector<128x14xf32>
    %26 = vector.extract_strided_slice %8 {offsets = [0, 2, 0, 0], sizes = [1, 1, 14, 32], strides = [1, 1, 1, 1]} : vector<3x3x14x32xbf16> to vector<1x1x14x32xbf16>
    %27 = vector.shape_cast %26 : vector<1x1x14x32xbf16> to vector<14x32xbf16>
    %28 = arith.truncf %25 : vector<128x14xf32> to vector<128x14xbf16>
    %cst_33 = arith.constant dense<0.000000e+00> : vector<128x32xf32>
    %29 = tpu.matmul %28, %27, %cst_33 {dimension_numbers = #tpu.dot_dimension_numbers<[1], [0], [0], [1], [0, 0, 1, 1], [], []>} : vector<128x14xbf16>, vector<14x32xbf16>, vector<128x32xf32> -> vector<128x32xf32>
    %30 = arith.addf %23, %29 : vector<128x32xf32>
    %c0_34 = arith.constant 0 : index
    %c1_35 = arith.constant 1 : index
    %c0_36 = arith.constant 0 : index
    %c0_37 = arith.constant 0 : index
    %31 = vector.load %arg31[%c0_34, %c1_35, %c0_36, %c0_37] : memref<2x10x10x14xf32, #tpu.memory_space<vmem>>, vector<2x8x8x14xf32>
    %32 = vector.shape_cast %31 : vector<2x8x8x14xf32> to vector<128x14xf32>
    %33 = vector.extract_strided_slice %8 {offsets = [1, 0, 0, 0], sizes = [1, 1, 14, 32], strides = [1, 1, 1, 1]} : vector<3x3x14x32xbf16> to vector<1x1x14x32xbf16>
    %34 = vector.shape_cast %33 : vector<1x1x14x32xbf16> to vector<14x32xbf16>
    %35 = arith.truncf %32 : vector<128x14xf32> to vector<128x14xbf16>
    %cst_38 = arith.constant dense<0.000000e+00> : vector<128x32xf32>
    %36 = tpu.matmul %35, %34, %cst_38 {dimension_numbers = #tpu.dot_dimension_numbers<[1], [0], [0], [1], [0, 0, 1, 1], [], []>} : vector<128x14xbf16>, vector<14x32xbf16>, vector<128x32xf32> -> vector<128x32xf32>
    %37 = arith.addf %30, %36 : vector<128x32xf32>
    %c0_39 = arith.constant 0 : index
    %c1_40 = arith.constant 1 : index
    %c1_41 = arith.constant 1 : index
    %c0_42 = arith.constant 0 : index
    %38 = vector.load %arg31[%c0_39, %c1_40, %c1_41, %c0_42] : memref<2x10x10x14xf32, #tpu.memory_space<vmem>>, vector<2x8x8x14xf32>
    %39 = vector.shape_cast %38 : vector<2x8x8x14xf32> to vector<128x14xf32>
    %40 = vector.extract_strided_slice %8 {offsets = [1, 1, 0, 0], sizes = [1, 1, 14, 32], strides = [1, 1, 1, 1]} : vector<3x3x14x32xbf16> to vector<1x1x14x32xbf16>
    %41 = vector.shape_cast %40 : vector<1x1x14x32xbf16> to vector<14x32xbf16>
    %42 = arith.truncf %39 : vector<128x14xf32> to vector<128x14xbf16>
    %cst_43 = arith.constant dense<0.000000e+00> : vector<128x32xf32>
    %43 = tpu.matmul %42, %41, %cst_43 {dimension_numbers = #tpu.dot_dimension_numbers<[1], [0], [0], [1], [0, 0, 1, 1], [], []>} : vector<128x14xbf16>, vector<14x32xbf16>, vector<128x32xf32> -> vector<128x32xf32>
    %44 = arith.addf %37, %43 : vector<128x32xf32>
    %c0_44 = arith.constant 0 : index
    %c1_45 = arith.constant 1 : index
    %c2_46 = arith.constant 2 : index
    %c0_47 = arith.constant 0 : index
    %45 = vector.load %arg31[%c0_44, %c1_45, %c2_46, %c0_47] : memref<2x10x10x14xf32, #tpu.memory_space<vmem>>, vector<2x8x8x14xf32>
    %46 = vector.shape_cast %45 : vector<2x8x8x14xf32> to vector<128x14xf32>
    %47 = vector.extract_strided_slice %8 {offsets = [1, 2, 0, 0], sizes = [1, 1, 14, 32], strides = [1, 1, 1, 1]} : vector<3x3x14x32xbf16> to vector<1x1x14x32xbf16>
    %48 = vector.shape_cast %47 : vector<1x1x14x32xbf16> to vector<14x32xbf16>
    %49 = arith.truncf %46 : vector<128x14xf32> to vector<128x14xbf16>
    %cst_48 = arith.constant dense<0.000000e+00> : vector<128x32xf32>
    %50 = tpu.matmul %49, %48, %cst_48 {dimension_numbers = #tpu.dot_dimension_numbers<[1], [0], [0], [1], [0, 0, 1, 1], [], []>} : vector<128x14xbf16>, vector<14x32xbf16>, vector<128x32xf32> -> vector<128x32xf32>
    %51 = arith.addf %44, %50 : vector<128x32xf32>
    %c0_49 = arith.constant 0 : index
    %c2_50 = arith.constant 2 : index
    %c0_51 = arith.constant 0 : index
    %c0_52 = arith.constant 0 : index
    %52 = vector.load %arg31[%c0_49, %c2_50, %c0_51, %c0_52] : memref<2x10x10x14xf32, #tpu.memory_space<vmem>>, vector<2x8x8x14xf32>
    %53 = vector.shape_cast %52 : vector<2x8x8x14xf32> to vector<128x14xf32>
    %54 = vector.extract_strided_slice %8 {offsets = [2, 0, 0, 0], sizes = [1, 1, 14, 32], strides = [1, 1, 1, 1]} : vector<3x3x14x32xbf16> to vector<1x1x14x32xbf16>
    %55 = vector.shape_cast %54 : vector<1x1x14x32xbf16> to vector<14x32xbf16>
    %56 = arith.truncf %53 : vector<128x14xf32> to vector<128x14xbf16>
    %cst_53 = arith.constant dense<0.000000e+00> : vector<128x32xf32>
    %57 = tpu.matmul %56, %55, %cst_53 {dimension_numbers = #tpu.dot_dimension_numbers<[1], [0], [0], [1], [0, 0, 1, 1], [], []>} : vector<128x14xbf16>, vector<14x32xbf16>, vector<128x32xf32> -> vector<128x32xf32>
    %58 = arith.addf %51, %57 : vector<128x32xf32>
    %c0_54 = arith.constant 0 : index
    %c2_55 = arith.constant 2 : index
    %c1_56 = arith.constant 1 : index
    %c0_57 = arith.constant 0 : index
    %59 = vector.load %arg31[%c0_54, %c2_55, %c1_56, %c0_57] : memref<2x10x10x14xf32, #tpu.memory_space<vmem>>, vector<2x8x8x14xf32>
    %60 = vector.shape_cast %59 : vector<2x8x8x14xf32> to vector<128x14xf32>
    %61 = vector.extract_strided_slice %8 {offsets = [2, 1, 0, 0], sizes = [1, 1, 14, 32], strides = [1, 1, 1, 1]} : vector<3x3x14x32xbf16> to vector<1x1x14x32xbf16>
    %62 = vector.shape_cast %61 : vector<1x1x14x32xbf16> to vector<14x32xbf16>
    %63 = arith.truncf %60 : vector<128x14xf32> to vector<128x14xbf16>
    %cst_58 = arith.constant dense<0.000000e+00> : vector<128x32xf32>
    %64 = tpu.matmul %63, %62, %cst_58 {dimension_numbers = #tpu.dot_dimension_numbers<[1], [0], [0], [1], [0, 0, 1, 1], [], []>} : vector<128x14xbf16>, vector<14x32xbf16>, vector<128x32xf32> -> vector<128x32xf32>
    %65 = arith.addf %58, %64 : vector<128x32xf32>
    %c0_59 = arith.constant 0 : index
    %c2_60 = arith.constant 2 : index
    %c2_61 = arith.constant 2 : index
    %c0_62 = arith.constant 0 : index
    %66 = vector.load %arg31[%c0_59, %c2_60, %c2_61, %c0_62] : memref<2x10x10x14xf32, #tpu.memory_space<vmem>>, vector<2x8x8x14xf32>
    %67 = vector.shape_cast %66 : vector<2x8x8x14xf32> to vector<128x14xf32>
    %68 = vector.extract_strided_slice %8 {offsets = [2, 2, 0, 0], sizes = [1, 1, 14, 32], strides = [1, 1, 1, 1]} : vector<3x3x14x32xbf16> to vector<1x1x14x32xbf16>
    %69 = vector.shape_cast %68 : vector<1x1x14x32xbf16> to vector<14x32xbf16>
    %70 = arith.truncf %67 : vector<128x14xf32> to vector<128x14xbf16>
    %cst_63 = arith.constant dense<0.000000e+00> : vector<128x32xf32>
    %71 = tpu.matmul %70, %69, %cst_63 {dimension_numbers = #tpu.dot_dimension_numbers<[1], [0], [0], [1], [0, 0, 1, 1], [], []>} : vector<128x14xbf16>, vector<14x32xbf16>, vector<128x32xf32> -> vector<128x32xf32>
    %72 = arith.addf %65, %71 : vector<128x32xf32>
    %cst_64 = arith.constant dense<0.000000e+00> : vector<32xf32>
    %73 = vector.multi_reduction <add>, %72, %cst_64 [0] : vector<128x32xf32> to vector<32xf32>
    %74 = vector.shape_cast %73 : vector<32xf32> to vector<1x32xf32>
    %cst_65 = arith.constant 1.280000e+02 : f32
    %75 = vector.broadcast %cst_65 : f32 to vector<1x32xf32>
    %76 = arith.divf %74, %75 : vector<1x32xf32>
    %77 = arith.mulf %72, %72 : vector<128x32xf32>
    %cst_66 = arith.constant dense<0.000000e+00> : vector<32xf32>
    %78 = vector.multi_reduction <add>, %77, %cst_66 [0] : vector<128x32xf32> to vector<32xf32>
    %79 = vector.shape_cast %78 : vector<32xf32> to vector<1x32xf32>
    %cst_67 = arith.constant 1.280000e+02 : f32
    %80 = vector.broadcast %cst_67 : f32 to vector<1x32xf32>
    %81 = arith.divf %79, %80 : vector<1x32xf32>
    %82 = arith.mulf %76, %76 : vector<1x32xf32>
    %83 = arith.subf %81, %82 : vector<1x32xf32>
    %c0_68 = arith.constant 0 : index
    %c0_69 = arith.constant 0 : index
    %84 = vector.load %arg2[%c0_68, %c0_69] : memref<1x32xf32, #tpu.memory_space<vmem>>, vector<1x32xf32>
    %cst_70 = arith.constant 9.99999974E-6 : f32
    %85 = vector.broadcast %cst_70 : f32 to vector<1x32xf32>
    %86 = arith.addf %83, %85 : vector<1x32xf32>
    %87 = math.rsqrt %86 : vector<1x32xf32>
    %88 = arith.mulf %84, %87 : vector<1x32xf32>
    %c0_71 = arith.constant 0 : index
    %c0_72 = arith.constant 0 : index
    %89 = vector.load %arg3[%c0_71, %c0_72] : memref<1x32xf32, #tpu.memory_space<vmem>>, vector<1x32xf32>
    %90 = arith.mulf %76, %88 : vector<1x32xf32>
    %91 = arith.subf %89, %90 : vector<1x32xf32>
    %92 = vector.broadcast %88 : vector<1x32xf32> to vector<128x32xf32>
    %93 = arith.mulf %72, %92 : vector<128x32xf32>
    %94 = vector.broadcast %91 : vector<1x32xf32> to vector<128x32xf32>
    %95 = arith.addf %93, %94 : vector<128x32xf32>
    %cst_73 = arith.constant 0.000000e+00 : f32
    %96 = vector.broadcast %cst_73 : f32 to vector<128x32xf32>
    %97 = arith.maximumf %95, %96 : vector<128x32xf32>
    %98 = vector.shape_cast %97 : vector<128x32xf32> to vector<2x8x8x32xf32>
    %c0_74 = arith.constant 0 : index
    %c1_75 = arith.constant 1 : index
    %c1_76 = arith.constant 1 : index
    %c0_77 = arith.constant 0 : index
    %99 = vector.load %arg32[%c0_74, %c1_75, %c1_76, %c0_77] : memref<2x10x10x32xf32, #tpu.memory_space<vmem>>, vector<2x8x8x32xf32>
    tpu.vector_store %arg32[%c0_74, %c1_75, %c1_76, %c0_77], %98 {strides = array<i32>} : memref<2x10x10x32xf32, #tpu.memory_space<vmem>>, vector<2x8x8x32xf32>,
    %c0_78 = arith.constant 0 : index
    %c0_79 = arith.constant 0 : index
    %c0_80 = arith.constant 0 : index
    %c0_81 = arith.constant 0 : index
    %100 = vector.load %arg4[%c0_78, %c0_79, %c0_80, %c0_81] : memref<3x3x32x32xbf16, #tpu.memory_space<vmem>>, vector<3x3x32x32xbf16>
    %cst_82 = arith.constant 0.000000e+00 : f32
    %101 = vector.broadcast %cst_82 : f32 to vector<128x32xf32>
    %c0_83 = arith.constant 0 : index
    %c0_84 = arith.constant 0 : index
    %c0_85 = arith.constant 0 : index
    %c0_86 = arith.constant 0 : index
    %102 = vector.load %arg32[%c0_83, %c0_84, %c0_85, %c0_86] : memref<2x10x10x32xf32, #tpu.memory_space<vmem>>, vector<2x8x8x32xf32>
    %103 = vector.shape_cast %102 : vector<2x8x8x32xf32> to vector<128x32xf32>
    %104 = vector.extract_strided_slice %100 {offsets = [0, 0, 0, 0], sizes = [1, 1, 32, 32], strides = [1, 1, 1, 1]} : vector<3x3x32x32xbf16> to vector<1x1x32x32xbf16>
    %105 = vector.shape_cast %104 : vector<1x1x32x32xbf16> to vector<32x32xbf16>
    %106 = arith.truncf %103 : vector<128x32xf32> to vector<128x32xbf16>
    %cst_87 = arith.constant dense<0.000000e+00> : vector<128x32xf32>
    %107 = tpu.matmul %106, %105, %cst_87 {dimension_numbers = #tpu.dot_dimension_numbers<[1], [0], [0], [1], [0, 0, 1, 1], [], []>} : vector<128x32xbf16>, vector<32x32xbf16>, vector<128x32xf32> -> vector<128x32xf32>
    %108 = arith.addf %101, %107 : vector<128x32xf32>
    %c0_88 = arith.constant 0 : index
    %c0_89 = arith.constant 0 : index
    %c1_90 = arith.constant 1 : index
    %c0_91 = arith.constant 0 : index
    %109 = vector.load %arg32[%c0_88, %c0_89, %c1_90, %c0_91] : memref<2x10x10x32xf32, #tpu.memory_space<vmem>>, vector<2x8x8x32xf32>
    %110 = vector.shape_cast %109 : vector<2x8x8x32xf32> to vector<128x32xf32>
    %111 = vector.extract_strided_slice %100 {offsets = [0, 1, 0, 0], sizes = [1, 1, 32, 32], strides = [1, 1, 1, 1]} : vector<3x3x32x32xbf16> to vector<1x1x32x32xbf16>
    %112 = vector.shape_cast %111 : vector<1x1x32x32xbf16> to vector<32x32xbf16>
    %113 = arith.truncf %110 : vector<128x32xf32> to vector<128x32xbf16>
    %cst_92 = arith.constant dense<0.000000e+00> : vector<128x32xf32>
    %114 = tpu.matmul %113, %112, %cst_92 {dimension_numbers = #tpu.dot_dimension_numbers<[1], [0], [0], [1], [0, 0, 1, 1], [], []>} : vector<128x32xbf16>, vector<32x32xbf16>, vector<128x32xf32> -> vector<128x32xf32>
    %115 = arith.addf %108, %114 : vector<128x32xf32>
    %c0_93 = arith.constant 0 : index
    %c0_94 = arith.constant 0 : index
    %c2_95 = arith.constant 2 : index
    %c0_96 = arith.constant 0 : index
    %116 = vector.load %arg32[%c0_93, %c0_94, %c2_95, %c0_96] : memref<2x10x10x32xf32, #tpu.memory_space<vmem>>, vector<2x8x8x32xf32>
    %117 = vector.shape_cast %116 : vector<2x8x8x32xf32> to vector<128x32xf32>
    %118 = vector.extract_strided_slice %100 {offsets = [0, 2, 0, 0], sizes = [1, 1, 32, 32], strides = [1, 1, 1, 1]} : vector<3x3x32x32xbf16> to vector<1x1x32x32xbf16>
    %119 = vector.shape_cast %118 : vector<1x1x32x32xbf16> to vector<32x32xbf16>
    %120 = arith.truncf %117 : vector<128x32xf32> to vector<128x32xbf16>
    %cst_97 = arith.constant dense<0.000000e+00> : vector<128x32xf32>
    %121 = tpu.matmul %120, %119, %cst_97 {dimension_numbers = #tpu.dot_dimension_numbers<[1], [0], [0], [1], [0, 0, 1, 1], [], []>} : vector<128x32xbf16>, vector<32x32xbf16>, vector<128x32xf32> -> vector<128x32xf32>
    %122 = arith.addf %115, %121 : vector<128x32xf32>
    %c0_98 = arith.constant 0 : index
    %c1_99 = arith.constant 1 : index
    %c0_100 = arith.constant 0 : index
    %c0_101 = arith.constant 0 : index
    %123 = vector.load %arg32[%c0_98, %c1_99, %c0_100, %c0_101] : memref<2x10x10x32xf32, #tpu.memory_space<vmem>>, vector<2x8x8x32xf32>
    %124 = vector.shape_cast %123 : vector<2x8x8x32xf32> to vector<128x32xf32>
    %125 = vector.extract_strided_slice %100 {offsets = [1, 0, 0, 0], sizes = [1, 1, 32, 32], strides = [1, 1, 1, 1]} : vector<3x3x32x32xbf16> to vector<1x1x32x32xbf16>
    %126 = vector.shape_cast %125 : vector<1x1x32x32xbf16> to vector<32x32xbf16>
    %127 = arith.truncf %124 : vector<128x32xf32> to vector<128x32xbf16>
    %cst_102 = arith.constant dense<0.000000e+00> : vector<128x32xf32>
    %128 = tpu.matmul %127, %126, %cst_102 {dimension_numbers = #tpu.dot_dimension_numbers<[1], [0], [0], [1], [0, 0, 1, 1], [], []>} : vector<128x32xbf16>, vector<32x32xbf16>, vector<128x32xf32> -> vector<128x32xf32>
    %129 = arith.addf %122, %128 : vector<128x32xf32>
    %c0_103 = arith.constant 0 : index
    %c1_104 = arith.constant 1 : index
    %c1_105 = arith.constant 1 : index
    %c0_106 = arith.constant 0 : index
    %130 = vector.load %arg32[%c0_103, %c1_104, %c1_105, %c0_106] : memref<2x10x10x32xf32, #tpu.memory_space<vmem>>, vector<2x8x8x32xf32>
    %131 = vector.shape_cast %130 : vector<2x8x8x32xf32> to vector<128x32xf32>
    %132 = vector.extract_strided_slice %100 {offsets = [1, 1, 0, 0], sizes = [1, 1, 32, 32], strides = [1, 1, 1, 1]} : vector<3x3x32x32xbf16> to vector<1x1x32x32xbf16>
    %133 = vector.shape_cast %132 : vector<1x1x32x32xbf16> to vector<32x32xbf16>
    %134 = arith.truncf %131 : vector<128x32xf32> to vector<128x32xbf16>
    %cst_107 = arith.constant dense<0.000000e+00> : vector<128x32xf32>
    %135 = tpu.matmul %134, %133, %cst_107 {dimension_numbers = #tpu.dot_dimension_numbers<[1], [0], [0], [1], [0, 0, 1, 1], [], []>} : vector<128x32xbf16>, vector<32x32xbf16>, vector<128x32xf32> -> vector<128x32xf32>
    %136 = arith.addf %129, %135 : vector<128x32xf32>
    %c0_108 = arith.constant 0 : index
    %c1_109 = arith.constant 1 : index
    %c2_110 = arith.constant 2 : index
    %c0_111 = arith.constant 0 : index
    %137 = vector.load %arg32[%c0_108, %c1_109, %c2_110, %c0_111] : memref<2x10x10x32xf32, #tpu.memory_space<vmem>>, vector<2x8x8x32xf32>
    %138 = vector.shape_cast %137 : vector<2x8x8x32xf32> to vector<128x32xf32>
    %139 = vector.extract_strided_slice %100 {offsets = [1, 2, 0, 0], sizes = [1, 1, 32, 32], strides = [1, 1, 1, 1]} : vector<3x3x32x32xbf16> to vector<1x1x32x32xbf16>
    %140 = vector.shape_cast %139 : vector<1x1x32x32xbf16> to vector<32x32xbf16>
    %141 = arith.truncf %138 : vector<128x32xf32> to vector<128x32xbf16>
    %cst_112 = arith.constant dense<0.000000e+00> : vector<128x32xf32>
    %142 = tpu.matmul %141, %140, %cst_112 {dimension_numbers = #tpu.dot_dimension_numbers<[1], [0], [0], [1], [0, 0, 1, 1], [], []>} : vector<128x32xbf16>, vector<32x32xbf16>, vector<128x32xf32> -> vector<128x32xf32>
    %143 = arith.addf %136, %142 : vector<128x32xf32>
    %c0_113 = arith.constant 0 : index
    %c2_114 = arith.constant 2 : index
    %c0_115 = arith.constant 0 : index
    %c0_116 = arith.constant 0 : index
    %144 = vector.load %arg32[%c0_113, %c2_114, %c0_115, %c0_116] : memref<2x10x10x32xf32, #tpu.memory_space<vmem>>, vector<2x8x8x32xf32>
    %145 = vector.shape_cast %144 : vector<2x8x8x32xf32> to vector<128x32xf32>
    %146 = vector.extract_strided_slice %100 {offsets = [2, 0, 0, 0], sizes = [1, 1, 32, 32], strides = [1, 1, 1, 1]} : vector<3x3x32x32xbf16> to vector<1x1x32x32xbf16>
    %147 = vector.shape_cast %146 : vector<1x1x32x32xbf16> to vector<32x32xbf16>
    %148 = arith.truncf %145 : vector<128x32xf32> to vector<128x32xbf16>
    %cst_117 = arith.constant dense<0.000000e+00> : vector<128x32xf32>
    %149 = tpu.matmul %148, %147, %cst_117 {dimension_numbers = #tpu.dot_dimension_numbers<[1], [0], [0], [1], [0, 0, 1, 1], [], []>} : vector<128x32xbf16>, vector<32x32xbf16>, vector<128x32xf32> -> vector<128x32xf32>
    %150 = arith.addf %143, %149 : vector<128x32xf32>
    %c0_118 = arith.constant 0 : index
    %c2_119 = arith.constant 2 : index
    %c1_120 = arith.constant 1 : index
    %c0_121 = arith.constant 0 : index
    %151 = vector.load %arg32[%c0_118, %c2_119, %c1_120, %c0_121] : memref<2x10x10x32xf32, #tpu.memory_space<vmem>>, vector<2x8x8x32xf32>
    %152 = vector.shape_cast %151 : vector<2x8x8x32xf32> to vector<128x32xf32>
    %153 = vector.extract_strided_slice %100 {offsets = [2, 1, 0, 0], sizes = [1, 1, 32, 32], strides = [1, 1, 1, 1]} : vector<3x3x32x32xbf16> to vector<1x1x32x32xbf16>
    %154 = vector.shape_cast %153 : vector<1x1x32x32xbf16> to vector<32x32xbf16>
    %155 = arith.truncf %152 : vector<128x32xf32> to vector<128x32xbf16>
    %cst_122 = arith.constant dense<0.000000e+00> : vector<128x32xf32>
    %156 = tpu.matmul %155, %154, %cst_122 {dimension_numbers = #tpu.dot_dimension_numbers<[1], [0], [0], [1], [0, 0, 1, 1], [], []>} : vector<128x32xbf16>, vector<32x32xbf16>, vector<128x32xf32> -> vector<128x32xf32>
    %157 = arith.addf %150, %156 : vector<128x32xf32>
    %c0_123 = arith.constant 0 : index
    %c2_124 = arith.constant 2 : index
    %c2_125 = arith.constant 2 : index
    %c0_126 = arith.constant 0 : index
    %158 = vector.load %arg32[%c0_123, %c2_124, %c2_125, %c0_126] : memref<2x10x10x32xf32, #tpu.memory_space<vmem>>, vector<2x8x8x32xf32>
    %159 = vector.shape_cast %158 : vector<2x8x8x32xf32> to vector<128x32xf32>
    %160 = vector.extract_strided_slice %100 {offsets = [2, 2, 0, 0], sizes = [1, 1, 32, 32], strides = [1, 1, 1, 1]} : vector<3x3x32x32xbf16> to vector<1x1x32x32xbf16>
    %161 = vector.shape_cast %160 : vector<1x1x32x32xbf16> to vector<32x32xbf16>
    %162 = arith.truncf %159 : vector<128x32xf32> to vector<128x32xbf16>
    %cst_127 = arith.constant dense<0.000000e+00> : vector<128x32xf32>
    %163 = tpu.matmul %162, %161, %cst_127 {dimension_numbers = #tpu.dot_dimension_numbers<[1], [0], [0], [1], [0, 0, 1, 1], [], []>} : vector<128x32xbf16>, vector<32x32xbf16>, vector<128x32xf32> -> vector<128x32xf32>
    %164 = arith.addf %157, %163 : vector<128x32xf32>
    %cst_128 = arith.constant dense<0.000000e+00> : vector<32xf32>
    %165 = vector.multi_reduction <add>, %164, %cst_128 [0] : vector<128x32xf32> to vector<32xf32>
    %166 = vector.shape_cast %165 : vector<32xf32> to vector<1x32xf32>
    %cst_129 = arith.constant 1.280000e+02 : f32
    %167 = vector.broadcast %cst_129 : f32 to vector<1x32xf32>
    %168 = arith.divf %166, %167 : vector<1x32xf32>
    %169 = arith.mulf %164, %164 : vector<128x32xf32>
    %cst_130 = arith.constant dense<0.000000e+00> : vector<32xf32>
    %170 = vector.multi_reduction <add>, %169, %cst_130 [0] : vector<128x32xf32> to vector<32xf32>
    %171 = vector.shape_cast %170 : vector<32xf32> to vector<1x32xf32>
    %cst_131 = arith.constant 1.280000e+02 : f32
    %172 = vector.broadcast %cst_131 : f32 to vector<1x32xf32>
    %173 = arith.divf %171, %172 : vector<1x32xf32>
    %174 = arith.mulf %168, %168 : vector<1x32xf32>
    %175 = arith.subf %173, %174 : vector<1x32xf32>
    %c0_132 = arith.constant 0 : index
    %c0_133 = arith.constant 0 : index
    %176 = vector.load %arg5[%c0_132, %c0_133] : memref<1x32xf32, #tpu.memory_space<vmem>>, vector<1x32xf32>
    %cst_134 = arith.constant 9.99999974E-6 : f32
    %177 = vector.broadcast %cst_134 : f32 to vector<1x32xf32>
    %178 = arith.addf %175, %177 : vector<1x32xf32>
    %179 = math.rsqrt %178 : vector<1x32xf32>
    %180 = arith.mulf %176, %179 : vector<1x32xf32>
    %c0_135 = arith.constant 0 : index
    %c0_136 = arith.constant 0 : index
    %181 = vector.load %arg6[%c0_135, %c0_136] : memref<1x32xf32, #tpu.memory_space<vmem>>, vector<1x32xf32>
    %182 = arith.mulf %168, %180 : vector<1x32xf32>
    %183 = arith.subf %181, %182 : vector<1x32xf32>
    %184 = vector.broadcast %180 : vector<1x32xf32> to vector<128x32xf32>
    %185 = arith.mulf %164, %184 : vector<128x32xf32>
    %186 = vector.broadcast %183 : vector<1x32xf32> to vector<128x32xf32>
    %187 = arith.addf %185, %186 : vector<128x32xf32>
    %cst_137 = arith.constant 0.000000e+00 : f32
    %188 = vector.broadcast %cst_137 : f32 to vector<128x32xf32>
    %189 = arith.maximumf %187, %188 : vector<128x32xf32>
    %190 = vector.shape_cast %189 : vector<128x32xf32> to vector<2x8x8x32xf32>
    %c0_138 = arith.constant 0 : index
    %c1_139 = arith.constant 1 : index
    %c1_140 = arith.constant 1 : index
    %c0_141 = arith.constant 0 : index
    %191 = vector.load %arg32[%c0_138, %c1_139, %c1_140, %c0_141] : memref<2x10x10x32xf32, #tpu.memory_space<vmem>>, vector<2x8x8x32xf32>
    tpu.vector_store %arg32[%c0_138, %c1_139, %c1_140, %c0_141], %190 {strides = array<i32>} : memref<2x10x10x32xf32, #tpu.memory_space<vmem>>, vector<2x8x8x32xf32>,
    %c0_142 = arith.constant 0 : index
    %c0_143 = arith.constant 0 : index
    %c0_144 = arith.constant 0 : index
    %c0_145 = arith.constant 0 : index
    %192 = vector.load %arg7[%c0_142, %c0_143, %c0_144, %c0_145] : memref<3x3x32x32xbf16, #tpu.memory_space<vmem>>, vector<3x3x32x32xbf16>
    %cst_146 = arith.constant 0.000000e+00 : f32
    %193 = vector.broadcast %cst_146 : f32 to vector<128x32xf32>
    %c0_147 = arith.constant 0 : index
    %c0_148 = arith.constant 0 : index
    %c0_149 = arith.constant 0 : index
    %c0_150 = arith.constant 0 : index
    %194 = vector.load %arg32[%c0_147, %c0_148, %c0_149, %c0_150] : memref<2x10x10x32xf32, #tpu.memory_space<vmem>>, vector<2x8x8x32xf32>
    %195 = vector.shape_cast %194 : vector<2x8x8x32xf32> to vector<128x32xf32>
    %196 = vector.extract_strided_slice %192 {offsets = [0, 0, 0, 0], sizes = [1, 1, 32, 32], strides = [1, 1, 1, 1]} : vector<3x3x32x32xbf16> to vector<1x1x32x32xbf16>
    %197 = vector.shape_cast %196 : vector<1x1x32x32xbf16> to vector<32x32xbf16>
    %198 = arith.truncf %195 : vector<128x32xf32> to vector<128x32xbf16>
    %cst_151 = arith.constant dense<0.000000e+00> : vector<128x32xf32>
    %199 = tpu.matmul %198, %197, %cst_151 {dimension_numbers = #tpu.dot_dimension_numbers<[1], [0], [0], [1], [0, 0, 1, 1], [], []>} : vector<128x32xbf16>, vector<32x32xbf16>, vector<128x32xf32> -> vector<128x32xf32>
    %200 = arith.addf %193, %199 : vector<128x32xf32>
    %c0_152 = arith.constant 0 : index
    %c0_153 = arith.constant 0 : index
    %c1_154 = arith.constant 1 : index
    %c0_155 = arith.constant 0 : index
    %201 = vector.load %arg32[%c0_152, %c0_153, %c1_154, %c0_155] : memref<2x10x10x32xf32, #tpu.memory_space<vmem>>, vector<2x8x8x32xf32>
    %202 = vector.shape_cast %201 : vector<2x8x8x32xf32> to vector<128x32xf32>
    %203 = vector.extract_strided_slice %192 {offsets = [0, 1, 0, 0], sizes = [1, 1, 32, 32], strides = [1, 1, 1, 1]} : vector<3x3x32x32xbf16> to vector<1x1x32x32xbf16>
    %204 = vector.shape_cast %203 : vector<1x1x32x32xbf16> to vector<32x32xbf16>
    %205 = arith.truncf %202 : vector<128x32xf32> to vector<128x32xbf16>
    %cst_156 = arith.constant dense<0.000000e+00> : vector<128x32xf32>
    %206 = tpu.matmul %205, %204, %cst_156 {dimension_numbers = #tpu.dot_dimension_numbers<[1], [0], [0], [1], [0, 0, 1, 1], [], []>} : vector<128x32xbf16>, vector<32x32xbf16>, vector<128x32xf32> -> vector<128x32xf32>
    %207 = arith.addf %200, %206 : vector<128x32xf32>
    %c0_157 = arith.constant 0 : index
    %c0_158 = arith.constant 0 : index
    %c2_159 = arith.constant 2 : index
    %c0_160 = arith.constant 0 : index
    %208 = vector.load %arg32[%c0_157, %c0_158, %c2_159, %c0_160] : memref<2x10x10x32xf32, #tpu.memory_space<vmem>>, vector<2x8x8x32xf32>
    %209 = vector.shape_cast %208 : vector<2x8x8x32xf32> to vector<128x32xf32>
    %210 = vector.extract_strided_slice %192 {offsets = [0, 2, 0, 0], sizes = [1, 1, 32, 32], strides = [1, 1, 1, 1]} : vector<3x3x32x32xbf16> to vector<1x1x32x32xbf16>
    %211 = vector.shape_cast %210 : vector<1x1x32x32xbf16> to vector<32x32xbf16>
    %212 = arith.truncf %209 : vector<128x32xf32> to vector<128x32xbf16>
    %cst_161 = arith.constant dense<0.000000e+00> : vector<128x32xf32>
    %213 = tpu.matmul %212, %211, %cst_161 {dimension_numbers = #tpu.dot_dimension_numbers<[1], [0], [0], [1], [0, 0, 1, 1], [], []>} : vector<128x32xbf16>, vector<32x32xbf16>, vector<128x32xf32> -> vector<128x32xf32>
    %214 = arith.addf %207, %213 : vector<128x32xf32>
    %c0_162 = arith.constant 0 : index
    %c1_163 = arith.constant 1 : index
    %c0_164 = arith.constant 0 : index
    %c0_165 = arith.constant 0 : index
    %215 = vector.load %arg32[%c0_162, %c1_163, %c0_164, %c0_165] : memref<2x10x10x32xf32, #tpu.memory_space<vmem>>, vector<2x8x8x32xf32>
    %216 = vector.shape_cast %215 : vector<2x8x8x32xf32> to vector<128x32xf32>
    %217 = vector.extract_strided_slice %192 {offsets = [1, 0, 0, 0], sizes = [1, 1, 32, 32], strides = [1, 1, 1, 1]} : vector<3x3x32x32xbf16> to vector<1x1x32x32xbf16>
    %218 = vector.shape_cast %217 : vector<1x1x32x32xbf16> to vector<32x32xbf16>
    %219 = arith.truncf %216 : vector<128x32xf32> to vector<128x32xbf16>
    %cst_166 = arith.constant dense<0.000000e+00> : vector<128x32xf32>
    %220 = tpu.matmul %219, %218, %cst_166 {dimension_numbers = #tpu.dot_dimension_numbers<[1], [0], [0], [1], [0, 0, 1, 1], [], []>} : vector<128x32xbf16>, vector<32x32xbf16>, vector<128x32xf32> -> vector<128x32xf32>
    %221 = arith.addf %214, %220 : vector<128x32xf32>
    %c0_167 = arith.constant 0 : index
    %c1_168 = arith.constant 1 : index
    %c1_169 = arith.constant 1 : index
    %c0_170 = arith.constant 0 : index
    %222 = vector.load %arg32[%c0_167, %c1_168, %c1_169, %c0_170] : memref<2x10x10x32xf32, #tpu.memory_space<vmem>>, vector<2x8x8x32xf32>
    %223 = vector.shape_cast %222 : vector<2x8x8x32xf32> to vector<128x32xf32>
    %224 = vector.extract_strided_slice %192 {offsets = [1, 1, 0, 0], sizes = [1, 1, 32, 32], strides = [1, 1, 1, 1]} : vector<3x3x32x32xbf16> to vector<1x1x32x32xbf16>
    %225 = vector.shape_cast %224 : vector<1x1x32x32xbf16> to vector<32x32xbf16>
    %226 = arith.truncf %223 : vector<128x32xf32> to vector<128x32xbf16>
    %cst_171 = arith.constant dense<0.000000e+00> : vector<128x32xf32>
    %227 = tpu.matmul %226, %225, %cst_171 {dimension_numbers = #tpu.dot_dimension_numbers<[1], [0], [0], [1], [0, 0, 1, 1], [], []>} : vector<128x32xbf16>, vector<32x32xbf16>, vector<128x32xf32> -> vector<128x32xf32>
    %228 = arith.addf %221, %227 : vector<128x32xf32>
    %c0_172 = arith.constant 0 : index
    %c1_173 = arith.constant 1 : index
    %c2_174 = arith.constant 2 : index
    %c0_175 = arith.constant 0 : index
    %229 = vector.load %arg32[%c0_172, %c1_173, %c2_174, %c0_175] : memref<2x10x10x32xf32, #tpu.memory_space<vmem>>, vector<2x8x8x32xf32>
    %230 = vector.shape_cast %229 : vector<2x8x8x32xf32> to vector<128x32xf32>
    %231 = vector.extract_strided_slice %192 {offsets = [1, 2, 0, 0], sizes = [1, 1, 32, 32], strides = [1, 1, 1, 1]} : vector<3x3x32x32xbf16> to vector<1x1x32x32xbf16>
    %232 = vector.shape_cast %231 : vector<1x1x32x32xbf16> to vector<32x32xbf16>
    %233 = arith.truncf %230 : vector<128x32xf32> to vector<128x32xbf16>
    %cst_176 = arith.constant dense<0.000000e+00> : vector<128x32xf32>
    %234 = tpu.matmul %233, %232, %cst_176 {dimension_numbers = #tpu.dot_dimension_numbers<[1], [0], [0], [1], [0, 0, 1, 1], [], []>} : vector<128x32xbf16>, vector<32x32xbf16>, vector<128x32xf32> -> vector<128x32xf32>
    %235 = arith.addf %228, %234 : vector<128x32xf32>
    %c0_177 = arith.constant 0 : index
    %c2_178 = arith.constant 2 : index
    %c0_179 = arith.constant 0 : index
    %c0_180 = arith.constant 0 : index
    %236 = vector.load %arg32[%c0_177, %c2_178, %c0_179, %c0_180] : memref<2x10x10x32xf32, #tpu.memory_space<vmem>>, vector<2x8x8x32xf32>
    %237 = vector.shape_cast %236 : vector<2x8x8x32xf32> to vector<128x32xf32>
    %238 = vector.extract_strided_slice %192 {offsets = [2, 0, 0, 0], sizes = [1, 1, 32, 32], strides = [1, 1, 1, 1]} : vector<3x3x32x32xbf16> to vector<1x1x32x32xbf16>
    %239 = vector.shape_cast %238 : vector<1x1x32x32xbf16> to vector<32x32xbf16>
    %240 = arith.truncf %237 : vector<128x32xf32> to vector<128x32xbf16>
    %cst_181 = arith.constant dense<0.000000e+00> : vector<128x32xf32>
    %241 = tpu.matmul %240, %239, %cst_181 {dimension_numbers = #tpu.dot_dimension_numbers<[1], [0], [0], [1], [0, 0, 1, 1], [], []>} : vector<128x32xbf16>, vector<32x32xbf16>, vector<128x32xf32> -> vector<128x32xf32>
    %242 = arith.addf %235, %241 : vector<128x32xf32>
    %c0_182 = arith.constant 0 : index
    %c2_183 = arith.constant 2 : index
    %c1_184 = arith.constant 1 : index
    %c0_185 = arith.constant 0 : index
    %243 = vector.load %arg32[%c0_182, %c2_183, %c1_184, %c0_185] : memref<2x10x10x32xf32, #tpu.memory_space<vmem>>, vector<2x8x8x32xf32>
    %244 = vector.shape_cast %243 : vector<2x8x8x32xf32> to vector<128x32xf32>
    %245 = vector.extract_strided_slice %192 {offsets = [2, 1, 0, 0], sizes = [1, 1, 32, 32], strides = [1, 1, 1, 1]} : vector<3x3x32x32xbf16> to vector<1x1x32x32xbf16>
    %246 = vector.shape_cast %245 : vector<1x1x32x32xbf16> to vector<32x32xbf16>
    %247 = arith.truncf %244 : vector<128x32xf32> to vector<128x32xbf16>
    %cst_186 = arith.constant dense<0.000000e+00> : vector<128x32xf32>
    %248 = tpu.matmul %247, %246, %cst_186 {dimension_numbers = #tpu.dot_dimension_numbers<[1], [0], [0], [1], [0, 0, 1, 1], [], []>} : vector<128x32xbf16>, vector<32x32xbf16>, vector<128x32xf32> -> vector<128x32xf32>
    %249 = arith.addf %242, %248 : vector<128x32xf32>
    %c0_187 = arith.constant 0 : index
    %c2_188 = arith.constant 2 : index
    %c2_189 = arith.constant 2 : index
    %c0_190 = arith.constant 0 : index
    %250 = vector.load %arg32[%c0_187, %c2_188, %c2_189, %c0_190] : memref<2x10x10x32xf32, #tpu.memory_space<vmem>>, vector<2x8x8x32xf32>
    %251 = vector.shape_cast %250 : vector<2x8x8x32xf32> to vector<128x32xf32>
    %252 = vector.extract_strided_slice %192 {offsets = [2, 2, 0, 0], sizes = [1, 1, 32, 32], strides = [1, 1, 1, 1]} : vector<3x3x32x32xbf16> to vector<1x1x32x32xbf16>
    %253 = vector.shape_cast %252 : vector<1x1x32x32xbf16> to vector<32x32xbf16>
    %254 = arith.truncf %251 : vector<128x32xf32> to vector<128x32xbf16>
    %cst_191 = arith.constant dense<0.000000e+00> : vector<128x32xf32>
    %255 = tpu.matmul %254, %253, %cst_191 {dimension_numbers = #tpu.dot_dimension_numbers<[1], [0], [0], [1], [0, 0, 1, 1], [], []>} : vector<128x32xbf16>, vector<32x32xbf16>, vector<128x32xf32> -> vector<128x32xf32>
    %256 = arith.addf %249, %255 : vector<128x32xf32>
    %cst_192 = arith.constant dense<0.000000e+00> : vector<32xf32>
    %257 = vector.multi_reduction <add>, %256, %cst_192 [0] : vector<128x32xf32> to vector<32xf32>
    %258 = vector.shape_cast %257 : vector<32xf32> to vector<1x32xf32>
    %cst_193 = arith.constant 1.280000e+02 : f32
    %259 = vector.broadcast %cst_193 : f32 to vector<1x32xf32>
    %260 = arith.divf %258, %259 : vector<1x32xf32>
    %261 = arith.mulf %256, %256 : vector<128x32xf32>
    %cst_194 = arith.constant dense<0.000000e+00> : vector<32xf32>
    %262 = vector.multi_reduction <add>, %261, %cst_194 [0] : vector<128x32xf32> to vector<32xf32>
    %263 = vector.shape_cast %262 : vector<32xf32> to vector<1x32xf32>
    %cst_195 = arith.constant 1.280000e+02 : f32
    %264 = vector.broadcast %cst_195 : f32 to vector<1x32xf32>
    %265 = arith.divf %263, %264 : vector<1x32xf32>
    %266 = arith.mulf %260, %260 : vector<1x32xf32>
    %267 = arith.subf %265, %266 : vector<1x32xf32>
    %c0_196 = arith.constant 0 : index
    %c0_197 = arith.constant 0 : index
    %268 = vector.load %arg8[%c0_196, %c0_197] : memref<1x32xf32, #tpu.memory_space<vmem>>, vector<1x32xf32>
    %cst_198 = arith.constant 9.99999974E-6 : f32
    %269 = vector.broadcast %cst_198 : f32 to vector<1x32xf32>
    %270 = arith.addf %267, %269 : vector<1x32xf32>
    %271 = math.rsqrt %270 : vector<1x32xf32>
    %272 = arith.mulf %268, %271 : vector<1x32xf32>
    %c0_199 = arith.constant 0 : index
    %c0_200 = arith.constant 0 : index
    %273 = vector.load %arg9[%c0_199, %c0_200] : memref<1x32xf32, #tpu.memory_space<vmem>>, vector<1x32xf32>
    %274 = arith.mulf %260, %272 : vector<1x32xf32>
    %275 = arith.subf %273, %274 : vector<1x32xf32>
    %276 = vector.broadcast %272 : vector<1x32xf32> to vector<128x32xf32>
    %277 = arith.mulf %256, %276 : vector<128x32xf32>
    %278 = vector.broadcast %275 : vector<1x32xf32> to vector<128x32xf32>
    %279 = arith.addf %277, %278 : vector<128x32xf32>
    %280 = arith.addf %279, %97 : vector<128x32xf32>
    %cst_201 = arith.constant 0.000000e+00 : f32
    %281 = vector.broadcast %cst_201 : f32 to vector<128x32xf32>
    %282 = arith.maximumf %280, %281 : vector<128x32xf32>
    %283 = vector.shape_cast %282 : vector<128x32xf32> to vector<2x8x8x32xf32>
    %c0_202 = arith.constant 0 : index
    %c1_203 = arith.constant 1 : index
    %c1_204 = arith.constant 1 : index
    %c0_205 = arith.constant 0 : index
    %284 = vector.load %arg32[%c0_202, %c1_203, %c1_204, %c0_205] : memref<2x10x10x32xf32, #tpu.memory_space<vmem>>, vector<2x8x8x32xf32>
    tpu.vector_store %arg32[%c0_202, %c1_203, %c1_204, %c0_205], %283 {strides = array<i32>} : memref<2x10x10x32xf32, #tpu.memory_space<vmem>>, vector<2x8x8x32xf32>,
    %c0_206 = arith.constant 0 : index
    %c0_207 = arith.constant 0 : index
    %c0_208 = arith.constant 0 : index
    %c0_209 = arith.constant 0 : index
    %285 = vector.load %arg10[%c0_206, %c0_207, %c0_208, %c0_209] : memref<3x3x32x32xbf16, #tpu.memory_space<vmem>>, vector<3x3x32x32xbf16>
    %cst_210 = arith.constant 0.000000e+00 : f32
    %286 = vector.broadcast %cst_210 : f32 to vector<128x32xf32>
    %c0_211 = arith.constant 0 : index
    %c0_212 = arith.constant 0 : index
    %c0_213 = arith.constant 0 : index
    %c0_214 = arith.constant 0 : index
    %287 = vector.load %arg32[%c0_211, %c0_212, %c0_213, %c0_214] : memref<2x10x10x32xf32, #tpu.memory_space<vmem>>, vector<2x8x8x32xf32>
    %288 = vector.shape_cast %287 : vector<2x8x8x32xf32> to vector<128x32xf32>
    %289 = vector.extract_strided_slice %285 {offsets = [0, 0, 0, 0], sizes = [1, 1, 32, 32], strides = [1, 1, 1, 1]} : vector<3x3x32x32xbf16> to vector<1x1x32x32xbf16>
    %290 = vector.shape_cast %289 : vector<1x1x32x32xbf16> to vector<32x32xbf16>
    %291 = arith.truncf %288 : vector<128x32xf32> to vector<128x32xbf16>
    %cst_215 = arith.constant dense<0.000000e+00> : vector<128x32xf32>
    %292 = tpu.matmul %291, %290, %cst_215 {dimension_numbers = #tpu.dot_dimension_numbers<[1], [0], [0], [1], [0, 0, 1, 1], [], []>} : vector<128x32xbf16>, vector<32x32xbf16>, vector<128x32xf32> -> vector<128x32xf32>
    %293 = arith.addf %286, %292 : vector<128x32xf32>
    %c0_216 = arith.constant 0 : index
    %c0_217 = arith.constant 0 : index
    %c1_218 = arith.constant 1 : index
    %c0_219 = arith.constant 0 : index
    %294 = vector.load %arg32[%c0_216, %c0_217, %c1_218, %c0_219] : memref<2x10x10x32xf32, #tpu.memory_space<vmem>>, vector<2x8x8x32xf32>
    %295 = vector.shape_cast %294 : vector<2x8x8x32xf32> to vector<128x32xf32>
    %296 = vector.extract_strided_slice %285 {offsets = [0, 1, 0, 0], sizes = [1, 1, 32, 32], strides = [1, 1, 1, 1]} : vector<3x3x32x32xbf16> to vector<1x1x32x32xbf16>
    %297 = vector.shape_cast %296 : vector<1x1x32x32xbf16> to vector<32x32xbf16>
    %298 = arith.truncf %295 : vector<128x32xf32> to vector<128x32xbf16>
    %cst_220 = arith.constant dense<0.000000e+00> : vector<128x32xf32>
    %299 = tpu.matmul %298, %297, %cst_220 {dimension_numbers = #tpu.dot_dimension_numbers<[1], [0], [0], [1], [0, 0, 1, 1], [], []>} : vector<128x32xbf16>, vector<32x32xbf16>, vector<128x32xf32> -> vector<128x32xf32>
    %300 = arith.addf %293, %299 : vector<128x32xf32>
    %c0_221 = arith.constant 0 : index
    %c0_222 = arith.constant 0 : index
    %c2_223 = arith.constant 2 : index
    %c0_224 = arith.constant 0 : index
    %301 = vector.load %arg32[%c0_221, %c0_222, %c2_223, %c0_224] : memref<2x10x10x32xf32, #tpu.memory_space<vmem>>, vector<2x8x8x32xf32>
    %302 = vector.shape_cast %301 : vector<2x8x8x32xf32> to vector<128x32xf32>
    %303 = vector.extract_strided_slice %285 {offsets = [0, 2, 0, 0], sizes = [1, 1, 32, 32], strides = [1, 1, 1, 1]} : vector<3x3x32x32xbf16> to vector<1x1x32x32xbf16>
    %304 = vector.shape_cast %303 : vector<1x1x32x32xbf16> to vector<32x32xbf16>
    %305 = arith.truncf %302 : vector<128x32xf32> to vector<128x32xbf16>
    %cst_225 = arith.constant dense<0.000000e+00> : vector<128x32xf32>
    %306 = tpu.matmul %305, %304, %cst_225 {dimension_numbers = #tpu.dot_dimension_numbers<[1], [0], [0], [1], [0, 0, 1, 1], [], []>} : vector<128x32xbf16>, vector<32x32xbf16>, vector<128x32xf32> -> vector<128x32xf32>
    %307 = arith.addf %300, %306 : vector<128x32xf32>
    %c0_226 = arith.constant 0 : index
    %c1_227 = arith.constant 1 : index
    %c0_228 = arith.constant 0 : index
    %c0_229 = arith.constant 0 : index
    %308 = vector.load %arg32[%c0_226, %c1_227, %c0_228, %c0_229] : memref<2x10x10x32xf32, #tpu.memory_space<vmem>>, vector<2x8x8x32xf32>
    %309 = vector.shape_cast %308 : vector<2x8x8x32xf32> to vector<128x32xf32>
    %310 = vector.extract_strided_slice %285 {offsets = [1, 0, 0, 0], sizes = [1, 1, 32, 32], strides = [1, 1, 1, 1]} : vector<3x3x32x32xbf16> to vector<1x1x32x32xbf16>
    %311 = vector.shape_cast %310 : vector<1x1x32x32xbf16> to vector<32x32xbf16>
    %312 = arith.truncf %309 : vector<128x32xf32> to vector<128x32xbf16>
    %cst_230 = arith.constant dense<0.000000e+00> : vector<128x32xf32>
    %313 = tpu.matmul %312, %311, %cst_230 {dimension_numbers = #tpu.dot_dimension_numbers<[1], [0], [0], [1], [0, 0, 1, 1], [], []>} : vector<128x32xbf16>, vector<32x32xbf16>, vector<128x32xf32> -> vector<128x32xf32>
    %314 = arith.addf %307, %313 : vector<128x32xf32>
    %c0_231 = arith.constant 0 : index
    %c1_232 = arith.constant 1 : index
    %c1_233 = arith.constant 1 : index
    %c0_234 = arith.constant 0 : index
    %315 = vector.load %arg32[%c0_231, %c1_232, %c1_233, %c0_234] : memref<2x10x10x32xf32, #tpu.memory_space<vmem>>, vector<2x8x8x32xf32>
    %316 = vector.shape_cast %315 : vector<2x8x8x32xf32> to vector<128x32xf32>
    %317 = vector.extract_strided_slice %285 {offsets = [1, 1, 0, 0], sizes = [1, 1, 32, 32], strides = [1, 1, 1, 1]} : vector<3x3x32x32xbf16> to vector<1x1x32x32xbf16>
    %318 = vector.shape_cast %317 : vector<1x1x32x32xbf16> to vector<32x32xbf16>
    %319 = arith.truncf %316 : vector<128x32xf32> to vector<128x32xbf16>
    %cst_235 = arith.constant dense<0.000000e+00> : vector<128x32xf32>
    %320 = tpu.matmul %319, %318, %cst_235 {dimension_numbers = #tpu.dot_dimension_numbers<[1], [0], [0], [1], [0, 0, 1, 1], [], []>} : vector<128x32xbf16>, vector<32x32xbf16>, vector<128x32xf32> -> vector<128x32xf32>
    %321 = arith.addf %314, %320 : vector<128x32xf32>
    %c0_236 = arith.constant 0 : index
    %c1_237 = arith.constant 1 : index
    %c2_238 = arith.constant 2 : index
    %c0_239 = arith.constant 0 : index
    %322 = vector.load %arg32[%c0_236, %c1_237, %c2_238, %c0_239] : memref<2x10x10x32xf32, #tpu.memory_space<vmem>>, vector<2x8x8x32xf32>
    %323 = vector.shape_cast %322 : vector<2x8x8x32xf32> to vector<128x32xf32>
    %324 = vector.extract_strided_slice %285 {offsets = [1, 2, 0, 0], sizes = [1, 1, 32, 32], strides = [1, 1, 1, 1]} : vector<3x3x32x32xbf16> to vector<1x1x32x32xbf16>
    %325 = vector.shape_cast %324 : vector<1x1x32x32xbf16> to vector<32x32xbf16>
    %326 = arith.truncf %323 : vector<128x32xf32> to vector<128x32xbf16>
    %cst_240 = arith.constant dense<0.000000e+00> : vector<128x32xf32>
    %327 = tpu.matmul %326, %325, %cst_240 {dimension_numbers = #tpu.dot_dimension_numbers<[1], [0], [0], [1], [0, 0, 1, 1], [], []>} : vector<128x32xbf16>, vector<32x32xbf16>, vector<128x32xf32> -> vector<128x32xf32>
    %328 = arith.addf %321, %327 : vector<128x32xf32>
    %c0_241 = arith.constant 0 : index
    %c2_242 = arith.constant 2 : index
    %c0_243 = arith.constant 0 : index
    %c0_244 = arith.constant 0 : index
    %329 = vector.load %arg32[%c0_241, %c2_242, %c0_243, %c0_244] : memref<2x10x10x32xf32, #tpu.memory_space<vmem>>, vector<2x8x8x32xf32>
    %330 = vector.shape_cast %329 : vector<2x8x8x32xf32> to vector<128x32xf32>
    %331 = vector.extract_strided_slice %285 {offsets = [2, 0, 0, 0], sizes = [1, 1, 32, 32], strides = [1, 1, 1, 1]} : vector<3x3x32x32xbf16> to vector<1x1x32x32xbf16>
    %332 = vector.shape_cast %331 : vector<1x1x32x32xbf16> to vector<32x32xbf16>
    %333 = arith.truncf %330 : vector<128x32xf32> to vector<128x32xbf16>
    %cst_245 = arith.constant dense<0.000000e+00> : vector<128x32xf32>
    %334 = tpu.matmul %333, %332, %cst_245 {dimension_numbers = #tpu.dot_dimension_numbers<[1], [0], [0], [1], [0, 0, 1, 1], [], []>} : vector<128x32xbf16>, vector<32x32xbf16>, vector<128x32xf32> -> vector<128x32xf32>
    %335 = arith.addf %328, %334 : vector<128x32xf32>
    %c0_246 = arith.constant 0 : index
    %c2_247 = arith.constant 2 : index
    %c1_248 = arith.constant 1 : index
    %c0_249 = arith.constant 0 : index
    %336 = vector.load %arg32[%c0_246, %c2_247, %c1_248, %c0_249] : memref<2x10x10x32xf32, #tpu.memory_space<vmem>>, vector<2x8x8x32xf32>
    %337 = vector.shape_cast %336 : vector<2x8x8x32xf32> to vector<128x32xf32>
    %338 = vector.extract_strided_slice %285 {offsets = [2, 1, 0, 0], sizes = [1, 1, 32, 32], strides = [1, 1, 1, 1]} : vector<3x3x32x32xbf16> to vector<1x1x32x32xbf16>
    %339 = vector.shape_cast %338 : vector<1x1x32x32xbf16> to vector<32x32xbf16>
    %340 = arith.truncf %337 : vector<128x32xf32> to vector<128x32xbf16>
    %cst_250 = arith.constant dense<0.000000e+00> : vector<128x32xf32>
    %341 = tpu.matmul %340, %339, %cst_250 {dimension_numbers = #tpu.dot_dimension_numbers<[1], [0], [0], [1], [0, 0, 1, 1], [], []>} : vector<128x32xbf16>, vector<32x32xbf16>, vector<128x32xf32> -> vector<128x32xf32>
    %342 = arith.addf %335, %341 : vector<128x32xf32>
    %c0_251 = arith.constant 0 : index
    %c2_252 = arith.constant 2 : index
    %c2_253 = arith.constant 2 : index
    %c0_254 = arith.constant 0 : index
    %343 = vector.load %arg32[%c0_251, %c2_252, %c2_253, %c0_254] : memref<2x10x10x32xf32, #tpu.memory_space<vmem>>, vector<2x8x8x32xf32>
    %344 = vector.shape_cast %343 : vector<2x8x8x32xf32> to vector<128x32xf32>
    %345 = vector.extract_strided_slice %285 {offsets = [2, 2, 0, 0], sizes = [1, 1, 32, 32], strides = [1, 1, 1, 1]} : vector<3x3x32x32xbf16> to vector<1x1x32x32xbf16>
    %346 = vector.shape_cast %345 : vector<1x1x32x32xbf16> to vector<32x32xbf16>
    %347 = arith.truncf %344 : vector<128x32xf32> to vector<128x32xbf16>
    %cst_255 = arith.constant dense<0.000000e+00> : vector<128x32xf32>
    %348 = tpu.matmul %347, %346, %cst_255 {dimension_numbers = #tpu.dot_dimension_numbers<[1], [0], [0], [1], [0, 0, 1, 1], [], []>} : vector<128x32xbf16>, vector<32x32xbf16>, vector<128x32xf32> -> vector<128x32xf32>
    %349 = arith.addf %342, %348 : vector<128x32xf32>
    %cst_256 = arith.constant dense<0.000000e+00> : vector<32xf32>
    %350 = vector.multi_reduction <add>, %349, %cst_256 [0] : vector<128x32xf32> to vector<32xf32>
    %351 = vector.shape_cast %350 : vector<32xf32> to vector<1x32xf32>
    %cst_257 = arith.constant 1.280000e+02 : f32
    %352 = vector.broadcast %cst_257 : f32 to vector<1x32xf32>
    %353 = arith.divf %351, %352 : vector<1x32xf32>
    %354 = arith.mulf %349, %349 : vector<128x32xf32>
    %cst_258 = arith.constant dense<0.000000e+00> : vector<32xf32>
    %355 = vector.multi_reduction <add>, %354, %cst_258 [0] : vector<128x32xf32> to vector<32xf32>
    %356 = vector.shape_cast %355 : vector<32xf32> to vector<1x32xf32>
    %cst_259 = arith.constant 1.280000e+02 : f32
    %357 = vector.broadcast %cst_259 : f32 to vector<1x32xf32>
    %358 = arith.divf %356, %357 : vector<1x32xf32>
    %359 = arith.mulf %353, %353 : vector<1x32xf32>
    %360 = arith.subf %358, %359 : vector<1x32xf32>
    %c0_260 = arith.constant 0 : index
    %c0_261 = arith.constant 0 : index
    %361 = vector.load %arg11[%c0_260, %c0_261] : memref<1x32xf32, #tpu.memory_space<vmem>>, vector<1x32xf32>
    %cst_262 = arith.constant 9.99999974E-6 : f32
    %362 = vector.broadcast %cst_262 : f32 to vector<1x32xf32>
    %363 = arith.addf %360, %362 : vector<1x32xf32>
    %364 = math.rsqrt %363 : vector<1x32xf32>
    %365 = arith.mulf %361, %364 : vector<1x32xf32>
    %c0_263 = arith.constant 0 : index
    %c0_264 = arith.constant 0 : index
    %366 = vector.load %arg12[%c0_263, %c0_264] : memref<1x32xf32, #tpu.memory_space<vmem>>, vector<1x32xf32>
    %367 = arith.mulf %353, %365 : vector<1x32xf32>
    %368 = arith.subf %366, %367 : vector<1x32xf32>
    %369 = vector.broadcast %365 : vector<1x32xf32> to vector<128x32xf32>
    %370 = arith.mulf %349, %369 : vector<128x32xf32>
    %371 = vector.broadcast %368 : vector<1x32xf32> to vector<128x32xf32>
    %372 = arith.addf %370, %371 : vector<128x32xf32>
    %cst_265 = arith.constant 0.000000e+00 : f32
    %373 = vector.broadcast %cst_265 : f32 to vector<128x32xf32>
    %374 = arith.maximumf %372, %373 : vector<128x32xf32>
    %375 = vector.shape_cast %374 : vector<128x32xf32> to vector<2x8x8x32xf32>
    %c0_266 = arith.constant 0 : index
    %c1_267 = arith.constant 1 : index
    %c1_268 = arith.constant 1 : index
    %c0_269 = arith.constant 0 : index
    %376 = vector.load %arg32[%c0_266, %c1_267, %c1_268, %c0_269] : memref<2x10x10x32xf32, #tpu.memory_space<vmem>>, vector<2x8x8x32xf32>
    tpu.vector_store %arg32[%c0_266, %c1_267, %c1_268, %c0_269], %375 {strides = array<i32>} : memref<2x10x10x32xf32, #tpu.memory_space<vmem>>, vector<2x8x8x32xf32>,
    %c0_270 = arith.constant 0 : index
    %c0_271 = arith.constant 0 : index
    %c0_272 = arith.constant 0 : index
    %c0_273 = arith.constant 0 : index
    %377 = vector.load %arg13[%c0_270, %c0_271, %c0_272, %c0_273] : memref<3x3x32x32xbf16, #tpu.memory_space<vmem>>, vector<3x3x32x32xbf16>
    %cst_274 = arith.constant 0.000000e+00 : f32
    %378 = vector.broadcast %cst_274 : f32 to vector<128x32xf32>
    %c0_275 = arith.constant 0 : index
    %c0_276 = arith.constant 0 : index
    %c0_277 = arith.constant 0 : index
    %c0_278 = arith.constant 0 : index
    %379 = vector.load %arg32[%c0_275, %c0_276, %c0_277, %c0_278] : memref<2x10x10x32xf32, #tpu.memory_space<vmem>>, vector<2x8x8x32xf32>
    %380 = vector.shape_cast %379 : vector<2x8x8x32xf32> to vector<128x32xf32>
    %381 = vector.extract_strided_slice %377 {offsets = [0, 0, 0, 0], sizes = [1, 1, 32, 32], strides = [1, 1, 1, 1]} : vector<3x3x32x32xbf16> to vector<1x1x32x32xbf16>
    %382 = vector.shape_cast %381 : vector<1x1x32x32xbf16> to vector<32x32xbf16>
    %383 = arith.truncf %380 : vector<128x32xf32> to vector<128x32xbf16>
    %cst_279 = arith.constant dense<0.000000e+00> : vector<128x32xf32>
    %384 = tpu.matmul %383, %382, %cst_279 {dimension_numbers = #tpu.dot_dimension_numbers<[1], [0], [0], [1], [0, 0, 1, 1], [], []>} : vector<128x32xbf16>, vector<32x32xbf16>, vector<128x32xf32> -> vector<128x32xf32>
    %385 = arith.addf %378, %384 : vector<128x32xf32>
    %c0_280 = arith.constant 0 : index
    %c0_281 = arith.constant 0 : index
    %c1_282 = arith.constant 1 : index
    %c0_283 = arith.constant 0 : index
    %386 = vector.load %arg32[%c0_280, %c0_281, %c1_282, %c0_283] : memref<2x10x10x32xf32, #tpu.memory_space<vmem>>, vector<2x8x8x32xf32>
    %387 = vector.shape_cast %386 : vector<2x8x8x32xf32> to vector<128x32xf32>
    %388 = vector.extract_strided_slice %377 {offsets = [0, 1, 0, 0], sizes = [1, 1, 32, 32], strides = [1, 1, 1, 1]} : vector<3x3x32x32xbf16> to vector<1x1x32x32xbf16>
    %389 = vector.shape_cast %388 : vector<1x1x32x32xbf16> to vector<32x32xbf16>
    %390 = arith.truncf %387 : vector<128x32xf32> to vector<128x32xbf16>
    %cst_284 = arith.constant dense<0.000000e+00> : vector<128x32xf32>
    %391 = tpu.matmul %390, %389, %cst_284 {dimension_numbers = #tpu.dot_dimension_numbers<[1], [0], [0], [1], [0, 0, 1, 1], [], []>} : vector<128x32xbf16>, vector<32x32xbf16>, vector<128x32xf32> -> vector<128x32xf32>
    %392 = arith.addf %385, %391 : vector<128x32xf32>
    %c0_285 = arith.constant 0 : index
    %c0_286 = arith.constant 0 : index
    %c2_287 = arith.constant 2 : index
    %c0_288 = arith.constant 0 : index
    %393 = vector.load %arg32[%c0_285, %c0_286, %c2_287, %c0_288] : memref<2x10x10x32xf32, #tpu.memory_space<vmem>>, vector<2x8x8x32xf32>
    %394 = vector.shape_cast %393 : vector<2x8x8x32xf32> to vector<128x32xf32>
    %395 = vector.extract_strided_slice %377 {offsets = [0, 2, 0, 0], sizes = [1, 1, 32, 32], strides = [1, 1, 1, 1]} : vector<3x3x32x32xbf16> to vector<1x1x32x32xbf16>
    %396 = vector.shape_cast %395 : vector<1x1x32x32xbf16> to vector<32x32xbf16>
    %397 = arith.truncf %394 : vector<128x32xf32> to vector<128x32xbf16>
    %cst_289 = arith.constant dense<0.000000e+00> : vector<128x32xf32>
    %398 = tpu.matmul %397, %396, %cst_289 {dimension_numbers = #tpu.dot_dimension_numbers<[1], [0], [0], [1], [0, 0, 1, 1], [], []>} : vector<128x32xbf16>, vector<32x32xbf16>, vector<128x32xf32> -> vector<128x32xf32>
    %399 = arith.addf %392, %398 : vector<128x32xf32>
    %c0_290 = arith.constant 0 : index
    %c1_291 = arith.constant 1 : index
    %c0_292 = arith.constant 0 : index
    %c0_293 = arith.constant 0 : index
    %400 = vector.load %arg32[%c0_290, %c1_291, %c0_292, %c0_293] : memref<2x10x10x32xf32, #tpu.memory_space<vmem>>, vector<2x8x8x32xf32>
    %401 = vector.shape_cast %400 : vector<2x8x8x32xf32> to vector<128x32xf32>
    %402 = vector.extract_strided_slice %377 {offsets = [1, 0, 0, 0], sizes = [1, 1, 32, 32], strides = [1, 1, 1, 1]} : vector<3x3x32x32xbf16> to vector<1x1x32x32xbf16>
    %403 = vector.shape_cast %402 : vector<1x1x32x32xbf16> to vector<32x32xbf16>
    %404 = arith.truncf %401 : vector<128x32xf32> to vector<128x32xbf16>
    %cst_294 = arith.constant dense<0.000000e+00> : vector<128x32xf32>
    %405 = tpu.matmul %404, %403, %cst_294 {dimension_numbers = #tpu.dot_dimension_numbers<[1], [0], [0], [1], [0, 0, 1, 1], [], []>} : vector<128x32xbf16>, vector<32x32xbf16>, vector<128x32xf32> -> vector<128x32xf32>
    %406 = arith.addf %399, %405 : vector<128x32xf32>
    %c0_295 = arith.constant 0 : index
    %c1_296 = arith.constant 1 : index
    %c1_297 = arith.constant 1 : index
    %c0_298 = arith.constant 0 : index
    %407 = vector.load %arg32[%c0_295, %c1_296, %c1_297, %c0_298] : memref<2x10x10x32xf32, #tpu.memory_space<vmem>>, vector<2x8x8x32xf32>
    %408 = vector.shape_cast %407 : vector<2x8x8x32xf32> to vector<128x32xf32>
    %409 = vector.extract_strided_slice %377 {offsets = [1, 1, 0, 0], sizes = [1, 1, 32, 32], strides = [1, 1, 1, 1]} : vector<3x3x32x32xbf16> to vector<1x1x32x32xbf16>
    %410 = vector.shape_cast %409 : vector<1x1x32x32xbf16> to vector<32x32xbf16>
    %411 = arith.truncf %408 : vector<128x32xf32> to vector<128x32xbf16>
    %cst_299 = arith.constant dense<0.000000e+00> : vector<128x32xf32>
    %412 = tpu.matmul %411, %410, %cst_299 {dimension_numbers = #tpu.dot_dimension_numbers<[1], [0], [0], [1], [0, 0, 1, 1], [], []>} : vector<128x32xbf16>, vector<32x32xbf16>, vector<128x32xf32> -> vector<128x32xf32>
    %413 = arith.addf %406, %412 : vector<128x32xf32>
    %c0_300 = arith.constant 0 : index
    %c1_301 = arith.constant 1 : index
    %c2_302 = arith.constant 2 : index
    %c0_303 = arith.constant 0 : index
    %414 = vector.load %arg32[%c0_300, %c1_301, %c2_302, %c0_303] : memref<2x10x10x32xf32, #tpu.memory_space<vmem>>, vector<2x8x8x32xf32>
    %415 = vector.shape_cast %414 : vector<2x8x8x32xf32> to vector<128x32xf32>
    %416 = vector.extract_strided_slice %377 {offsets = [1, 2, 0, 0], sizes = [1, 1, 32, 32], strides = [1, 1, 1, 1]} : vector<3x3x32x32xbf16> to vector<1x1x32x32xbf16>
    %417 = vector.shape_cast %416 : vector<1x1x32x32xbf16> to vector<32x32xbf16>
    %418 = arith.truncf %415 : vector<128x32xf32> to vector<128x32xbf16>
    %cst_304 = arith.constant dense<0.000000e+00> : vector<128x32xf32>
    %419 = tpu.matmul %418, %417, %cst_304 {dimension_numbers = #tpu.dot_dimension_numbers<[1], [0], [0], [1], [0, 0, 1, 1], [], []>} : vector<128x32xbf16>, vector<32x32xbf16>, vector<128x32xf32> -> vector<128x32xf32>
    %420 = arith.addf %413, %419 : vector<128x32xf32>
    %c0_305 = arith.constant 0 : index
    %c2_306 = arith.constant 2 : index
    %c0_307 = arith.constant 0 : index
    %c0_308 = arith.constant 0 : index
    %421 = vector.load %arg32[%c0_305, %c2_306, %c0_307, %c0_308] : memref<2x10x10x32xf32, #tpu.memory_space<vmem>>, vector<2x8x8x32xf32>
    %422 = vector.shape_cast %421 : vector<2x8x8x32xf32> to vector<128x32xf32>
    %423 = vector.extract_strided_slice %377 {offsets = [2, 0, 0, 0], sizes = [1, 1, 32, 32], strides = [1, 1, 1, 1]} : vector<3x3x32x32xbf16> to vector<1x1x32x32xbf16>
    %424 = vector.shape_cast %423 : vector<1x1x32x32xbf16> to vector<32x32xbf16>
    %425 = arith.truncf %422 : vector<128x32xf32> to vector<128x32xbf16>
    %cst_309 = arith.constant dense<0.000000e+00> : vector<128x32xf32>
    %426 = tpu.matmul %425, %424, %cst_309 {dimension_numbers = #tpu.dot_dimension_numbers<[1], [0], [0], [1], [0, 0, 1, 1], [], []>} : vector<128x32xbf16>, vector<32x32xbf16>, vector<128x32xf32> -> vector<128x32xf32>
    %427 = arith.addf %420, %426 : vector<128x32xf32>
    %c0_310 = arith.constant 0 : index
    %c2_311 = arith.constant 2 : index
    %c1_312 = arith.constant 1 : index
    %c0_313 = arith.constant 0 : index
    %428 = vector.load %arg32[%c0_310, %c2_311, %c1_312, %c0_313] : memref<2x10x10x32xf32, #tpu.memory_space<vmem>>, vector<2x8x8x32xf32>
    %429 = vector.shape_cast %428 : vector<2x8x8x32xf32> to vector<128x32xf32>
    %430 = vector.extract_strided_slice %377 {offsets = [2, 1, 0, 0], sizes = [1, 1, 32, 32], strides = [1, 1, 1, 1]} : vector<3x3x32x32xbf16> to vector<1x1x32x32xbf16>
    %431 = vector.shape_cast %430 : vector<1x1x32x32xbf16> to vector<32x32xbf16>
    %432 = arith.truncf %429 : vector<128x32xf32> to vector<128x32xbf16>
    %cst_314 = arith.constant dense<0.000000e+00> : vector<128x32xf32>
    %433 = tpu.matmul %432, %431, %cst_314 {dimension_numbers = #tpu.dot_dimension_numbers<[1], [0], [0], [1], [0, 0, 1, 1], [], []>} : vector<128x32xbf16>, vector<32x32xbf16>, vector<128x32xf32> -> vector<128x32xf32>
    %434 = arith.addf %427, %433 : vector<128x32xf32>
    %c0_315 = arith.constant 0 : index
    %c2_316 = arith.constant 2 : index
    %c2_317 = arith.constant 2 : index
    %c0_318 = arith.constant 0 : index
    %435 = vector.load %arg32[%c0_315, %c2_316, %c2_317, %c0_318] : memref<2x10x10x32xf32, #tpu.memory_space<vmem>>, vector<2x8x8x32xf32>
    %436 = vector.shape_cast %435 : vector<2x8x8x32xf32> to vector<128x32xf32>
    %437 = vector.extract_strided_slice %377 {offsets = [2, 2, 0, 0], sizes = [1, 1, 32, 32], strides = [1, 1, 1, 1]} : vector<3x3x32x32xbf16> to vector<1x1x32x32xbf16>
    %438 = vector.shape_cast %437 : vector<1x1x32x32xbf16> to vector<32x32xbf16>
    %439 = arith.truncf %436 : vector<128x32xf32> to vector<128x32xbf16>
    %cst_319 = arith.constant dense<0.000000e+00> : vector<128x32xf32>
    %440 = tpu.matmul %439, %438, %cst_319 {dimension_numbers = #tpu.dot_dimension_numbers<[1], [0], [0], [1], [0, 0, 1, 1], [], []>} : vector<128x32xbf16>, vector<32x32xbf16>, vector<128x32xf32> -> vector<128x32xf32>
    %441 = arith.addf %434, %440 : vector<128x32xf32>
    %cst_320 = arith.constant dense<0.000000e+00> : vector<32xf32>
    %442 = vector.multi_reduction <add>, %441, %cst_320 [0] : vector<128x32xf32> to vector<32xf32>
    %443 = vector.shape_cast %442 : vector<32xf32> to vector<1x32xf32>
    %cst_321 = arith.constant 1.280000e+02 : f32
    %444 = vector.broadcast %cst_321 : f32 to vector<1x32xf32>
    %445 = arith.divf %443, %444 : vector<1x32xf32>
    %446 = arith.mulf %441, %441 : vector<128x32xf32>
    %cst_322 = arith.constant dense<0.000000e+00> : vector<32xf32>
    %447 = vector.multi_reduction <add>, %446, %cst_322 [0] : vector<128x32xf32> to vector<32xf32>
    %448 = vector.shape_cast %447 : vector<32xf32> to vector<1x32xf32>
    %cst_323 = arith.constant 1.280000e+02 : f32
    %449 = vector.broadcast %cst_323 : f32 to vector<1x32xf32>
    %450 = arith.divf %448, %449 : vector<1x32xf32>
    %451 = arith.mulf %445, %445 : vector<1x32xf32>
    %452 = arith.subf %450, %451 : vector<1x32xf32>
    %c0_324 = arith.constant 0 : index
    %c0_325 = arith.constant 0 : index
    %453 = vector.load %arg14[%c0_324, %c0_325] : memref<1x32xf32, #tpu.memory_space<vmem>>, vector<1x32xf32>
    %cst_326 = arith.constant 9.99999974E-6 : f32
    %454 = vector.broadcast %cst_326 : f32 to vector<1x32xf32>
    %455 = arith.addf %452, %454 : vector<1x32xf32>
    %456 = math.rsqrt %455 : vector<1x32xf32>
    %457 = arith.mulf %453, %456 : vector<1x32xf32>
    %c0_327 = arith.constant 0 : index
    %c0_328 = arith.constant 0 : index
    %458 = vector.load %arg15[%c0_327, %c0_328] : memref<1x32xf32, #tpu.memory_space<vmem>>, vector<1x32xf32>
    %459 = arith.mulf %445, %457 : vector<1x32xf32>
    %460 = arith.subf %458, %459 : vector<1x32xf32>
    %461 = vector.broadcast %457 : vector<1x32xf32> to vector<128x32xf32>
    %462 = arith.mulf %441, %461 : vector<128x32xf32>
    %463 = vector.broadcast %460 : vector<1x32xf32> to vector<128x32xf32>
    %464 = arith.addf %462, %463 : vector<128x32xf32>
    %465 = arith.addf %464, %282 : vector<128x32xf32>
    %cst_329 = arith.constant 0.000000e+00 : f32
    %466 = vector.broadcast %cst_329 : f32 to vector<128x32xf32>
    %467 = arith.maximumf %465, %466 : vector<128x32xf32>
    %468 = tpu.iota {dimensions = array<i32: 1>} : vector<2x64x64xi32>
    %469 = tpu.iota {dimensions = array<i32: 2>} : vector<2x64x64xi32>
    %470 = arith.cmpi eq, %468, %469 : vector<2x64x64xi32>
    %471 = arith.extui %470 : vector<2x64x64xi1> to vector<2x64x64xi32>
    %472 = arith.sitofp %471 : vector<2x64x64xi32> to vector<2x64x64xf32>
    %473 = vector.shape_cast %472 : vector<2x64x64xf32> to vector<128x64xf32>
    %474 = tpu.iota {dimensions = array<i32: 0>} : vector<2x128xi32>
    %475 = tpu.iota {dimensions = array<i32: 1>} : vector<2x128xi32>
    %c64_i32 = arith.constant 64 : i32
    %476 = vector.broadcast %c64_i32 : i32 to vector<2x128xi32>
    %477 = arith.muli %474, %476 : vector<2x128xi32>
    %478 = arith.cmpi sge, %475, %477 : vector<2x128xi32>
    %c1_i32 = arith.constant 1 : i32
    %479 = vector.broadcast %c1_i32 : i32 to vector<2x128xi32>
    %480 = arith.addi %474, %479 : vector<2x128xi32>
    %c64_i32_330 = arith.constant 64 : i32
    %481 = vector.broadcast %c64_i32_330 : i32 to vector<2x128xi32>
    %482 = arith.muli %480, %481 : vector<2x128xi32>
    %483 = arith.cmpi slt, %475, %482 : vector<2x128xi32>
    %484 = arith.andi %478, %483 : vector<2x128xi1>
    %485 = arith.extui %484 : vector<2x128xi1> to vector<2x128xi32>
    %486 = arith.sitofp %485 : vector<2x128xi32> to vector<2x128xf32>
    %c0_331 = arith.constant 0 : index
    %c0_332 = arith.constant 0 : index
    %487 = vector.load %arg16[%c0_331, %c0_332] : memref<32x2xbf16, #tpu.memory_space<vmem>>, vector<32x2xbf16>
    %488 = arith.truncf %467 : vector<128x32xf32> to vector<128x32xbf16>
    %cst_333 = arith.constant dense<0.000000e+00> : vector<128x2xf32>
    %489 = tpu.matmul %488, %487, %cst_333 {dimension_numbers = #tpu.dot_dimension_numbers<[1], [0], [0], [1], [0, 0, 1, 1], [], []>} : vector<128x32xbf16>, vector<32x2xbf16>, vector<128x2xf32> -> vector<128x2xf32>
    %cst_334 = arith.constant dense<0.000000e+00> : vector<2xf32>
    %490 = vector.multi_reduction <add>, %489, %cst_334 [0] : vector<128x2xf32> to vector<2xf32>
    %491 = vector.shape_cast %490 : vector<2xf32> to vector<1x2xf32>
    %cst_335 = arith.constant 1.280000e+02 : f32
    %492 = vector.broadcast %cst_335 : f32 to vector<1x2xf32>
    %493 = arith.divf %491, %492 : vector<1x2xf32>
    %494 = arith.mulf %489, %489 : vector<128x2xf32>
    %cst_336 = arith.constant dense<0.000000e+00> : vector<2xf32>
    %495 = vector.multi_reduction <add>, %494, %cst_336 [0] : vector<128x2xf32> to vector<2xf32>
    %496 = vector.shape_cast %495 : vector<2xf32> to vector<1x2xf32>
    %cst_337 = arith.constant 1.280000e+02 : f32
    %497 = vector.broadcast %cst_337 : f32 to vector<1x2xf32>
    %498 = arith.divf %496, %497 : vector<1x2xf32>
    %499 = arith.mulf %493, %493 : vector<1x2xf32>
    %500 = arith.subf %498, %499 : vector<1x2xf32>
    %c0_338 = arith.constant 0 : index
    %c0_339 = arith.constant 0 : index
    %501 = vector.load %arg17[%c0_338, %c0_339] : memref<1x2xf32, #tpu.memory_space<vmem>>, vector<1x2xf32>
    %cst_340 = arith.constant 9.99999974E-6 : f32
    %502 = vector.broadcast %cst_340 : f32 to vector<1x2xf32>
    %503 = arith.addf %500, %502 : vector<1x2xf32>
    %504 = math.rsqrt %503 : vector<1x2xf32>
    %505 = arith.mulf %501, %504 : vector<1x2xf32>
    %c0_341 = arith.constant 0 : index
    %c0_342 = arith.constant 0 : index
    %506 = vector.load %arg18[%c0_341, %c0_342] : memref<1x2xf32, #tpu.memory_space<vmem>>, vector<1x2xf32>
    %507 = arith.mulf %493, %505 : vector<1x2xf32>
    %508 = arith.subf %506, %507 : vector<1x2xf32>
    %509 = vector.broadcast %505 : vector<1x2xf32> to vector<128x2xf32>
    %510 = arith.mulf %489, %509 : vector<128x2xf32>
    %511 = vector.broadcast %508 : vector<1x2xf32> to vector<128x2xf32>
    %512 = arith.addf %510, %511 : vector<128x2xf32>
    %cst_343 = arith.constant 0.000000e+00 : f32
    %513 = vector.broadcast %cst_343 : f32 to vector<128x2xf32>
    %514 = arith.maximumf %512, %513 : vector<128x2xf32>
    %515 = vector.extract_strided_slice %514 {offsets = [0, 0], sizes = [128, 1], strides = [1, 1]} : vector<128x2xf32> to vector<128x1xf32>
    %516 = vector.broadcast %515 : vector<128x1xf32> to vector<128x64xf32>
    %517 = arith.mulf %516, %473 : vector<128x64xf32>
    %518 = arith.truncf %486 : vector<2x128xf32> to vector<2x128xbf16>
    %519 = arith.truncf %517 : vector<128x64xf32> to vector<128x64xbf16>
    %cst_344 = arith.constant dense<0.000000e+00> : vector<2x64xf32>
    %520 = tpu.matmul %518, %519, %cst_344 {dimension_numbers = #tpu.dot_dimension_numbers<[1], [0], [0], [1], [0, 0, 1, 1], [], []>} : vector<2x128xbf16>, vector<128x64xbf16>, vector<2x64xf32> -> vector<2x64xf32>
    %521 = vector.extract_strided_slice %514 {offsets = [0, 1], sizes = [128, 1], strides = [1, 1]} : vector<128x2xf32> to vector<128x1xf32>
    %522 = vector.broadcast %521 : vector<128x1xf32> to vector<128x64xf32>
    %523 = arith.mulf %522, %473 : vector<128x64xf32>
    %524 = arith.truncf %486 : vector<2x128xf32> to vector<2x128xbf16>
    %525 = arith.truncf %523 : vector<128x64xf32> to vector<128x64xbf16>
    %cst_345 = arith.constant dense<0.000000e+00> : vector<2x64xf32>
    %526 = tpu.matmul %524, %525, %cst_345 {dimension_numbers = #tpu.dot_dimension_numbers<[1], [0], [0], [1], [0, 0, 1, 1], [], []>} : vector<2x128xbf16>, vector<128x64xbf16>, vector<2x64xf32> -> vector<2x64xf32>
    %c0_346 = arith.constant 0 : index
    %c0_347 = arith.constant 0 : index
    %527 = vector.load %arg19[%c0_346, %c0_347] : memref<64x512xbf16, #tpu.memory_space<vmem>>, vector<64x512xbf16>
    %528 = arith.truncf %520 : vector<2x64xf32> to vector<2x64xbf16>
    %cst_348 = arith.constant dense<0.000000e+00> : vector<2x512xf32>
    %529 = tpu.matmul %528, %527, %cst_348 {dimension_numbers = #tpu.dot_dimension_numbers<[1], [0], [0], [1], [0, 0, 1, 1], [], []>} : vector<2x64xbf16>, vector<64x512xbf16>, vector<2x512xf32> -> vector<2x512xf32>
    %c0_349 = arith.constant 0 : index
    %c0_350 = arith.constant 0 : index
    %530 = vector.load %arg20[%c0_349, %c0_350] : memref<64x512xbf16, #tpu.memory_space<vmem>>, vector<64x512xbf16>
    %531 = arith.truncf %526 : vector<2x64xf32> to vector<2x64xbf16>
    %cst_351 = arith.constant dense<0.000000e+00> : vector<2x512xf32>
    %532 = tpu.matmul %531, %530, %cst_351 {dimension_numbers = #tpu.dot_dimension_numbers<[1], [0], [0], [1], [0, 0, 1, 1], [], []>} : vector<2x64xbf16>, vector<64x512xbf16>, vector<2x512xf32> -> vector<2x512xf32>
    %533 = arith.addf %529, %532 : vector<2x512xf32>
    %c0_352 = arith.constant 0 : index
    %c0_353 = arith.constant 0 : index
    %534 = vector.load %arg21[%c0_352, %c0_353] : memref<1x512xf32, #tpu.memory_space<vmem>>, vector<1x512xf32>
    %535 = vector.broadcast %534 : vector<1x512xf32> to vector<2x512xf32>
    %536 = arith.addf %533, %535 : vector<2x512xf32>
    %c0_354 = arith.constant 0 : index
    %c0_355 = arith.constant 0 : index
    %537 = vector.load %arg29[%c0_354, %c0_355] : memref<2x512xf32, #tpu.memory_space<vmem>>, vector<2x512xf32>
    tpu.vector_store %arg29[%c0_354, %c0_355], %536 {strides = array<i32>} : memref<2x512xf32, #tpu.memory_space<vmem>>, vector<2x512xf32>,
    %c0_356 = arith.constant 0 : index
    %c0_357 = arith.constant 0 : index
    %538 = vector.load %arg22[%c0_356, %c0_357] : memref<32x1xbf16, #tpu.memory_space<vmem>>, vector<32x1xbf16>
    %539 = arith.truncf %467 : vector<128x32xf32> to vector<128x32xbf16>
    %cst_358 = arith.constant dense<0.000000e+00> : vector<128x1xf32>
    %540 = tpu.matmul %539, %538, %cst_358 {dimension_numbers = #tpu.dot_dimension_numbers<[1], [0], [0], [1], [0, 0, 1, 1], [], []>} : vector<128x32xbf16>, vector<32x1xbf16>, vector<128x1xf32> -> vector<128x1xf32>
    %cst_359 = arith.constant dense<0.000000e+00> : vector<1xf32>
    %541 = vector.multi_reduction <add>, %540, %cst_359 [0] : vector<128x1xf32> to vector<1xf32>
    %542 = vector.shape_cast %541 : vector<1xf32> to vector<1x1xf32>
    %cst_360 = arith.constant 1.280000e+02 : f32
    %543 = vector.broadcast %cst_360 : f32 to vector<1x1xf32>
    %544 = arith.divf %542, %543 : vector<1x1xf32>
    %545 = arith.mulf %540, %540 : vector<128x1xf32>
    %cst_361 = arith.constant dense<0.000000e+00> : vector<1xf32>
    %546 = vector.multi_reduction <add>, %545, %cst_361 [0] : vector<128x1xf32> to vector<1xf32>
    %547 = vector.shape_cast %546 : vector<1xf32> to vector<1x1xf32>
    %cst_362 = arith.constant 1.280000e+02 : f32
    %548 = vector.broadcast %cst_362 : f32 to vector<1x1xf32>
    %549 = arith.divf %547, %548 : vector<1x1xf32>
    %550 = arith.mulf %544, %544 : vector<1x1xf32>
    %551 = arith.subf %549, %550 : vector<1x1xf32>
    %c0_363 = arith.constant 0 : index
    %c0_364 = arith.constant 0 : index
    %552 = vector.load %arg23[%c0_363, %c0_364] : memref<1x1xf32, #tpu.memory_space<vmem>>, vector<1x1xf32>
    %cst_365 = arith.constant 9.99999974E-6 : f32
    %553 = vector.broadcast %cst_365 : f32 to vector<1x1xf32>
    %554 = arith.addf %551, %553 : vector<1x1xf32>
    %555 = math.rsqrt %554 : vector<1x1xf32>
    %556 = arith.mulf %552, %555 : vector<1x1xf32>
    %c0_366 = arith.constant 0 : index
    %c0_367 = arith.constant 0 : index
    %557 = vector.load %arg24[%c0_366, %c0_367] : memref<1x1xf32, #tpu.memory_space<vmem>>, vector<1x1xf32>
    %558 = arith.mulf %544, %556 : vector<1x1xf32>
    %559 = arith.subf %557, %558 : vector<1x1xf32>
    %560 = vector.broadcast %556 : vector<1x1xf32> to vector<128x1xf32>
    %561 = arith.mulf %540, %560 : vector<128x1xf32>
    %562 = vector.broadcast %559 : vector<1x1xf32> to vector<128x1xf32>
    %563 = arith.addf %561, %562 : vector<128x1xf32>
    %cst_368 = arith.constant 0.000000e+00 : f32
    %564 = vector.broadcast %cst_368 : f32 to vector<128x1xf32>
    %565 = arith.maximumf %563, %564 : vector<128x1xf32>
    %566 = vector.broadcast %565 : vector<128x1xf32> to vector<128x64xf32>
    %567 = arith.mulf %566, %473 : vector<128x64xf32>
    %568 = arith.truncf %486 : vector<2x128xf32> to vector<2x128xbf16>
    %569 = arith.truncf %567 : vector<128x64xf32> to vector<128x64xbf16>
    %cst_369 = arith.constant dense<0.000000e+00> : vector<2x64xf32>
    %570 = tpu.matmul %568, %569, %cst_369 {dimension_numbers = #tpu.dot_dimension_numbers<[1], [0], [0], [1], [0, 0, 1, 1], [], []>} : vector<2x128xbf16>, vector<128x64xbf16>, vector<2x64xf32> -> vector<2x64xf32>
    %c0_370 = arith.constant 0 : index
    %c0_371 = arith.constant 0 : index
    %571 = vector.load %arg25[%c0_370, %c0_371] : memref<64x128xbf16, #tpu.memory_space<vmem>>, vector<64x128xbf16>
    %572 = arith.truncf %570 : vector<2x64xf32> to vector<2x64xbf16>
    %cst_372 = arith.constant dense<0.000000e+00> : vector<2x128xf32>
    %573 = tpu.matmul %572, %571, %cst_372 {dimension_numbers = #tpu.dot_dimension_numbers<[1], [0], [0], [1], [0, 0, 1, 1], [], []>} : vector<2x64xbf16>, vector<64x128xbf16>, vector<2x128xf32> -> vector<2x128xf32>
    %c0_373 = arith.constant 0 : index
    %c0_374 = arith.constant 0 : index
    %574 = vector.load %arg26[%c0_373, %c0_374] : memref<1x128xf32, #tpu.memory_space<vmem>>, vector<1x128xf32>
    %575 = vector.broadcast %574 : vector<1x128xf32> to vector<2x128xf32>
    %576 = arith.addf %573, %575 : vector<2x128xf32>
    %cst_375 = arith.constant 0.000000e+00 : f32
    %577 = vector.broadcast %cst_375 : f32 to vector<2x128xf32>
    %578 = arith.maximumf %576, %577 : vector<2x128xf32>
    %c0_376 = arith.constant 0 : index
    %c0_377 = arith.constant 0 : index
    %579 = vector.load %arg27[%c0_376, %c0_377] : memref<128x1xbf16, #tpu.memory_space<vmem>>, vector<128x1xbf16>
    %580 = arith.truncf %578 : vector<2x128xf32> to vector<2x128xbf16>
    %cst_378 = arith.constant dense<0.000000e+00> : vector<2x1xf32>
    %581 = tpu.matmul %580, %579, %cst_378 {dimension_numbers = #tpu.dot_dimension_numbers<[1], [0], [0], [1], [0, 0, 1, 1], [], []>} : vector<2x128xbf16>, vector<128x1xbf16>, vector<2x1xf32> -> vector<2x1xf32>
    %c0_379 = arith.constant 0 : index
    %c0_380 = arith.constant 0 : index
    %582 = vector.load %arg28[%c0_379, %c0_380] : memref<1x1xf32, #tpu.memory_space<vmem>>, vector<1x1xf32>
    %583 = vector.broadcast %582 : vector<1x1xf32> to vector<2x1xf32>
    %584 = arith.addf %581, %583 : vector<2x1xf32>
    %585 = math.tanh %584 : vector<2x1xf32>
    %c0_381 = arith.constant 0 : index
    %c0_382 = arith.constant 0 : index
    %586 = vector.load %arg30[%c0_381, %c0_382] : memref<2x1xf32, #tpu.memory_space<vmem>>, vector<2x1xf32>
    tpu.vector_store %arg30[%c0_381, %c0_382], %585 {strides = array<i32>} : memref<2x1xf32, #tpu.memory_space<vmem>>, vector<2x1xf32>,
    return
  }
}

</mosaic_0001>

<bundles_post_ra>
// kernel: chess_model_forward.1
= control target key start
LH: loop header
LB: loop body
LE: loop exit
PB: predicated region body
PF: predicated region fallthrough
CT: control target
= control target key end

     0   :  { %s14202_s6 = smov 1   ;;  %s14203_s10 = smov 2   ;;  %s17720_s0 = inlined_call_operand.smem [shape: u32[31], index: -1, kind: input, shape index: {}] }
   0x1   :  { %s14271_s5 = sld [smem:[%s17720_s0]]   ;;  %s14204_s14 = smov 3  }
   0x2   :  { %s14276_s9 = sld [smem:[%s17720_s0 + %s14202_s6]]   ;;  %s14205_s18 = smov 4  }
   0x3   :  { %s14281_s13 = sld [smem:[%s17720_s0 + %s14203_s10]]   ;;  %s14206_s22 = smov 5  }
   0x4   :  { %s14286_s17 = sld [smem:[%s17720_s0 + %s14204_s14]]   ;;  %s14207_s26 = smov 6  }
   0x5   :  { %s14291_s21 = sld [smem:[%s17720_s0 + %s14205_s18]]   ;;  %s14208_s30 = smov 7  }
   0x6   :  { %s14296_s25 = sld [smem:[%s17720_s0 + %s14206_s22]]   ;;  %s14209_s4 = smov 8  }
   0x7   :  { %s14301_s29 = sld [smem:[%s17720_s0 + %s14207_s26]]   ;;  %s14210_s10 = smov 9  }
   0x8   :  { %s14306_s3 = sld [smem:[%s17720_s0 + %s14208_s30]]   ;;  %s14211_s15 = smov 10  }
   0x9   :  { %17813 = sst [smem:[#allocation48_spill]] %s14281_s13  ;;  %s14212_s20 = smov 11  }
   0xa   :  { %s14311_s8 = sld [smem:[%s17720_s0 + %s14209_s4]]   ;;  %s14213_s26 = smov 12  }
   0xb   :  { %17814 = sst [smem:[#allocation49_spill]] %s14291_s21  ;;  %s14214_s1 = smov 13  }
   0xc   :  { %s14316_s14 = sld [smem:[%s17720_s0 + %s14210_s10]]   ;;  %s14215_s7 = smov 14  }
   0xd   :  { %s14321_s19 = sld [smem:[%s17720_s0 + %s14211_s15]]   ;;  %s14216_s15 = smov 15  }
   0xe   :  { %s14326_s24 = sld [smem:[%s17720_s0 + %s14212_s20]]   ;;  %s14217_s22 = smov 16  }
   0xf   :  { %s14331_s30 = sld [smem:[%s17720_s0 + %s14213_s26]]   ;;  %s14218_s28 = smov 17  }
  0x10   :  { %s14336_s6 = sld [smem:[%s17720_s0 + %s14214_s1]]   ;;  %s14225_s23 = smov 25  }
  0x11   :  { %s14341_s12 = sld [smem:[%s17720_s0 + %s14215_s7]]   ;;  %s14219_s7 = smov 18  }
  0x12   :  { %s14346_s20 = sld [smem:[%s17720_s0 + %s14216_s15]]   ;;  %s14220_s15 = smov 19  }
  0x13   :  { %s14351_s27 = sld [smem:[%s17720_s0 + %s14217_s22]]   ;;  %s14221_s22 = smov 20  }
  0x14   :  { %s14356_s4 = sld [smem:[%s17720_s0 + %s14218_s28]]   ;;  %s14222_s28 = smov 21  }
  0x15   :  { %17815 = sst [smem:[#allocation50_spill]] %s14331_s30  ;;  %s14226_s1 = smov 26  }
  0x16   :  { %s14366_s13 = sld [smem:[%s17720_s0 + %s14220_s15]]   ;;  %s14224_s15 = smov 23  }
  0x17   :  { %17816 = sst [smem:[#allocation51_spill]] %s14341_s12  ;;  %s14227_s10 = smov 27  }
  0x18   :  { %17817 = sst [smem:[#allocation52_spill]] %s14346_s20  ;;  %s14228_s16 = smov 29  }
  0x19   :  { %17818 = sst [smem:[#allocation53_spill]] %s14351_s27 }
  0x1a   :  { %s14361_s12 = sld [smem:[%s17720_s0 + %s14219_s7]]   ;;  %s14223_s7 = smov 22  }
  0x1b   :  { %s14371_s27 = sld [smem:[%s17720_s0 + %s14221_s22]]  }
  0x1c   :  { %s14376_s21 = sld [smem:[%s17720_s0 + %s14222_s28]]  }
  0x1d   :  { %s10834_s20 = sld [smem:[%s17720_s0 + %s14224_s15]]  }
  0x1e   :  { %s14404_s30 = sld [smem:[%s17720_s0 + %s14228_s16]]  }
  0x20   :  { %17819 = sst [smem:[#allocation54_spill]] %s14361_s12 }
  0x21   :  { %17820 = sst [smem:[#allocation55_spill]] %s14371_s27 }
  0x22   :  { %17821 = sst [smem:[#allocation56_spill]] %s14376_s21 }
  0x23   :  { %s14381_s12 = sld [smem:[%s17720_s0 + %s14223_s7]]   ;;  %v67_v0 = vstv %s10834_s20 }
  0x24   :  { %s14389_s27 = sld [smem:[%s17720_s0 + %s14225_s23]]   ;;  %s14229_s23 = smov 30   ;;  %68 = vst [vmem:[#allocation4] sm:$0x1] %v67_v0 }
  0x25   :  { %s14394_s21 = sld [smem:[%s17720_s0 + %s14226_s1]]   ;;  %s14230_s1 = smov 24  }
  0x26   :  { %s10835_s7 = sld [smem:[%s17720_s0 + %s14230_s1]]  }
  0x29   :  { %17822 = sst [smem:[#allocation57_spill]] %s14381_s12 }
  0x2a   :  { %17823 = sst [smem:[#allocation58_spill]] %s14389_s27 }
  0x2b   :  { %17824 = sst [smem:[#allocation59_spill]] %s14394_s21 }
  0x2c   :  { %s14399_s12 = sld [smem:[%s17720_s0 + %s14227_s10]]   ;;  %s14231_s10 = smov 28   ;;  %v69_v1 = vstv %s10835_s7 }
  0x2d   :  { %s14409_s27 = sld [smem:[%s17720_s0 + %s14229_s23]]   ;;  %70 = vst [vmem:[#allocation5] sm:$0x1] %v69_v1 }
  0x2e   :  { %s10839_s15 = sld [smem:[%s17720_s0 + %s14231_s10]]  }
  0x34   :  { %v71_v2 = vstv %s10839_s15 }
  0x35   :  { %72 = vst [vmem:[#allocation6] sm:$0x1] %v71_v2 }
  0x36   :  { %73 = vsyncpa [#allocation8], 0 }
  0x37   :  { %74 = vsyncpa [#allocation11], 0 }
  0x38   :  { %75 = vsyncpa [#allocation14], 0 }
  0x39   :  { %76 = vsyncpa [#allocation17], 0 }
  0x3a   :  { %77 = vsyncpa [#allocation20], 0 }
  0x3b   :  { %78 = vsyncpa [#allocation23], 0 }
  0x3c   :  { %79 = vsyncpa [#allocation26], 0 }
  0x3d   :  { %80 = vsyncpa [#allocation29], 0 }
  0x3e   :  { %81 = vsyncpa [#allocation32], 0 }
  0x3f   :  { %82 = vsyncpa [#allocation35], 0 }
  0x40   :  { %83 = vsyncpa [#allocation9], 0  ;;  %s14232_s21 = smov [#allocation10]   ;;  %s13762_s20 = scalar_lea.hbm %s14276_s9, 1152 }
  0x41   :  { %s101_s0 = sshll.u32 %s14232_s21, 4  ;;  %p13763_p0 = scmp.ne.s32.totalorder %s14276_s9, %s13762_s20  ;;  %s102_s0 = int_to_ptr.vmem [resolvable:$true] %s101_s0 }
  0x42   :  { %p13766_p1 = scmp.lt.u32.totalorder %s13762_s20, %s14276_s9 }
  0x44   :  { %p13768_p2 = pnand %p13766_p1, %p13763_p0 }
  0x46   :  { %13771 = shalt.err (!%p13768_p2)
}
  0x47   :  { %s13772_s16 = scalar_lea.vmem %s102_s0, 1152  ;;  %p13777_p4 = scmp.lt.s32.totalorder %s102_s0, %s102_s0 }
  0x48   :  { %p13773_p3 = scmp.ne.s32.totalorder %s102_s0, %s13772_s16  ;;  %p13778_p5 = scmp.lt.s32.totalorder %s13772_s16, %s13772_s16 }
  0x4a   :  { %p13779_p6 = por %p13778_p5, %p13777_p4 }
  0x4c   :  { %p13780_p7 = pnand %p13779_p6, %p13773_p3 }
  0x4e   :  { %13783 = shalt.err (!%p13780_p7)
}
  0x4f   :  { %s14233_s18 = smov 64   ;;  %s14234_s23 = smov 4  }
  0x50   :  { %107 = dma.hbm_to_vmem [thread:$0]  %s14276_s9, 1152, %s102_s0, [#allocation11], %s14233_s18, %s14233_s18, %s14234_s23  }
  0x51   :  { %s14235_s22 = smov [#allocation13]   ;;  %s14236_s1 = smov [#allocation16]  }
  0x52   :  { %s128_s26 = sshll.u32 %s14235_s22, 4  ;;  %s147_s28 = sshll.u32 %s14236_s1, 4  ;;  %s129_s26 = int_to_ptr.vmem [resolvable:$true] %s128_s26  ;;  %s148_s28 = int_to_ptr.vmem [resolvable:$true] %s147_s28 }
  0x53   :  { %s13784_s2 = scalar_lea.hbm %s14296_s25, 16 }
  0x54   :  { %p13785_p8 = scmp.ne.s32.totalorder %s14296_s25, %s13784_s2  ;;  %p13788_p9 = scmp.lt.u32.totalorder %s13784_s2, %s14296_s25 }
  0x56   :  { %p13790_p10 = pnand %p13788_p9, %p13785_p8 }
  0x58   :  { %13793 = shalt.err (!%p13790_p10)
}
  0x59   :  { %s13794_s7 = scalar_lea.vmem %s129_s26, 16  ;;  %s13798_s10 = scalar_lea.vmem %s129_s26, 32 }
  0x5a   :  { %p13795_p11 = scmp.ne.s32.totalorder %s129_s26, %s13794_s7  ;;  %p13799_p12 = scmp.lt.s32.totalorder %s129_s26, %s129_s26 }
  0x5b   :  { %p13800_p13 = scmp.lt.s32.totalorder %s13798_s10, %s13794_s7 }
  0x5d   :  { %p13801_p0 = por %p13800_p13, %p13799_p12 }
  0x5f   :  { %p13802_p1 = pnand %p13801_p0, %p13795_p11 }
  0x61   :  { %13805 = shalt.err (!%p13802_p1)
}
  0x62   :  { %131 = dma.hbm_to_vmem [thread:$0]  %s14296_s25, 16, %s129_s26, [#allocation14]  }
  0x63   :  { %s13806_s9 = scalar_lea.hbm %s14306_s3, 2304 }
  0x64   :  { %p13807_p2 = scmp.ne.s32.totalorder %s14306_s3, %s13806_s9  ;;  %p13810_p3 = scmp.lt.u32.totalorder %s13806_s9, %s14306_s3 }
  0x66   :  { %p13812_p4 = pnand %p13810_p3, %p13807_p2 }
  0x68   :  { %13815 = shalt.err (!%p13812_p4)
}
  0x69   :  { %s13816_s11 = scalar_lea.vmem %s148_s28, 2304  ;;  %p13821_p6 = scmp.lt.s32.totalorder %s148_s28, %s148_s28 }
  0x6a   :  { %p13817_p5 = scmp.ne.s32.totalorder %s148_s28, %s13816_s11  ;;  %p13822_p7 = scmp.lt.s32.totalorder %s13816_s11, %s13816_s11 }
  0x6c   :  { %p13823_p8 = por %p13822_p7, %p13821_p6 }
  0x6e   :  { %p13824_p9 = pnand %p13823_p8, %p13817_p5 }
  0x70   :  { %13827 = shalt.err (!%p13824_p9)
}
  0x71   :  { %153 = dma.hbm_to_vmem [thread:$0]  %s14306_s3, 2304, %s148_s28, [#allocation17], %s14233_s18, %s14233_s18, %s14234_s23  }
  0x72   :  { %s14237_s25 = smov [#allocation19]   ;;  %s14238_s21 = smov [#allocation22]  }
  0x73   :  { %s170_s15 = sshll.u32 %s14237_s25, 4  ;;  %s192_s0 = sshll.u32 %s14238_s21, 4  ;;  %s171_s15 = int_to_ptr.vmem [resolvable:$true] %s170_s15  ;;  %s193_s0 = int_to_ptr.vmem [resolvable:$true] %s192_s0 }
  0x74   :  { %s13828_s20 = scalar_lea.hbm %s14316_s14, 16 }
  0x75   :  { %p13829_p10 = scmp.ne.s32.totalorder %s14316_s14, %s13828_s20  ;;  %p13832_p11 = scmp.lt.u32.totalorder %s13828_s20, %s14316_s14 }
  0x77   :  { %p13834_p12 = pnand %p13832_p11, %p13829_p10 }
  0x79   :  { %13837 = shalt.err (!%p13834_p12)
}
  0x7a   :  { %s13838_s16 = scalar_lea.vmem %s171_s15, 16  ;;  %s13842_s22 = scalar_lea.vmem %s171_s15, 32 }
  0x7b   :  { %p13839_p13 = scmp.ne.s32.totalorder %s171_s15, %s13838_s16  ;;  %p13843_p0 = scmp.lt.s32.totalorder %s171_s15, %s171_s15 }
  0x7c   :  { %p13844_p1 = scmp.lt.s32.totalorder %s13842_s22, %s13838_s16 }
  0x7e   :  { %p13845_p2 = por %p13844_p1, %p13843_p0 }
  0x80   :  { %p13846_p3 = pnand %p13845_p2, %p13839_p13 }
  0x82   :  { %13849 = shalt.err (!%p13846_p3)
}
  0x83   :  { %173 = dma.hbm_to_vmem [thread:$0]  %s14316_s14, 16, %s171_s15, [#allocation20]  }
  0x84   :  { %s13850_s3 = scalar_lea.hbm %s14326_s24, 16 }
  0x85   :  { %p13851_p4 = scmp.ne.s32.totalorder %s14326_s24, %s13850_s3  ;;  %p13854_p5 = scmp.lt.u32.totalorder %s13850_s3, %s14326_s24 }
  0x87   :  { %p13856_p6 = pnand %p13854_p5, %p13851_p4 }
  0x89   :  { %13859 = shalt.err (!%p13856_p6)
}
  0x8a   :  { %s13860_s26 = scalar_lea.vmem %s193_s0, 16  ;;  %s13864_s1 = scalar_lea.vmem %s193_s0, 32 }
  0x8b   :  { %p13861_p7 = scmp.ne.s32.totalorder %s193_s0, %s13860_s26  ;;  %p13865_p8 = scmp.lt.s32.totalorder %s193_s0, %s193_s0 }
  0x8c   :  { %p13866_p9 = scmp.lt.s32.totalorder %s13864_s1, %s13860_s26 }
  0x8e   :  { %p13867_p10 = por %p13866_p9, %p13865_p8 }
  0x90   :  { %p13868_p11 = pnand %p13867_p10, %p13861_p7 }
  0x92   :  { %13871 = shalt.err (!%p13868_p11)
}
  0x93   :  { %195 = dma.hbm_to_vmem [thread:$0]  %s14326_s24, 16, %s193_s0, [#allocation23]  }
  0x94   :  { %s14239_s14 = smov [#allocation25]   ;;  %s14240_s2 = smov [#allocation28]  }
  0x95   :  { %s211_s28 = sshll.u32 %s14239_s14, 4  ;;  %s238_s7 = sshll.u32 %s14240_s2, 4  ;;  %s212_s28 = int_to_ptr.vmem [resolvable:$true] %s211_s28  ;;  %s239_s7 = int_to_ptr.vmem [resolvable:$true] %s238_s7 }
  0x96   :  { %s13872_s10 = scalar_lea.hbm %s14336_s6, 2304 }
  0x97   :  { %p13873_p12 = scmp.ne.s32.totalorder %s14336_s6, %s13872_s10  ;;  %p13876_p13 = scmp.lt.u32.totalorder %s13872_s10, %s14336_s6 }
  0x99   :  { %p13878_p0 = pnand %p13876_p13, %p13873_p12 }
  0x9b   :  { %13881 = shalt.err (!%p13878_p0)
}
  0x9c   :  { %s13882_s9 = scalar_lea.vmem %s212_s28, 2304  ;;  %p13887_p2 = scmp.lt.s32.totalorder %s212_s28, %s212_s28 }
  0x9d   :  { %p13883_p1 = scmp.ne.s32.totalorder %s212_s28, %s13882_s9  ;;  %p13888_p3 = scmp.lt.s32.totalorder %s13882_s9, %s13882_s9 }
  0x9f   :  { %p13889_p4 = por %p13888_p3, %p13887_p2 }
  0xa1   :  { %p13890_p5 = pnand %p13889_p4, %p13883_p1 }
  0xa3   :  { %13893 = shalt.err (!%p13890_p5)
}
  0xa4   :  { %217 = dma.hbm_to_vmem [thread:$0]  %s14336_s6, 2304, %s212_s28, [#allocation26], %s14233_s18, %s14233_s18, %s14234_s23  }
  0xa5   :  { %s13894_s24 = scalar_lea.hbm %s14356_s4, 16 }
  0xa6   :  { %p13895_p6 = scmp.ne.s32.totalorder %s14356_s4, %s13894_s24  ;;  %p13898_p7 = scmp.lt.u32.totalorder %s13894_s24, %s14356_s4 }
  0xa8   :  { %p13900_p8 = pnand %p13898_p7, %p13895_p6 }
  0xaa   :  { %13903 = shalt.err (!%p13900_p8)
}
  0xab   :  { %s13904_s11 = scalar_lea.vmem %s239_s7, 16  ;;  %s13908_s25 = scalar_lea.vmem %s239_s7, 32 }
  0xac   :  { %p13905_p9 = scmp.ne.s32.totalorder %s239_s7, %s13904_s11  ;;  %p13909_p10 = scmp.lt.s32.totalorder %s239_s7, %s239_s7 }
  0xad   :  { %p13910_p11 = scmp.lt.s32.totalorder %s13908_s25, %s13904_s11 }
  0xaf   :  { %p13911_p12 = por %p13910_p11, %p13909_p10 }
  0xb1   :  { %p13912_p13 = pnand %p13911_p12, %p13905_p9 }
  0xb3   :  { %13915 = shalt.err (!%p13912_p13)
}
  0xb4   :  { %241 = dma.hbm_to_vmem [thread:$0]  %s14356_s4, 16, %s239_s7, [#allocation29]  }
  0xb5   :  { %s14241_s6 = smov [#allocation31]   ;;  %s13916_s21 = scalar_lea.hbm %s14366_s13, 2048 }
  0xb6   :  { %s257_s15 = sshll.u32 %s14241_s6, 4  ;;  %p13917_p0 = scmp.ne.s32.totalorder %s14366_s13, %s13916_s21  ;;  %s258_s15 = int_to_ptr.vmem [resolvable:$true] %s257_s15 }
  0xb7   :  { %p13920_p1 = scmp.lt.u32.totalorder %s13916_s21, %s14366_s13 }
  0xb9   :  { %p13922_p2 = pnand %p13920_p1, %p13917_p0 }
  0xbb   :  { %13925 = shalt.err (!%p13922_p2)
}
  0xbc   :  { %s13926_s0 = scalar_lea.vmem %s258_s15, 2048  ;;  %p13931_p4 = scmp.lt.s32.totalorder %s258_s15, %s258_s15 }
  0xbd   :  { %p13927_p3 = scmp.ne.s32.totalorder %s258_s15, %s13926_s0  ;;  %p13932_p5 = scmp.lt.s32.totalorder %s13926_s0, %s13926_s0 }
  0xbf   :  { %p13933_p6 = por %p13932_p5, %p13931_p4 }
  0xc1   :  { %p13934_p7 = pnand %p13933_p6, %p13927_p3 }
  0xc3   :  { %13937 = shalt.err (!%p13934_p7)
}
  0xc4   :  { %s14242_s20 = smov 256   ;;  %s14243_s4 = smov 16  }
  0xc5   :  { %263 = dma.hbm_to_vmem [thread:$0]  %s14366_s13, 2048, %s258_s15, [#allocation32], %s14242_s20, %s14242_s20, %s14243_s4  }
  0xc6   :  { %s14244_s16 = smov [#allocation7]   ;;  %s13938_s3 = scalar_lea.hbm %s14271_s5, 2048 }
  0xc7   :  { %s89_s22 = sshll.u32 %s14244_s16, 4  ;;  %p13939_p8 = scmp.ne.s32.totalorder %s14271_s5, %s13938_s3  ;;  %s90_s22 = int_to_ptr.vmem [resolvable:$true] %s89_s22 }
  0xc8   :  { %p13942_p9 = scmp.lt.u32.totalorder %s13938_s3, %s14271_s5 }
  0xca   :  { %p13944_p10 = pnand %p13942_p9, %p13939_p8 }
  0xcc   :  { %13947 = shalt.err (!%p13944_p10)
}
  0xcd   :  { %s13948_s26 = scalar_lea.vmem %s90_s22, 2048  ;;  %p13953_p12 = scmp.lt.s32.totalorder %s90_s22, %s90_s22 }
  0xce   :  { %p13949_p11 = scmp.ne.s32.totalorder %s90_s22, %s13948_s26  ;;  %p13954_p13 = scmp.lt.s32.totalorder %s13948_s26, %s13948_s26 }
  0xd0   :  { %p13955_p0 = por %p13954_p13, %p13953_p12 }
  0xd2   :  { %p13956_p1 = pnand %p13955_p0, %p13949_p11 }
  0xd4   :  { %13959 = shalt.err (!%p13956_p1)
}
  0xd5   :  { %s14245_s1 = smov 128   ;;  %s14246_s13 = smov 8  }
  0xd6   :  { %95 = dma.hbm_to_vmem [thread:$0]  %s14271_s5, 2048, %s90_s22, [#allocation8], %s14245_s1, %s14245_s1, %s14246_s13  }
  0xd7   :  { %s14247_s14 = smov [#allocation12]   ;;  %s14248_s2 = smov [#allocation15]  }
  0xd8   :  { %s116_s28 = sshll.u32 %s14247_s14, 4  ;;  %s138_s7 = sshll.u32 %s14248_s2, 4  ;;  %s117_s28 = int_to_ptr.vmem [resolvable:$true] %s116_s28  ;;  %s139_s7 = int_to_ptr.vmem [resolvable:$true] %s138_s7 }
  0xd9   :  { %s13960_s10 = scalar_lea.hbm %s14286_s17, 16 }
  0xda   :  { %p13961_p2 = scmp.ne.s32.totalorder %s14286_s17, %s13960_s10  ;;  %p13964_p3 = scmp.lt.u32.totalorder %s13960_s10, %s14286_s17 }
  0xdc   :  { %p13966_p4 = pnand %p13964_p3, %p13961_p2 }
  0xde   :  { %13969 = shalt.err (!%p13966_p4)
}
  0xdf   :  { %s13970_s9 = scalar_lea.vmem %s117_s28, 16  ;;  %s13974_s24 = scalar_lea.vmem %s117_s28, 32 }
  0xe0   :  { %p13971_p5 = scmp.ne.s32.totalorder %s117_s28, %s13970_s9  ;;  %p13975_p6 = scmp.lt.s32.totalorder %s117_s28, %s117_s28 }
  0xe1   :  { %p13976_p7 = scmp.lt.s32.totalorder %s13974_s24, %s13970_s9 }
  0xe3   :  { %p13977_p8 = por %p13976_p7, %p13975_p6 }
  0xe5   :  { %p13978_p9 = pnand %p13977_p8, %p13971_p5 }
  0xe7   :  { %13981 = shalt.err (!%p13978_p9)
}
  0xe8   :  { %119 = dma.hbm_to_vmem [thread:$0]  %s14286_s17, 16, %s117_s28, [#allocation11]  }
  0xe9   :  { %s13982_s5 = scalar_lea.hbm %s14301_s29, 16 }
  0xea   :  { %p13983_p10 = scmp.ne.s32.totalorder %s14301_s29, %s13982_s5  ;;  %p13986_p11 = scmp.lt.u32.totalorder %s13982_s5, %s14301_s29 }
  0xec   :  { %p13988_p12 = pnand %p13986_p11, %p13983_p10 }
  0xee   :  { %13991 = shalt.err (!%p13988_p12)
}
  0xef   :  { %s13992_s11 = scalar_lea.vmem %s139_s7, 16  ;;  %s13996_s25 = scalar_lea.vmem %s139_s7, 32 }
  0xf0   :  { %p13993_p13 = scmp.ne.s32.totalorder %s139_s7, %s13992_s11  ;;  %p13997_p0 = scmp.lt.s32.totalorder %s139_s7, %s139_s7 }
  0xf1   :  { %p13998_p1 = scmp.lt.s32.totalorder %s13996_s25, %s13992_s11 }
  0xf3   :  { %p13999_p2 = por %p13998_p1, %p13997_p0 }
  0xf5   :  { %p14000_p3 = pnand %p13999_p2, %p13993_p13 }
  0xf7   :  { %14003 = shalt.err (!%p14000_p3)
}
  0xf8   :  { %141 = dma.hbm_to_vmem [thread:$0]  %s14301_s29, 16, %s139_s7, [#allocation14]  }
  0xf9   :  { %s14249_s17 = smov [#allocation18]   ;;  %s14250_s15 = smov [#allocation21]  }
  0xfa   :  { %s160_s6 = sshll.u32 %s14249_s17, 4  ;;  %s179_s21 = sshll.u32 %s14250_s15, 4  ;;  %s161_s6 = int_to_ptr.vmem [resolvable:$true] %s160_s6  ;;  %s180_s21 = int_to_ptr.vmem [resolvable:$true] %s179_s21 }
  0xfb   :  { %s14004_s0 = scalar_lea.hbm %s14311_s8, 16 }
  0xfc   :  { %p14005_p4 = scmp.ne.s32.totalorder %s14311_s8, %s14004_s0  ;;  %p14008_p5 = scmp.lt.u32.totalorder %s14004_s0, %s14311_s8 }
  0xfe   :  { %p14010_p6 = pnand %p14008_p5, %p14005_p4 }
 0x100   :  { %14013 = shalt.err (!%p14010_p6)
}
 0x101   :  { %s14014_s16 = scalar_lea.vmem %s161_s6, 16  ;;  %s14018_s22 = scalar_lea.vmem %s161_s6, 32 }
 0x102   :  { %p14015_p7 = scmp.ne.s32.totalorder %s161_s6, %s14014_s16  ;;  %p14019_p8 = scmp.lt.s32.totalorder %s161_s6, %s161_s6 }
 0x103   :  { %p14020_p9 = scmp.lt.s32.totalorder %s14018_s22, %s14014_s16 }
 0x105   :  { %p14021_p10 = por %p14020_p9, %p14019_p8 }
 0x107   :  { %p14022_p11 = pnand %p14021_p10, %p14015_p7 }
 0x109   :  { %14025 = shalt.err (!%p14022_p11)
}
 0x10a   :  { %163 = dma.hbm_to_vmem [thread:$0]  %s14311_s8, 16, %s161_s6, [#allocation17]  }
 0x10b   :  { %s14026_s29 = scalar_lea.hbm %s14321_s19, 2304 }
 0x10c   :  { %p14027_p12 = scmp.ne.s32.totalorder %s14321_s19, %s14026_s29  ;;  %p14030_p13 = scmp.lt.u32.totalorder %s14026_s29, %s14321_s19 }
 0x10e   :  { %p14032_p0 = pnand %p14030_p13, %p14027_p12 }
 0x110   :  { %14035 = shalt.err (!%p14032_p0)
}
 0x111   :  { %s14036_s3 = scalar_lea.vmem %s180_s21, 2304  ;;  %p14041_p2 = scmp.lt.s32.totalorder %s180_s21, %s180_s21 }
 0x112   :  { %p14037_p1 = scmp.ne.s32.totalorder %s180_s21, %s14036_s3  ;;  %p14042_p3 = scmp.lt.s32.totalorder %s14036_s3, %s14036_s3 }
 0x114   :  { %p14043_p4 = por %p14042_p3, %p14041_p2 }
 0x116   :  { %p14044_p5 = pnand %p14043_p4, %p14037_p1 }
 0x118   :  { %14047 = shalt.err (!%p14044_p5)
}
 0x119   :  { %s17825_s26 = sld [smem:[#allocation50_spill]]  ;;  %s14251_s8 = smov [#allocation24]  }
 0x11a   :  { %185 = dma.hbm_to_vmem [thread:$0]  %s14321_s19, 2304, %s180_s21, [#allocation20], %s14233_s18, %s14233_s18, %s14234_s23  }
 0x11b   :  { %s202_s1 = sshll.u32 %s14251_s8, 4  ;;  %s14252_s13 = smov [#allocation27]   ;;  %s203_s1 = int_to_ptr.vmem [resolvable:$true] %s202_s1 }
 0x11c   :  { %s226_s14 = sshll.u32 %s14252_s13, 4  ;;  %s227_s14 = int_to_ptr.vmem [resolvable:$true] %s226_s14 }
 0x11f   :  { %s14048_s28 = scalar_lea.hbm %s17825_s26, 16 }
 0x120   :  { %p14049_p6 = scmp.ne.s32.totalorder %s17825_s26, %s14048_s28  ;;  %p14052_p7 = scmp.lt.u32.totalorder %s14048_s28, %s17825_s26 }
 0x122   :  { %p14054_p8 = pnand %p14052_p7, %p14049_p6 }
 0x124   :  { %14057 = shalt.err (!%p14054_p8)
}
 0x125   :  { %s14058_s2 = scalar_lea.vmem %s203_s1, 16  ;;  %s14062_s7 = scalar_lea.vmem %s203_s1, 32 }
 0x126   :  { %p14059_p9 = scmp.ne.s32.totalorder %s203_s1, %s14058_s2  ;;  %p14063_p10 = scmp.lt.s32.totalorder %s203_s1, %s203_s1 }
 0x127   :  { %p14064_p11 = scmp.lt.s32.totalorder %s14062_s7, %s14058_s2 }
 0x129   :  { %p14065_p12 = por %p14064_p11, %p14063_p10 }
 0x12b   :  { %p14066_p13 = pnand %p14065_p12, %p14059_p9 }
 0x12d   :  { %14069 = shalt.err (!%p14066_p13)
}
 0x12e   :  { %s17826_s19 = sld [smem:[#allocation52_spill]] }
 0x12f   :  { %205 = dma.hbm_to_vmem [thread:$0]  %s17825_s26, 16, %s203_s1, [#allocation23]  }
 0x134   :  { %s14070_s18 = scalar_lea.hbm %s17826_s19, 16 }
 0x135   :  { %p14071_p0 = scmp.ne.s32.totalorder %s17826_s19, %s14070_s18  ;;  %p14074_p1 = scmp.lt.u32.totalorder %s14070_s18, %s17826_s19 }
 0x137   :  { %p14076_p2 = pnand %p14074_p1, %p14071_p0 }
 0x139   :  { %14079 = shalt.err (!%p14076_p2)
}
 0x13a   :  { %s14080_s23 = scalar_lea.vmem %s227_s14, 16  ;;  %s14084_s10 = scalar_lea.vmem %s227_s14, 32 }
 0x13b   :  { %p14081_p3 = scmp.ne.s32.totalorder %s227_s14, %s14080_s23  ;;  %p14085_p4 = scmp.lt.s32.totalorder %s227_s14, %s227_s14 }
 0x13c   :  { %p14086_p5 = scmp.lt.s32.totalorder %s14084_s10, %s14080_s23 }
 0x13e   :  { %p14087_p6 = por %p14086_p5, %p14085_p4 }
 0x140   :  { %p14088_p7 = pnand %p14087_p6, %p14081_p3 }
 0x142   :  { %14091 = shalt.err (!%p14088_p7)
}
 0x143   :  { %s17827_s9 = sld [smem:[#allocation54_spill]]  ;;  %s14253_s24 = smov [#allocation30]  }
 0x144   :  { %229 = dma.hbm_to_vmem [thread:$0]  %s17826_s19, 16, %s227_s14, [#allocation26]  }
 0x145   :  { %s248_s5 = sshll.u32 %s14253_s24, 4  ;;  %s14254_s11 = smov [#allocation33]   ;;  %s249_s5 = int_to_ptr.vmem [resolvable:$true] %s248_s5 }
 0x146   :  { %s269_s25 = sshll.u32 %s14254_s11, 4  ;;  %s270_s25 = int_to_ptr.vmem [resolvable:$true] %s269_s25 }
 0x149   :  { %s14092_s17 = scalar_lea.hbm %s17827_s9, 16 }
 0x14a   :  { %p14093_p8 = scmp.ne.s32.totalorder %s17827_s9, %s14092_s17  ;;  %p14096_p9 = scmp.lt.u32.totalorder %s14092_s17, %s17827_s9 }
 0x14c   :  { %p14098_p10 = pnand %p14096_p9, %p14093_p8 }
 0x14e   :  { %14101 = shalt.err (!%p14098_p10)
}
 0x14f   :  { %s14102_s6 = scalar_lea.vmem %s249_s5, 16  ;;  %s14106_s15 = scalar_lea.vmem %s249_s5, 32 }
 0x150   :  { %p14103_p11 = scmp.ne.s32.totalorder %s249_s5, %s14102_s6  ;;  %p14107_p12 = scmp.lt.s32.totalorder %s249_s5, %s249_s5 }
 0x151   :  { %p14108_p13 = scmp.lt.s32.totalorder %s14106_s15, %s14102_s6 }
 0x153   :  { %p14109_p0 = por %p14108_p13, %p14107_p12 }
 0x155   :  { %p14110_p1 = pnand %p14109_p0, %p14103_p11 }
 0x157   :  { %14113 = shalt.err (!%p14110_p1)
}
 0x158   :  { %s17828_s21 = sld [smem:[#allocation55_spill]] }
 0x159   :  { %251 = dma.hbm_to_vmem [thread:$0]  %s17827_s9, 16, %s249_s5, [#allocation29]  }
 0x15e   :  { %s14114_s0 = scalar_lea.hbm %s17828_s21, 2048 }
 0x15f   :  { %p14115_p2 = scmp.ne.s32.totalorder %s17828_s21, %s14114_s0  ;;  %p14118_p3 = scmp.lt.u32.totalorder %s14114_s0, %s17828_s21 }
 0x161   :  { %p14120_p4 = pnand %p14118_p3, %p14115_p2 }
 0x163   :  { %14123 = shalt.err (!%p14120_p4)
}
 0x164   :  { %s14124_s16 = scalar_lea.vmem %s270_s25, 2048  ;;  %p14129_p6 = scmp.lt.s32.totalorder %s270_s25, %s270_s25 }
 0x165   :  { %p14125_p5 = scmp.ne.s32.totalorder %s270_s25, %s14124_s16  ;;  %p14130_p7 = scmp.lt.s32.totalorder %s14124_s16, %s14124_s16 }
 0x167   :  { %p14131_p8 = por %p14130_p7, %p14129_p6 }
 0x169   :  { %p14132_p9 = pnand %p14131_p8, %p14125_p5 }
 0x16b   :  { %14135 = shalt.err (!%p14132_p9)
}
 0x16c   :  { %s17829_s22 = sld [smem:[#allocation56_spill]]  ;;  %s14255_s29 = smov [#allocation34]  }
 0x16d   :  { %275 = dma.hbm_to_vmem [thread:$0]  %s17828_s21, 2048, %s270_s25, [#allocation32], %s14242_s20, %s14242_s20, %s14243_s4  }
 0x16e   :  { %s282_s3 = sshll.u32 %s14255_s29, 4  ;;  %s283_s3 = int_to_ptr.vmem [resolvable:$true] %s282_s3 }
 0x172   :  { %s14136_s26 = scalar_lea.hbm %s17829_s22, 64 }
 0x173   :  { %p14137_p10 = scmp.ne.s32.totalorder %s17829_s22, %s14136_s26  ;;  %p14140_p11 = scmp.lt.u32.totalorder %s14136_s26, %s17829_s22 }
 0x175   :  { %p14142_p12 = pnand %p14140_p11, %p14137_p10 }
 0x177   :  { %14145 = shalt.err (!%p14142_p12)
}
 0x178   :  { %s14146_s8 = scalar_lea.vmem %s283_s3, 64  ;;  %p14151_p0 = scmp.lt.s32.totalorder %s283_s3, %s283_s3 }
 0x179   :  { %p14147_p13 = scmp.ne.s32.totalorder %s283_s3, %s14146_s8  ;;  %p14152_p1 = scmp.lt.s32.totalorder %s14146_s8, %s14146_s8 }
 0x17b   :  { %p14153_p2 = por %p14152_p1, %p14151_p0 }
 0x17d   :  { %p14154_p3 = pnand %p14153_p2, %p14147_p13 }
 0x17f   :  { %14157 = shalt.err (!%p14154_p3)
}
 0x180   :  { %285 = dma.hbm_to_vmem [thread:$0]  %s17829_s22, 64, %s283_s3, [#allocation35]  }
 0x181   :  { %14180 = dma.done.wait [#allocation8], 2048  }
 0x182   :  { %14181 = vsyncadd [#allocation8], 4294965248 }
 0x183   :  { %14182 = dma.done.wait [#allocation11], 1168  }
 0x184   :  { %14183 = vsyncadd [#allocation11], 4294966128 }
 0x185   :  { %14184 = dma.done.wait [#allocation14], 32  }
 0x186   :  { %14185 = vsyncadd [#allocation14], 4294967264 }
 0x187   :  { %14186 = dma.done.wait [#allocation17], 2320  }
 0x188   :  { %14187 = vsyncadd [#allocation17], 4294964976 }
 0x189   :  { %14188 = dma.done.wait [#allocation20], 2320  }
 0x18a   :  { %14189 = vsyncadd [#allocation20], 4294964976 }
 0x18b   :  { %14190 = dma.done.wait [#allocation23], 32  }
 0x18c   :  { %14191 = vsyncadd [#allocation23], 4294967264 }
 0x18d   :  { %14192 = dma.done.wait [#allocation26], 2320  }
 0x18e   :  { %14193 = vsyncadd [#allocation26], 4294964976 }
 0x18f   :  { %14194 = dma.done.wait [#allocation29], 32  }
 0x190   :  { %14195 = vsyncadd [#allocation29], 4294967264 }
 0x191   :  { %14196 = dma.done.wait [#allocation32], 4096  }
 0x192   :  { %14197 = vsyncadd [#allocation32], 4294963200 }
 0x193   :  { %14198 = dma.done.wait [#allocation35], 64  }
 0x194   :  { %14199 = vsyncadd [#allocation35], 4294967232  ;;  %vm355_vm0 = vcmask 113664   ;;  %vm357_vm1 = vcmask 107520   ;;  %v17731_v3 = vmov 0.0   ;;  %vm567_vm2 = vcmask 1046528  }
 0x195   :  { %356 = vst.msk [vmem:[#allocation2] sm:$0xff] %vm355_vm0, %v17731_v3  ;;  %359 = vst.msk [vmem:[#allocation2 + $0x10] sm:$0xff] %vm355_vm0, %v17731_v3  ;;  %v13601_v4 = vld [vmem:[#allocation10] sm:$0x7f]   ;;  %v440_v6 = vld [vmem:[#allocation7 + $0x8] sm:$0xff]  ;;  %vm397_vm3 = vcmask 261120  }
 0x196   :  { %360 = vst.msk [vmem:[#allocation2 + $0x18] sm:$0x3] %vm357_vm1, %v17731_v3  ;;  %358 = vst.msk [vmem:[#allocation2 + $0x8] sm:$0x3] %vm357_vm1, %v17731_v3  ;;  %v439_v5 = vld [vmem:[#allocation7] sm:$0xff]  ;;  %13526 = vmatprep.subr.msk.bf16.mxu0 %vm567_vm2, %v13601_v4  ;;  %v698_v7 = vsel %vm567_vm2, %v13601_v4, 0 }
 0x197   :  { %361 = vst.msk [vmem:[#allocation2 + $0x20] sm:$0xff] %vm355_vm0, %v17731_v3  ;;  %363 = vst.msk [vmem:[#allocation2 + $0x30] sm:$0xff] %vm355_vm0, %v17731_v3  ;;  %v441_v8 = vld [vmem:[#allocation7 + $0x10] sm:$0xff]  ;;  %11890 = vmatpush3.bf16.msra.mxu0 %v698_v7  ;;  %v442_v10 = vld [vmem:[#allocation7 + $0x18] sm:$0xff]  ;;  %vm399_vm4 = vcmask 254976   ;;  %s17830_s20 = sld [smem:[#allocation49_spill]] }
 0x198   :  { %362 = vst.msk [vmem:[#allocation2 + $0x28] sm:$0x3] %vm357_vm1, %v17731_v3  ;;  %364 = vst.msk [vmem:[#allocation2 + $0x38] sm:$0x3] %vm357_vm1, %v17731_v3  ;;  %v13602_v9 = vld [vmem:[#allocation10 + $0x10] sm:$0x7f]  }
 0x199   :  { %365 = vst.msk [vmem:[#allocation2 + $0x40] sm:$0xff] %vm355_vm0, %v17731_v3  ;;  %367 = vst.msk [vmem:[#allocation2 + $0x50] sm:$0xff] %vm355_vm0, %v17731_v3  ;;  %v443_v11 = vld [vmem:[#allocation7 + $0x20] sm:$0xff]  ;;  %v444_v12 = vld [vmem:[#allocation7 + $0x28] sm:$0xff]  ;;  %13527 = vmatprep.subr.msk.bf16.mxu0 %vm567_vm2, %v13602_v9  ;;  %v851_v31 = vsel %vm567_vm2, %v13602_v9, 0  ;;  %s17831_s4 = sld [smem:[#allocation48_spill]] }
 0x19a   :  { %366 = vst.msk [vmem:[#allocation2 + $0x48] sm:$0x3] %vm357_vm1, %v17731_v3  ;;  %368 = vst.msk [vmem:[#allocation2 + $0x58] sm:$0x3] %vm357_vm1, %v17731_v3  ;;  %v445_v13 = vld [vmem:[#allocation7 + $0x30] sm:$0xff]  ;;  %v447_v14 = vld [vmem:[#allocation7 + $0x40] sm:$0xff] }
 0x19b   :  { %369 = vst.msk [vmem:[#allocation2 + $0x60] sm:$0xff] %vm355_vm0, %v17731_v3  ;;  %371 = vst.msk [vmem:[#allocation2 + $0x70] sm:$0xff] %vm355_vm0, %v17731_v3  ;;  %v448_v15 = vld [vmem:[#allocation7 + $0x48] sm:$0xff]  ;;  %v449_v16 = vld [vmem:[#allocation7 + $0x50] sm:$0xff]  ;;  %s17928_s1 = sld [smem:[#allocation53_spill]]  ;;  %s17933_s13 = sld [smem:[#allocation51_spill]] }
 0x19c   :  { %370 = vst.msk [vmem:[#allocation2 + $0x68] sm:$0x3] %vm357_vm1, %v17731_v3  ;;  %372 = vst.msk [vmem:[#allocation2 + $0x78] sm:$0x3] %vm357_vm1, %v17731_v3  ;;  %v450_v17 = vld [vmem:[#allocation7 + $0x58] sm:$0xff]  ;;  %v451_v18 = vld [vmem:[#allocation7 + $0x60] sm:$0xff] }
 0x19d   :  { %373 = vst.msk [vmem:[#allocation2 + $0x80] sm:$0xff] %vm355_vm0, %v17731_v3  ;;  %375 = vst.msk [vmem:[#allocation2 + $0x90] sm:$0xff] %vm355_vm0, %v17731_v3  ;;  %v452_v19 = vld [vmem:[#allocation7 + $0x68] sm:$0xff]  ;;  %v490_v20 = vld [vmem:[#allocation2] sm:$0xff]  ;;  %vm9315_vm5 = vcmask 15360   ;;  %vm14259_vm6 = vmmov 0  }
 0x19e   :  { %374 = vst.msk [vmem:[#allocation2 + $0x88] sm:$0x3] %vm357_vm1, %v17731_v3  ;;  %376 = vst.msk [vmem:[#allocation2 + $0x98] sm:$0x3] %vm357_vm1, %v17731_v3  ;;  %v453_v21 = vld [vmem:[#allocation7 + $0x70] sm:$0xff]  ;;  %v446_v47 = vld [vmem:[#allocation7 + $0x38] sm:$0xff] }
 0x19f   :  { %377 = vst.msk [vmem:[#allocation2 + $0xa0] sm:$0xff] %vm355_vm0, %v17731_v3  ;;  %379 = vst.msk [vmem:[#allocation2 + $0xb0] sm:$0xff] %vm355_vm0, %v17731_v3  ;;  %v13603_v25 = vld [vmem:[#allocation10 + $0x18] sm:$0x7f]   ;;  %v797_v0 = vld [vmem:[#allocation2 + $0x2] sm:$0xff]  ;;  %s17973_s14 = sld [smem:[#allocation57_spill]] }
 0x1a0   :  { %378 = vst.msk [vmem:[#allocation2 + $0xa8] sm:$0x3] %vm357_vm1, %v17731_v3  ;;  %380 = vst.msk [vmem:[#allocation2 + $0xb8] sm:$0x3] %vm357_vm1, %v17731_v3  ;;  %v454_v48 = vld [vmem:[#allocation7 + $0x78] sm:$0xff]  ;;  %v1020_v4 = vsel %vm567_vm2, %v13603_v25, 0 }
 0x1a1   :  { %381 = vst.msk [vmem:[#allocation2 + $0xc0] sm:$0xff] %vm355_vm0, %v17731_v3  ;;  %383 = vst.msk [vmem:[#allocation2 + $0xd0] sm:$0xff] %vm355_vm0, %v17731_v3  ;;  %s17974_s28 = sld [smem:[#allocation58_spill]]  ;;  %s17975_s2 = sld [smem:[#allocation59_spill]] }
 0x1a2   :  { %382 = vst.msk [vmem:[#allocation2 + $0xc8] sm:$0x3] %vm357_vm1, %v17731_v3  ;;  %384 = vst.msk [vmem:[#allocation2 + $0xd8] sm:$0x3] %vm357_vm1, %v17731_v3  ;;  %s14262_s7 = smov [#allocation36]  }
 0x1a3   :  { %385 = vst.msk [vmem:[#allocation2 + $0xe0] sm:$0xff] %vm355_vm0, %v17731_v3  ;;  %387 = vst.msk [vmem:[#allocation2 + $0xf0] sm:$0xff] %vm355_vm0, %v17731_v3  ;;  %s10790_s19 = sshll.u32 %s14262_s7, 4  ;;  %s10791_s19 = int_to_ptr.vmem [resolvable:$true] %s10790_s19 }
 0x1a4   :  { %386 = vst.msk [vmem:[#allocation2 + $0xe8] sm:$0x3] %vm357_vm1, %v17731_v3  ;;  %388 = vst.msk [vmem:[#allocation2 + $0xf8] sm:$0x3] %vm357_vm1, %v17731_v3  ;;  %s14158_s18 = scalar_lea.vmem %s10791_s19, 128  ;;  %p14163_p5 = scmp.lt.s32.totalorder %s10791_s19, %s10791_s19 }
 0x1a5   :  { %389 = vst.msk [vmem:[#allocation2 + $0x100] sm:$0xff] %vm355_vm0, %v17731_v3  ;;  %391 = vst.msk [vmem:[#allocation2 + $0x110] sm:$0xff] %vm355_vm0, %v17731_v3  ;;  %p14159_p4 = scmp.ne.s32.totalorder %s10791_s19, %s14158_s18  ;;  %p14164_p6 = scmp.lt.s32.totalorder %s14158_s18, %s14158_s18 }
 0x1a6   :  { %390 = vst.msk [vmem:[#allocation2 + $0x108] sm:$0x3] %vm357_vm1, %v17731_v3  ;;  %392 = vst.msk [vmem:[#allocation2 + $0x118] sm:$0x3] %vm357_vm1, %v17731_v3  ;;  %v498_v40 = vld [vmem:[#allocation2 + $0xa0] sm:$0xff] }
 0x1a7   :  { %393 = vst.msk [vmem:[#allocation2 + $0x120] sm:$0xff] %vm355_vm0, %v17731_v3  ;;  %395 = vst.msk [vmem:[#allocation2 + $0x130] sm:$0xff] %vm355_vm0, %v17731_v3  ;;  %p14165_p7 = por %p14164_p6, %p14163_p5 }
 0x1a8   :  { %394 = vst.msk [vmem:[#allocation2 + $0x128] sm:$0x3] %vm357_vm1, %v17731_v3  ;;  %396 = vst.msk [vmem:[#allocation2 + $0x138] sm:$0x3] %vm357_vm1, %v17731_v3 }
 0x1a9   :  { %456 = vst.msk [vmem:[#allocation2 + $0x11] sm:$0xff] %vm355_vm0, %v439_v5  ;;  %457 = vst.msk [vmem:[#allocation2 + $0x21] sm:$0xff] %vm355_vm0, %v440_v6  ;;  %p14166_p8 = pnand %p14165_p7, %p14159_p4 }
 0x1aa   :  { %458 = vst.msk [vmem:[#allocation2 + $0x31] sm:$0xff] %vm355_vm0, %v441_v8  ;;  %459 = vst.msk [vmem:[#allocation2 + $0x41] sm:$0xff] %vm355_vm0, %v442_v10  ;;  %v13604_v8 = vld [vmem:[#allocation10 + $0x20] sm:$0x7f]  }
 0x1ab   :  { %460 = vst.msk [vmem:[#allocation2 + $0x51] sm:$0xff] %vm355_vm0, %v443_v11  ;;  %461 = vst.msk [vmem:[#allocation2 + $0x61] sm:$0xff] %vm355_vm0, %v444_v12  ;;  %v805_v10 = vld [vmem:[#allocation2 + $0xa2] sm:$0xff] }
 0x1ac   :  { %462 = vst.msk [vmem:[#allocation2 + $0x71] sm:$0xff] %vm355_vm0, %v445_v13  ;;  %464 = vst.msk [vmem:[#allocation2 + $0xb1] sm:$0xff] %vm355_vm0, %v447_v14 }
 0x1ad   :  { %465 = vst.msk [vmem:[#allocation2 + $0xc1] sm:$0xff] %vm355_vm0, %v448_v15  ;;  %466 = vst.msk [vmem:[#allocation2 + $0xd1] sm:$0xff] %vm355_vm0, %v449_v16 }
 0x1ae   :  { %467 = vst.msk [vmem:[#allocation2 + $0xe1] sm:$0xff] %vm355_vm0, %v450_v17  ;;  %468 = vst.msk [vmem:[#allocation2 + $0xf1] sm:$0xff] %vm355_vm0, %v451_v18  ;;  %v1189_v17 = vsel %vm567_vm2, %v13604_v8, 0 }
 0x1af   :  { %469 = vst.msk [vmem:[#allocation2 + $0x101] sm:$0xff] %vm355_vm0, %v452_v19  ;;  %470 = vst.msk [vmem:[#allocation2 + $0x111] sm:$0xff] %vm355_vm0, %v453_v21  ;;  %v13605_v21 = vld [vmem:[#allocation10 + $0x28] sm:$0x7f]  }
 0x1b0   :  { %v14604_v22 = vld [vmem:[#allocation2 + $0x10] sm:$0xff]  ;;  %v14606_v23 = vld [vmem:[#allocation2 + $0x20] sm:$0xff]  ;;  %463 = vst.msk [vmem:[#allocation2 + $0x81] sm:$0xff] %vm355_vm0, %v446_v47  ;;  %471 = vst.msk [vmem:[#allocation2 + $0x121] sm:$0xff] %vm355_vm0, %v454_v48 }
 0x1b1   :  { %v14608_v24 = vld [vmem:[#allocation2 + $0x12] sm:$0xff]  ;;  %v506_v26 = vpack.c.bf16 %v14604_v22, %v490_v20  ;;  %v14613_v28 = vld [vmem:[#allocation2 + $0x22] sm:$0xff]  ;;  %v982_v19 = vpack.c.bf16 %v14606_v23, %v14604_v22  ;;  %v13609_v47 = vld [vmem:[#allocation10 + $0x8] sm:$0x7f]   ;;  %398 = vst.msk [vmem:[#allocation3] sm:$0xff] %vm397_vm3, %v17731_v3 }
 0x1b2   :  { %v14611_v27 = vld [vmem:[#allocation2 + $0x30] sm:$0xff]  ;;  %v14622_v32 = vld [vmem:[#allocation2 + $0x40] sm:$0xff]  ;;  %v1320_v35 = vpack.c.bf16 %v14613_v28, %v14608_v24  ;;  %v813_v6 = vpack.c.bf16 %v14608_v24, %v797_v0  ;;  %13525 = vmatprep.subr.msk.bf16.mxu1 %vm567_vm2, %v13609_v47  ;;  %401 = vst.msk [vmem:[#allocation3 + $0x10] sm:$0xff] %vm397_vm3, %v17731_v3  ;;  %403 = vst.msk [vmem:[#allocation3 + $0x20] sm:$0xff] %vm397_vm3, %v17731_v3 }
 0x1b3   :  { %v14615_v29 = vld [vmem:[#allocation2 + $0x32] sm:$0xff]  ;;  %v14619_v30 = vpack.c.bf16 %v14611_v27, %v14606_v23  ;;  %v14626_v34 = vld [vmem:[#allocation2 + $0x42] sm:$0xff]  ;;  %11891 = vmatprep.mubr.msk.bf16.mxu0 %vm355_vm0, %v506_v26  ;;  %v983_v20 = vpack.c.bf16 %v14622_v32, %v14611_v27  ;;  %405 = vst.msk [vmem:[#allocation3 + $0x30] sm:$0xff] %vm397_vm3, %v17731_v3  ;;  %407 = vst.msk [vmem:[#allocation3 + $0x40] sm:$0xff] %vm397_vm3, %v17731_v3 }
 0x1b4   :  { %v14624_v33 = vld [vmem:[#allocation2 + $0x50] sm:$0xff]  ;;  %v1321_v37 = vpack.c.bf16 %v14626_v34, %v14615_v29  ;;  %v14641_v38 = vld [vmem:[#allocation2 + $0x60] sm:$0xff]  ;;  %v14699_v7 = vpack.c.bf16 %v14615_v29, %v14613_v28  ;;  %409 = vst.msk [vmem:[#allocation3 + $0x50] sm:$0xff] %vm397_vm3, %v17731_v3  ;;  %411 = vst.msk [vmem:[#allocation3 + $0x60] sm:$0xff] %vm397_vm3, %v17731_v3 }
 0x1b5   :  { %v14633_v36 = vpack.c.bf16 %v14624_v33, %v14622_v32  ;;  %11892 = vmatmul.mubr.msk.bf16.vlgmr.msra.gmra.mrb[0].mxu0 %vm355_vm0, %v14619_v30  ;;  %v14643_v39 = vld [vmem:[#allocation2 + $0x70] sm:$0xff]  ;;  %v14650_v43 = vld [vmem:[#allocation2 + $0x62] sm:$0xff]  ;;  %413 = vst.msk [vmem:[#allocation3 + $0x70] sm:$0xff] %vm397_vm3, %v17731_v3  ;;  %415 = vst.msk [vmem:[#allocation3 + $0x80] sm:$0xff] %vm397_vm3, %v17731_v3 }
 0x1b6   :  { %11908 = vmatpush3.bf16.msra.mxu0 %v851_v31  ;;  %v14645_v41 = vld [vmem:[#allocation2 + $0xb0] sm:$0xff]  ;;  %v14656_v45 = vpack.c.bf16 %v14643_v39, %v14641_v38  ;;  %v14661_v50 = vld [vmem:[#allocation2 + $0xc2] sm:$0xff]  ;;  %417 = vst.msk [vmem:[#allocation3 + $0x90] sm:$0xff] %vm397_vm3, %v17731_v3  ;;  %419 = vst.msk [vmem:[#allocation3 + $0xa0] sm:$0xff] %vm397_vm3, %v17731_v3 }
 0x1b7   :  { %11895 = vmatprep.mubr.msk.bf16.mxu0 %vm355_vm0, %v14633_v36  ;;  %13528 = vmatprep.subr.msk.bf16.mxu0 %vm567_vm2, %v13603_v25  ;;  %v14648_v42 = vld [vmem:[#allocation2 + $0x52] sm:$0xff]  ;;  %v510_v46 = vpack.c.bf16 %v14645_v41, %v498_v40  ;;  %v14669_v52 = vld [vmem:[#allocation2 + $0xe2] sm:$0xff]  ;;  %v984_v25 = vpack.c.bf16 %v14641_v38, %v14624_v33  ;;  %421 = vst.msk [vmem:[#allocation3 + $0xb0] sm:$0xff] %vm397_vm3, %v17731_v3  ;;  %423 = vst.msk [vmem:[#allocation3 + $0xc0] sm:$0xff] %vm397_vm3, %v17731_v3 }
 0x1b8   :  { %v1322_v44 = vpack.c.bf16 %v14650_v43, %v14648_v42  ;;  %v14659_v49 = vld [vmem:[#allocation2 + $0xb2] sm:$0xff]  ;;  %v500_v54 = vld [vmem:[#allocation2 + $0xc0] sm:$0xff]  ;;  %v14703_v9 = vpack.c.bf16 %v14648_v42, %v14626_v34  ;;  %425 = vst.msk [vmem:[#allocation3 + $0xd0] sm:$0xff] %vm397_vm3, %v17731_v3  ;;  %427 = vst.msk [vmem:[#allocation3 + $0xe0] sm:$0xff] %vm397_vm3, %v17731_v3 }
 0x1b9   :  { %v14663_v51 = vld [vmem:[#allocation2 + $0xd2] sm:$0xff]  ;;  %v1324_v53 = vpack.c.bf16 %v14661_v50, %v14659_v49  ;;  %v502_v57 = vld [vmem:[#allocation2 + $0xe0] sm:$0xff]  ;;  %v817_v13 = vpack.c.bf16 %v14659_v49, %v805_v10  ;;  %v986_v23 = vpack.c.bf16 %v500_v54, %v14645_v41  ;;  %429 = vst.msk [vmem:[#allocation3 + $0xf0] sm:$0xff] %vm397_vm3, %v17731_v3  ;;  %431 = vst.msk [vmem:[#allocation3 + $0x100] sm:$0xff] %vm397_vm3, %v17731_v3 }
 0x1ba   :  { %v501_v55 = vld [vmem:[#allocation2 + $0xd0] sm:$0xff]  ;;  %v1325_v56 = vpack.c.bf16 %v14669_v52, %v14663_v51  ;;  %v504_v61 = vld [vmem:[#allocation2 + $0x100] sm:$0xff]  ;;  %v14722_v14 = vpack.c.bf16 %v14663_v51, %v14661_v50  ;;  %433 = vst.msk [vmem:[#allocation3 + $0x110] sm:$0xff] %vm397_vm3, %v17731_v3  ;;  %435 = vst.msk [vmem:[#allocation3 + $0x120] sm:$0xff] %vm397_vm3, %v17731_v3 }
 0x1bb   :  { %v503_v58 = vld [vmem:[#allocation2 + $0xf0] sm:$0xff]  ;;  %v14676_v59 = vpack.c.bf16 %v501_v55, %v500_v54  ;;  %v14682_v63 = vld [vmem:[#allocation2 + $0x102] sm:$0xff]  ;;  %v987_v27 = vpack.c.bf16 %v502_v57, %v501_v55  ;;  %v569_v54 = vsel %vm567_vm2, %v13609_v47, 0  ;;  %437 = vst.msk [vmem:[#allocation3 + $0x130] sm:$0xff] %vm397_vm3, %v17731_v3 }
 0x1bc   :  { %v14678_v60 = vpack.c.bf16 %v503_v58, %v502_v57  ;;  %v14680_v62 = vld [vmem:[#allocation2 + $0xf2] sm:$0xff]  ;;  %v14750_v26 = vld [vmem:[#allocation2 + $0x80] sm:$0xff]  ;;  %v988_v31 = vpack.c.bf16 %v504_v61, %v503_v58  ;;  %11872 = vmatpush3.bf16.msra.mxu1 %v569_v54  ;;  %432 = vst.msk [vmem:[#allocation3 + $0x108] sm:$0x3] %vm399_vm4, %v17731_v3  ;;  %400 = vst.msk [vmem:[#allocation3 + $0x8] sm:$0x3] %vm399_vm4, %v17731_v3 }
 0x1bd   :  { %11896 = vmatmul.mubr.msk.bf16.gmra.mrb[4].mxu0 %vm355_vm0, %v14656_v45  ;;  %v1326_v1 = vpack.c.bf16 %v14682_v63, %v14680_v62  ;;  %v505_v2 = vld [vmem:[#allocation2 + $0x110] sm:$0xff]  ;;  %v14726_v15 = vpack.c.bf16 %v14680_v62, %v14669_v52  ;;  %v985_v22 = vpack.c.bf16 %v14750_v26, %v14643_v39  ;;  %v1136_v33 = vld [vmem:[#allocation2 + $0x21] sm:$0xff]  ;;  %402 = vst.msk [vmem:[#allocation3 + $0x18] sm:$0x3] %vm399_vm4, %v17731_v3  ;;  %404 = vst.msk [vmem:[#allocation3 + $0x28] sm:$0x3] %vm399_vm4, %v17731_v3 }
 0x1be   :  { %11899 = vmatprep.mubr.msk.bf16.mxu0 %vm355_vm0, %v510_v46  ;;  %v14691_v5 = vpack.c.bf16 %v505_v2, %v504_v61  ;;  %v14709_v11 = vld [vmem:[#allocation2 + $0x72] sm:$0xff]  ;;  %v14760_v38 = vld [vmem:[#allocation2 + $0x120] sm:$0xff]  ;;  %406 = vst.msk [vmem:[#allocation3 + $0x38] sm:$0x3] %vm399_vm4, %v17731_v3  ;;  %408 = vst.msk [vmem:[#allocation3 + $0x48] sm:$0x3] %vm399_vm4, %v17731_v3 }
 0x1bf   :  { %v14714_v12 = vpack.c.bf16 %v14709_v11, %v14650_v43  ;;  %v14732_v16 = vld [vmem:[#allocation2 + $0x112] sm:$0xff]  ;;  %v989_v40 = vpack.c.bf16 %v14760_v38, %v505_v2  ;;  %v514_v41 = vld [vmem:[#allocation2 + $0x1] sm:$0xff]  ;;  %410 = vst.msk [vmem:[#allocation3 + $0x58] sm:$0x3] %vm399_vm4, %v17731_v3  ;;  %412 = vst.msk [vmem:[#allocation3 + $0x68] sm:$0x3] %vm399_vm4, %v17731_v3 }
 0x1c0   :  { %v14737_v18 = vpack.c.bf16 %v14732_v16, %v14682_v63  ;;  %v1135_v32 = vld [vmem:[#allocation2 + $0x11] sm:$0xff]  ;;  %v1138_v48 = vld [vmem:[#allocation2 + $0x41] sm:$0xff]  ;;  %414 = vst.msk [vmem:[#allocation3 + $0x78] sm:$0x3] %vm399_vm4, %v17731_v3  ;;  %416 = vst.msk [vmem:[#allocation3 + $0x88] sm:$0x3] %vm399_vm4, %v17731_v3 }
 0x1c1   :  { %v1151_v46 = vpack.c.bf16 %v1136_v33, %v1135_v32  ;;  %v1137_v39 = vld [vmem:[#allocation2 + $0x31] sm:$0xff]  ;;  %v530_v55 = vpack.c.bf16 %v1135_v32, %v514_v41  ;;  %v1140_v58 = vld [vmem:[#allocation2 + $0x61] sm:$0xff]  ;;  %418 = vst.msk [vmem:[#allocation3 + $0x98] sm:$0x3] %vm399_vm4, %v17731_v3  ;;  %420 = vst.msk [vmem:[#allocation3 + $0xa8] sm:$0x3] %vm399_vm4, %v17731_v3 }
 0x1c2   :  { %v1139_v57 = vld [vmem:[#allocation2 + $0x51] sm:$0xff]  ;;  %v14767_v61 = vpack.c.bf16 %v1137_v39, %v1136_v33  ;;  %v1152_v0 = vpack.c.bf16 %v1138_v48, %v1137_v39  ;;  %v1148_v33 = vld [vmem:[#allocation2 + $0x101] sm:$0xff]  ;;  %422 = vst.msk [vmem:[#allocation3 + $0xb8] sm:$0x3] %vm399_vm4, %v17731_v3  ;;  %424 = vst.msk [vmem:[#allocation3 + $0xc8] sm:$0x3] %vm399_vm4, %v17731_v3 }
 0x1c3   :  { %11873 = vmatprep.mubr.msk.bf16.mxu1 %vm355_vm0, %v530_v55  ;;  %v14770_v2 = vpack.c.bf16 %v1139_v57, %v1138_v48  ;;  %v1141_v10 = vld [vmem:[#allocation2 + $0x71] sm:$0xff]  ;;  %v14800_v48 = vld [vmem:[#allocation2 + $0x121] sm:$0xff]  ;;  %426 = vst.msk [vmem:[#allocation3 + $0xd8] sm:$0x3] %vm399_vm4, %v17731_v3  ;;  %428 = vst.msk [vmem:[#allocation3 + $0xe8] sm:$0x3] %vm399_vm4, %v17731_v3 }
 0x1c4   :  { %11874 = vmatmul.mubr.msk.bf16.vlgmr.msra.gmra.mrb[0].mxu1 %vm355_vm0, %v14767_v61  ;;  %v1147_v32 = vld [vmem:[#allocation2 + $0xf1] sm:$0xff]  ;;  %v14839_v28 = vld [vmem:[#allocation2 + $0x122] sm:$0xff]  ;;  %430 = vst.msk [vmem:[#allocation3 + $0xf8] sm:$0x3] %vm399_vm4, %v17731_v3  ;;  %434 = vst.msk [vmem:[#allocation3 + $0x118] sm:$0x3] %vm399_vm4, %v17731_v3 }
 0x1c5   :  { %11900 = vmatmul.mubr.msk.bf16.gmra.mrb[8].mxu0 %vm355_vm0, %v14676_v59  ;;  %11877 = vmatprep.mubr.msk.bf16.mxu1 %vm355_vm0, %v14770_v2  ;;  %v1157_v47 = vpack.c.bf16 %v1148_v33, %v1147_v32  ;;  %v1149_v41 = vld [vmem:[#allocation2 + $0x111] sm:$0xff]  ;;  %v1327_v29 = vpack.c.bf16 %v14839_v28, %v14732_v16  ;;  %436 = vst.msk [vmem:[#allocation3 + $0x128] sm:$0x3] %vm399_vm4, %v17731_v3  ;;  %438 = vst.msk [vmem:[#allocation3 + $0x138] sm:$0x3] %vm399_vm4, %v17731_v3  ;;  %v13615_v3 = vld [vmem:[%s17830_s20 + $0x28] sm:$0xff]  }
 0x1c6   :  { %11903 = vmatprep.mubr.msk.bf16.mxu0 %vm355_vm0, %v14678_v60  ;;  %v14802_v54 = vpack.c.bf16 %v1149_v41, %v1148_v33  ;;  %v1158_v55 = vpack.c.bf16 %v14800_v48, %v1149_v41  ;;  %v1658_v49 = vld [vmem:[#allocation2 + $0x131] sm:$0xff]  ;;  %vm9866_vm4 = vcmask 523264  }
 0x1c7   :  { %v1666_v50 = vpack.c.bf16 %v1658_v49, %v14800_v48  ;;  %v1819_v51 = vld [vmem:[#allocation2 + $0x92] sm:$0xff] }
 0x1cd   :  { %11904 = vmatmul.mubr.msk.bf16.gmra.mrb[12].mxu0 %vm355_vm0, %v14691_v5 }
 0x1ce   :  { %11909 = vmatprep.mubr.msk.bf16.mxu0 %vm355_vm0, %v813_v6  ;;  %v1358_v6 = vsel %vm567_vm2, %v13605_v21, 0 }
 0x1d5   :  { %11910 = vmatmul.mubr.msk.bf16.vlgmr.msra.gmra.mrb[0].mxu0 %vm355_vm0, %v14699_v7 }
 0x1d6   :  { %11926 = vmatpush3.bf16.msra.mxu0 %v1020_v4  ;;  %11913 = vmatprep.mubr.msk.bf16.mxu0 %vm355_vm0, %v14703_v9  ;;  %v1153_v4 = vpack.c.bf16 %v1140_v58, %v1139_v57 }
 0x1d7   :  { %13529 = vmatprep.subr.msk.bf16.mxu0 %vm567_vm2, %v13604_v8  ;;  %v13606_v8 = vld [vmem:[#allocation10 + $0x30] sm:$0x7f]  }
 0x1d8   :  { %v1528_v57 = vsel %vm567_vm2, %v13606_v8, 0 }
 0x1dd   :  { %11914 = vmatmul.mubr.msk.bf16.gmra.mrb[4].mxu0 %vm355_vm0, %v14714_v12 }
 0x1de   :  { %11917 = vmatprep.mubr.msk.bf16.mxu0 %vm355_vm0, %v817_v13  ;;  %v14779_v13 = vld [vmem:[#allocation2 + $0x81] sm:$0xff] }
 0x1e5   :  { %11918 = vmatmul.mubr.msk.bf16.gmra.mrb[8].mxu0 %vm355_vm0, %v14722_v14 }
 0x1e6   :  { %11921 = vmatprep.mubr.msk.bf16.mxu0 %vm355_vm0, %v14726_v15 }
 0x1ed   :  { %11922 = vmatmul.mubr.msk.bf16.gmra.mrb[12].mxu0 %vm355_vm0, %v14737_v18 }
 0x1ee   :  { %11927 = vmatprep.mubr.msk.bf16.mxu0 %vm355_vm0, %v982_v19  ;;  %v1144_v19 = vld [vmem:[#allocation2 + $0xc1] sm:$0xff] }
 0x1f5   :  { %11928 = vmatmul.mubr.msk.bf16.vlgmr.msra.gmra.mrb[0].mxu0 %vm355_vm0, %v983_v20  ;;  %v14782_v20 = vpack.c.bf16 %v1141_v10, %v1140_v58  ;;  %v13607_v58 = vld [vmem:[#allocation10 + $0x38] sm:$0x7f]  }
 0x1f6   :  { %11944 = vmatpush3.bf16.msra.mxu0 %v1189_v17  ;;  %11931 = vmatprep.mubr.msk.bf16.mxu0 %vm355_vm0, %v984_v25  ;;  %v1143_v17 = vld [vmem:[#allocation2 + $0xb1] sm:$0xff]  ;;  %v1697_v34 = vsel %vm567_vm2, %v13607_v58, 0 }
 0x1f7   :  { %13530 = vmatprep.subr.msk.bf16.mxu0 %vm567_vm2, %v13605_v21  ;;  %v1154_v21 = vpack.c.bf16 %v14779_v13, %v1141_v10  ;;  %v1155_v25 = vpack.c.bf16 %v1144_v19, %v1143_v17  ;;  %11878 = vmatmul.mubr.msk.bf16.gmra.mrb[4].mxu1 %vm355_vm0, %v14782_v20 }
 0x1fd   :  { %11932 = vmatmul.mubr.msk.bf16.gmra.mrb[4].mxu0 %vm355_vm0, %v985_v22  ;;  %v522_v22 = vld [vmem:[#allocation2 + $0xa1] sm:$0xff] }
 0x1fe   :  { %11935 = vmatprep.mubr.msk.bf16.mxu0 %vm355_vm0, %v986_v23  ;;  %v1145_v23 = vld [vmem:[#allocation2 + $0xd1] sm:$0xff] }
 0x205   :  { %11936 = vmatmul.mubr.msk.bf16.gmra.mrb[8].mxu0 %vm355_vm0, %v987_v27  ;;  %v1146_v27 = vld [vmem:[#allocation2 + $0xe1] sm:$0xff] }
 0x206   :  { %11939 = vmatprep.mubr.msk.bf16.mxu0 %vm355_vm0, %v988_v31  ;;  %v534_v31 = vpack.c.bf16 %v1143_v17, %v522_v22  ;;  %v14792_v39 = vpack.c.bf16 %v1147_v32, %v1146_v27 }
 0x208   :  { %11881 = vmatprep.mubr.msk.bf16.mxu1 %vm355_vm0, %v534_v31 }
 0x20d   :  { %11940 = vmatmul.mubr.msk.bf16.gmra.mrb[12].mxu0 %vm355_vm0, %v989_v40  ;;  %v14789_v40 = vpack.c.bf16 %v1145_v23, %v1144_v19 }
 0x20e   :  { %11945 = vmatprep.mubr.msk.bf16.mxu0 %vm355_vm0, %v1151_v46  ;;  %v1156_v46 = vpack.c.bf16 %v1146_v27, %v1145_v23 }
 0x20f   :  { %11882 = vmatmul.mubr.msk.bf16.gmra.mrb[8].mxu1 %vm355_vm0, %v14789_v40 }
 0x210   :  { %11885 = vmatprep.mubr.msk.bf16.mxu1 %vm355_vm0, %v14792_v39 }
 0x215   :  { %11946 = vmatmul.mubr.msk.bf16.vlgmr.msra.gmra.mrb[0].mxu0 %vm355_vm0, %v1152_v0  ;;  %v14821_v0 = vld [vmem:[#allocation2 + $0x82] sm:$0xff] }
 0x216   :  { %11962 = vmatpush3.bf16.msra.mxu0 %v1358_v6  ;;  %11949 = vmatprep.mubr.msk.bf16.mxu0 %vm355_vm0, %v1153_v4  ;;  %v1323_v24 = vpack.c.bf16 %v14821_v0, %v14709_v11  ;;  %v1831_v52 = vpack.c.bf16 %v1819_v51, %v14821_v0  ;;  %v15000_v4 = vld [vmem:[%s17830_s20] sm:$0xff]  }
 0x217   :  { %13531 = vmatprep.subr.msk.bf16.mxu0 %vm567_vm2, %v13606_v8  ;;  %11886 = vmatmul.mubr.msk.bf16.gmra.mrb[12].mxu1 %vm355_vm0, %v14802_v54 }
 0x21d   :  { %11950 = vmatmul.mubr.msk.bf16.gmra.mrb[4].mxu0 %vm355_vm0, %v1154_v21 }
 0x21e   :  { %11953 = vmatprep.mubr.msk.bf16.mxu0 %vm355_vm0, %v1155_v25 }
 0x225   :  { %11954 = vmatmul.mubr.msk.bf16.gmra.mrb[8].mxu0 %vm355_vm0, %v1156_v46 }
 0x226   :  { %11957 = vmatprep.mubr.msk.bf16.mxu0 %vm355_vm0, %v1157_v47 }
 0x22d   :  { %11958 = vmatmul.mubr.msk.bf16.gmra.mrb[12].mxu0 %vm355_vm0, %v1158_v55 }
 0x22e   :  { %11963 = vmatprep.mubr.msk.bf16.mxu0 %vm355_vm0, %v1320_v35  ;;  %v13608_v35 = vld [vmem:[#allocation10 + $0x40] sm:$0x7f]  }
 0x22f   :  { %v1866_v43 = vsel %vm567_vm2, %v13608_v35, 0 }
 0x235   :  { %11964 = vmatmul.mubr.msk.bf16.vlgmr.msra.gmra.mrb[0].mxu0 %vm355_vm0, %v1321_v37  ;;  %v1481_v37 = vld [vmem:[#allocation2 + $0x90] sm:$0xff] }
 0x236   :  { %11980 = vmatpush3.bf16.msra.mxu0 %v1528_v57  ;;  %11967 = vmatprep.mubr.msk.bf16.mxu0 %vm355_vm0, %v1322_v44  ;;  %v1493_v42 = vpack.c.bf16 %v1481_v37, %v14750_v26  ;;  %v1650_v44 = vld [vmem:[#allocation2 + $0x91] sm:$0xff] }
 0x237   :  { %13532 = vmatprep.subr.msk.bf16.mxu0 %vm567_vm2, %v13607_v58 }
 0x23d   :  { %11968 = vmatmul.mubr.msk.bf16.gmra.mrb[4].mxu0 %vm355_vm0, %v1323_v24 }
 0x23e   :  { %11971 = vmatprep.mubr.msk.bf16.mxu0 %vm355_vm0, %v1324_v53  ;;  %v1827_v53 = vld [vmem:[#allocation2 + $0x132] sm:$0xff] }
 0x245   :  { %11972 = vmatmul.mubr.msk.bf16.gmra.mrb[8].mxu0 %vm355_vm0, %v1325_v56  ;;  %v1835_v56 = vpack.c.bf16 %v1827_v53, %v14839_v28 }
 0x246   :  { %11975 = vmatprep.mubr.msk.bf16.mxu0 %vm355_vm0, %v1326_v1 }
 0x24d   :  { %11976 = vmatmul.mubr.msk.bf16.gmra.mrb[12].mxu0 %vm355_vm0, %v1327_v29 }
 0x24e   :  { %11981 = vmatprep.mubr.msk.bf16.mxu0 %vm355_vm0, %v14619_v30  ;;  %v1489_v30 = vld [vmem:[#allocation2 + $0x130] sm:$0xff] }
 0x255   :  { %11982 = vmatmul.mubr.msk.bf16.vlgmr.msra.gmra.mrb[0].mxu0 %vm355_vm0, %v14633_v36  ;;  %v1497_v36 = vpack.c.bf16 %v1489_v30, %v14760_v38 }
 0x256   :  { %11998 = vmatpush3.bf16.msra.mxu0 %v1697_v34  ;;  %11985 = vmatprep.mubr.msk.bf16.mxu0 %vm355_vm0, %v14656_v45  ;;  %v1662_v45 = vpack.c.bf16 %v1650_v44, %v14779_v13 }
 0x257   :  { %13533 = vmatprep.subr.msk.bf16.mxu0 %vm567_vm2, %v13608_v35 }
 0x25d   :  { %11986 = vmatmul.mubr.msk.bf16.gmra.mrb[4].mxu0 %vm355_vm0, %v1493_v42 }
 0x25e   :  { %11989 = vmatprep.mubr.msk.bf16.mxu0 %vm355_vm0, %v14676_v59 }
 0x265   :  { %11990 = vmatmul.mubr.msk.bf16.gmra.mrb[8].mxu0 %vm355_vm0, %v14678_v60 }
 0x266   :  { %11993 = vmatprep.mubr.msk.bf16.mxu0 %vm355_vm0, %v14691_v5 }
 0x26d   :  { %11994 = vmatmul.mubr.msk.bf16.gmra.mrb[12].mxu0 %vm355_vm0, %v1497_v36 }
 0x26e   :  { %11999 = vmatprep.mubr.msk.bf16.mxu0 %vm355_vm0, %v14767_v61  ;;  %v13610_v61 = vld [vmem:[%s17830_s20 + $0x10] sm:$0xff]  }
 0x26f   :  { %12033 = vmatprep.subr.bf16.mxu1 %v13610_v61 }
 0x270   :  { %12034 = vmatpush3.bf16.msra.mxu1 %v13610_v61 }
 0x275   :  { %12000 = vmatmul.mubr.msk.bf16.vlgmr.msra.gmra.mrb[0].mxu0 %vm355_vm0, %v14770_v2  ;;  %v13611_v2 = vld [vmem:[%s17830_s20 + $0x18] sm:$0xff]  }
 0x276   :  { %12016 = vmatpush3.bf16.msra.mxu0 %v1866_v43  ;;  %12003 = vmatprep.mubr.msk.bf16.mxu0 %vm355_vm0, %v14782_v20 }
 0x277   :  { %12035 = vmatprep.subr.bf16.mxu1 %v13611_v2 }
 0x278   :  { %12036 = vmatpush3.bf16.msra.mxu1 %v13611_v2 }
 0x279   :  { %12053 = vmatprep.subr.bf16.mxu1 %v15000_v4 }
 0x27d   :  { %12004 = vmatmul.mubr.msk.bf16.gmra.mrb[4].mxu0 %vm355_vm0, %v1662_v45 }
 0x27e   :  { %12007 = vmatprep.mubr.msk.bf16.mxu0 %vm355_vm0, %v14789_v40 }
 0x285   :  { %12008 = vmatmul.mubr.msk.bf16.gmra.mrb[8].mxu0 %vm355_vm0, %v14792_v39 }
 0x286   :  { %12011 = vmatprep.mubr.msk.bf16.mxu0 %vm355_vm0, %v14802_v54 }
 0x28d   :  { %12012 = vmatmul.mubr.msk.bf16.gmra.mrb[12].mxu0 %vm355_vm0, %v1666_v50 }
 0x28e   :  { %12017 = vmatprep.mubr.msk.bf16.mxu0 %vm355_vm0, %v14699_v7 }
 0x295   :  { %12018 = vmatmul.mubr.msk.bf16.vlgmr.msra.gmra.mrb[0].mxu0 %vm355_vm0, %v14703_v9 }
 0x296   :  { %12021 = vmatprep.mubr.msk.bf16.mxu0 %vm355_vm0, %v14714_v12 }
 0x297   :  { %v11875_v59 = vpop.f32.mrb[0].mxu1 }
 0x298   :  { %v605_v60 = vpop.f32.mrb[1].mxu1 }
 0x299   :  { %v11876_v62 = vpop.f32.mrb[2].mxu1 }
 0x29a   :  { %v608_v63 = vpop.f32.mrb[3].mxu1 }
 0x29d   :  { %12022 = vmatmul.mubr.msk.bf16.gmra.mrb[4].mxu0 %vm355_vm0, %v1831_v52 }
 0x29e   :  { %12025 = vmatprep.mubr.msk.bf16.mxu0 %vm355_vm0, %v14722_v14 }
 0x2a5   :  { %12026 = vmatmul.mubr.msk.bf16.gmra.mrb[8].mxu0 %vm355_vm0, %v14726_v15 }
 0x2a6   :  { %12029 = vmatprep.mubr.msk.bf16.mxu0 %vm355_vm0, %v14737_v18 }
 0x2ad   :  { %12030 = vmatmul.mubr.msk.bf16.gmra.mrb[12].mxu0 %vm355_vm0, %v1835_v56 }
 0x2ca   :  { %v11879_v1 = vpop.f32.mrb[4].mxu1 }
 0x2cb   :  { %v14935_v5 = vpop.f32.mrb[5].mxu1 }
 0x2cc   :  { %v14937_v7 = vpop.f32.mrb[6].mxu1 }
 0x2cd   :  { %v14939_v9 = vpop.f32.mrb[7].mxu1 }
 0x2e2   :  { %v14941_v11 = vpop.f32.mrb[8].mxu1 }
 0x2e3   :  { %v14943_v12 = vpop.f32.mrb[9].mxu1 }
 0x2e4   :  { %v14945_v14 = vpop.f32.mrb[10].mxu1 }
 0x2e5   :  { %v14947_v15 = vpop.f32.mrb[11].mxu1 }
 0x2ea   :  { %v14949_v16 = vpop.f32.mrb[12].mxu1 }
 0x2eb   :  { %v14951_v18 = vpop.f32.mrb[13].mxu1 }
 0x2ec   :  { %v14953_v26 = vpop.f32.mrb[14].mxu1 }
 0x2ed   :  { %v14955_v38 = vpop.f32.mrb[15].mxu1 }
 0x368   :  { %v12019_v6 = vpop.f32.mrb[0].mxu0 }
 0x369   :  { %v15003_v8 = vadd.f32 %v12019_v6, %v11875_v59  ;;  %v1902_v10 = vpop.f32.mrb[1].mxu0 }
 0x36a   :  { %v15005_v13 = vadd.f32 %v1902_v10, %v605_v60  ;;  %v12020_v17 = vpop.f32.mrb[2].mxu0 }
 0x36b   :  { %v15007_v19 = vadd.f32 %v12020_v17, %v11876_v62  ;;  %v1905_v20 = vpop.f32.mrb[3].mxu0  ;;  %v2022_v22 = vmul.f32 %v15003_v8, %v15003_v8  ;;  %v1984_v40 = vsel %vm397_vm3, %v15003_v8, 0.0 }
 0x36c   :  { %v2020_v21 = vmul.f32 %v15005_v13, %v15005_v13  ;;  %v15011_v25 = vadd.f32 %v1905_v20, %v608_v63  ;;  %v1981_v23 = vsel %vm397_vm3, %v15005_v13, 0.0 }
 0x36d   :  { %v2023_v32 = vmul.f32 %v15007_v19, %v15007_v19  ;;  %v2039_v57 = vsel %vm397_vm3, %v2022_v22, 0.0  ;;  %v1986_v58 = vsel %vm397_vm3, %v15007_v19, 0.0 }
 0x36e   :  { %v1982_v27 = vsel %vm397_vm3, %v15011_v25, 0.0  ;;  %v2021_v31 = vmul.f32 %v15011_v25, %v15011_v25  ;;  %v2036_v46 = vsel %vm397_vm3, %v2020_v21, 0.0 }
 0x36f   :  { %v1983_v33 = vadd.f32 %v1982_v27, %v1981_v23  ;;  %v2041_v28 = vsel %vm397_vm3, %v2023_v32, 0.0 }
 0x370   :  { %v2037_v39 = vsel %vm397_vm3, %v2021_v31, 0.0  ;;  %v12023_v47 = vpop.f32.mrb[4].mxu0 }
 0x371   :  { %v1985_v41 = vadd.f32 %v1984_v40, %v1983_v33  ;;  %v2038_v48 = vadd.f32 %v2037_v39, %v2036_v46  ;;  %v15027_v54 = vadd.f32 %v12023_v47, %v11879_v1  ;;  %v1918_v55 = vpop.f32.mrb[5].mxu0 }
 0x372   :  { %v15033_v0 = vadd.f32 %v1918_v55, %v14935_v5  ;;  %v12024_v24 = vpop.f32.mrb[6].mxu0 }
 0x373   :  { %v2040_v29 = vadd.f32 %v2039_v57, %v2038_v48  ;;  %v1987_v34 = vadd.f32 %v1986_v58, %v1985_v41  ;;  %v1921_v35 = vpop.f32.mrb[7].mxu0  ;;  %v15041_v30 = vadd.f32 %v12024_v24, %v14937_v7  ;;  %v2026_v50 = vmul.f32 %v15027_v54, %v15027_v54 }
 0x374   :  { %v1988_v37 = vsel %vm397_vm3, %v15033_v0, 0.0  ;;  %v2024_v42 = vmul.f32 %v15033_v0, %v15033_v0  ;;  %v15044_v36 = vadd.f32 %v1921_v35, %v14939_v9  ;;  %v1992_v56 = vsel %vm397_vm3, %v15027_v54, 0.0 }
 0x375   :  { %v1989_v43 = vadd.f32 %v1988_v37, %v1987_v34  ;;  %v2042_v44 = vadd.f32 %v2041_v28, %v2040_v29  ;;  %v2027_v60 = vmul.f32 %v15041_v30, %v15041_v30  ;;  %v1994_v7 = vsel %vm397_vm3, %v15041_v30, 0.0 }
 0x376   :  { %v2043_v45 = vsel %vm397_vm3, %v2024_v42, 0.0  ;;  %v1990_v49 = vsel %vm397_vm3, %v15044_v36, 0.0  ;;  %v2025_v53 = vmul.f32 %v15044_v36, %v15044_v36  ;;  %v2047_v6 = vsel %vm397_vm3, %v2026_v50, 0.0 }
 0x377   :  { %v2044_v51 = vadd.f32 %v2043_v45, %v2042_v44  ;;  %v1991_v52 = vadd.f32 %v1990_v49, %v1989_v43 }
 0x378   :  { %v12027_v59 = vpop.f32.mrb[8].mxu0  ;;  %v2045_v63 = vsel %vm397_vm3, %v2025_v53, 0.0 }
 0x379   :  { %v1993_v62 = vadd.f32 %v1992_v56, %v1991_v52  ;;  %v15059_v1 = vadd.f32 %v12027_v59, %v14941_v11  ;;  %v1934_v5 = vpop.f32.mrb[9].mxu0  ;;  %v2046_v9 = vadd.f32 %v2045_v63, %v2044_v51 }
 0x37a   :  { %v15064_v61 = vadd.f32 %v1934_v5, %v14943_v12  ;;  %v12028_v2 = vpop.f32.mrb[10].mxu0  ;;  %v2049_v12 = vsel %vm397_vm3, %v2027_v60, 0.0 }
 0x37b   :  { %v1995_v10 = vadd.f32 %v1994_v7, %v1993_v62  ;;  %v15068_v17 = vadd.f32 %v12028_v2, %v14945_v14  ;;  %v1937_v20 = vpop.f32.mrb[11].mxu0  ;;  %v2048_v21 = vadd.f32 %v2047_v6, %v2046_v9  ;;  %v2030_v40 = vmul.f32 %v15059_v1, %v15059_v1 }
 0x37c   :  { %v1996_v11 = vsel %vm397_vm3, %v15064_v61, 0.0  ;;  %v2028_v22 = vmul.f32 %v15064_v61, %v15064_v61  ;;  %v15075_v23 = vadd.f32 %v1937_v20, %v14947_v15  ;;  %v2000_v15 = vsel %vm397_vm3, %v15059_v1, 0.0 }
 0x37d   :  { %v1997_v27 = vadd.f32 %v1996_v11, %v1995_v10  ;;  %v2050_v31 = vadd.f32 %v2049_v12, %v2048_v21  ;;  %v2031_v48 = vmul.f32 %v15068_v17, %v15068_v17  ;;  %v2002_v24 = vsel %vm397_vm3, %v15068_v17, 0.0 }
 0x37e   :  { %v2051_v32 = vsel %vm397_vm3, %v2028_v22, 0.0  ;;  %v1998_v14 = vsel %vm397_vm3, %v15075_v23, 0.0  ;;  %v2029_v33 = vmul.f32 %v15075_v23, %v15075_v23  ;;  %v2055_v35 = vsel %vm397_vm3, %v2030_v40, 0.0 }
 0x37f   :  { %v1999_v46 = vadd.f32 %v1998_v14, %v1997_v27  ;;  %v2052_v39 = vadd.f32 %v2051_v32, %v2050_v31 }
 0x380   :  { %v2053_v47 = vsel %vm397_vm3, %v2029_v33, 0.0  ;;  %v12031_v41 = vpop.f32.mrb[12].mxu0 }
 0x381   :  { %v2001_v55 = vadd.f32 %v2000_v15, %v1999_v46  ;;  %v15091_v57 = vadd.f32 %v12031_v41, %v14949_v16  ;;  %v1950_v58 = vpop.f32.mrb[13].mxu0  ;;  %v2054_v28 = vadd.f32 %v2053_v47, %v2052_v39 }
 0x382   :  { %v15096_v29 = vadd.f32 %v1950_v58, %v14951_v18  ;;  %v12032_v34 = vpop.f32.mrb[14].mxu0  ;;  %v2057_v18 = vsel %vm397_vm3, %v2031_v48, 0.0 }
 0x383   :  { %v2003_v37 = vadd.f32 %v2002_v24, %v2001_v55  ;;  %v15100_v42 = vadd.f32 %v12032_v34, %v14953_v26  ;;  %v1953_v43 = vpop.f32.mrb[15].mxu0  ;;  %v2056_v44 = vadd.f32 %v2055_v35, %v2054_v28  ;;  %v2034_v56 = vmul.f32 %v15091_v57, %v15091_v57  ;;  %v2076_v34 = vld [vmem:[%s17831_s4] sm:$0x1] }
 0x384   :  { %v2004_v16 = vsel %vm397_vm3, %v15096_v29, 0.0  ;;  %v2032_v45 = vmul.f32 %v15096_v29, %v15096_v29  ;;  %v12900_v49 = vadd.f32 %v1953_v43, %v14955_v38  ;;  %v2008_v60 = vsel %vm397_vm3, %v15091_v57, 0.0 }
 0x385   :  { %v2005_v50 = vadd.f32 %v2004_v16, %v2003_v37  ;;  %v2058_v51 = vadd.f32 %v2057_v18, %v2056_v44  ;;  %v2035_v38 = vmul.f32 %v15100_v42, %v15100_v42  ;;  %v2010_v7 = vsel %vm397_vm3, %v15100_v42, 0.0  ;;  %v2080_v44 = vld [vmem:[#allocation12] sm:$0x1] }
 0x386   :  { %v2059_v52 = vsel %vm397_vm3, %v2032_v45, 0.0  ;;  %v2006_v53 = vsel %vm397_vm3, %v12900_v49, 0.0  ;;  %v2033_v26 = vmul.f32 %v12900_v49, %v12900_v49  ;;  %v2063_v2 = vsel %vm397_vm3, %v2034_v56, 0.0 }
 0x387   :  { %v2007_v59 = vadd.f32 %v2006_v53, %v2005_v50  ;;  %v2060_v62 = vadd.f32 %v2059_v52, %v2058_v51  ;;  %v2065_v20 = vsel %vm397_vm3, %v2035_v38, 0.0  ;;  %v17730_v24 = vlaneseq }
 0x388   :  { %v2061_v63 = vsel %vm397_vm3, %v2033_v26, 0.0 }
 0x389   :  { %v2009_v5 = vadd.f32 %v2008_v60, %v2007_v59  ;;  %v2062_v9 = vadd.f32 %v2061_v63, %v2060_v62  ;;  %v15122_v28 = vshrl.u32 %v17730_v24, 7 }
 0x38b   :  { %v2011_v6 = vadd.f32 %v2010_v7, %v2009_v5  ;;  %v2064_v10 = vadd.f32 %v2063_v2, %v2062_v9  ;;  %17832 = vst [vmem:[#allocation60_spill] sm:$0xff] %v15122_v28  ;;  %v15126_v35 = vsub.s32 0, %v15122_v28 }
 0x38d   :  { %v2012_v21 = vrot.slane %v2011_v6, 4  ;;  %v2066_v11 = vadd.f32 %v2065_v20, %v2064_v10  ;;  %17833 = vst [vmem:[#allocation61_spill] sm:$0xff] %v15126_v35 }
 0x38f   :  { %v2013_v22 = vadd.f32 %v2012_v21, %v2011_v6  ;;  %v2067_v12 = vrot.slane %v2066_v11, 4 }
 0x391   :  { %v2014_v27 = vrot.slane %v2013_v22, 2  ;;  %v2068_v31 = vadd.f32 %v2067_v12, %v2066_v11 }
 0x393   :  { %v2015_v32 = vadd.f32 %v2014_v27, %v2013_v22  ;;  %v2069_v14 = vrot.slane %v2068_v31, 2 }
 0x395   :  { %v2016_v33 = vrot.slane %v2015_v32, 1  ;;  %v2070_v40 = vadd.f32 %v2069_v14, %v2068_v31 }
 0x397   :  { %v2017_v46 = vadd.f32 %v2016_v33, %v2015_v32  ;;  %v2071_v15 = vrot.slane %v2070_v40, 1 }
 0x399   :  { %v2019_v39 = vmul.f32 0.0078125, %v2017_v46  ;;  %v2072_v47 = vadd.f32 %v2071_v15, %v2070_v40 }
 0x39b   :  { %v2074_v41 = vmul.f32 %v2019_v39, %v2019_v39  ;;  %v2073_v48 = vmul.f32 0.0078125, %v2072_v47 }
 0x39d   :  { %v2075_v55 = vsub.f32 %v2073_v48, %v2074_v41 }
 0x39f   :  { %v2077_v58 = vadd.f32 1e-05, %v2075_v55 }
 0x3a1   :  { %13746 = vrsqrt.f32 %v2077_v58 }
 0x3ab   :  { %v13747_v37 = vpop.eup %13746 }
 0x3ac   :  { %v2079_v43 = vmul.f32 %v13747_v37, %v2076_v34 }
 0x3ae   :  { %v2081_v16 = vmul.f32 %v2079_v43, %v2019_v39  ;;  %v2087_v45 = vrot.slane %v2079_v43, %v15126_v35 }
 0x3b0   :  { %v2082_v18 = vsub.f32 %v2080_v44, %v2081_v16  ;;  %v2102_v50 = vmul.f32 %v12900_v49, %v2087_v45  ;;  %v2089_v51 = vmul.f32 %v15005_v13, %v2087_v45  ;;  %v2090_v52 = vmul.f32 %v15011_v25, %v2087_v45 }
 0x3b1   :  { %v2091_v53 = vmul.f32 %v15003_v8, %v2087_v45  ;;  %v2092_v26 = vmul.f32 %v15007_v19, %v2087_v45  ;;  %v2093_v56 = vmul.f32 %v15033_v0, %v2087_v45  ;;  %v2094_v59 = vmul.f32 %v15044_v36, %v2087_v45 }
 0x3b2   :  { %v2109_v60 = vrot.slane %v2082_v18, %v15126_v35  ;;  %v2095_v62 = vmul.f32 %v15027_v54, %v2087_v45  ;;  %v2097_v63 = vmul.f32 %v15064_v61, %v2087_v45  ;;  %v2098_v49 = vmul.f32 %v15075_v23, %v2087_v45  ;;  %v13619_v35 = vld [vmem:[%s17830_s20 + $0x48] sm:$0xff]  }
 0x3b3   :  { %v2099_v13 = vmul.f32 %v15059_v1, %v2087_v45  ;;  %v2100_v25 = vmul.f32 %v15068_v17, %v2087_v45  ;;  %v2101_v8 = vmul.f32 %v15096_v29, %v2087_v45  ;;  %v2103_v19 = vmul.f32 %v15091_v57, %v2087_v45 }
 0x3b4   :  { %v15143_v38 = vadd.f32 %v2109_v60, %v2102_v50  ;;  %v15145_v0 = vadd.f32 %v2109_v60, %v2089_v51  ;;  %v15147_v36 = vadd.f32 %v2109_v60, %v2090_v52  ;;  %v15149_v5 = vadd.f32 %v2109_v60, %v2091_v53  ;;  %v13614_v50 = vld [vmem:[%s17830_s20 + $0x20] sm:$0xff]  }
 0x3b5   :  { %v15151_v54 = vadd.f32 %v2109_v60, %v2092_v26  ;;  %v15153_v61 = vadd.f32 %v2109_v60, %v2093_v56  ;;  %v15155_v23 = vadd.f32 %v2109_v60, %v2094_v59  ;;  %v15157_v1 = vadd.f32 %v2109_v60, %v2095_v62  ;;  %v2228_v53 = vld [vmem:[#allocation3 + $0xa1] sm:$0xff] }
 0x3b6   :  { %17834 = vst [vmem:[#allocation62_spill] sm:$0xff] %v15143_v38  ;;  %17835 = vst [vmem:[#allocation63_spill] sm:$0xff] %v15145_v0  ;;  %v17738_v17 = vmax.f32 %v15143_v38, 0.0  ;;  %v17736_v57 = vmax.f32 %v15145_v0, 0.0  ;;  %v17748_v29 = vmax.f32 %v15147_v36, 0.0  ;;  %v17747_v7 = vmax.f32 %v15149_v5, 0.0 }
 0x3b7   :  { %17836 = vst [vmem:[#allocation64_spill] sm:$0xff] %v15147_v36  ;;  %17837 = vst [vmem:[#allocation65_spill] sm:$0xff] %v15149_v5  ;;  %v17746_v9 = vmax.f32 %v15151_v54, 0.0  ;;  %v17745_v2 = vmax.f32 %v15153_v61, 0.0  ;;  %v17744_v6 = vmax.f32 %v15155_v23, 0.0  ;;  %v17743_v10 = vmax.f32 %v15157_v1, 0.0 }
 0x3b8   :  { %17838 = vst [vmem:[#allocation66_spill] sm:$0xff] %v15151_v54  ;;  %17839 = vst [vmem:[#allocation67_spill] sm:$0xff] %v15153_v61  ;;  %v15179_v20 = vadd.f32 %v2109_v60, %v2097_v63  ;;  %v15181_v21 = vadd.f32 %v2109_v60, %v2098_v49  ;;  %v15183_v11 = vadd.f32 %v2109_v60, %v2099_v13  ;;  %v2518_v38 = vld [vmem:[#allocation3 + $0xa2] sm:$0xff] }
 0x3b9   :  { %17840 = vst [vmem:[#allocation68_spill] sm:$0xff] %v15155_v23  ;;  %17841 = vst [vmem:[#allocation69_spill] sm:$0xff] %v15157_v1  ;;  %v15185_v22 = vadd.f32 %v2109_v60, %v2100_v25  ;;  %v15199_v12 = vadd.f32 %v2109_v60, %v2101_v8  ;;  %v15201_v27 = vadd.f32 %v2109_v60, %v2103_v19  ;;  %v2196_v19 = vld [vmem:[#allocation3] sm:$0xff] }
 0x3ba   :  { %2157 = vst.msk [vmem:[#allocation3 + $0x101] sm:$0xff] %vm397_vm3, %v17738_v17  ;;  %2144 = vst.msk [vmem:[#allocation3 + $0x11] sm:$0xff] %vm397_vm3, %v17736_v57  ;;  %v2096_v31 = vmul.f32 %v15041_v30, %v2087_v45  ;;  %v2104_v32 = vmul.f32 %v15100_v42, %v2087_v45  ;;  %v17735_v14 = vmax.f32 %v15179_v20, 0.0  ;;  %v17742_v33 = vmax.f32 %v15181_v21, 0.0  ;;  %v2220_v30 = vld [vmem:[#allocation3 + $0x1] sm:$0xff] }
 0x3bb   :  { %2145 = vst.msk [vmem:[#allocation3 + $0x21] sm:$0xff] %vm397_vm3, %v17748_v29  ;;  %2146 = vst.msk [vmem:[#allocation3 + $0x31] sm:$0xff] %vm397_vm3, %v17747_v7  ;;  %v17741_v40 = vmax.f32 %v15183_v11, 0.0  ;;  %v17740_v46 = vmax.f32 %v15185_v22, 0.0  ;;  %v17739_v15 = vmax.f32 %v15199_v12, 0.0  ;;  %v17737_v39 = vmax.f32 %v15201_v27, 0.0 }
 0x3bc   :  { %17842 = vst [vmem:[#allocation70_spill] sm:$0xff] %v15179_v20  ;;  %17843 = vst [vmem:[#allocation71_spill] sm:$0xff] %v15181_v21  ;;  %v15211_v47 = vadd.f32 %v2109_v60, %v2096_v31  ;;  %v15213_v41 = vadd.f32 %v2109_v60, %v2104_v32  ;;  %v13613_v45 = vld [vmem:[%s17830_s20 + $0x8] sm:$0xff]   ;;  %v13617_v20 = vld [vmem:[%s17830_s20 + $0x38] sm:$0xff]  }
 0x3bd   :  { %17844 = vst [vmem:[#allocation72_spill] sm:$0xff] %v15183_v11  ;;  %17845 = vst [vmem:[#allocation73_spill] sm:$0xff] %v15185_v22 }
 0x3be   :  { %2147 = vst.msk [vmem:[#allocation3 + $0x41] sm:$0xff] %vm397_vm3, %v17746_v9  ;;  %2148 = vst.msk [vmem:[#allocation3 + $0x51] sm:$0xff] %vm397_vm3, %v17745_v2  ;;  %v17734_v42 = vmax.f32 %v15211_v47, 0.0  ;;  %v17733_v48 = vmax.f32 %v15213_v41, 0.0 }
 0x3bf   :  { %2149 = vst.msk [vmem:[#allocation3 + $0x61] sm:$0xff] %vm397_vm3, %v17744_v6  ;;  %2150 = vst.msk [vmem:[#allocation3 + $0x71] sm:$0xff] %vm397_vm3, %v17743_v10  ;;  %v2510_v10 = vld [vmem:[#allocation3 + $0x2] sm:$0xff] }
 0x3c0   :  { %17846 = vst [vmem:[#allocation74_spill] sm:$0xff] %v15199_v12  ;;  %17847 = vst [vmem:[#allocation75_spill] sm:$0xff] %v15201_v27 }
 0x3c1   :  { %17848 = vst [vmem:[#allocation76_spill] sm:$0xff] %v15211_v47  ;;  %17849 = vst [vmem:[#allocation77_spill] sm:$0xff] %v15213_v41  ;;  %v15235_v55 = vld [vmem:[#allocation3 + $0x11] sm:$0xff]  ;;  %v15302_v25 = vld [vmem:[#allocation3 + $0x101] sm:$0xff] }
 0x3c2   :  { %2152 = vst.msk [vmem:[#allocation3 + $0xb1] sm:$0xff] %vm397_vm3, %v17735_v14  ;;  %2153 = vst.msk [vmem:[#allocation3 + $0xc1] sm:$0xff] %vm397_vm3, %v17742_v33  ;;  %v15237_v58 = vld [vmem:[#allocation3 + $0x21] sm:$0xff]  ;;  %v15239_v34 = vld [vmem:[#allocation3 + $0x31] sm:$0xff]  ;;  %v2236_v37 = vpack.c.bf16 %v15235_v55, %v2220_v30 }
 0x3c3   :  { %2154 = vst.msk [vmem:[#allocation3 + $0xd1] sm:$0xff] %vm397_vm3, %v17741_v40  ;;  %2155 = vst.msk [vmem:[#allocation3 + $0xe1] sm:$0xff] %vm397_vm3, %v17740_v46  ;;  %v15250_v43 = vpack.c.bf16 %v15239_v34, %v15237_v58  ;;  %v15306_v31 = vld [vmem:[#allocation3 + $0x10] sm:$0xff]  ;;  %v2204_v14 = vld [vmem:[#allocation3 + $0xa0] sm:$0xff] }
 0x3c4   :  { %2156 = vst.msk [vmem:[#allocation3 + $0xf1] sm:$0xff] %vm397_vm3, %v17739_v15  ;;  %2158 = vst.msk [vmem:[#allocation3 + $0x111] sm:$0xff] %vm397_vm3, %v17737_v39  ;;  %12037 = vmatprep.mubr.msk.bf16.mxu1 %vm397_vm3, %v2236_v37  ;;  %v2212_v30 = vpack.c.bf16 %v15306_v31, %v2196_v19  ;;  %v15316_v37 = vld [vmem:[#allocation3 + $0x20] sm:$0xff]  ;;  %v15376_v6 = vld [vmem:[#allocation3 + $0x12] sm:$0xff] }
 0x3c5   :  { %2151 = vst.msk [vmem:[#allocation3 + $0x81] sm:$0xff] %vm397_vm3, %v17734_v42  ;;  %2159 = vst.msk [vmem:[#allocation3 + $0x121] sm:$0xff] %vm397_vm3, %v17733_v48  ;;  %v15252_v44 = vld [vmem:[#allocation3 + $0x41] sm:$0xff]  ;;  %v15254_v16 = vld [vmem:[#allocation3 + $0x51] sm:$0xff]  ;;  %12038 = vmatmul.mubr.msk.bf16.vlgmr.msra.gmra.mrb[16].mxu1 %vm397_vm3, %v15250_v43  ;;  %v2526_v9 = vpack.c.bf16 %v15376_v6, %v2510_v10  ;;  %v2699_v5 = vpack.c.bf16 %v15316_v37, %v15306_v31 }
 0x3c6   :  { %v15260_v18 = vpack.c.bf16 %v15254_v16, %v15252_v44  ;;  %12054 = vmatpush3.bf16.msra.mxu1 %v15000_v4  ;;  %v15268_v51 = vld [vmem:[#allocation3 + $0x61] sm:$0xff]  ;;  %v15270_v52 = vld [vmem:[#allocation3 + $0x71] sm:$0xff] }
 0x3c7   :  { %12055 = vmatprep.subr.bf16.mxu1 %v13613_v45  ;;  %v15276_v56 = vpack.c.bf16 %v15270_v52, %v15268_v51  ;;  %v15338_v48 = vld [vmem:[#allocation3 + $0x60] sm:$0xff]  ;;  %v15340_v42 = vld [vmem:[#allocation3 + $0x70] sm:$0xff] }
 0x3c8   :  { %12041 = vmatprep.mubr.msk.bf16.mxu1 %vm397_vm3, %v15260_v18  ;;  %v15346_v39 = vpack.c.bf16 %v15340_v42, %v15338_v48  ;;  %v15386_v7 = vld [vmem:[#allocation3 + $0x22] sm:$0xff]  ;;  %v15388_v29 = vld [vmem:[#allocation3 + $0x32] sm:$0xff] }
 0x3c9   :  { %v15272_v26 = vld [vmem:[#allocation3 + $0xb1] sm:$0xff]  ;;  %v15282_v4 = vld [vmem:[#allocation3 + $0xc1] sm:$0xff]  ;;  %v15396_v47 = vpack.c.bf16 %v15388_v29, %v15386_v7 }
 0x3ca   :  { %12056 = vmatpush3.bf16.msra.mxu1 %v13613_v45  ;;  %v2240_v59 = vpack.c.bf16 %v15272_v26, %v2228_v53  ;;  %v15284_v60 = vld [vmem:[#allocation3 + $0xd1] sm:$0xff]  ;;  %v15286_v62 = vld [vmem:[#allocation3 + $0xe1] sm:$0xff] }
 0x3cb   :  { %12073 = vmatprep.subr.bf16.mxu1 %v13614_v50  ;;  %v15288_v63 = vld [vmem:[#allocation3 + $0xf1] sm:$0xff]  ;;  %v15292_v49 = vpack.c.bf16 %v15284_v60, %v15282_v4  ;;  %v15320_v53 = vld [vmem:[#allocation3 + $0x40] sm:$0xff] }
 0x3cc   :  { %v15296_v13 = vpack.c.bf16 %v15288_v63, %v15286_v62  ;;  %v15304_v8 = vld [vmem:[#allocation3 + $0x111] sm:$0xff]  ;;  %v15356_v46 = vld [vmem:[#allocation3 + $0xe0] sm:$0xff] }
 0x3cd   :  { %12042 = vmatmul.mubr.msk.bf16.gmra.mrb[20].mxu1 %vm397_vm3, %v15276_v56  ;;  %v15310_v32 = vpack.c.bf16 %v15304_v8, %v15302_v25  ;;  %v15318_v45 = vld [vmem:[#allocation3 + $0x30] sm:$0xff]  ;;  %v15390_v28 = vld [vmem:[#allocation3 + $0x42] sm:$0xff] }
 0x3ce   :  { %12045 = vmatprep.mubr.msk.bf16.mxu1 %vm397_vm3, %v2240_v59  ;;  %v15322_v59 = vld [vmem:[#allocation3 + $0x50] sm:$0xff]  ;;  %v15326_v24 = vpack.c.bf16 %v15318_v45, %v15316_v37  ;;  %v15408_v0 = vld [vmem:[#allocation3 + $0x62] sm:$0xff]  ;;  %v2700_v36 = vpack.c.bf16 %v15320_v53, %v15318_v45 }
 0x3cf   :  { %v15331_v19 = vpack.c.bf16 %v15322_v59, %v15320_v53  ;;  %v15342_v57 = vld [vmem:[#allocation3 + $0xb0] sm:$0xff]  ;;  %v15426_v1 = vld [vmem:[#allocation3 + $0xe2] sm:$0xff] }
 0x3d0   :  { %v2216_v17 = vpack.c.bf16 %v15342_v57, %v2204_v14  ;;  %v15354_v15 = vld [vmem:[#allocation3 + $0xd0] sm:$0xff]  ;;  %v15463_v31 = vld [vmem:[#allocation3 + $0x80] sm:$0xff] }
 0x3d1   :  { %v15358_v40 = vld [vmem:[#allocation3 + $0xf0] sm:$0xff]  ;;  %v15493_v45 = vld [vmem:[#allocation3 + $0x81] sm:$0xff] }
 0x3d2   :  { %v15366_v14 = vpack.c.bf16 %v15358_v40, %v15356_v46  ;;  %v15374_v33 = vld [vmem:[#allocation3 + $0x110] sm:$0xff] }
 0x3d3   :  { %v15392_v41 = vld [vmem:[#allocation3 + $0x52] sm:$0xff]  ;;  %v13629_v53 = vld [vmem:[#allocation16 + $0x18] sm:$0xff]  }
 0x3d4   :  { %v15401_v10 = vpack.c.bf16 %v15392_v41, %v15390_v28  ;;  %v15410_v27 = vld [vmem:[#allocation3 + $0x72] sm:$0xff] }
 0x3d5   :  { %12046 = vmatmul.mubr.msk.bf16.gmra.mrb[24].mxu1 %vm397_vm3, %v15292_v49  ;;  %v15412_v12 = vld [vmem:[#allocation3 + $0xb2] sm:$0xff]  ;;  %v15416_v22 = vpack.c.bf16 %v15410_v27, %v15408_v0 }
 0x3d6   :  { %12049 = vmatprep.mubr.msk.bf16.mxu1 %vm397_vm3, %v15296_v13  ;;  %v2530_v11 = vpack.c.bf16 %v15412_v12, %v2518_v38  ;;  %v15424_v21 = vld [vmem:[#allocation3 + $0xd2] sm:$0xff] }
 0x3d7   :  { %v15444_v61 = vld [vmem:[#allocation3 + $0x112] sm:$0xff] }
 0x3dd   :  { %12050 = vmatmul.mubr.msk.bf16.gmra.mrb[28].mxu1 %vm397_vm3, %v15310_v32 }
 0x3de   :  { %12057 = vmatprep.mubr.msk.bf16.mxu1 %vm397_vm3, %v2212_v30  ;;  %v13616_v30 = vld [vmem:[%s17830_s20 + $0x30] sm:$0xff]  }
 0x3e5   :  { %12058 = vmatmul.mubr.msk.bf16.vlgmr.msra.gmra.mrb[16].mxu1 %vm397_vm3, %v15326_v24 }
 0x3e6   :  { %12061 = vmatprep.mubr.msk.bf16.mxu1 %vm397_vm3, %v15331_v19  ;;  %12074 = vmatpush3.bf16.msra.mxu1 %v13614_v50  ;;  %v15352_v50 = vld [vmem:[#allocation3 + $0xc0] sm:$0xff] }
 0x3e7   :  { %12075 = vmatprep.subr.bf16.mxu1 %v13615_v3  ;;  %v2703_v37 = vpack.c.bf16 %v15352_v50, %v15342_v57 }
 0x3ea   :  { %12076 = vmatpush3.bf16.msra.mxu1 %v13615_v3  ;;  %v15362_v3 = vpack.c.bf16 %v15354_v15, %v15352_v50 }
 0x3eb   :  { %12093 = vmatprep.subr.bf16.mxu1 %v13616_v30 }
 0x3ed   :  { %12062 = vmatmul.mubr.msk.bf16.gmra.mrb[20].mxu1 %vm397_vm3, %v15346_v39 }
 0x3ee   :  { %12065 = vmatprep.mubr.msk.bf16.mxu1 %vm397_vm3, %v2216_v17  ;;  %v15372_v17 = vld [vmem:[#allocation3 + $0x100] sm:$0xff] }
 0x3ef   :  { %v15380_v2 = vpack.c.bf16 %v15374_v33, %v15372_v17 }
 0x3f5   :  { %12066 = vmatmul.mubr.msk.bf16.gmra.mrb[24].mxu1 %vm397_vm3, %v15362_v3 }
 0x3f6   :  { %12069 = vmatprep.mubr.msk.bf16.mxu1 %vm397_vm3, %v15366_v14 }
 0x3fd   :  { %12070 = vmatmul.mubr.msk.bf16.gmra.mrb[28].mxu1 %vm397_vm3, %v15380_v2 }
 0x3fe   :  { %12077 = vmatprep.mubr.msk.bf16.mxu1 %vm397_vm3, %v2526_v9  ;;  %v13618_v9 = vld [vmem:[%s17830_s20 + $0x40] sm:$0xff]  }
 0x405   :  { %12078 = vmatmul.mubr.msk.bf16.vlgmr.msra.gmra.mrb[16].mxu1 %vm397_vm3, %v15396_v47 }
 0x406   :  { %12081 = vmatprep.mubr.msk.bf16.mxu1 %vm397_vm3, %v15401_v10  ;;  %12094 = vmatpush3.bf16.msra.mxu1 %v13616_v30  ;;  %v15422_v30 = vld [vmem:[#allocation3 + $0xc2] sm:$0xff] }
 0x407   :  { %12095 = vmatprep.subr.bf16.mxu1 %v13617_v20  ;;  %v15432_v23 = vpack.c.bf16 %v15424_v21, %v15422_v30 }
 0x409   :  { %17850 = vst [vmem:[#allocation78_spill] sm:$0xff] %v15432_v23 }
 0x40a   :  { %12096 = vmatpush3.bf16.msra.mxu1 %v13617_v20  ;;  %v15428_v20 = vld [vmem:[#allocation3 + $0xf2] sm:$0xff] }
 0x40b   :  { %12113 = vmatprep.subr.bf16.mxu1 %v13618_v9  ;;  %v15436_v38 = vpack.c.bf16 %v15428_v20, %v15426_v1 }
 0x40d   :  { %12082 = vmatmul.mubr.msk.bf16.gmra.mrb[20].mxu1 %vm397_vm3, %v15416_v22  ;;  %17851 = vst [vmem:[#allocation79_spill] sm:$0xff] %v15436_v38 }
 0x40e   :  { %12085 = vmatprep.mubr.msk.bf16.mxu1 %vm397_vm3, %v2530_v11  ;;  %v15442_v11 = vld [vmem:[#allocation3 + $0x102] sm:$0xff] }
 0x40f   :  { %v15448_v54 = vpack.c.bf16 %v15444_v61, %v15442_v11 }
 0x415   :  { %12086 = vmatmul.mubr.msk.bf16.gmra.mrb[24].mxu1 %vm397_vm3, %v15432_v23  ;;  %v13620_v23 = vld [vmem:[%s17830_s20 + $0x50] sm:$0xff]  }
 0x416   :  { %12089 = vmatprep.mubr.msk.bf16.mxu1 %vm397_vm3, %v15436_v38  ;;  %v2701_v38 = vpack.c.bf16 %v15338_v48, %v15322_v59  ;;  %v2705_v48 = vpack.c.bf16 %v15372_v17, %v15358_v40  ;;  %v13621_v40 = vld [vmem:[%s17830_s20 + $0x58] sm:$0xff]  }
 0x41d   :  { %12090 = vmatmul.mubr.msk.bf16.gmra.mrb[28].mxu1 %vm397_vm3, %v15448_v54 }
 0x41e   :  { %12097 = vmatprep.mubr.msk.bf16.mxu1 %vm397_vm3, %v2699_v5  ;;  %v2702_v5 = vpack.c.bf16 %v15463_v31, %v15340_v42  ;;  %v2872_v42 = vpack.c.bf16 %v15237_v58, %v15235_v55  ;;  %v2875_v55 = vpack.c.bf16 %v15493_v45, %v15270_v52  ;;  %v2876_v58 = vpack.c.bf16 %v15282_v4, %v15272_v26  ;;  %v13623_v26 = vld [vmem:[%s17830_s20 + $0x68] sm:$0xff]  }
 0x41f   :  { %v3046_v52 = vpack.c.bf16 %v15390_v28, %v15388_v29  ;;  %v3047_v4 = vpack.c.bf16 %v15408_v0, %v15392_v41  ;;  %v3049_v28 = vpack.c.bf16 %v15422_v30, %v15412_v12  ;;  %v3050_v0 = vpack.c.bf16 %v15426_v1, %v15424_v21  ;;  %v13625_v12 = vld [vmem:[%s17830_s20 + $0x78] sm:$0xff]   ;;  %v13626_v1 = vld [vmem:[%s17830_s20 + $0x80] sm:$0xff]   ;;  %v3210_v21 = vld [vmem:[#allocation3 + $0x90] sm:$0xff] }
 0x420   :  { %v3051_v29 = vpack.c.bf16 %v15442_v11, %v15428_v20 }
 0x425   :  { %12098 = vmatmul.mubr.msk.bf16.vlgmr.msra.gmra.mrb[16].mxu1 %vm397_vm3, %v2700_v36  ;;  %v2704_v36 = vpack.c.bf16 %v15356_v46, %v15354_v15  ;;  %v2873_v46 = vpack.c.bf16 %v15252_v44, %v15239_v34  ;;  %v2874_v15 = vpack.c.bf16 %v15268_v51, %v15254_v16  ;;  %v2878_v34 = vpack.c.bf16 %v15302_v25, %v15288_v63  ;;  %v2871_v44 = vld [vmem:[#allocation3 + $0x121] sm:$0xff]  ;;  %v3383_v63 = vld [vmem:[#allocation3 + $0x91] sm:$0xff] }
 0x426   :  { %12101 = vmatprep.mubr.msk.bf16.mxu1 %vm397_vm3, %v2701_v38  ;;  %12114 = vmatpush3.bf16.msra.mxu1 %v13618_v9  ;;  %v2879_v16 = vpack.c.bf16 %v2871_v44, %v15304_v8  ;;  %v3045_v51 = vpack.c.bf16 %v15386_v7, %v15376_v6  ;;  %v3036_v7 = vld [vmem:[#allocation3 + $0x82] sm:$0xff]  ;;  %v17853_v25 = vld [vmem:[#allocation79_spill] sm:$0xff] }
 0x427   :  { %12115 = vmatprep.subr.bf16.mxu1 %v13619_v35  ;;  %v3048_v6 = vpack.c.bf16 %v3036_v7, %v15410_v27  ;;  %v3044_v27 = vld [vmem:[#allocation3 + $0x122] sm:$0xff] }
 0x428   :  { %v3052_v41 = vpack.c.bf16 %v3044_v27, %v15444_v61  ;;  %v3222_v61 = vpack.c.bf16 %v3210_v21, %v15463_v31 }
 0x42a   :  { %12116 = vmatpush3.bf16.msra.mxu1 %v13619_v35  ;;  %v15477_v35 = vld [vmem:[#allocation3 + $0x120] sm:$0xff] }
 0x42b   :  { %12133 = vmatprep.subr.bf16.mxu1 %v13620_v23  ;;  %v2706_v57 = vpack.c.bf16 %v15477_v35, %v15374_v33  ;;  %v13622_v33 = vld [vmem:[%s17830_s20 + $0x60] sm:$0xff]  }
 0x42d   :  { %12102 = vmatmul.mubr.msk.bf16.gmra.mrb[20].mxu1 %vm397_vm3, %v2702_v5 }
 0x42e   :  { %12105 = vmatprep.mubr.msk.bf16.mxu1 %vm397_vm3, %v2703_v37 }
 0x435   :  { %12106 = vmatmul.mubr.msk.bf16.gmra.mrb[24].mxu1 %vm397_vm3, %v2704_v36 }
 0x436   :  { %12109 = vmatprep.mubr.msk.bf16.mxu1 %vm397_vm3, %v2705_v48 }
 0x43d   :  { %12110 = vmatmul.mubr.msk.bf16.gmra.mrb[28].mxu1 %vm397_vm3, %v2706_v57 }
 0x43e   :  { %12117 = vmatprep.mubr.msk.bf16.mxu1 %vm397_vm3, %v2872_v42 }
 0x445   :  { %12118 = vmatmul.mubr.msk.bf16.vlgmr.msra.gmra.mrb[16].mxu1 %vm397_vm3, %v2873_v46 }
 0x446   :  { %12121 = vmatprep.mubr.msk.bf16.mxu1 %vm397_vm3, %v2874_v15  ;;  %12134 = vmatpush3.bf16.msra.mxu1 %v13620_v23  ;;  %v2877_v23 = vpack.c.bf16 %v15286_v62, %v15284_v60  ;;  %v13624_v60 = vld [vmem:[%s17830_s20 + $0x70] sm:$0xff]   ;;  %v13627_v62 = vld [vmem:[%s17830_s20 + $0x88] sm:$0xff]  }
 0x447   :  { %12135 = vmatprep.subr.bf16.mxu1 %v13621_v40 }
 0x44a   :  { %12136 = vmatpush3.bf16.msra.mxu1 %v13621_v40 }
 0x44b   :  { %12153 = vmatprep.subr.bf16.mxu1 %v13622_v33 }
 0x44d   :  { %12122 = vmatmul.mubr.msk.bf16.gmra.mrb[20].mxu1 %vm397_vm3, %v2875_v55 }
 0x44e   :  { %12125 = vmatprep.mubr.msk.bf16.mxu1 %vm397_vm3, %v2876_v58 }
 0x455   :  { %12126 = vmatmul.mubr.msk.bf16.gmra.mrb[24].mxu1 %vm397_vm3, %v2877_v23 }
 0x456   :  { %12129 = vmatprep.mubr.msk.bf16.mxu1 %vm397_vm3, %v2878_v34 }
 0x45d   :  { %12130 = vmatmul.mubr.msk.bf16.gmra.mrb[28].mxu1 %vm397_vm3, %v2879_v16 }
 0x45e   :  { %12137 = vmatprep.mubr.msk.bf16.mxu1 %vm397_vm3, %v3045_v51 }
 0x465   :  { %12138 = vmatmul.mubr.msk.bf16.vlgmr.msra.gmra.mrb[16].mxu1 %vm397_vm3, %v3046_v52 }
 0x466   :  { %12141 = vmatprep.mubr.msk.bf16.mxu1 %vm397_vm3, %v3047_v4  ;;  %12154 = vmatpush3.bf16.msra.mxu1 %v13622_v33 }
 0x467   :  { %12155 = vmatprep.subr.bf16.mxu1 %v13623_v26 }
 0x46a   :  { %12156 = vmatpush3.bf16.msra.mxu1 %v13623_v26 }
 0x46b   :  { %12173 = vmatprep.subr.bf16.mxu1 %v13624_v60 }
 0x46d   :  { %12142 = vmatmul.mubr.msk.bf16.gmra.mrb[20].mxu1 %vm397_vm3, %v3048_v6 }
 0x46e   :  { %12145 = vmatprep.mubr.msk.bf16.mxu1 %vm397_vm3, %v3049_v28 }
 0x475   :  { %12146 = vmatmul.mubr.msk.bf16.gmra.mrb[24].mxu1 %vm397_vm3, %v3050_v0 }
 0x476   :  { %12149 = vmatprep.mubr.msk.bf16.mxu1 %vm397_vm3, %v3051_v29 }
 0x47d   :  { %12150 = vmatmul.mubr.msk.bf16.gmra.mrb[28].mxu1 %vm397_vm3, %v3052_v41 }
 0x47e   :  { %12157 = vmatprep.mubr.msk.bf16.mxu1 %vm397_vm3, %v15326_v24  ;;  %v3218_v24 = vld [vmem:[#allocation3 + $0x130] sm:$0xff] }
 0x485   :  { %12158 = vmatmul.mubr.msk.bf16.vlgmr.msra.gmra.mrb[16].mxu1 %vm397_vm3, %v15331_v19 }
 0x486   :  { %12161 = vmatprep.mubr.msk.bf16.mxu1 %vm397_vm3, %v15346_v39  ;;  %12174 = vmatpush3.bf16.msra.mxu1 %v13624_v60  ;;  %v3226_v39 = vpack.c.bf16 %v3218_v24, %v15477_v35 }
 0x487   :  { %12175 = vmatprep.subr.bf16.mxu1 %v13625_v12 }
 0x48a   :  { %12176 = vmatpush3.bf16.msra.mxu1 %v13625_v12 }
 0x48b   :  { %12193 = vmatprep.subr.bf16.mxu1 %v13626_v1 }
 0x48d   :  { %12162 = vmatmul.mubr.msk.bf16.gmra.mrb[20].mxu1 %vm397_vm3, %v3222_v61 }
 0x48e   :  { %12165 = vmatprep.mubr.msk.bf16.mxu1 %vm397_vm3, %v15362_v3 }
 0x495   :  { %12166 = vmatmul.mubr.msk.bf16.gmra.mrb[24].mxu1 %vm397_vm3, %v15366_v14 }
 0x496   :  { %12169 = vmatprep.mubr.msk.bf16.mxu1 %vm397_vm3, %v15380_v2  ;;  %v3395_v2 = vpack.c.bf16 %v3383_v63, %v15493_v45 }
 0x49d   :  { %12170 = vmatmul.mubr.msk.bf16.gmra.mrb[28].mxu1 %vm397_vm3, %v3226_v39 }
 0x49e   :  { %12177 = vmatprep.mubr.msk.bf16.mxu1 %vm397_vm3, %v15250_v43  ;;  %v3391_v43 = vld [vmem:[#allocation3 + $0x131] sm:$0xff] }
 0x4a5   :  { %12178 = vmatmul.mubr.msk.bf16.vlgmr.msra.gmra.mrb[16].mxu1 %vm397_vm3, %v15260_v18  ;;  %v3399_v18 = vpack.c.bf16 %v3391_v43, %v2871_v44 }
 0x4a6   :  { %12181 = vmatprep.mubr.msk.bf16.mxu1 %vm397_vm3, %v15276_v56  ;;  %12194 = vmatpush3.bf16.msra.mxu1 %v13626_v1  ;;  %v3556_v56 = vld [vmem:[#allocation3 + $0x92] sm:$0xff] }
 0x4a7   :  { %12195 = vmatprep.subr.bf16.mxu1 %v13627_v62 }
 0x4aa   :  { %12196 = vmatpush3.bf16.msra.mxu1 %v13627_v62 }
 0x4ad   :  { %12182 = vmatmul.mubr.msk.bf16.gmra.mrb[20].mxu1 %vm397_vm3, %v3395_v2 }
 0x4ae   :  { %12185 = vmatprep.mubr.msk.bf16.mxu1 %vm397_vm3, %v15292_v49  ;;  %v3568_v49 = vpack.c.bf16 %v3556_v56, %v3036_v7 }
 0x4b5   :  { %12186 = vmatmul.mubr.msk.bf16.gmra.mrb[24].mxu1 %vm397_vm3, %v15296_v13  ;;  %v17852_v13 = vld [vmem:[#allocation78_spill] sm:$0xff] }
 0x4b6   :  { %12189 = vmatprep.mubr.msk.bf16.mxu1 %vm397_vm3, %v15310_v32  ;;  %v13628_v32 = vld [vmem:[#allocation16 + $0x10] sm:$0xff]  }
 0x4b7   :  { %12213 = vmatprep.subr.bf16.mxu0 %v13628_v32 }
 0x4b8   :  { %12214 = vmatpush3.bf16.msra.mxu0 %v13628_v32 }
 0x4b9   :  { %12215 = vmatprep.subr.bf16.mxu0 %v13629_v53 }
 0x4bc   :  { %12216 = vmatpush3.bf16.msra.mxu0 %v13629_v53 }
 0x4bd   :  { %12190 = vmatmul.mubr.msk.bf16.gmra.mrb[28].mxu1 %vm397_vm3, %v3399_v18 }
 0x4be   :  { %12197 = vmatprep.mubr.msk.bf16.mxu1 %vm397_vm3, %v15396_v47  ;;  %v3564_v47 = vld [vmem:[#allocation3 + $0x132] sm:$0xff] }
 0x4bf   :  { %v3572_v8 = vpack.c.bf16 %v3564_v47, %v3044_v27 }
 0x4c5   :  { %12198 = vmatmul.mubr.msk.bf16.vlgmr.msra.gmra.mrb[16].mxu1 %vm397_vm3, %v15401_v10 }
 0x4c6   :  { %12201 = vmatprep.mubr.msk.bf16.mxu1 %vm397_vm3, %v15416_v22  ;;  %v15581_v22 = vld [vmem:[#allocation16] sm:$0xff]  }
 0x4c7   :  { %12233 = vmatprep.subr.bf16.mxu0 %v15581_v22 }
 0x4cd   :  { %12202 = vmatmul.mubr.msk.bf16.gmra.mrb[20].mxu1 %vm397_vm3, %v3568_v49 }
 0x4ce   :  { %12205 = vmatprep.mubr.msk.bf16.mxu1 %vm397_vm3, %v17852_v13 }
 0x4d5   :  { %12206 = vmatmul.mubr.msk.bf16.gmra.mrb[24].mxu1 %vm397_vm3, %v17853_v25 }
 0x4d6   :  { %12209 = vmatprep.mubr.msk.bf16.mxu1 %vm397_vm3, %v15448_v54 }
 0x4dd   :  { %12210 = vmatmul.mubr.msk.bf16.gmra.mrb[28].mxu1 %vm397_vm3, %v3572_v8 }
 0x598   :  { %v15584_v59 = vpop.f32.mrb[16].mxu1 }
 0x599   :  { %v15586_v19 = vpop.f32.mrb[17].mxu1  ;;  %v3762_v14 = vmul.f32 %v15584_v59, %v15584_v59  ;;  %v3725_v20 = vsel %vm397_vm3, %v15584_v59, 0.0 }
 0x59a   :  { %v3760_v54 = vmul.f32 %v15586_v19, %v15586_v19  ;;  %v15590_v50 = vpop.f32.mrb[18].mxu1  ;;  %v3722_v17 = vsel %vm397_vm3, %v15586_v19, 0.0 }
 0x59b   :  { %v15592_v3 = vpop.f32.mrb[19].mxu1  ;;  %v3763_v11 = vmul.f32 %v15590_v50, %v15590_v50  ;;  %v3779_v36 = vsel %vm397_vm3, %v3762_v14, 0.0  ;;  %v3727_v48 = vsel %vm397_vm3, %v15590_v50, 0.0 }
 0x59c   :  { %v3723_v10 = vsel %vm397_vm3, %v15592_v3, 0.0  ;;  %v3761_v9 = vmul.f32 %v15592_v3, %v15592_v3  ;;  %v3776_v38 = vsel %vm397_vm3, %v3760_v54, 0.0 }
 0x59d   :  { %v3724_v30 = vadd.f32 %v3723_v10, %v3722_v17  ;;  %v3781_v40 = vsel %vm397_vm3, %v3763_v11, 0.0 }
 0x59e   :  { %v3777_v31 = vsel %vm397_vm3, %v3761_v9, 0.0 }
 0x59f   :  { %v3726_v5 = vadd.f32 %v3725_v20, %v3724_v30  ;;  %v3778_v37 = vadd.f32 %v3777_v31, %v3776_v38 }
 0x5a0   :  { %v15611_v35 = vpop.f32.mrb[20].mxu1 }
 0x5a1   :  { %v3780_v57 = vadd.f32 %v3779_v36, %v3778_v37  ;;  %v15613_v42 = vpop.f32.mrb[21].mxu1  ;;  %v3728_v46 = vadd.f32 %v3727_v48, %v3726_v5  ;;  %v3766_v34 = vmul.f32 %v15611_v35, %v15611_v35  ;;  %v3733_v4 = vsel %vm397_vm3, %v15611_v35, 0.0 }
 0x5a2   :  { %v3729_v15 = vsel %vm397_vm3, %v15613_v42, 0.0  ;;  %v3764_v33 = vmul.f32 %v15613_v42, %v15613_v42  ;;  %v15620_v45 = vpop.f32.mrb[22].mxu1 }
 0x5a3   :  { %v3730_v55 = vadd.f32 %v3729_v15, %v3728_v46  ;;  %v3782_v58 = vadd.f32 %v3781_v40, %v3780_v57  ;;  %v15622_v23 = vpop.f32.mrb[23].mxu1  ;;  %v3767_v60 = vmul.f32 %v15620_v45, %v15620_v45  ;;  %v3787_v0 = vsel %vm397_vm3, %v3766_v34, 0.0 }
 0x5a4   :  { %v3783_v44 = vsel %vm397_vm3, %v3764_v33, 0.0  ;;  %v3731_v16 = vsel %vm397_vm3, %v15622_v23, 0.0  ;;  %v3765_v51 = vmul.f32 %v15622_v23, %v15622_v23  ;;  %v3735_v29 = vsel %vm397_vm3, %v15620_v45, 0.0 }
 0x5a5   :  { %v3784_v52 = vadd.f32 %v3783_v44, %v3782_v58  ;;  %v3732_v26 = vadd.f32 %v3731_v16, %v3730_v55  ;;  %v3789_v21 = vsel %vm397_vm3, %v3767_v60, 0.0 }
 0x5a6   :  { %v3785_v7 = vsel %vm397_vm3, %v3765_v51, 0.0 }
 0x5a7   :  { %v3734_v6 = vadd.f32 %v3733_v4, %v3732_v26  ;;  %v3786_v28 = vadd.f32 %v3785_v7, %v3784_v52 }
 0x5a8   :  { %v15639_v27 = vpop.f32.mrb[24].mxu1 }
 0x5a9   :  { %v3788_v41 = vadd.f32 %v3787_v0, %v3786_v28  ;;  %v15641_v12 = vpop.f32.mrb[25].mxu1  ;;  %v3736_v1 = vadd.f32 %v3735_v29, %v3734_v6  ;;  %v3770_v43 = vmul.f32 %v15639_v27, %v15639_v27  ;;  %v3741_v47 = vsel %vm397_vm3, %v15639_v27, 0.0 }
 0x5aa   :  { %v3737_v61 = vsel %vm397_vm3, %v15641_v12, 0.0  ;;  %v3768_v24 = vmul.f32 %v15641_v12, %v15641_v12  ;;  %v15648_v39 = vpop.f32.mrb[26].mxu1 }
 0x5ab   :  { %v3738_v62 = vadd.f32 %v3737_v61, %v3736_v1  ;;  %v3790_v63 = vadd.f32 %v3789_v21, %v3788_v41  ;;  %v15650_v2 = vpop.f32.mrb[27].mxu1  ;;  %v3771_v8 = vmul.f32 %v15648_v39, %v15648_v39  ;;  %v3795_v14 = vsel %vm397_vm3, %v3770_v43, 0.0 }
 0x5ac   :  { %v3791_v18 = vsel %vm397_vm3, %v3768_v24, 0.0  ;;  %v3739_v56 = vsel %vm397_vm3, %v15650_v2, 0.0  ;;  %v3769_v49 = vmul.f32 %v15650_v2, %v15650_v2  ;;  %v3743_v17 = vsel %vm397_vm3, %v15648_v39, 0.0 }
 0x5ad   :  { %v3792_v13 = vadd.f32 %v3791_v18, %v3790_v63  ;;  %v3740_v25 = vadd.f32 %v3739_v56, %v3738_v62  ;;  %v3797_v38 = vsel %vm397_vm3, %v3771_v8, 0.0  ;;  %v3816_v8 = vld [vmem:[#allocation13] sm:$0x1] }
 0x5ae   :  { %v3793_v32 = vsel %vm397_vm3, %v3769_v49, 0.0 }
 0x5af   :  { %v3742_v53 = vadd.f32 %v3741_v47, %v3740_v25  ;;  %v3794_v54 = vadd.f32 %v3793_v32, %v3792_v13 }
 0x5b0   :  { %v15667_v10 = vpop.f32.mrb[28].mxu1 }
 0x5b1   :  { %v3796_v9 = vadd.f32 %v3795_v14, %v3794_v54  ;;  %v15669_v30 = vpop.f32.mrb[29].mxu1  ;;  %v3744_v20 = vadd.f32 %v3743_v17, %v3742_v53  ;;  %v3774_v57 = vmul.f32 %v15667_v10, %v15667_v10  ;;  %v3749_v58 = vsel %vm397_vm3, %v15667_v10, 0.0  ;;  %v3820_v54 = vld [vmem:[#allocation15] sm:$0x1]  ;;  %v17854_v17 = vld [vmem:[#allocation61_spill] sm:$0xff] }
 0x5b2   :  { %v3745_v11 = vsel %vm397_vm3, %v15669_v30, 0.0  ;;  %v3772_v31 = vmul.f32 %v15669_v30, %v15669_v30  ;;  %v15676_v5 = vpop.f32.mrb[30].mxu1 }
 0x5b3   :  { %v3746_v37 = vadd.f32 %v3745_v11, %v3744_v20  ;;  %v3798_v36 = vadd.f32 %v3797_v38, %v3796_v9  ;;  %v3694_v48 = vpop.f32.mrb[31].mxu1  ;;  %v3775_v34 = vmul.f32 %v15676_v5, %v15676_v5  ;;  %v3803_v52 = vsel %vm397_vm3, %v3774_v57, 0.0 }
 0x5b4   :  { %v3799_v46 = vsel %vm397_vm3, %v3772_v31, 0.0  ;;  %v3747_v40 = vsel %vm397_vm3, %v3694_v48, 0.0  ;;  %v3773_v15 = vmul.f32 %v3694_v48, %v3694_v48  ;;  %v3751_v26 = vsel %vm397_vm3, %v15676_v5, 0.0 }
 0x5b5   :  { %v3800_v33 = vadd.f32 %v3799_v46, %v3798_v36  ;;  %v3748_v55 = vadd.f32 %v3747_v40, %v3746_v37  ;;  %v3805_v7 = vsel %vm397_vm3, %v3775_v34, 0.0 }
 0x5b6   :  { %v3801_v44 = vsel %vm397_vm3, %v3773_v15, 0.0 }
 0x5b7   :  { %v3750_v16 = vadd.f32 %v3749_v58, %v3748_v55  ;;  %v3802_v51 = vadd.f32 %v3801_v44, %v3800_v33 }
 0x5b9   :  { %v3752_v4 = vadd.f32 %v3751_v26, %v3750_v16  ;;  %v3804_v60 = vadd.f32 %v3803_v52, %v3802_v51 }
 0x5bb   :  { %v3753_v6 = vrot.slane %v3752_v4, 4  ;;  %v3806_v28 = vadd.f32 %v3805_v7, %v3804_v60 }
 0x5bd   :  { %v3754_v0 = vadd.f32 %v3753_v6, %v3752_v4  ;;  %v3807_v29 = vrot.slane %v3806_v28, 4 }
 0x5bf   :  { %v3755_v41 = vrot.slane %v3754_v0, 2  ;;  %v3808_v1 = vadd.f32 %v3807_v29, %v3806_v28 }
 0x5c1   :  { %v3756_v21 = vadd.f32 %v3755_v41, %v3754_v0  ;;  %v3809_v61 = vrot.slane %v3808_v1, 2 }
 0x5c3   :  { %v3757_v24 = vrot.slane %v3756_v21, 1  ;;  %v3810_v62 = vadd.f32 %v3809_v61, %v3808_v1 }
 0x5c5   :  { %v3758_v63 = vadd.f32 %v3757_v24, %v3756_v21  ;;  %v3811_v43 = vrot.slane %v3810_v62, 1 }
 0x5c7   :  { %v3759_v18 = vmul.f32 0.0078125, %v3758_v63  ;;  %v3812_v56 = vadd.f32 %v3811_v43, %v3810_v62 }
 0x5c9   :  { %v3813_v49 = vmul.f32 0.0078125, %v3812_v56  ;;  %v3814_v13 = vmul.f32 %v3759_v18, %v3759_v18 }
 0x5cb   :  { %v3815_v25 = vsub.f32 %v3813_v49, %v3814_v13 }
 0x5cd   :  { %v3817_v47 = vadd.f32 1e-05, %v3815_v25 }
 0x5cf   :  { %13748 = vrsqrt.f32 %v3817_v47 }
 0x5d9   :  { %v13749_v32 = vpop.eup %13748 }
 0x5da   :  { %v3819_v53 = vmul.f32 %v13749_v32, %v3816_v8 }
 0x5dc   :  { %v3821_v14 = vmul.f32 %v3819_v53, %v3759_v18  ;;  %v3827_v9 = vrot.slane %v3819_v53, %v17854_v17  ;;  %v3959_v18 = vld [vmem:[#allocation3 + $0x1] sm:$0xff]  ;;  %v13631_v53 = vld [vmem:[#allocation16 + $0x8] sm:$0xff]  }
 0x5de   :  { %v3822_v20 = vsub.f32 %v3820_v54, %v3821_v14  ;;  %v3842_v38 = vmul.f32 %v3827_v9, %v3694_v48  ;;  %v3829_v11 = vmul.f32 %v3827_v9, %v15586_v19  ;;  %v3830_v31 = vmul.f32 %v3827_v9, %v15592_v3  ;;  %v13632_v14 = vld [vmem:[#allocation16 + $0x20] sm:$0xff]  }
 0x5df   :  { %v3831_v37 = vmul.f32 %v15584_v59, %v3827_v9  ;;  %v3832_v36 = vmul.f32 %v15590_v50, %v3827_v9  ;;  %v3833_v57 = vmul.f32 %v3827_v9, %v15613_v42  ;;  %v3834_v46 = vmul.f32 %v3827_v9, %v15622_v23 }
 0x5e0   :  { %v3849_v40 = vrot.slane %v3822_v20, %v17854_v17  ;;  %v3835_v15 = vmul.f32 %v15611_v35, %v3827_v9  ;;  %v3837_v33 = vmul.f32 %v3827_v9, %v15641_v12  ;;  %v3838_v48 = vmul.f32 %v3827_v9, %v15650_v2  ;;  %v13637_v17 = vld [vmem:[#allocation16 + $0x48] sm:$0xff]  }
 0x5e1   :  { %v3839_v19 = vmul.f32 %v15639_v27, %v3827_v9  ;;  %v3840_v3 = vmul.f32 %v15648_v39, %v3827_v9  ;;  %v3841_v59 = vmul.f32 %v3827_v9, %v15669_v30  ;;  %v3843_v50 = vmul.f32 %v15667_v10, %v3827_v9 }
 0x5e2   :  { %v3864_v55 = vadd.f32 %v3849_v40, %v3842_v38  ;;  %v3851_v42 = vadd.f32 %v3849_v40, %v3829_v11  ;;  %v3852_v58 = vadd.f32 %v3849_v40, %v3830_v31  ;;  %v3853_v23 = vadd.f32 %v3849_v40, %v3831_v37  ;;  %v3967_v38 = vld [vmem:[#allocation3 + $0xa1] sm:$0xff] }
 0x5e3   :  { %v3854_v34 = vadd.f32 %v3849_v40, %v3832_v36  ;;  %v3855_v44 = vadd.f32 %v3849_v40, %v3833_v57  ;;  %v3856_v16 = vadd.f32 %v3849_v40, %v3834_v46  ;;  %v3857_v35 = vadd.f32 %v3849_v40, %v3835_v15 }
 0x5e4   :  { %v3880_v51 = vmax.f32 %v3864_v55, 0.0  ;;  %v3867_v12 = vmax.f32 %v3851_v42, 0.0  ;;  %v3868_v52 = vmax.f32 %v3852_v58, 0.0  ;;  %v3869_v2 = vmax.f32 %v3853_v23, 0.0 }
 0x5e5   :  { %v3870_v26 = vmax.f32 %v3854_v34, 0.0  ;;  %v3871_v27 = vmax.f32 %v3855_v44, 0.0  ;;  %v3872_v4 = vmax.f32 %v3856_v16, 0.0  ;;  %v3873_v39 = vmax.f32 %v3857_v35, 0.0  ;;  %v13633_v44 = vld [vmem:[#allocation16 + $0x28] sm:$0xff]   ;;  %v13634_v35 = vld [vmem:[#allocation16 + $0x30] sm:$0xff]  }
 0x5e6   :  { %3896 = vst.msk [vmem:[#allocation3 + $0x101] sm:$0xff] %vm397_vm3, %v3880_v51  ;;  %3883 = vst.msk [vmem:[#allocation3 + $0x11] sm:$0xff] %vm397_vm3, %v3867_v12  ;;  %v3859_v10 = vadd.f32 %v3849_v40, %v3837_v33  ;;  %v3860_v30 = vadd.f32 %v3849_v40, %v3838_v48  ;;  %v3861_v60 = vadd.f32 %v3849_v40, %v3839_v19  ;;  %v3935_v19 = vld [vmem:[#allocation3] sm:$0xff] }
 0x5e7   :  { %3884 = vst.msk [vmem:[#allocation3 + $0x21] sm:$0xff] %vm397_vm3, %v3868_v52  ;;  %3885 = vst.msk [vmem:[#allocation3 + $0x31] sm:$0xff] %vm397_vm3, %v3869_v2  ;;  %v3862_v7 = vadd.f32 %v3849_v40, %v3840_v3  ;;  %v3863_v6 = vadd.f32 %v3849_v40, %v3841_v59  ;;  %v3865_v28 = vadd.f32 %v3849_v40, %v3843_v50  ;;  %v3943_v52 = vld [vmem:[#allocation3 + $0xa0] sm:$0xff] }
 0x5e8   :  { %3886 = vst.msk [vmem:[#allocation3 + $0x41] sm:$0xff] %vm397_vm3, %v3870_v26  ;;  %3887 = vst.msk [vmem:[#allocation3 + $0x51] sm:$0xff] %vm397_vm3, %v3871_v27  ;;  %v3836_v0 = vmul.f32 %v15620_v45, %v3827_v9  ;;  %v3844_v29 = vmul.f32 %v15676_v5, %v3827_v9  ;;  %v3875_v41 = vmax.f32 %v3859_v10, 0.0  ;;  %v3876_v1 = vmax.f32 %v3860_v30, 0.0 }
 0x5e9   :  { %3888 = vst.msk [vmem:[#allocation3 + $0x61] sm:$0xff] %vm397_vm3, %v3872_v4  ;;  %3889 = vst.msk [vmem:[#allocation3 + $0x71] sm:$0xff] %vm397_vm3, %v3873_v39  ;;  %v3877_v21 = vmax.f32 %v3861_v60, 0.0  ;;  %v3878_v61 = vmax.f32 %v3862_v7, 0.0  ;;  %v3879_v24 = vmax.f32 %v3863_v6, 0.0  ;;  %v3881_v62 = vmax.f32 %v3865_v28, 0.0 }
 0x5ea   :  { %v3858_v63 = vadd.f32 %v3849_v40, %v3836_v0  ;;  %v3866_v43 = vadd.f32 %v3849_v40, %v3844_v29  ;;  %3891 = vst.msk [vmem:[#allocation3 + $0xb1] sm:$0xff] %vm397_vm3, %v3875_v41  ;;  %3892 = vst.msk [vmem:[#allocation3 + $0xc1] sm:$0xff] %vm397_vm3, %v3876_v1  ;;  %v4249_v0 = vld [vmem:[#allocation3 + $0x2] sm:$0xff] }
 0x5eb   :  { %3893 = vst.msk [vmem:[#allocation3 + $0xd1] sm:$0xff] %vm397_vm3, %v3877_v21  ;;  %3894 = vst.msk [vmem:[#allocation3 + $0xe1] sm:$0xff] %vm397_vm3, %v3878_v61 }
 0x5ec   :  { %3895 = vst.msk [vmem:[#allocation3 + $0xf1] sm:$0xff] %vm397_vm3, %v3879_v24  ;;  %3897 = vst.msk [vmem:[#allocation3 + $0x111] sm:$0xff] %vm397_vm3, %v3881_v62  ;;  %v3874_v45 = vmax.f32 %v3858_v63, 0.0  ;;  %v3882_v5 = vmax.f32 %v3866_v43, 0.0  ;;  %v13635_v43 = vld [vmem:[#allocation16 + $0x38] sm:$0xff]  }
 0x5ed   :  { %v15722_v56 = vld [vmem:[#allocation3 + $0x11] sm:$0xff]  ;;  %v15783_v33 = vld [vmem:[#allocation3 + $0x101] sm:$0xff] }
 0x5ee   :  { %v15724_v49 = vld [vmem:[#allocation3 + $0x21] sm:$0xff]  ;;  %v15726_v13 = vld [vmem:[#allocation3 + $0x31] sm:$0xff]  ;;  %3890 = vst.msk [vmem:[#allocation3 + $0x81] sm:$0xff] %vm397_vm3, %v3874_v45  ;;  %3898 = vst.msk [vmem:[#allocation3 + $0x121] sm:$0xff] %vm397_vm3, %v3882_v5  ;;  %v3975_v25 = vpack.c.bf16 %v15722_v56, %v3959_v18 }
 0x5ef   :  { %v15733_v47 = vpack.c.bf16 %v15726_v13, %v15724_v49  ;;  %v15735_v8 = vld [vmem:[#allocation3 + $0x41] sm:$0xff]  ;;  %v15737_v32 = vld [vmem:[#allocation3 + $0x51] sm:$0xff] }
 0x5f0   :  { %12217 = vmatprep.mubr.msk.bf16.mxu0 %vm397_vm3, %v3975_v25  ;;  %v15742_v54 = vpack.c.bf16 %v15737_v32, %v15735_v8  ;;  %v15749_v9 = vld [vmem:[#allocation3 + $0x61] sm:$0xff]  ;;  %v15751_v20 = vld [vmem:[#allocation3 + $0x71] sm:$0xff] }
 0x5f1   :  { %12218 = vmatmul.mubr.msk.bf16.vlgmr.msra.gmra.mrb[16].mxu0 %vm397_vm3, %v15733_v47  ;;  %v15753_v11 = vld [vmem:[#allocation3 + $0xb1] sm:$0xff]  ;;  %v15757_v31 = vpack.c.bf16 %v15751_v20, %v15749_v9  ;;  %v15797_v55 = vld [vmem:[#allocation3 + $0x20] sm:$0xff] }
 0x5f2   :  { %12221 = vmatprep.mubr.msk.bf16.mxu0 %vm397_vm3, %v15742_v54  ;;  %12234 = vmatpush3.bf16.msra.mxu0 %v15581_v22  ;;  %v3979_v37 = vpack.c.bf16 %v15753_v11, %v3967_v38  ;;  %v15763_v22 = vld [vmem:[#allocation3 + $0xc1] sm:$0xff]  ;;  %v15765_v36 = vld [vmem:[#allocation3 + $0xd1] sm:$0xff] }
 0x5f3   :  { %12235 = vmatprep.subr.bf16.mxu0 %v13631_v53  ;;  %v15767_v57 = vld [vmem:[#allocation3 + $0xe1] sm:$0xff]  ;;  %v15769_v46 = vld [vmem:[#allocation3 + $0xf1] sm:$0xff]  ;;  %v15773_v40 = vpack.c.bf16 %v15765_v36, %v15763_v22 }
 0x5f4   :  { %v15777_v15 = vpack.c.bf16 %v15769_v46, %v15767_v57  ;;  %v15785_v48 = vld [vmem:[#allocation3 + $0x111] sm:$0xff]  ;;  %v15801_v58 = vld [vmem:[#allocation3 + $0x40] sm:$0xff] }
 0x5f5   :  { %v15787_v3 = vld [vmem:[#allocation3 + $0x10] sm:$0xff]  ;;  %v15791_v59 = vpack.c.bf16 %v15785_v48, %v15783_v33  ;;  %v15817_v51 = vld [vmem:[#allocation3 + $0x60] sm:$0xff] }
 0x5f6   :  { %12236 = vmatpush3.bf16.msra.mxu0 %v13631_v53  ;;  %v3951_v50 = vpack.c.bf16 %v15787_v3, %v3935_v19  ;;  %v15799_v42 = vld [vmem:[#allocation3 + $0x30] sm:$0xff]  ;;  %v15831_v4 = vld [vmem:[#allocation3 + $0xc0] sm:$0xff] }
 0x5f7   :  { %12253 = vmatprep.subr.bf16.mxu0 %v13632_v14  ;;  %v15803_v23 = vld [vmem:[#allocation3 + $0x50] sm:$0xff]  ;;  %v15807_v34 = vpack.c.bf16 %v15799_v42, %v15797_v55  ;;  %v15835_v10 = vld [vmem:[#allocation3 + $0xe0] sm:$0xff] }
 0x5f8   :  { %v15811_v16 = vpack.c.bf16 %v15803_v23, %v15801_v58  ;;  %v15819_v12 = vld [vmem:[#allocation3 + $0x70] sm:$0xff]  ;;  %v15851_v6 = vld [vmem:[#allocation3 + $0x100] sm:$0xff] }
 0x5f9   :  { %12222 = vmatmul.mubr.msk.bf16.gmra.mrb[20].mxu0 %vm397_vm3, %v15757_v31  ;;  %v15821_v2 = vld [vmem:[#allocation3 + $0xb0] sm:$0xff]  ;;  %v15825_v26 = vpack.c.bf16 %v15819_v12, %v15817_v51  ;;  %v15865_v21 = vld [vmem:[#allocation3 + $0x22] sm:$0xff] }
 0x5fa   :  { %12225 = vmatprep.mubr.msk.bf16.mxu0 %vm397_vm3, %v3979_v37  ;;  %v3955_v27 = vpack.c.bf16 %v15821_v2, %v3943_v52  ;;  %v15833_v39 = vld [vmem:[#allocation3 + $0xd0] sm:$0xff]  ;;  %v15869_v24 = vld [vmem:[#allocation3 + $0x42] sm:$0xff] }
 0x5fb   :  { %v15837_v30 = vld [vmem:[#allocation3 + $0xf0] sm:$0xff]  ;;  %v15841_v60 = vpack.c.bf16 %v15833_v39, %v15831_v4  ;;  %v15885_v5 = vld [vmem:[#allocation3 + $0x62] sm:$0xff] }
 0x5fc   :  { %v15845_v7 = vpack.c.bf16 %v15837_v30, %v15835_v10  ;;  %v15853_v28 = vld [vmem:[#allocation3 + $0x110] sm:$0xff]  ;;  %v4257_v53 = vld [vmem:[#allocation3 + $0xa2] sm:$0xff] }
 0x5fd   :  { %v15855_v29 = vld [vmem:[#allocation3 + $0x12] sm:$0xff]  ;;  %v15859_v41 = vpack.c.bf16 %v15853_v28, %v15851_v6  ;;  %v15899_v19 = vld [vmem:[#allocation3 + $0xc2] sm:$0xff] }
 0x5fe   :  { %v4265_v1 = vpack.c.bf16 %v15855_v29, %v4249_v0  ;;  %v15867_v61 = vld [vmem:[#allocation3 + $0x32] sm:$0xff]  ;;  %v15919_v0 = vld [vmem:[#allocation3 + $0x102] sm:$0xff] }
 0x5ff   :  { %v15871_v62 = vld [vmem:[#allocation3 + $0x52] sm:$0xff]  ;;  %v15875_v63 = vpack.c.bf16 %v15867_v61, %v15865_v21 }
 0x600   :  { %v15879_v18 = vpack.c.bf16 %v15871_v62, %v15869_v24  ;;  %v13636_v45 = vld [vmem:[#allocation16 + $0x40] sm:$0xff]  }
 0x601   :  { %12226 = vmatmul.mubr.msk.bf16.gmra.mrb[24].mxu0 %vm397_vm3, %v15773_v40  ;;  %v15887_v25 = vld [vmem:[#allocation3 + $0x72] sm:$0xff] }
 0x602   :  { %12229 = vmatprep.mubr.msk.bf16.mxu0 %vm397_vm3, %v15777_v15  ;;  %v15893_v38 = vpack.c.bf16 %v15887_v25, %v15885_v5 }
 0x609   :  { %12230 = vmatmul.mubr.msk.bf16.gmra.mrb[28].mxu0 %vm397_vm3, %v15791_v59 }
 0x60a   :  { %12237 = vmatprep.mubr.msk.bf16.mxu0 %vm397_vm3, %v3951_v50  ;;  %v15901_v50 = vld [vmem:[#allocation3 + $0xd2] sm:$0xff] }
 0x60b   :  { %v15909_v52 = vpack.c.bf16 %v15901_v50, %v15899_v19 }
 0x60d   :  { %17855 = vst [vmem:[#allocation78_spill] sm:$0xff] %v15909_v52 }
 0x611   :  { %12238 = vmatmul.mubr.msk.bf16.vlgmr.msra.gmra.mrb[16].mxu0 %vm397_vm3, %v15807_v34 }
 0x612   :  { %12241 = vmatprep.mubr.msk.bf16.mxu0 %vm397_vm3, %v15811_v16  ;;  %12254 = vmatpush3.bf16.msra.mxu0 %v13632_v14  ;;  %v15889_v14 = vld [vmem:[#allocation3 + $0xb2] sm:$0xff] }
 0x613   :  { %12255 = vmatprep.subr.bf16.mxu0 %v13633_v44  ;;  %v4269_v37 = vpack.c.bf16 %v15889_v14, %v4257_v53  ;;  %v4438_v53 = vpack.c.bf16 %v15797_v55, %v15787_v3  ;;  %v15938_v3 = vld [vmem:[#allocation3 + $0x80] sm:$0xff] }
 0x614   :  { %v4441_v55 = vpack.c.bf16 %v15938_v3, %v15819_v12  ;;  %v4611_v12 = vpack.c.bf16 %v15724_v49, %v15722_v56  ;;  %v4615_v49 = vpack.c.bf16 %v15763_v22, %v15753_v11  ;;  %v4785_v11 = vpack.c.bf16 %v15869_v24, %v15867_v61  ;;  %v13641_v22 = vld [vmem:[#allocation16 + $0x68] sm:$0xff]   ;;  %v13643_v61 = vld [vmem:[#allocation16 + $0x78] sm:$0xff]   ;;  %v13644_v24 = vld [vmem:[#allocation16 + $0x80] sm:$0xff]  }
 0x616   :  { %12256 = vmatpush3.bf16.msra.mxu0 %v13633_v44  ;;  %v15903_v44 = vld [vmem:[#allocation3 + $0xe2] sm:$0xff] }
 0x617   :  { %12273 = vmatprep.subr.bf16.mxu0 %v13634_v35 }
 0x619   :  { %12242 = vmatmul.mubr.msk.bf16.gmra.mrb[20].mxu0 %vm397_vm3, %v15825_v26 }
 0x61a   :  { %12245 = vmatprep.mubr.msk.bf16.mxu0 %vm397_vm3, %v3955_v27 }
 0x621   :  { %12246 = vmatmul.mubr.msk.bf16.gmra.mrb[24].mxu0 %vm397_vm3, %v15841_v60 }
 0x622   :  { %12249 = vmatprep.mubr.msk.bf16.mxu0 %vm397_vm3, %v15845_v7 }
 0x629   :  { %12250 = vmatmul.mubr.msk.bf16.gmra.mrb[28].mxu0 %vm397_vm3, %v15859_v41 }
 0x62a   :  { %12257 = vmatprep.mubr.msk.bf16.mxu0 %vm397_vm3, %v4265_v1  ;;  %v15921_v1 = vld [vmem:[#allocation3 + $0x112] sm:$0xff] }
 0x631   :  { %12258 = vmatmul.mubr.msk.bf16.vlgmr.msra.gmra.mrb[16].mxu0 %vm397_vm3, %v15875_v63 }
 0x632   :  { %12261 = vmatprep.mubr.msk.bf16.mxu0 %vm397_vm3, %v15879_v18  ;;  %12274 = vmatpush3.bf16.msra.mxu0 %v13634_v35  ;;  %v15905_v35 = vld [vmem:[#allocation3 + $0xf2] sm:$0xff] }
 0x633   :  { %12275 = vmatprep.subr.bf16.mxu0 %v13635_v43  ;;  %v15913_v27 = vpack.c.bf16 %v15905_v35, %v15903_v44 }
 0x635   :  { %17856 = vst [vmem:[#allocation79_spill] sm:$0xff] %v15913_v27 }
 0x636   :  { %12276 = vmatpush3.bf16.msra.mxu0 %v13635_v43  ;;  %v15925_v43 = vpack.c.bf16 %v15921_v1, %v15919_v0 }
 0x637   :  { %12293 = vmatprep.subr.bf16.mxu0 %v13636_v45 }
 0x639   :  { %12262 = vmatmul.mubr.msk.bf16.gmra.mrb[20].mxu0 %vm397_vm3, %v15893_v38 }
 0x63a   :  { %12265 = vmatprep.mubr.msk.bf16.mxu0 %vm397_vm3, %v4269_v37  ;;  %v4439_v37 = vpack.c.bf16 %v15801_v58, %v15799_v42  ;;  %v4442_v42 = vpack.c.bf16 %v15831_v4, %v15821_v2  ;;  %v4443_v58 = vpack.c.bf16 %v15835_v10, %v15833_v39  ;;  %v4612_v2 = vpack.c.bf16 %v15735_v8, %v15726_v13  ;;  %v13639_v4 = vld [vmem:[#allocation16 + $0x58] sm:$0xff]   ;;  %v13640_v10 = vld [vmem:[#allocation16 + $0x60] sm:$0xff]  }
 0x63b   :  { %v4613_v39 = vpack.c.bf16 %v15749_v9, %v15737_v32  ;;  %v4616_v13 = vpack.c.bf16 %v15767_v57, %v15765_v36  ;;  %v4617_v8 = vpack.c.bf16 %v15783_v33, %v15769_v46  ;;  %v4610_v32 = vld [vmem:[#allocation3 + $0x121] sm:$0xff]  ;;  %v4786_v36 = vpack.c.bf16 %v15885_v5, %v15871_v62  ;;  %v4948_v62 = vld [vmem:[#allocation3 + $0x90] sm:$0xff] }
 0x63c   :  { %v4618_v9 = vpack.c.bf16 %v4610_v32, %v15785_v48  ;;  %v13642_v57 = vld [vmem:[#allocation16 + $0x70] sm:$0xff]   ;;  %v4788_v48 = vpack.c.bf16 %v15899_v19, %v15889_v14 }
 0x63d   :  { %v4775_v46 = vld [vmem:[#allocation3 + $0x82] sm:$0xff] }
 0x63e   :  { %v4787_v33 = vpack.c.bf16 %v4775_v46, %v15887_v25  ;;  %v13647_v5 = vld [vmem:[#allocation21 + $0x18] sm:$0xff]   ;;  %v16049_v25 = vld [vmem:[#allocation21] sm:$0xff]  }
 0x641   :  { %12266 = vmatmul.mubr.msk.bf16.gmra.mrb[24].mxu0 %vm397_vm3, %v15909_v52  ;;  %v13638_v52 = vld [vmem:[#allocation16 + $0x50] sm:$0xff]  }
 0x642   :  { %12269 = vmatprep.mubr.msk.bf16.mxu0 %vm397_vm3, %v15913_v27  ;;  %v4440_v27 = vpack.c.bf16 %v15817_v51, %v15803_v23  ;;  %v4444_v23 = vpack.c.bf16 %v15851_v6, %v15837_v30  ;;  %v15966_v30 = vld [vmem:[#allocation3 + $0x81] sm:$0xff]  ;;  %v4789_v6 = vpack.c.bf16 %v15903_v44, %v15901_v50 }
 0x643   :  { %v4614_v56 = vpack.c.bf16 %v15966_v30, %v15751_v20  ;;  %v4784_v20 = vpack.c.bf16 %v15865_v21, %v15855_v29  ;;  %v4783_v29 = vld [vmem:[#allocation3 + $0x122] sm:$0xff] }
 0x644   :  { %v4791_v21 = vpack.c.bf16 %v4783_v29, %v15921_v1 }
 0x649   :  { %12270 = vmatmul.mubr.msk.bf16.gmra.mrb[28].mxu0 %vm397_vm3, %v15925_v43 }
 0x64a   :  { %12277 = vmatprep.mubr.msk.bf16.mxu0 %vm397_vm3, %v4438_v53 }
 0x651   :  { %12278 = vmatmul.mubr.msk.bf16.vlgmr.msra.gmra.mrb[16].mxu0 %vm397_vm3, %v4439_v37 }
 0x652   :  { %12281 = vmatprep.mubr.msk.bf16.mxu0 %vm397_vm3, %v4440_v27  ;;  %12294 = vmatpush3.bf16.msra.mxu0 %v13636_v45  ;;  %v4960_v45 = vpack.c.bf16 %v4948_v62, %v15938_v3 }
 0x653   :  { %12295 = vmatprep.subr.bf16.mxu0 %v13637_v17 }
 0x656   :  { %12296 = vmatpush3.bf16.msra.mxu0 %v13637_v17  ;;  %v15952_v17 = vld [vmem:[#allocation3 + $0x120] sm:$0xff] }
 0x657   :  { %12313 = vmatprep.subr.bf16.mxu0 %v13638_v52  ;;  %v4445_v51 = vpack.c.bf16 %v15952_v17, %v15853_v28  ;;  %v4790_v28 = vpack.c.bf16 %v15919_v0, %v15905_v35 }
 0x659   :  { %12282 = vmatmul.mubr.msk.bf16.gmra.mrb[20].mxu0 %vm397_vm3, %v4441_v55 }
 0x65a   :  { %12285 = vmatprep.mubr.msk.bf16.mxu0 %vm397_vm3, %v4442_v42 }
 0x661   :  { %12286 = vmatmul.mubr.msk.bf16.gmra.mrb[24].mxu0 %vm397_vm3, %v4443_v58 }
 0x662   :  { %12289 = vmatprep.mubr.msk.bf16.mxu0 %vm397_vm3, %v4444_v23 }
 0x669   :  { %12290 = vmatmul.mubr.msk.bf16.gmra.mrb[28].mxu0 %vm397_vm3, %v4445_v51 }
 0x66a   :  { %12297 = vmatprep.mubr.msk.bf16.mxu0 %vm397_vm3, %v4611_v12 }
 0x671   :  { %12298 = vmatmul.mubr.msk.bf16.vlgmr.msra.gmra.mrb[16].mxu0 %vm397_vm3, %v4612_v2 }
 0x672   :  { %12301 = vmatprep.mubr.msk.bf16.mxu0 %vm397_vm3, %v4613_v39  ;;  %12314 = vmatpush3.bf16.msra.mxu0 %v13638_v52 }
 0x673   :  { %12315 = vmatprep.subr.bf16.mxu0 %v13639_v4 }
 0x676   :  { %12316 = vmatpush3.bf16.msra.mxu0 %v13639_v4 }
 0x677   :  { %12333 = vmatprep.subr.bf16.mxu0 %v13640_v10 }
 0x679   :  { %12302 = vmatmul.mubr.msk.bf16.gmra.mrb[20].mxu0 %vm397_vm3, %v4614_v56 }
 0x67a   :  { %12305 = vmatprep.mubr.msk.bf16.mxu0 %vm397_vm3, %v4615_v49 }
 0x681   :  { %12306 = vmatmul.mubr.msk.bf16.gmra.mrb[24].mxu0 %vm397_vm3, %v4616_v13 }
 0x682   :  { %12309 = vmatprep.mubr.msk.bf16.mxu0 %vm397_vm3, %v4617_v8 }
 0x689   :  { %12310 = vmatmul.mubr.msk.bf16.gmra.mrb[28].mxu0 %vm397_vm3, %v4618_v9 }
 0x68a   :  { %12317 = vmatprep.mubr.msk.bf16.mxu0 %vm397_vm3, %v4784_v20 }
 0x691   :  { %12318 = vmatmul.mubr.msk.bf16.vlgmr.msra.gmra.mrb[16].mxu0 %vm397_vm3, %v4785_v11 }
 0x692   :  { %12321 = vmatprep.mubr.msk.bf16.mxu0 %vm397_vm3, %v4786_v36  ;;  %12334 = vmatpush3.bf16.msra.mxu0 %v13640_v10 }
 0x693   :  { %12335 = vmatprep.subr.bf16.mxu0 %v13641_v22 }
 0x696   :  { %12336 = vmatpush3.bf16.msra.mxu0 %v13641_v22 }
 0x697   :  { %12353 = vmatprep.subr.bf16.mxu0 %v13642_v57 }
 0x699   :  { %12322 = vmatmul.mubr.msk.bf16.gmra.mrb[20].mxu0 %vm397_vm3, %v4787_v33 }
 0x69a   :  { %12325 = vmatprep.mubr.msk.bf16.mxu0 %vm397_vm3, %v4788_v48 }
 0x6a1   :  { %12326 = vmatmul.mubr.msk.bf16.gmra.mrb[24].mxu0 %vm397_vm3, %v4789_v6 }
 0x6a2   :  { %12329 = vmatprep.mubr.msk.bf16.mxu0 %vm397_vm3, %v4790_v28 }
 0x6a9   :  { %12330 = vmatmul.mubr.msk.bf16.gmra.mrb[28].mxu0 %vm397_vm3, %v4791_v21 }
 0x6aa   :  { %12337 = vmatprep.mubr.msk.bf16.mxu0 %vm397_vm3, %v15807_v34  ;;  %v4956_v34 = vld [vmem:[#allocation3 + $0x130] sm:$0xff] }
 0x6b1   :  { %12338 = vmatmul.mubr.msk.bf16.vlgmr.msra.gmra.mrb[16].mxu0 %vm397_vm3, %v15811_v16  ;;  %v4964_v16 = vpack.c.bf16 %v4956_v34, %v15952_v17 }
 0x6b2   :  { %12341 = vmatprep.mubr.msk.bf16.mxu0 %vm397_vm3, %v15825_v26  ;;  %12354 = vmatpush3.bf16.msra.mxu0 %v13642_v57  ;;  %v13645_v26 = vld [vmem:[#allocation16 + $0x88] sm:$0xff]  }
 0x6b3   :  { %12355 = vmatprep.subr.bf16.mxu0 %v13643_v61 }
 0x6b6   :  { %12356 = vmatpush3.bf16.msra.mxu0 %v13643_v61 }
 0x6b7   :  { %12373 = vmatprep.subr.bf16.mxu0 %v13644_v24 }
 0x6b9   :  { %12342 = vmatmul.mubr.msk.bf16.gmra.mrb[20].mxu0 %vm397_vm3, %v4960_v45 }
 0x6ba   :  { %12345 = vmatprep.mubr.msk.bf16.mxu0 %vm397_vm3, %v15841_v60  ;;  %v5121_v60 = vld [vmem:[#allocation3 + $0x91] sm:$0xff] }
 0x6c1   :  { %12346 = vmatmul.mubr.msk.bf16.gmra.mrb[24].mxu0 %vm397_vm3, %v15845_v7  ;;  %v5133_v7 = vpack.c.bf16 %v5121_v60, %v15966_v30 }
 0x6c2   :  { %12349 = vmatprep.mubr.msk.bf16.mxu0 %vm397_vm3, %v15859_v41  ;;  %v5302_v41 = vld [vmem:[#allocation3 + $0x132] sm:$0xff] }
 0x6c9   :  { %12350 = vmatmul.mubr.msk.bf16.gmra.mrb[28].mxu0 %vm397_vm3, %v4964_v16 }
 0x6ca   :  { %12357 = vmatprep.mubr.msk.bf16.mxu0 %vm397_vm3, %v15733_v47  ;;  %v5129_v47 = vld [vmem:[#allocation3 + $0x131] sm:$0xff] }
 0x6d1   :  { %12358 = vmatmul.mubr.msk.bf16.vlgmr.msra.gmra.mrb[16].mxu0 %vm397_vm3, %v15742_v54  ;;  %v5137_v54 = vpack.c.bf16 %v5129_v47, %v4610_v32 }
 0x6d2   :  { %12361 = vmatprep.mubr.msk.bf16.mxu0 %vm397_vm3, %v15757_v31  ;;  %12374 = vmatpush3.bf16.msra.mxu0 %v13644_v24  ;;  %v5294_v31 = vld [vmem:[#allocation3 + $0x92] sm:$0xff] }
 0x6d3   :  { %12375 = vmatprep.subr.bf16.mxu0 %v13645_v26 }
 0x6d6   :  { %12376 = vmatpush3.bf16.msra.mxu0 %v13645_v26 }
 0x6d9   :  { %12362 = vmatmul.mubr.msk.bf16.gmra.mrb[20].mxu0 %vm397_vm3, %v5133_v7 }
 0x6da   :  { %12365 = vmatprep.mubr.msk.bf16.mxu0 %vm397_vm3, %v15773_v40  ;;  %v5306_v40 = vpack.c.bf16 %v5294_v31, %v4775_v46 }
 0x6e1   :  { %12366 = vmatmul.mubr.msk.bf16.gmra.mrb[24].mxu0 %vm397_vm3, %v15777_v15  ;;  %v17857_v15 = vld [vmem:[#allocation78_spill] sm:$0xff] }
 0x6e2   :  { %12369 = vmatprep.mubr.msk.bf16.mxu0 %vm397_vm3, %v15791_v59  ;;  %v17858_v59 = vld [vmem:[#allocation79_spill] sm:$0xff] }
 0x6e9   :  { %12370 = vmatmul.mubr.msk.bf16.gmra.mrb[28].mxu0 %vm397_vm3, %v5137_v54 }
 0x6ea   :  { %12377 = vmatprep.mubr.msk.bf16.mxu0 %vm397_vm3, %v15875_v63  ;;  %v5310_v63 = vpack.c.bf16 %v5302_v41, %v4783_v29 }
 0x6f1   :  { %12378 = vmatmul.mubr.msk.bf16.vlgmr.msra.gmra.mrb[16].mxu0 %vm397_vm3, %v15879_v18  ;;  %v13646_v18 = vld [vmem:[#allocation21 + $0x10] sm:$0xff]  }
 0x6f2   :  { %12381 = vmatprep.mubr.msk.bf16.mxu0 %vm397_vm3, %v15893_v38  ;;  %12393 = vmatprep.subr.bf16.mxu1 %v13646_v18 }
 0x6f3   :  { %12394 = vmatpush3.bf16.msra.mxu1 %v13646_v18 }
 0x6f4   :  { %12395 = vmatprep.subr.bf16.mxu1 %v13647_v5 }
 0x6f7   :  { %12396 = vmatpush3.bf16.msra.mxu1 %v13647_v5 }
 0x6f8   :  { %12413 = vmatprep.subr.bf16.mxu1 %v16049_v25 }
 0x6f9   :  { %12382 = vmatmul.mubr.msk.bf16.gmra.mrb[20].mxu0 %vm397_vm3, %v5306_v40 }
 0x6fa   :  { %12385 = vmatprep.mubr.msk.bf16.mxu0 %vm397_vm3, %v17857_v15 }
 0x701   :  { %12386 = vmatmul.mubr.msk.bf16.gmra.mrb[24].mxu0 %vm397_vm3, %v17858_v59 }
 0x702   :  { %12389 = vmatprep.mubr.msk.bf16.mxu0 %vm397_vm3, %v15925_v43 }
 0x709   :  { %12390 = vmatmul.mubr.msk.bf16.gmra.mrb[28].mxu0 %vm397_vm3, %v5310_v63 }
 0x7c4   :  { %v16052_v14 = vpop.f32.mrb[16].mxu0 }
 0x7c5   :  { %v16054_v38 = vpop.f32.mrb[17].mxu0  ;;  %v5500_v35 = vmul.f32 %v16052_v14, %v16052_v14  ;;  %v5463_v43 = vsel %vm397_vm3, %v16052_v14, 0.0 }
 0x7c6   :  { %v5498_v19 = vmul.f32 %v16054_v38, %v16054_v38  ;;  %v16058_v50 = vpop.f32.mrb[18].mxu0  ;;  %v5460_v52 = vsel %vm397_vm3, %v16054_v38, 0.0 }
 0x7c7   :  { %v16060_v44 = vpop.f32.mrb[19].mxu0  ;;  %v5501_v37 = vmul.f32 %v16058_v50, %v16058_v50  ;;  %v5517_v58 = vsel %vm397_vm3, %v5500_v35, 0.0  ;;  %v5465_v23 = vsel %vm397_vm3, %v16058_v50, 0.0 }
 0x7c8   :  { %v5461_v27 = vsel %vm397_vm3, %v16060_v44, 0.0  ;;  %v5499_v0 = vmul.f32 %v16060_v44, %v16060_v44  ;;  %v5514_v53 = vsel %vm397_vm3, %v5498_v19, 0.0 }
 0x7c9   :  { %v5462_v1 = vadd.f32 %v5461_v27, %v5460_v52  ;;  %v5519_v4 = vsel %vm397_vm3, %v5501_v37, 0.0 }
 0x7ca   :  { %v5515_v3 = vsel %vm397_vm3, %v5499_v0, 0.0 }
 0x7cb   :  { %v5464_v55 = vadd.f32 %v5463_v43, %v5462_v1  ;;  %v5516_v42 = vadd.f32 %v5515_v3, %v5514_v53 }
 0x7cc   :  { %v16079_v17 = vpop.f32.mrb[20].mxu0 }
 0x7cd   :  { %v5518_v51 = vadd.f32 %v5517_v58, %v5516_v42  ;;  %v16081_v12 = vpop.f32.mrb[21].mxu0  ;;  %v5466_v2 = vadd.f32 %v5465_v23, %v5464_v55  ;;  %v5504_v8 = vmul.f32 %v16079_v17, %v16079_v17  ;;  %v5471_v36 = vsel %vm397_vm3, %v16079_v17, 0.0 }
 0x7ce   :  { %v5467_v39 = vsel %vm397_vm3, %v16081_v12, 0.0  ;;  %v5502_v10 = vmul.f32 %v16081_v12, %v16081_v12  ;;  %v16088_v30 = vpop.f32.mrb[22].mxu0 }
 0x7cf   :  { %v5468_v56 = vadd.f32 %v5467_v39, %v5466_v2  ;;  %v5520_v49 = vadd.f32 %v5519_v4, %v5518_v51  ;;  %v16090_v13 = vpop.f32.mrb[23].mxu0  ;;  %v5505_v57 = vmul.f32 %v16088_v30, %v16088_v30  ;;  %v5525_v6 = vsel %vm397_vm3, %v5504_v8, 0.0 }
 0x7d0   :  { %v5521_v32 = vsel %vm397_vm3, %v5502_v10, 0.0  ;;  %v5469_v9 = vsel %vm397_vm3, %v16090_v13, 0.0  ;;  %v5503_v20 = vmul.f32 %v16090_v13, %v16090_v13  ;;  %v5473_v28 = vsel %vm397_vm3, %v16088_v30, 0.0 }
 0x7d1   :  { %v5522_v11 = vadd.f32 %v5521_v32, %v5520_v49  ;;  %v5470_v22 = vadd.f32 %v5469_v9, %v5468_v56  ;;  %v5527_v62 = vsel %vm397_vm3, %v5505_v57, 0.0 }
 0x7d2   :  { %v5523_v46 = vsel %vm397_vm3, %v5503_v20, 0.0 }
 0x7d3   :  { %v5472_v33 = vadd.f32 %v5471_v36, %v5470_v22  ;;  %v5524_v48 = vadd.f32 %v5523_v46, %v5522_v11 }
 0x7d4   :  { %v16107_v29 = vpop.f32.mrb[24].mxu0 }
 0x7d5   :  { %v5526_v21 = vadd.f32 %v5525_v6, %v5524_v48  ;;  %v16109_v61 = vpop.f32.mrb[25].mxu0  ;;  %v5474_v24 = vadd.f32 %v5473_v28, %v5472_v33  ;;  %v5508_v47 = vmul.f32 %v16107_v29, %v16107_v29  ;;  %v5479_v41 = vsel %vm397_vm3, %v16107_v29, 0.0 }
 0x7d6   :  { %v5475_v45 = vsel %vm397_vm3, %v16109_v61, 0.0  ;;  %v5506_v34 = vmul.f32 %v16109_v61, %v16109_v61  ;;  %v16116_v16 = vpop.f32.mrb[26].mxu0 }
 0x7d7   :  { %v5476_v26 = vadd.f32 %v5475_v45, %v5474_v24  ;;  %v5528_v60 = vadd.f32 %v5527_v62, %v5526_v21  ;;  %v16118_v7 = vpop.f32.mrb[27].mxu0  ;;  %v5509_v63 = vmul.f32 %v16116_v16, %v16116_v16  ;;  %v5533_v35 = vsel %vm397_vm3, %v5508_v47, 0.0 }
 0x7d8   :  { %v5529_v54 = vsel %vm397_vm3, %v5506_v34, 0.0  ;;  %v5477_v31 = vsel %vm397_vm3, %v16118_v7, 0.0  ;;  %v5507_v40 = vmul.f32 %v16118_v7, %v16118_v7  ;;  %v5481_v52 = vsel %vm397_vm3, %v16116_v16, 0.0 }
 0x7d9   :  { %v5530_v15 = vadd.f32 %v5529_v54, %v5528_v60  ;;  %v5478_v59 = vadd.f32 %v5477_v31, %v5476_v26  ;;  %v5535_v53 = vsel %vm397_vm3, %v5509_v63, 0.0  ;;  %v5554_v63 = vld [vmem:[#allocation18] sm:$0x1] }
 0x7da   :  { %v5531_v18 = vsel %vm397_vm3, %v5507_v40, 0.0 }
 0x7db   :  { %v5480_v5 = vadd.f32 %v5479_v41, %v5478_v59  ;;  %v5532_v19 = vadd.f32 %v5531_v18, %v5530_v15 }
 0x7dc   :  { %v16135_v27 = vpop.f32.mrb[28].mxu0 }
 0x7dd   :  { %v5534_v0 = vadd.f32 %v5533_v35, %v5532_v19  ;;  %v5429_v1 = vpop.f32.mrb[29].mxu0  ;;  %v5482_v43 = vadd.f32 %v5481_v52, %v5480_v5  ;;  %v5512_v51 = vmul.f32 %v16135_v27, %v16135_v27  ;;  %v5487_v49 = vsel %vm397_vm3, %v16135_v27, 0.0  ;;  %v5558_v19 = vld [vmem:[#allocation19] sm:$0x1] }
 0x7de   :  { %v5483_v37 = vsel %vm397_vm3, %v5429_v1, 0.0  ;;  %v5510_v3 = vmul.f32 %v5429_v1, %v5429_v1  ;;  %v12392_v55 = vpop.f32.mrb[30].mxu0  ;;  %v17859_v52 = vld [vmem:[#allocation61_spill] sm:$0xff] }
 0x7df   :  { %v5484_v42 = vadd.f32 %v5483_v37, %v5482_v43  ;;  %v5536_v58 = vadd.f32 %v5535_v53, %v5534_v0  ;;  %v5432_v23 = vpop.f32.mrb[31].mxu0  ;;  %v5513_v8 = vmul.f32 %v12392_v55, %v12392_v55  ;;  %v5541_v11 = vsel %vm397_vm3, %v5512_v51, 0.0 }
 0x7e0   :  { %v5537_v2 = vsel %vm397_vm3, %v5510_v3, 0.0  ;;  %v5485_v4 = vsel %vm397_vm3, %v5432_v23, 0.0  ;;  %v5511_v39 = vmul.f32 %v5432_v23, %v5432_v23  ;;  %v5489_v22 = vsel %vm397_vm3, %v12392_v55, 0.0 }
 0x7e1   :  { %v5538_v10 = vadd.f32 %v5537_v2, %v5536_v58  ;;  %v5486_v56 = vadd.f32 %v5485_v4, %v5484_v42  ;;  %v5543_v46 = vsel %vm397_vm3, %v5513_v8, 0.0 }
 0x7e2   :  { %v5539_v32 = vsel %vm397_vm3, %v5511_v39, 0.0 }
 0x7e3   :  { %v5488_v9 = vadd.f32 %v5487_v49, %v5486_v56  ;;  %v5540_v20 = vadd.f32 %v5539_v32, %v5538_v10 }
 0x7e5   :  { %v5490_v36 = vadd.f32 %v5489_v22, %v5488_v9  ;;  %v5542_v57 = vadd.f32 %v5541_v11, %v5540_v20  ;;  %v17860_v22 = vld [vmem:[#allocation64_spill] sm:$0xff] }
 0x7e7   :  { %v5491_v33 = vrot.slane %v5490_v36, 4  ;;  %v5544_v48 = vadd.f32 %v5543_v46, %v5542_v57 }
 0x7e9   :  { %v5492_v6 = vadd.f32 %v5491_v33, %v5490_v36  ;;  %v5545_v28 = vrot.slane %v5544_v48, 4  ;;  %v17861_v36 = vmax.f32 %v17860_v22, 0.0 }
 0x7eb   :  { %v5493_v21 = vrot.slane %v5492_v6, 2  ;;  %v5546_v24 = vadd.f32 %v5545_v28, %v5544_v48  ;;  %v17869_v48 = vld [vmem:[#allocation67_spill] sm:$0xff] }
 0x7ed   :  { %v5494_v62 = vadd.f32 %v5493_v21, %v5492_v6  ;;  %v5547_v45 = vrot.slane %v5546_v24, 2  ;;  %v17870_v6 = vmax.f32 %v17869_v48, 0.0  ;;  %v17872_v21 = vld [vmem:[#allocation68_spill] sm:$0xff] }
 0x7ef   :  { %v5495_v34 = vrot.slane %v5494_v62, 1  ;;  %v5548_v26 = vadd.f32 %v5547_v45, %v5546_v24  ;;  %v17873_v24 = vmax.f32 %v17872_v21, 0.0  ;;  %v17875_v45 = vld [vmem:[#allocation69_spill] sm:$0xff] }
 0x7f0   :  { %v5713_v21 = vld [vmem:[#allocation3 + $0x1] sm:$0xff] }
 0x7f1   :  { %v5496_v60 = vadd.f32 %v5495_v34, %v5494_v62  ;;  %v5549_v47 = vrot.slane %v5548_v26, 1  ;;  %v17876_v34 = vmax.f32 %v17875_v45, 0.0 }
 0x7f3   :  { %v5497_v54 = vmul.f32 0.0078125, %v5496_v60  ;;  %v5550_v31 = vadd.f32 %v5549_v47, %v5548_v26  ;;  %v17878_v60 = vld [vmem:[#allocation71_spill] sm:$0xff] }
 0x7f4   :  { %v17879_v47 = vmax.f32 %v17878_v60, 0.0 }
 0x7f5   :  { %v5551_v40 = vmul.f32 0.0078125, %v5550_v31  ;;  %v5552_v15 = vmul.f32 %v5497_v54, %v5497_v54  ;;  %v17881_v31 = vld [vmem:[#allocation72_spill] sm:$0xff] }
 0x7f7   :  { %v5553_v59 = vsub.f32 %v5551_v40, %v5552_v15  ;;  %v17882_v40 = vmax.f32 %v17881_v31, 0.0  ;;  %v13649_v31 = vld [vmem:[#allocation21 + $0x8] sm:$0xff]  }
 0x7f9   :  { %v5555_v41 = vadd.f32 1e-05, %v5553_v59  ;;  %v17884_v59 = vld [vmem:[#allocation73_spill] sm:$0xff] }
 0x7fb   :  { %13750 = vrsqrt.f32 %v5555_v41  ;;  %v17885_v41 = vmax.f32 %v17884_v59, 0.0  ;;  %v13650_v59 = vld [vmem:[#allocation21 + $0x20] sm:$0xff]  }
 0x805   :  { %v13751_v18 = vpop.eup %13750 }
 0x806   :  { %v5557_v5 = vmul.f32 %v13751_v18, %v5554_v63  ;;  %v17887_v18 = vld [vmem:[#allocation74_spill] sm:$0xff] }
 0x808   :  { %v5559_v35 = vmul.f32 %v5557_v5, %v5497_v54  ;;  %v5565_v0 = vrot.slane %v5557_v5, %v17859_v52  ;;  %v17888_v5 = vmax.f32 %v17887_v18, 0.0 }
 0x80a   :  { %v5560_v43 = vsub.f32 %v5558_v19, %v5559_v35  ;;  %v5568_v53 = vmul.f32 %v5565_v0, %v16060_v44  ;;  %v5569_v37 = vmul.f32 %v16052_v14, %v5565_v0  ;;  %v5570_v3 = vmul.f32 %v16058_v50, %v5565_v0  ;;  %v17890_v35 = vld [vmem:[#allocation62_spill] sm:$0xff] }
 0x80b   :  { %v5571_v42 = vmul.f32 %v5565_v0, %v16081_v12  ;;  %v5572_v58 = vmul.f32 %v5565_v0, %v16090_v13  ;;  %v5573_v51 = vmul.f32 %v16079_v17, %v5565_v0  ;;  %v5576_v2 = vmul.f32 %v5565_v0, %v16118_v7 }
 0x80c   :  { %v5577_v4 = vmul.f32 %v16107_v29, %v5565_v0  ;;  %v5578_v39 = vmul.f32 %v16116_v16, %v5565_v0  ;;  %v5579_v10 = vmul.f32 %v5565_v0, %v5429_v1  ;;  %v5580_v56 = vmul.f32 %v5565_v0, %v5432_v23 }
 0x80d   :  { %v5581_v44 = vmul.f32 %v16135_v27, %v5565_v0  ;;  %v5587_v14 = vrot.slane %v5560_v43, %v17859_v52  ;;  %v5567_v50 = vmul.f32 %v5565_v0, %v16054_v38  ;;  %v5575_v12 = vmul.f32 %v5565_v0, %v16109_v61  ;;  %v17863_v61 = vld [vmem:[#allocation65_spill] sm:$0xff]  ;;  %v13655_v52 = vld [vmem:[#allocation21 + $0x48] sm:$0xff]  }
 0x80e   :  { %v5574_v13 = vmul.f32 %v16088_v30, %v5565_v0  ;;  %v5582_v49 = vmul.f32 %v12392_v55, %v5565_v0  ;;  %v17864_v57 = vmax.f32 %v17863_v61, 0.0  ;;  %v17866_v55 = vld [vmem:[#allocation66_spill] sm:$0xff]  ;;  %v17891_v0 = vmax.f32 %v17890_v35, 0.0 }
 0x80f   :  { %v5590_v17 = vadd.f32 %v5587_v14, %v5568_v53  ;;  %v5591_v8 = vadd.f32 %v5587_v14, %v5569_v37  ;;  %v5592_v7 = vadd.f32 %v5587_v14, %v5570_v3  ;;  %v5593_v32 = vadd.f32 %v5587_v14, %v5571_v42  ;;  %v17893_v53 = vld [vmem:[#allocation75_spill] sm:$0xff] }
 0x810   :  { %v5594_v29 = vadd.f32 %v5587_v14, %v5572_v58  ;;  %v5595_v9 = vadd.f32 %v5587_v14, %v5573_v51  ;;  %v5598_v16 = vadd.f32 %v5587_v14, %v5576_v2  ;;  %v5599_v1 = vadd.f32 %v5587_v14, %v5577_v4 }
 0x811   :  { %v5600_v23 = vadd.f32 %v5587_v14, %v5578_v39  ;;  %v5601_v20 = vadd.f32 %v5587_v14, %v5579_v10  ;;  %v5602_v27 = vadd.f32 %v5587_v14, %v5580_v56  ;;  %v5603_v11 = vadd.f32 %v5587_v14, %v5581_v44 }
 0x812   :  { %v16166_v38 = vadd.f32 %v5590_v17, %v17861_v36  ;;  %v16170_v30 = vadd.f32 %v5591_v8, %v17864_v57  ;;  %v17867_v46 = vmax.f32 %v17866_v55, 0.0  ;;  %v16178_v28 = vadd.f32 %v5593_v32, %v17870_v6 }
 0x813   :  { %v16182_v62 = vadd.f32 %v5594_v29, %v17873_v24  ;;  %v16186_v26 = vadd.f32 %v5595_v9, %v17876_v34  ;;  %v16190_v54 = vadd.f32 %v5598_v16, %v17879_v47  ;;  %v16194_v15 = vadd.f32 %v5599_v1, %v17882_v40 }
 0x814   :  { %17862 = vst [vmem:[#allocation78_spill] sm:$0xff] %v16166_v38  ;;  %17865 = vst [vmem:[#allocation79_spill] sm:$0xff] %v16170_v30  ;;  %v16174_v33 = vadd.f32 %v5592_v7, %v17867_v46  ;;  %v16198_v63 = vadd.f32 %v5600_v23, %v17885_v41  ;;  %v16202_v19 = vadd.f32 %v5601_v20, %v17888_v5  ;;  %v17894_v37 = vmax.f32 %v17893_v53, 0.0  ;;  %v17902_v23 = vld [vmem:[#allocation76_spill] sm:$0xff] }
 0x815   :  { %17871 = vst [vmem:[#allocation65_spill] sm:$0xff] %v16178_v28  ;;  %17874 = vst [vmem:[#allocation66_spill] sm:$0xff] %v16182_v62  ;;  %v16206_v43 = vadd.f32 %v5602_v27, %v17891_v0  ;;  %v17787_v42 = vmax.f32 %v16166_v38, 0.0  ;;  %v17786_v58 = vmax.f32 %v16170_v30, 0.0  ;;  %v17784_v2 = vmax.f32 %v16178_v28, 0.0  ;;  %v5721_v5 = vld [vmem:[#allocation3 + $0xa1] sm:$0xff] }
 0x816   :  { %17868 = vst [vmem:[#allocation64_spill] sm:$0xff] %v16174_v33  ;;  %17877 = vst [vmem:[#allocation67_spill] sm:$0xff] %v16186_v26  ;;  %v16210_v3 = vadd.f32 %v5603_v11, %v17894_v37  ;;  %v17785_v51 = vmax.f32 %v16174_v33, 0.0  ;;  %v17783_v4 = vmax.f32 %v16182_v62, 0.0  ;;  %v17782_v39 = vmax.f32 %v16186_v26, 0.0  ;;  %v17905_v11 = vld [vmem:[#allocation77_spill] sm:$0xff] }
 0x817   :  { %17880 = vst [vmem:[#allocation68_spill] sm:$0xff] %v16190_v54  ;;  %17883 = vst [vmem:[#allocation69_spill] sm:$0xff] %v16194_v15  ;;  %v17779_v10 = vmax.f32 %v16190_v54, 0.0  ;;  %v17778_v56 = vmax.f32 %v16194_v15, 0.0  ;;  %v17777_v44 = vmax.f32 %v16198_v63, 0.0  ;;  %v17776_v17 = vmax.f32 %v16202_v19, 0.0 }
 0x818   :  { %17886 = vst [vmem:[#allocation71_spill] sm:$0xff] %v16198_v63  ;;  %17889 = vst [vmem:[#allocation72_spill] sm:$0xff] %v16202_v19  ;;  %v17789_v8 = vmax.f32 %v16206_v43, 0.0  ;;  %v17775_v7 = vmax.f32 %v16210_v3, 0.0  ;;  %v5589_v32 = vadd.f32 %v5587_v14, %v5567_v50  ;;  %v5597_v29 = vadd.f32 %v5587_v14, %v5575_v12  ;;  %v17896_v50 = vld [vmem:[#allocation63_spill] sm:$0xff]  ;;  %v13653_v19 = vld [vmem:[#allocation21 + $0x38] sm:$0xff]  }
 0x819   :  { %17892 = vst [vmem:[#allocation73_spill] sm:$0xff] %v16206_v43  ;;  %17895 = vst [vmem:[#allocation74_spill] sm:$0xff] %v16210_v3  ;;  %v5596_v9 = vadd.f32 %v5587_v14, %v5574_v13  ;;  %v5604_v16 = vadd.f32 %v5587_v14, %v5582_v49  ;;  %v17897_v12 = vmax.f32 %v17896_v50, 0.0  ;;  %v17899_v14 = vld [vmem:[#allocation70_spill] sm:$0xff]  ;;  %v17903_v20 = vmax.f32 %v17902_v23, 0.0  ;;  %v6011_v54 = vld [vmem:[#allocation3 + $0xa2] sm:$0xff] }
 0x81a   :  { %5638 = vst.msk [vmem:[#allocation3 + $0x21] sm:$0xff] %vm397_vm3, %v17787_v42  ;;  %5639 = vst.msk [vmem:[#allocation3 + $0x31] sm:$0xff] %vm397_vm3, %v17786_v58  ;;  %v17900_v49 = vmax.f32 %v17899_v14, 0.0  ;;  %v17906_v22 = vmax.f32 %v17905_v11, 0.0  ;;  %v5689_v14 = vld [vmem:[#allocation3] sm:$0xff] }
 0x81b   :  { %5640 = vst.msk [vmem:[#allocation3 + $0x41] sm:$0xff] %vm397_vm3, %v17785_v51  ;;  %5641 = vst.msk [vmem:[#allocation3 + $0x51] sm:$0xff] %vm397_vm3, %v17784_v2  ;;  %v16262_v13 = vadd.f32 %v5589_v32, %v17897_v12  ;;  %v16270_v27 = vadd.f32 %v5596_v9, %v17903_v20 }
 0x81c   :  { %5642 = vst.msk [vmem:[#allocation3 + $0x61] sm:$0xff] %vm397_vm3, %v17783_v4  ;;  %5643 = vst.msk [vmem:[#allocation3 + $0x71] sm:$0xff] %vm397_vm3, %v17782_v39  ;;  %v16266_v1 = vadd.f32 %v5597_v29, %v17900_v49  ;;  %v16274_v36 = vadd.f32 %v5604_v16, %v17906_v22  ;;  %v6003_v4 = vld [vmem:[#allocation3 + $0x2] sm:$0xff] }
 0x81d   :  { %5646 = vst.msk [vmem:[#allocation3 + $0xc1] sm:$0xff] %vm397_vm3, %v17779_v10  ;;  %5647 = vst.msk [vmem:[#allocation3 + $0xd1] sm:$0xff] %vm397_vm3, %v17778_v56  ;;  %v17788_v61 = vmax.f32 %v16262_v13, 0.0  ;;  %v17781_v55 = vmax.f32 %v16270_v27, 0.0 }
 0x81e   :  { %5648 = vst.msk [vmem:[#allocation3 + $0xe1] sm:$0xff] %vm397_vm3, %v17777_v44  ;;  %5649 = vst.msk [vmem:[#allocation3 + $0xf1] sm:$0xff] %vm397_vm3, %v17776_v17  ;;  %v17780_v57 = vmax.f32 %v16266_v1, 0.0  ;;  %v17774_v46 = vmax.f32 %v16274_v36, 0.0 }
 0x81f   :  { %5650 = vst.msk [vmem:[#allocation3 + $0x101] sm:$0xff] %vm397_vm3, %v17789_v8  ;;  %5651 = vst.msk [vmem:[#allocation3 + $0x111] sm:$0xff] %vm397_vm3, %v17775_v7  ;;  %v5697_v7 = vld [vmem:[#allocation3 + $0xa0] sm:$0xff] }
 0x820   :  { %17898 = vst [vmem:[#allocation62_spill] sm:$0xff] %v16262_v13  ;;  %17901 = vst [vmem:[#allocation75_spill] sm:$0xff] %v16266_v1 }
 0x821   :  { %17904 = vst [vmem:[#allocation63_spill] sm:$0xff] %v16270_v27  ;;  %17907 = vst [vmem:[#allocation70_spill] sm:$0xff] %v16274_v36  ;;  %v16292_v48 = vld [vmem:[#allocation3 + $0x21] sm:$0xff]  ;;  %v16294_v6 = vld [vmem:[#allocation3 + $0x31] sm:$0xff] }
 0x822   :  { %5637 = vst.msk [vmem:[#allocation3 + $0x11] sm:$0xff] %vm397_vm3, %v17788_v61  ;;  %5645 = vst.msk [vmem:[#allocation3 + $0xb1] sm:$0xff] %vm397_vm3, %v17780_v57  ;;  %v16300_v45 = vpack.c.bf16 %v16294_v6, %v16292_v48  ;;  %v16302_v34 = vld [vmem:[#allocation3 + $0x41] sm:$0xff]  ;;  %v16304_v60 = vld [vmem:[#allocation3 + $0x51] sm:$0xff] }
 0x823   :  { %5644 = vst.msk [vmem:[#allocation3 + $0x81] sm:$0xff] %vm397_vm3, %v17781_v55  ;;  %5652 = vst.msk [vmem:[#allocation3 + $0x121] sm:$0xff] %vm397_vm3, %v17774_v46  ;;  %v16310_v40 = vpack.c.bf16 %v16304_v60, %v16302_v34  ;;  %v16317_v41 = vld [vmem:[#allocation3 + $0x61] sm:$0xff]  ;;  %v16319_v18 = vld [vmem:[#allocation3 + $0x71] sm:$0xff] }
 0x824   :  { %v16325_v0 = vpack.c.bf16 %v16319_v18, %v16317_v41  ;;  %v16333_v37 = vld [vmem:[#allocation3 + $0xd1] sm:$0xff]  ;;  %v16365_v11 = vld [vmem:[#allocation3 + $0x20] sm:$0xff] }
 0x825   :  { %v16335_v32 = vld [vmem:[#allocation3 + $0xe1] sm:$0xff]  ;;  %v16337_v29 = vld [vmem:[#allocation3 + $0xf1] sm:$0xff] }
 0x826   :  { %v16345_v16 = vpack.c.bf16 %v16337_v29, %v16335_v32  ;;  %v16351_v50 = vld [vmem:[#allocation3 + $0x101] sm:$0xff]  ;;  %v16353_v12 = vld [vmem:[#allocation3 + $0x111] sm:$0xff] }
 0x827   :  { %v16359_v23 = vpack.c.bf16 %v16353_v12, %v16351_v50  ;;  %v16367_v22 = vld [vmem:[#allocation3 + $0x30] sm:$0xff]  ;;  %v16403_v57 = vld [vmem:[#allocation3 + $0xe0] sm:$0xff] }
 0x828   :  { %v16387_v46 = vld [vmem:[#allocation3 + $0x70] sm:$0xff]  ;;  %v16433_v42 = vld [vmem:[#allocation3 + $0x22] sm:$0xff] }
 0x829   :  { %v16296_v24 = vld [vmem:[#allocation3 + $0x11] sm:$0xff]  ;;  %v16437_v8 = vld [vmem:[#allocation3 + $0x42] sm:$0xff] }
 0x82a   :  { %v5729_v47 = vpack.c.bf16 %v16296_v24, %v5713_v21  ;;  %v16321_v35 = vld [vmem:[#allocation3 + $0xb1] sm:$0xff]  ;;  %v16369_v21 = vld [vmem:[#allocation3 + $0x40] sm:$0xff] }
 0x82b   :  { %v5733_v53 = vpack.c.bf16 %v16321_v35, %v5721_v5  ;;  %v16355_v49 = vld [vmem:[#allocation3 + $0x10] sm:$0xff]  ;;  %v16453_v63 = vld [vmem:[#allocation3 + $0x62] sm:$0xff]  ;;  %v6193_v43 = vpack.c.bf16 %v16369_v21, %v16367_v22 }
 0x82c   :  { %12397 = vmatprep.mubr.msk.bf16.mxu1 %vm397_vm3, %v5729_v47  ;;  %v5705_v20 = vpack.c.bf16 %v16355_v49, %v5689_v14  ;;  %v16371_v47 = vld [vmem:[#allocation3 + $0x50] sm:$0xff]  ;;  %v16471_v28 = vld [vmem:[#allocation3 + $0xe2] sm:$0xff]  ;;  %v6192_v13 = vpack.c.bf16 %v16365_v11, %v16355_v49 }
 0x82d   :  { %12398 = vmatmul.mubr.msk.bf16.vlgmr.msra.gmra.mrb[32].mxu1 %vm397_vm3, %v16300_v45  ;;  %v13651_v5 = vld [vmem:[#allocation21 + $0x28] sm:$0xff]   ;;  %v13652_v14 = vld [vmem:[#allocation21 + $0x30] sm:$0xff]   ;;  %v16506_v49 = vld [vmem:[#allocation3 + $0x80] sm:$0xff] }
 0x82e   :  { %12401 = vmatprep.mubr.msk.bf16.mxu1 %vm397_vm3, %v16310_v40  ;;  %12414 = vmatpush3.bf16.msra.mxu1 %v16049_v25  ;;  %v16331_v25 = vld [vmem:[#allocation3 + $0xc1] sm:$0xff]  ;;  %v16389_v17 = vld [vmem:[#allocation3 + $0xb0] sm:$0xff] }
 0x82f   :  { %12415 = vmatprep.subr.bf16.mxu1 %v13649_v31  ;;  %v16341_v9 = vpack.c.bf16 %v16333_v37, %v16331_v25  ;;  %v5709_v56 = vpack.c.bf16 %v16389_v17, %v5697_v7  ;;  %v16401_v10 = vld [vmem:[#allocation3 + $0xd0] sm:$0xff] }
 0x830   :  { %v16405_v55 = vld [vmem:[#allocation3 + $0xf0] sm:$0xff] }
 0x831   :  { %v16413_v7 = vpack.c.bf16 %v16405_v55, %v16403_v57  ;;  %v16421_v39 = vld [vmem:[#allocation3 + $0x110] sm:$0xff] }
 0x832   :  { %12416 = vmatpush3.bf16.msra.mxu1 %v13649_v31  ;;  %v16375_v31 = vpack.c.bf16 %v16367_v22, %v16365_v11  ;;  %v16423_v2 = vld [vmem:[#allocation3 + $0x12] sm:$0xff] }
 0x833   :  { %12433 = vmatprep.subr.bf16.mxu1 %v13650_v59  ;;  %v6019_v58 = vpack.c.bf16 %v16423_v2, %v6003_v4  ;;  %v16435_v61 = vld [vmem:[#allocation3 + $0x32] sm:$0xff] }
 0x834   :  { %v16439_v36 = vld [vmem:[#allocation3 + $0x52] sm:$0xff]  ;;  %v16443_v3 = vpack.c.bf16 %v16435_v61, %v16433_v42 }
 0x835   :  { %12402 = vmatmul.mubr.msk.bf16.gmra.mrb[36].mxu1 %vm397_vm3, %v16325_v0  ;;  %v16447_v4 = vpack.c.bf16 %v16439_v36, %v16437_v8  ;;  %v16455_v15 = vld [vmem:[#allocation3 + $0x72] sm:$0xff] }
 0x836   :  { %12405 = vmatprep.mubr.msk.bf16.mxu1 %vm397_vm3, %v5733_v53  ;;  %v16379_v53 = vpack.c.bf16 %v16371_v47, %v16369_v21  ;;  %v16457_v1 = vld [vmem:[#allocation3 + $0xb2] sm:$0xff]  ;;  %v16461_v27 = vpack.c.bf16 %v16455_v15, %v16453_v63  ;;  %v16534_v21 = vld [vmem:[#allocation3 + $0x81] sm:$0xff] }
 0x837   :  { %v6023_v26 = vpack.c.bf16 %v16457_v1, %v6011_v54  ;;  %v16469_v62 = vld [vmem:[#allocation3 + $0xd2] sm:$0xff] }
 0x838   :  { %v16473_v33 = vld [vmem:[#allocation3 + $0xf2] sm:$0xff] }
 0x839   :  { %v16481_v54 = vpack.c.bf16 %v16473_v33, %v16471_v28  ;;  %v16489_v30 = vld [vmem:[#allocation3 + $0x112] sm:$0xff] }
 0x83b   :  { %17909 = vst [vmem:[#allocation77_spill] sm:$0xff] %v16481_v54 }
 0x83d   :  { %12406 = vmatmul.mubr.msk.bf16.gmra.mrb[40].mxu1 %vm397_vm3, %v16341_v9 }
 0x83e   :  { %12409 = vmatprep.mubr.msk.bf16.mxu1 %vm397_vm3, %v16345_v16 }
 0x845   :  { %12410 = vmatmul.mubr.msk.bf16.gmra.mrb[44].mxu1 %vm397_vm3, %v16359_v23 }
 0x846   :  { %12417 = vmatprep.mubr.msk.bf16.mxu1 %vm397_vm3, %v5705_v20  ;;  %v16385_v20 = vld [vmem:[#allocation3 + $0x60] sm:$0xff] }
 0x847   :  { %v16393_v44 = vpack.c.bf16 %v16387_v46, %v16385_v20 }
 0x84d   :  { %12418 = vmatmul.mubr.msk.bf16.vlgmr.msra.gmra.mrb[32].mxu1 %vm397_vm3, %v16375_v31 }
 0x84e   :  { %12421 = vmatprep.mubr.msk.bf16.mxu1 %vm397_vm3, %v16379_v53  ;;  %12434 = vmatpush3.bf16.msra.mxu1 %v13650_v59  ;;  %v16399_v59 = vld [vmem:[#allocation3 + $0xc0] sm:$0xff] }
 0x84f   :  { %12435 = vmatprep.subr.bf16.mxu1 %v13651_v5  ;;  %v6196_v11 = vpack.c.bf16 %v16399_v59, %v16389_v17  ;;  %v6365_v17 = vpack.c.bf16 %v16292_v48, %v16296_v24  ;;  %v6368_v48 = vpack.c.bf16 %v16534_v21, %v16319_v18  ;;  %v6370_v24 = vpack.c.bf16 %v16335_v32, %v16333_v37  ;;  %v13660_v32 = vld [vmem:[#allocation21 + $0x70] sm:$0xff]  }
 0x850   :  { %v6538_v18 = vpack.c.bf16 %v16433_v42, %v16423_v2  ;;  %v6540_v37 = vpack.c.bf16 %v16453_v63, %v16439_v36  ;;  %v6543_v63 = vpack.c.bf16 %v16471_v28, %v16469_v62  ;;  %v6537_v36 = vld [vmem:[#allocation3 + $0x122] sm:$0xff]  ;;  %v6702_v28 = vld [vmem:[#allocation3 + $0x90] sm:$0xff] }
 0x852   :  { %12436 = vmatpush3.bf16.msra.mxu1 %v13651_v5  ;;  %v16409_v5 = vpack.c.bf16 %v16401_v10, %v16399_v59 }
 0x853   :  { %12453 = vmatprep.subr.bf16.mxu1 %v13652_v14 }
 0x855   :  { %12422 = vmatmul.mubr.msk.bf16.gmra.mrb[36].mxu1 %vm397_vm3, %v16393_v44 }
 0x856   :  { %12425 = vmatprep.mubr.msk.bf16.mxu1 %vm397_vm3, %v5709_v56  ;;  %v16419_v56 = vld [vmem:[#allocation3 + $0x100] sm:$0xff] }
 0x857   :  { %v16427_v51 = vpack.c.bf16 %v16421_v39, %v16419_v56  ;;  %v6198_v22 = vpack.c.bf16 %v16419_v56, %v16405_v55  ;;  %v6367_v55 = vpack.c.bf16 %v16317_v41, %v16304_v60  ;;  %v6364_v60 = vld [vmem:[#allocation3 + $0x121] sm:$0xff] }
 0x858   :  { %v6372_v41 = vpack.c.bf16 %v6364_v60, %v16353_v12  ;;  %v17911_v12 = vld [vmem:[#allocation77_spill] sm:$0xff] }
 0x85d   :  { %12426 = vmatmul.mubr.msk.bf16.gmra.mrb[40].mxu1 %vm397_vm3, %v16409_v5 }
 0x85e   :  { %12429 = vmatprep.mubr.msk.bf16.mxu1 %vm397_vm3, %v16413_v7 }
 0x865   :  { %12430 = vmatmul.mubr.msk.bf16.gmra.mrb[44].mxu1 %vm397_vm3, %v16427_v51 }
 0x866   :  { %12437 = vmatprep.mubr.msk.bf16.mxu1 %vm397_vm3, %v6019_v58  ;;  %v13654_v58 = vld [vmem:[#allocation21 + $0x40] sm:$0xff]  }
 0x86d   :  { %12438 = vmatmul.mubr.msk.bf16.vlgmr.msra.gmra.mrb[32].mxu1 %vm397_vm3, %v16443_v3 }
 0x86e   :  { %12441 = vmatprep.mubr.msk.bf16.mxu1 %vm397_vm3, %v16447_v4  ;;  %12454 = vmatpush3.bf16.msra.mxu1 %v13652_v14  ;;  %v16467_v14 = vld [vmem:[#allocation3 + $0xc2] sm:$0xff] }
 0x86f   :  { %12455 = vmatprep.subr.bf16.mxu1 %v13653_v19  ;;  %v6542_v2 = vpack.c.bf16 %v16467_v14, %v16457_v1  ;;  %v13661_v1 = vld [vmem:[#allocation21 + $0x78] sm:$0xff]  }
 0x872   :  { %12456 = vmatpush3.bf16.msra.mxu1 %v13653_v19  ;;  %v16477_v19 = vpack.c.bf16 %v16469_v62, %v16467_v14  ;;  %v6714_v62 = vpack.c.bf16 %v6702_v28, %v16506_v49 }
 0x873   :  { %12473 = vmatprep.subr.bf16.mxu1 %v13654_v58 }
 0x874   :  { %17908 = vst [vmem:[#allocation76_spill] sm:$0xff] %v16477_v19 }
 0x875   :  { %12442 = vmatmul.mubr.msk.bf16.gmra.mrb[36].mxu1 %vm397_vm3, %v16461_v27 }
 0x876   :  { %12445 = vmatprep.mubr.msk.bf16.mxu1 %vm397_vm3, %v6023_v26  ;;  %v16487_v26 = vld [vmem:[#allocation3 + $0x102] sm:$0xff] }
 0x877   :  { %v16493_v38 = vpack.c.bf16 %v16489_v30, %v16487_v26 }
 0x87d   :  { %12446 = vmatmul.mubr.msk.bf16.gmra.mrb[40].mxu1 %vm397_vm3, %v16477_v19  ;;  %v13656_v19 = vld [vmem:[#allocation21 + $0x50] sm:$0xff]  }
 0x87e   :  { %12449 = vmatprep.mubr.msk.bf16.mxu1 %vm397_vm3, %v16481_v54  ;;  %v6194_v54 = vpack.c.bf16 %v16385_v20, %v16371_v47  ;;  %v13664_v47 = vld [vmem:[#allocation25 + $0x10] sm:$0xff]  }
 0x87f   :  { %12573 = vmatprep.subr.bf16.mxu0 %v13664_v47 }
 0x880   :  { %12574 = vmatpush3.bf16.msra.mxu0 %v13664_v47 }
 0x885   :  { %12450 = vmatmul.mubr.msk.bf16.gmra.mrb[44].mxu1 %vm397_vm3, %v16493_v38 }
 0x886   :  { %12457 = vmatprep.mubr.msk.bf16.mxu1 %vm397_vm3, %v6192_v13  ;;  %v6195_v13 = vpack.c.bf16 %v16506_v49, %v16387_v46 }
 0x88d   :  { %12458 = vmatmul.mubr.msk.bf16.vlgmr.msra.gmra.mrb[32].mxu1 %vm397_vm3, %v6193_v43  ;;  %v6197_v43 = vpack.c.bf16 %v16403_v57, %v16401_v10  ;;  %v6366_v10 = vpack.c.bf16 %v16302_v34, %v16294_v6  ;;  %v13657_v57 = vld [vmem:[#allocation21 + $0x58] sm:$0xff]   ;;  %v6369_v6 = vpack.c.bf16 %v16331_v25, %v16321_v35  ;;  %v6371_v34 = vpack.c.bf16 %v16351_v50, %v16337_v29  ;;  %v13659_v25 = vld [vmem:[#allocation21 + $0x68] sm:$0xff]  }
 0x88e   :  { %12461 = vmatprep.mubr.msk.bf16.mxu1 %vm397_vm3, %v6194_v54  ;;  %12474 = vmatpush3.bf16.msra.mxu1 %v13654_v58  ;;  %v6539_v35 = vpack.c.bf16 %v16437_v8, %v16435_v61  ;;  %v6529_v29 = vld [vmem:[#allocation3 + $0x82] sm:$0xff]  ;;  %v6544_v8 = vpack.c.bf16 %v16487_v26, %v16473_v33  ;;  %v13663_v61 = vld [vmem:[#allocation21 + $0x88] sm:$0xff]  }
 0x88f   :  { %12475 = vmatprep.subr.bf16.mxu1 %v13655_v52  ;;  %v6541_v42 = vpack.c.bf16 %v6529_v29, %v16455_v15  ;;  %v6545_v15 = vpack.c.bf16 %v6537_v36, %v16489_v30  ;;  %v13662_v33 = vld [vmem:[#allocation21 + $0x80] sm:$0xff]   ;;  %v6710_v30 = vld [vmem:[#allocation3 + $0x130] sm:$0xff] }
 0x890   :  { %v6875_v50 = vld [vmem:[#allocation3 + $0x91] sm:$0xff] }
 0x892   :  { %12476 = vmatpush3.bf16.msra.mxu1 %v13655_v52  ;;  %v16520_v52 = vld [vmem:[#allocation3 + $0x120] sm:$0xff] }
 0x893   :  { %12493 = vmatprep.subr.bf16.mxu1 %v13656_v19  ;;  %v6199_v46 = vpack.c.bf16 %v16520_v52, %v16421_v39  ;;  %v13658_v39 = vld [vmem:[#allocation21 + $0x60] sm:$0xff]  }
 0x895   :  { %12462 = vmatmul.mubr.msk.bf16.gmra.mrb[36].mxu1 %vm397_vm3, %v6195_v13 }
 0x896   :  { %12465 = vmatprep.mubr.msk.bf16.mxu1 %vm397_vm3, %v6196_v11 }
 0x89d   :  { %12466 = vmatmul.mubr.msk.bf16.gmra.mrb[40].mxu1 %vm397_vm3, %v6197_v43 }
 0x89e   :  { %12469 = vmatprep.mubr.msk.bf16.mxu1 %vm397_vm3, %v6198_v22 }
 0x8a5   :  { %12470 = vmatmul.mubr.msk.bf16.gmra.mrb[44].mxu1 %vm397_vm3, %v6199_v46 }
 0x8a6   :  { %12477 = vmatprep.mubr.msk.bf16.mxu1 %vm397_vm3, %v6365_v17 }
 0x8ad   :  { %12478 = vmatmul.mubr.msk.bf16.vlgmr.msra.gmra.mrb[32].mxu1 %vm397_vm3, %v6366_v10 }
 0x8ae   :  { %12481 = vmatprep.mubr.msk.bf16.mxu1 %vm397_vm3, %v6367_v55  ;;  %12494 = vmatpush3.bf16.msra.mxu1 %v13656_v19 }
 0x8af   :  { %12495 = vmatprep.subr.bf16.mxu1 %v13657_v57 }
 0x8b2   :  { %12496 = vmatpush3.bf16.msra.mxu1 %v13657_v57 }
 0x8b3   :  { %12513 = vmatprep.subr.bf16.mxu1 %v13658_v39 }
 0x8b5   :  { %12482 = vmatmul.mubr.msk.bf16.gmra.mrb[36].mxu1 %vm397_vm3, %v6368_v48 }
 0x8b6   :  { %12485 = vmatprep.mubr.msk.bf16.mxu1 %vm397_vm3, %v6369_v6 }
 0x8bd   :  { %12486 = vmatmul.mubr.msk.bf16.gmra.mrb[40].mxu1 %vm397_vm3, %v6370_v24 }
 0x8be   :  { %12489 = vmatprep.mubr.msk.bf16.mxu1 %vm397_vm3, %v6371_v34 }
 0x8c5   :  { %12490 = vmatmul.mubr.msk.bf16.gmra.mrb[44].mxu1 %vm397_vm3, %v6372_v41 }
 0x8c6   :  { %12497 = vmatprep.mubr.msk.bf16.mxu1 %vm397_vm3, %v6538_v18 }
 0x8cd   :  { %12498 = vmatmul.mubr.msk.bf16.vlgmr.msra.gmra.mrb[32].mxu1 %vm397_vm3, %v6539_v35 }
 0x8ce   :  { %12501 = vmatprep.mubr.msk.bf16.mxu1 %vm397_vm3, %v6540_v37  ;;  %12514 = vmatpush3.bf16.msra.mxu1 %v13658_v39 }
 0x8cf   :  { %12515 = vmatprep.subr.bf16.mxu1 %v13659_v25 }
 0x8d2   :  { %12516 = vmatpush3.bf16.msra.mxu1 %v13659_v25 }
 0x8d3   :  { %12533 = vmatprep.subr.bf16.mxu1 %v13660_v32 }
 0x8d5   :  { %12502 = vmatmul.mubr.msk.bf16.gmra.mrb[36].mxu1 %vm397_vm3, %v6541_v42 }
 0x8d6   :  { %12505 = vmatprep.mubr.msk.bf16.mxu1 %vm397_vm3, %v6542_v2 }
 0x8dd   :  { %12506 = vmatmul.mubr.msk.bf16.gmra.mrb[40].mxu1 %vm397_vm3, %v6543_v63 }
 0x8de   :  { %12509 = vmatprep.mubr.msk.bf16.mxu1 %vm397_vm3, %v6544_v8 }
 0x8e5   :  { %12510 = vmatmul.mubr.msk.bf16.gmra.mrb[44].mxu1 %vm397_vm3, %v6545_v15 }
 0x8e6   :  { %12517 = vmatprep.mubr.msk.bf16.mxu1 %vm397_vm3, %v16375_v31  ;;  %v13665_v31 = vld [vmem:[#allocation25 + $0x18] sm:$0xff]  }
 0x8e7   :  { %12575 = vmatprep.subr.bf16.mxu0 %v13665_v31 }
 0x8e8   :  { %12576 = vmatpush3.bf16.msra.mxu0 %v13665_v31 }
 0x8ed   :  { %12518 = vmatmul.mubr.msk.bf16.vlgmr.msra.gmra.mrb[32].mxu1 %vm397_vm3, %v16379_v53 }
 0x8ee   :  { %12521 = vmatprep.mubr.msk.bf16.mxu1 %vm397_vm3, %v16393_v44  ;;  %12534 = vmatpush3.bf16.msra.mxu1 %v13660_v32  ;;  %v6718_v44 = vpack.c.bf16 %v6710_v30, %v16520_v52 }
 0x8ef   :  { %12535 = vmatprep.subr.bf16.mxu1 %v13661_v1 }
 0x8f2   :  { %12536 = vmatpush3.bf16.msra.mxu1 %v13661_v1 }
 0x8f3   :  { %12553 = vmatprep.subr.bf16.mxu1 %v13662_v33 }
 0x8f5   :  { %12522 = vmatmul.mubr.msk.bf16.gmra.mrb[36].mxu1 %vm397_vm3, %v6714_v62 }
 0x8f6   :  { %12525 = vmatprep.mubr.msk.bf16.mxu1 %vm397_vm3, %v16409_v5 }
 0x8fd   :  { %12526 = vmatmul.mubr.msk.bf16.gmra.mrb[40].mxu1 %vm397_vm3, %v16413_v7 }
 0x8fe   :  { %12529 = vmatprep.mubr.msk.bf16.mxu1 %vm397_vm3, %v16427_v51  ;;  %v6887_v51 = vpack.c.bf16 %v6875_v50, %v16534_v21 }
 0x905   :  { %12530 = vmatmul.mubr.msk.bf16.gmra.mrb[44].mxu1 %vm397_vm3, %v6718_v44 }
 0x906   :  { %12537 = vmatprep.mubr.msk.bf16.mxu1 %vm397_vm3, %v16300_v45  ;;  %v6883_v45 = vld [vmem:[#allocation3 + $0x131] sm:$0xff] }
 0x90d   :  { %12538 = vmatmul.mubr.msk.bf16.vlgmr.msra.gmra.mrb[32].mxu1 %vm397_vm3, %v16310_v40  ;;  %v6891_v40 = vpack.c.bf16 %v6883_v45, %v6364_v60 }
 0x90e   :  { %12541 = vmatprep.mubr.msk.bf16.mxu1 %vm397_vm3, %v16325_v0  ;;  %12554 = vmatpush3.bf16.msra.mxu1 %v13662_v33  ;;  %v7048_v0 = vld [vmem:[#allocation3 + $0x92] sm:$0xff] }
 0x90f   :  { %12555 = vmatprep.subr.bf16.mxu1 %v13663_v61 }
 0x912   :  { %12556 = vmatpush3.bf16.msra.mxu1 %v13663_v61 }
 0x915   :  { %12542 = vmatmul.mubr.msk.bf16.gmra.mrb[36].mxu1 %vm397_vm3, %v6887_v51 }
 0x916   :  { %12545 = vmatprep.mubr.msk.bf16.mxu1 %vm397_vm3, %v16341_v9  ;;  %v7060_v9 = vpack.c.bf16 %v7048_v0, %v6529_v29 }
 0x91d   :  { %12546 = vmatmul.mubr.msk.bf16.gmra.mrb[40].mxu1 %vm397_vm3, %v16345_v16  ;;  %v17910_v16 = vld [vmem:[#allocation76_spill] sm:$0xff] }
 0x91e   :  { %12549 = vmatprep.mubr.msk.bf16.mxu1 %vm397_vm3, %v16359_v23 }
 0x925   :  { %12550 = vmatmul.mubr.msk.bf16.gmra.mrb[44].mxu1 %vm397_vm3, %v6891_v40 }
 0x926   :  { %12557 = vmatprep.mubr.msk.bf16.mxu1 %vm397_vm3, %v16443_v3  ;;  %v7056_v3 = vld [vmem:[#allocation3 + $0x132] sm:$0xff] }
 0x927   :  { %v7064_v23 = vpack.c.bf16 %v7056_v3, %v6537_v36 }
 0x92d   :  { %12558 = vmatmul.mubr.msk.bf16.vlgmr.msra.gmra.mrb[32].mxu1 %vm397_vm3, %v16447_v4 }
 0x92e   :  { %12561 = vmatprep.mubr.msk.bf16.mxu1 %vm397_vm3, %v16461_v27  ;;  %v16617_v27 = vld [vmem:[#allocation25] sm:$0xff]  }
 0x92f   :  { %12593 = vmatprep.subr.bf16.mxu0 %v16617_v27 }
 0x935   :  { %12562 = vmatmul.mubr.msk.bf16.gmra.mrb[36].mxu1 %vm397_vm3, %v7060_v9 }
 0x936   :  { %12565 = vmatprep.mubr.msk.bf16.mxu1 %vm397_vm3, %v17910_v16 }
 0x93d   :  { %12566 = vmatmul.mubr.msk.bf16.gmra.mrb[40].mxu1 %vm397_vm3, %v17911_v12 }
 0x93e   :  { %12569 = vmatprep.mubr.msk.bf16.mxu1 %vm397_vm3, %v16493_v38 }
 0x945   :  { %12570 = vmatmul.mubr.msk.bf16.gmra.mrb[44].mxu1 %vm397_vm3, %v7064_v23 }
 0xa00   :  { %v16620_v53 = vpop.f32.mrb[32].mxu1 }
 0xa01   :  { %v16622_v20 = vpop.f32.mrb[33].mxu1  ;;  %v7254_v7 = vmul.f32 %v16620_v53, %v16620_v53  ;;  %v7217_v19 = vsel %vm397_vm3, %v16620_v53, 0.0 }
 0xa02   :  { %v7252_v38 = vmul.f32 %v16622_v20, %v16622_v20  ;;  %v16626_v59 = vpop.f32.mrb[34].mxu1  ;;  %v7214_v56 = vsel %vm397_vm3, %v16622_v20, 0.0 }
 0xa03   :  { %v16628_v5 = vpop.f32.mrb[35].mxu1  ;;  %v7255_v26 = vmul.f32 %v16626_v59, %v16626_v59  ;;  %v7271_v43 = vsel %vm397_vm3, %v7254_v7, 0.0  ;;  %v7219_v22 = vsel %vm397_vm3, %v16626_v59, 0.0 }
 0xa04   :  { %v7215_v4 = vsel %vm397_vm3, %v16628_v5, 0.0  ;;  %v7253_v58 = vmul.f32 %v16628_v5, %v16628_v5  ;;  %v7268_v54 = vsel %vm397_vm3, %v7252_v38, 0.0 }
 0xa05   :  { %v7216_v14 = vadd.f32 %v7215_v4, %v7214_v56  ;;  %v7273_v57 = vsel %vm397_vm3, %v7255_v26, 0.0 }
 0xa06   :  { %v7269_v49 = vsel %vm397_vm3, %v7253_v58, 0.0 }
 0xa07   :  { %v7218_v13 = vadd.f32 %v7217_v19, %v7216_v14  ;;  %v7270_v11 = vadd.f32 %v7269_v49, %v7268_v54 }
 0xa08   :  { %v16647_v52 = vpop.f32.mrb[36].mxu1 }
 0xa09   :  { %v7272_v46 = vadd.f32 %v7271_v43, %v7270_v11  ;;  %v16649_v17 = vpop.f32.mrb[37].mxu1  ;;  %v7220_v10 = vadd.f32 %v7219_v22, %v7218_v13  ;;  %v7258_v34 = vmul.f32 %v16647_v52, %v16647_v52  ;;  %v7225_v37 = vsel %vm397_vm3, %v16647_v52, 0.0 }
 0xa0a   :  { %v7221_v55 = vsel %vm397_vm3, %v16649_v17, 0.0  ;;  %v7256_v39 = vmul.f32 %v16649_v17, %v16649_v17  ;;  %v16656_v21 = vpop.f32.mrb[38].mxu1 }
 0xa0b   :  { %v7222_v48 = vadd.f32 %v7221_v55, %v7220_v10  ;;  %v7274_v6 = vadd.f32 %v7273_v57, %v7272_v46  ;;  %v16658_v24 = vpop.f32.mrb[39].mxu1  ;;  %v7259_v32 = vmul.f32 %v16656_v21, %v16656_v21  ;;  %v7279_v63 = vsel %vm397_vm3, %v7258_v34, 0.0 }
 0xa0c   :  { %v7275_v60 = vsel %vm397_vm3, %v7256_v39, 0.0  ;;  %v7223_v41 = vsel %vm397_vm3, %v16658_v24, 0.0  ;;  %v7257_v18 = vmul.f32 %v16658_v24, %v16658_v24  ;;  %v7227_v8 = vsel %vm397_vm3, %v16656_v21, 0.0 }
 0xa0d   :  { %v7276_v35 = vadd.f32 %v7275_v60, %v7274_v6  ;;  %v7224_v25 = vadd.f32 %v7223_v41, %v7222_v48  ;;  %v7281_v28 = vsel %vm397_vm3, %v7259_v32, 0.0 }
 0xa0e   :  { %v7277_v29 = vsel %vm397_vm3, %v7257_v18, 0.0 }
 0xa0f   :  { %v7226_v42 = vadd.f32 %v7225_v37, %v7224_v25  ;;  %v7278_v2 = vadd.f32 %v7277_v29, %v7276_v35 }
 0xa10   :  { %v16675_v36 = vpop.f32.mrb[40].mxu1 }
 0xa11   :  { %v7280_v15 = vadd.f32 %v7279_v63, %v7278_v2  ;;  %v16677_v1 = vpop.f32.mrb[41].mxu1  ;;  %v7228_v33 = vadd.f32 %v7227_v8, %v7226_v42  ;;  %v7262_v45 = vmul.f32 %v16675_v36, %v16675_v36  ;;  %v7233_v3 = vsel %vm397_vm3, %v16675_v36, 0.0 }
 0xa12   :  { %v7229_v62 = vsel %vm397_vm3, %v16677_v1, 0.0  ;;  %v7260_v30 = vmul.f32 %v16677_v1, %v16677_v1  ;;  %v16684_v44 = vpop.f32.mrb[42].mxu1 }
 0xa13   :  { %v7230_v61 = vadd.f32 %v7229_v62, %v7228_v33  ;;  %v7282_v50 = vadd.f32 %v7281_v28, %v7280_v15  ;;  %v16686_v51 = vpop.f32.mrb[43].mxu1  ;;  %v7263_v23 = vmul.f32 %v16684_v44, %v16684_v44  ;;  %v7287_v7 = vsel %vm397_vm3, %v7262_v45, 0.0 }
 0xa14   :  { %v7283_v40 = vsel %vm397_vm3, %v7260_v30, 0.0  ;;  %v7231_v0 = vsel %vm397_vm3, %v16686_v51, 0.0  ;;  %v7261_v9 = vmul.f32 %v16686_v51, %v16686_v51  ;;  %v7235_v56 = vsel %vm397_vm3, %v16684_v44, 0.0 }
 0xa15   :  { %v7284_v16 = vadd.f32 %v7283_v40, %v7282_v50  ;;  %v7232_v12 = vadd.f32 %v7231_v0, %v7230_v61  ;;  %v7289_v54 = vsel %vm397_vm3, %v7263_v23, 0.0  ;;  %v7308_v23 = vld [vmem:[#allocation22] sm:$0x1] }
 0xa16   :  { %v7285_v47 = vsel %vm397_vm3, %v7261_v9, 0.0 }
 0xa17   :  { %v7234_v31 = vadd.f32 %v7233_v3, %v7232_v12  ;;  %v7286_v38 = vadd.f32 %v7285_v47, %v7284_v16 }
 0xa18   :  { %v16703_v4 = vpop.f32.mrb[44].mxu1 }
 0xa19   :  { %v7288_v58 = vadd.f32 %v7287_v7, %v7286_v38  ;;  %v16705_v14 = vpop.f32.mrb[45].mxu1  ;;  %v7236_v19 = vadd.f32 %v7235_v56, %v7234_v31  ;;  %v7266_v46 = vmul.f32 %v16703_v4, %v16703_v4  ;;  %v7241_v6 = vsel %vm397_vm3, %v16703_v4, 0.0  ;;  %v7312_v38 = vld [vmem:[#allocation24] sm:$0x1]  ;;  %v17912_v56 = vld [vmem:[#allocation61_spill] sm:$0xff] }
 0xa1a   :  { %v7237_v26 = vsel %vm397_vm3, %v16705_v14, 0.0  ;;  %v7264_v49 = vmul.f32 %v16705_v14, %v16705_v14  ;;  %v12572_v13 = vpop.f32.mrb[46].mxu1 }
 0xa1b   :  { %v7238_v11 = vadd.f32 %v7237_v26, %v7236_v19  ;;  %v7290_v43 = vadd.f32 %v7289_v54, %v7288_v58  ;;  %v7186_v22 = vpop.f32.mrb[47].mxu1  ;;  %v7267_v34 = vmul.f32 %v12572_v13, %v12572_v13  ;;  %v7295_v35 = vsel %vm397_vm3, %v7266_v46, 0.0 }
 0xa1c   :  { %v7291_v10 = vsel %vm397_vm3, %v7264_v49, 0.0  ;;  %v7239_v57 = vsel %vm397_vm3, %v7186_v22, 0.0  ;;  %v7265_v55 = vmul.f32 %v7186_v22, %v7186_v22  ;;  %v7243_v25 = vsel %vm397_vm3, %v12572_v13, 0.0 }
 0xa1d   :  { %v7292_v39 = vadd.f32 %v7291_v10, %v7290_v43  ;;  %v7240_v48 = vadd.f32 %v7239_v57, %v7238_v11  ;;  %v7297_v29 = vsel %vm397_vm3, %v7267_v34, 0.0 }
 0xa1e   :  { %v7293_v60 = vsel %vm397_vm3, %v7265_v55, 0.0 }
 0xa1f   :  { %v7242_v41 = vadd.f32 %v7241_v6, %v7240_v48  ;;  %v7294_v18 = vadd.f32 %v7293_v60, %v7292_v39 }
 0xa21   :  { %v7244_v37 = vadd.f32 %v7243_v25, %v7242_v41  ;;  %v7296_v32 = vadd.f32 %v7295_v35, %v7294_v18 }
 0xa23   :  { %v7245_v42 = vrot.slane %v7244_v37, 4  ;;  %v7298_v2 = vadd.f32 %v7297_v29, %v7296_v32 }
 0xa25   :  { %v7246_v63 = vadd.f32 %v7245_v42, %v7244_v37  ;;  %v7299_v8 = vrot.slane %v7298_v2, 4 }
 0xa27   :  { %v7247_v15 = vrot.slane %v7246_v63, 2  ;;  %v7300_v33 = vadd.f32 %v7299_v8, %v7298_v2 }
 0xa29   :  { %v7248_v28 = vadd.f32 %v7247_v15, %v7246_v63  ;;  %v7301_v62 = vrot.slane %v7300_v33, 2 }
 0xa2b   :  { %v7249_v30 = vrot.slane %v7248_v28, 1  ;;  %v7302_v61 = vadd.f32 %v7301_v62, %v7300_v33 }
 0xa2d   :  { %v7250_v50 = vadd.f32 %v7249_v30, %v7248_v28  ;;  %v7303_v45 = vrot.slane %v7302_v61, 1 }
 0xa2f   :  { %v7251_v40 = vmul.f32 0.0078125, %v7250_v50  ;;  %v7304_v0 = vadd.f32 %v7303_v45, %v7302_v61 }
 0xa31   :  { %v7305_v9 = vmul.f32 0.0078125, %v7304_v0  ;;  %v7306_v16 = vmul.f32 %v7251_v40, %v7251_v40 }
 0xa33   :  { %v7307_v12 = vsub.f32 %v7305_v9, %v7306_v16 }
 0xa35   :  { %v7309_v3 = vadd.f32 1e-05, %v7307_v12 }
 0xa37   :  { %13752 = vrsqrt.f32 %v7309_v3 }
 0xa41   :  { %v13753_v47 = vpop.eup %13752 }
 0xa42   :  { %v7311_v31 = vmul.f32 %v13753_v47, %v7308_v23 }
 0xa44   :  { %v7313_v7 = vmul.f32 %v7311_v31, %v7251_v40  ;;  %v7319_v58 = vrot.slane %v7311_v31, %v17912_v56  ;;  %v7451_v40 = vld [vmem:[#allocation3 + $0x1] sm:$0xff] }
 0xa46   :  { %v7314_v19 = vsub.f32 %v7312_v38, %v7313_v7  ;;  %v7321_v54 = vmul.f32 %v7319_v58, %v16622_v20  ;;  %v7322_v26 = vmul.f32 %v7319_v58, %v16628_v5  ;;  %v7323_v49 = vmul.f32 %v16620_v53, %v7319_v58 }
 0xa47   :  { %v7324_v11 = vmul.f32 %v16626_v59, %v7319_v58  ;;  %v7325_v43 = vmul.f32 %v7319_v58, %v16649_v17  ;;  %v7326_v46 = vmul.f32 %v7319_v58, %v16658_v24  ;;  %v7327_v10 = vmul.f32 %v16647_v52, %v7319_v58 }
 0xa48   :  { %v7328_v57 = vmul.f32 %v16656_v21, %v7319_v58  ;;  %v7329_v55 = vmul.f32 %v7319_v58, %v16677_v1  ;;  %v7330_v39 = vmul.f32 %v7319_v58, %v16686_v51  ;;  %v7331_v20 = vmul.f32 %v16675_v36, %v7319_v58 }
 0xa49   :  { %v7332_v5 = vmul.f32 %v16684_v44, %v7319_v58  ;;  %v7333_v53 = vmul.f32 %v7319_v58, %v16705_v14  ;;  %v7334_v48 = vmul.f32 %v7319_v58, %v7186_v22  ;;  %v7335_v59 = vmul.f32 %v16703_v4, %v7319_v58 }
 0xa4a   :  { %v7336_v17 = vmul.f32 %v12572_v13, %v7319_v58  ;;  %v7341_v24 = vrot.slane %v7314_v19, %v17912_v56  ;;  %v13667_v19 = vld [vmem:[#allocation25 + $0x8] sm:$0xff]  }
 0xa4b   :  { %v13673_v56 = vld [vmem:[#allocation25 + $0x48] sm:$0xff]  }
 0xa4c   :  { %v7343_v6 = vadd.f32 %v7341_v24, %v7321_v54  ;;  %v7344_v52 = vadd.f32 %v7341_v24, %v7322_v26  ;;  %v7345_v34 = vadd.f32 %v7341_v24, %v7323_v49  ;;  %v7346_v21 = vadd.f32 %v7341_v24, %v7324_v11 }
 0xa4d   :  { %v7347_v60 = vadd.f32 %v7341_v24, %v7325_v43  ;;  %v7348_v1 = vadd.f32 %v7341_v24, %v7326_v46  ;;  %v7349_v41 = vadd.f32 %v7341_v24, %v7327_v10  ;;  %v7350_v51 = vadd.f32 %v7341_v24, %v7328_v57 }
 0xa4e   :  { %v7351_v18 = vadd.f32 %v7341_v24, %v7329_v55  ;;  %v7352_v36 = vadd.f32 %v7341_v24, %v7330_v39  ;;  %v7353_v35 = vadd.f32 %v7341_v24, %v7331_v20  ;;  %v7354_v44 = vadd.f32 %v7341_v24, %v7332_v5  ;;  %v13668_v20 = vld [vmem:[#allocation25 + $0x20] sm:$0xff]  }
 0xa4f   :  { %v7355_v25 = vadd.f32 %v7341_v24, %v7333_v53  ;;  %v7356_v14 = vadd.f32 %v7341_v24, %v7334_v48  ;;  %v7357_v22 = vadd.f32 %v7341_v24, %v7335_v59  ;;  %v7358_v37 = vadd.f32 %v7341_v24, %v7336_v17  ;;  %v7459_v53 = vld [vmem:[#allocation3 + $0xa1] sm:$0xff] }
 0xa50   :  { %v7359_v4 = vmax.f32 %v7343_v6, 0.0  ;;  %v7360_v13 = vmax.f32 %v7344_v52, 0.0  ;;  %v7361_v32 = vmax.f32 %v7345_v34, 0.0  ;;  %v7362_v29 = vmax.f32 %v7346_v21, 0.0  ;;  %v13671_v52 = vld [vmem:[#allocation25 + $0x38] sm:$0xff]  }
 0xa51   :  { %v7363_v42 = vmax.f32 %v7347_v60, 0.0  ;;  %v7364_v2 = vmax.f32 %v7348_v1, 0.0  ;;  %v7365_v63 = vmax.f32 %v7349_v41, 0.0  ;;  %v7366_v8 = vmax.f32 %v7350_v51, 0.0 }
 0xa52   :  { %v7367_v15 = vmax.f32 %v7351_v18, 0.0  ;;  %v7368_v33 = vmax.f32 %v7352_v36, 0.0  ;;  %v7369_v28 = vmax.f32 %v7353_v35, 0.0  ;;  %v7370_v62 = vmax.f32 %v7354_v44, 0.0  ;;  %7375 = vst.msk [vmem:[#allocation3 + $0x11] sm:$0xff] %vm397_vm3, %v7359_v4  ;;  %7376 = vst.msk [vmem:[#allocation3 + $0x21] sm:$0xff] %vm397_vm3, %v7360_v13 }
 0xa53   :  { %7377 = vst.msk [vmem:[#allocation3 + $0x31] sm:$0xff] %vm397_vm3, %v7361_v32  ;;  %7378 = vst.msk [vmem:[#allocation3 + $0x41] sm:$0xff] %vm397_vm3, %v7362_v29  ;;  %v7371_v30 = vmax.f32 %v7355_v25, 0.0  ;;  %v7372_v61 = vmax.f32 %v7356_v14, 0.0  ;;  %v7373_v50 = vmax.f32 %v7357_v22, 0.0  ;;  %v7374_v45 = vmax.f32 %v7358_v37, 0.0 }
 0xa54   :  { %7379 = vst.msk [vmem:[#allocation3 + $0x51] sm:$0xff] %vm397_vm3, %v7363_v42  ;;  %7380 = vst.msk [vmem:[#allocation3 + $0x61] sm:$0xff] %vm397_vm3, %v7364_v2  ;;  %v7427_v32 = vld [vmem:[#allocation3] sm:$0xff] }
 0xa55   :  { %7381 = vst.msk [vmem:[#allocation3 + $0x71] sm:$0xff] %vm397_vm3, %v7365_v63  ;;  %7382 = vst.msk [vmem:[#allocation3 + $0x81] sm:$0xff] %vm397_vm3, %v7366_v8  ;;  %v7741_v25 = vld [vmem:[#allocation3 + $0x2] sm:$0xff] }
 0xa56   :  { %7383 = vst.msk [vmem:[#allocation3 + $0xb1] sm:$0xff] %vm397_vm3, %v7367_v15  ;;  %7384 = vst.msk [vmem:[#allocation3 + $0xc1] sm:$0xff] %vm397_vm3, %v7368_v33 }
 0xa57   :  { %7385 = vst.msk [vmem:[#allocation3 + $0xd1] sm:$0xff] %vm397_vm3, %v7369_v28  ;;  %7386 = vst.msk [vmem:[#allocation3 + $0xe1] sm:$0xff] %vm397_vm3, %v7370_v62  ;;  %v13669_v62 = vld [vmem:[#allocation25 + $0x28] sm:$0xff]  }
 0xa58   :  { %7387 = vst.msk [vmem:[#allocation3 + $0xf1] sm:$0xff] %vm397_vm3, %v7371_v30  ;;  %7388 = vst.msk [vmem:[#allocation3 + $0x101] sm:$0xff] %vm397_vm3, %v7372_v61  ;;  %v13670_v61 = vld [vmem:[#allocation25 + $0x30] sm:$0xff]  }
 0xa59   :  { %7389 = vst.msk [vmem:[#allocation3 + $0x111] sm:$0xff] %vm397_vm3, %v7373_v50  ;;  %7390 = vst.msk [vmem:[#allocation3 + $0x121] sm:$0xff] %vm397_vm3, %v7374_v45  ;;  %v16754_v0 = vld [vmem:[#allocation3 + $0x11] sm:$0xff]  ;;  %v16756_v9 = vld [vmem:[#allocation3 + $0x21] sm:$0xff] }
 0xa5a   :  { %v16758_v16 = vld [vmem:[#allocation3 + $0x31] sm:$0xff]  ;;  %v7467_v12 = vpack.c.bf16 %v16754_v0, %v7451_v40  ;;  %v16765_v23 = vld [vmem:[#allocation3 + $0x41] sm:$0xff] }
 0xa5b   :  { %v16763_v3 = vpack.c.bf16 %v16758_v16, %v16756_v9  ;;  %v16767_v47 = vld [vmem:[#allocation3 + $0x51] sm:$0xff]  ;;  %v16769_v31 = vld [vmem:[#allocation3 + $0x61] sm:$0xff] }
 0xa5c   :  { %12577 = vmatprep.mubr.msk.bf16.mxu0 %vm397_vm3, %v7467_v12  ;;  %v16784_v49 = vpack.c.bf16 %v16767_v47, %v16765_v23  ;;  %v16805_v5 = vld [vmem:[#allocation3 + $0x71] sm:$0xff]  ;;  %v16809_v59 = vld [vmem:[#allocation3 + $0x22] sm:$0xff] }
 0xa5d   :  { %v16773_v7 = vld [vmem:[#allocation3 + $0xb1] sm:$0xff]  ;;  %v16775_v58 = vld [vmem:[#allocation3 + $0xc1] sm:$0xff]  ;;  %12578 = vmatmul.mubr.msk.bf16.vlgmr.msra.gmra.mrb[32].mxu0 %vm397_vm3, %v16763_v3  ;;  %v16813_v17 = vpack.c.bf16 %v16805_v5, %v16769_v31 }
 0xa5e   :  { %v16786_v11 = vld [vmem:[#allocation3 + $0xd1] sm:$0xff]  ;;  %v16788_v43 = vld [vmem:[#allocation3 + $0xe1] sm:$0xff]  ;;  %12581 = vmatprep.mubr.msk.bf16.mxu0 %vm397_vm3, %v16784_v49  ;;  %12594 = vmatpush3.bf16.msra.mxu0 %v16617_v27  ;;  %v7471_v34 = vpack.c.bf16 %v16773_v7, %v7459_v53 }
 0xa5f   :  { %v16790_v46 = vld [vmem:[#allocation3 + $0xf1] sm:$0xff]  ;;  %v16796_v57 = vld [vmem:[#allocation3 + $0x101] sm:$0xff]  ;;  %12595 = vmatprep.subr.bf16.mxu0 %v13667_v19  ;;  %v16853_v37 = vpack.c.bf16 %v16786_v11, %v16775_v58 }
 0xa60   :  { %v16807_v48 = vld [vmem:[#allocation3 + $0x12] sm:$0xff]  ;;  %v16817_v27 = vld [vmem:[#allocation3 + $0x42] sm:$0xff]  ;;  %v16857_v4 = vpack.c.bf16 %v16790_v46, %v16788_v43 }
 0xa61   :  { %v16815_v24 = vld [vmem:[#allocation3 + $0x32] sm:$0xff]  ;;  %v16824_v21 = vld [vmem:[#allocation3 + $0x62] sm:$0xff] }
 0xa62   :  { %12596 = vmatpush3.bf16.msra.mxu0 %v13667_v19  ;;  %v16819_v6 = vld [vmem:[#allocation3 + $0x52] sm:$0xff]  ;;  %v16832_v41 = vld [vmem:[#allocation3 + $0xc2] sm:$0xff]  ;;  %v16916_v1 = vpack.c.bf16 %v16815_v24, %v16809_v59 }
 0xa63   :  { %12613 = vmatprep.subr.bf16.mxu0 %v13668_v20  ;;  %v16826_v60 = vld [vmem:[#allocation3 + $0xb2] sm:$0xff]  ;;  %v16836_v18 = vld [vmem:[#allocation3 + $0xe2] sm:$0xff]  ;;  %v16920_v39 = vpack.c.bf16 %v16819_v6, %v16817_v27 }
 0xa64   :  { %v16834_v51 = vld [vmem:[#allocation3 + $0xd2] sm:$0xff]  ;;  %v16843_v44 = vld [vmem:[#allocation3 + $0x102] sm:$0xff] }
 0xa65   :  { %12582 = vmatmul.mubr.msk.bf16.gmra.mrb[36].mxu0 %vm397_vm3, %v16813_v17  ;;  %v16841_v35 = vld [vmem:[#allocation3 + $0xf2] sm:$0xff]  ;;  %v7429_v63 = vld [vmem:[#allocation3 + $0x20] sm:$0xff] }
 0xa66   :  { %12585 = vmatprep.mubr.msk.bf16.mxu0 %vm397_vm3, %v7471_v34  ;;  %v16863_v13 = vld [vmem:[#allocation3 + $0x111] sm:$0xff]  ;;  %v16877_v15 = vld [vmem:[#allocation3 + $0x40] sm:$0xff]  ;;  %v16942_v54 = vpack.c.bf16 %v16841_v35, %v16836_v18 }
 0xa67   :  { %v16865_v29 = vld [vmem:[#allocation3 + $0x10] sm:$0xff]  ;;  %v16869_v42 = vpack.c.bf16 %v16863_v13, %v16796_v57  ;;  %v7433_v50 = vld [vmem:[#allocation3 + $0x60] sm:$0xff] }
 0xa68   :  { %v7443_v2 = vpack.c.bf16 %v16865_v29, %v7427_v32  ;;  %v16875_v8 = vld [vmem:[#allocation3 + $0x30] sm:$0xff]  ;;  %v7435_v40 = vld [vmem:[#allocation3 + $0xa0] sm:$0xff]  ;;  %17915 = vst [vmem:[#allocation80_spill] sm:$0xff] %v16942_v54 }
 0xa69   :  { %v16879_v33 = vld [vmem:[#allocation3 + $0x50] sm:$0xff]  ;;  %v16882_v28 = vpack.c.bf16 %v16875_v8, %v7429_v63  ;;  %v7437_v34 = vld [vmem:[#allocation3 + $0xc0] sm:$0xff]  ;;  %v7931_v38 = vpack.c.bf16 %v16877_v15, %v16875_v8 }
 0xa6a   :  { %v16886_v30 = vpack.c.bf16 %v16879_v33, %v16877_v15  ;;  %v16892_v45 = vld [vmem:[#allocation3 + $0x70] sm:$0xff]  ;;  %v7439_v32 = vld [vmem:[#allocation3 + $0xe0] sm:$0xff] }
 0xa6b   :  { %v7436_v12 = vld [vmem:[#allocation3 + $0xb0] sm:$0xff]  ;;  %v16895_v19 = vpack.c.bf16 %v16892_v45, %v7433_v50 }
 0xa6c   :  { %v7447_v53 = vpack.c.bf16 %v7436_v12, %v7435_v40  ;;  %v7442_v40 = vld [vmem:[#allocation3 + $0x110] sm:$0xff] }
 0xa6d   :  { %12586 = vmatmul.mubr.msk.bf16.gmra.mrb[40].mxu0 %vm397_vm3, %v16853_v37  ;;  %v16926_v55 = vld [vmem:[#allocation3 + $0x72] sm:$0xff] }
 0xa6e   :  { %12589 = vmatprep.mubr.msk.bf16.mxu0 %vm397_vm3, %v16857_v4  ;;  %v16930_v10 = vpack.c.bf16 %v16926_v55, %v16824_v21 }
 0xa70   :  { %17913 = vst [vmem:[#allocation76_spill] sm:$0xff] %v16930_v10 }
 0xa75   :  { %12590 = vmatmul.mubr.msk.bf16.gmra.mrb[44].mxu0 %vm397_vm3, %v16869_v42 }
 0xa76   :  { %12597 = vmatprep.mubr.msk.bf16.mxu0 %vm397_vm3, %v7443_v2  ;;  %v7440_v2 = vld [vmem:[#allocation3 + $0xf0] sm:$0xff] }
 0xa77   :  { %v16902_v14 = vpack.c.bf16 %v7440_v2, %v7439_v32 }
 0xa7d   :  { %12598 = vmatmul.mubr.msk.bf16.vlgmr.msra.gmra.mrb[32].mxu0 %vm397_vm3, %v16882_v28 }
 0xa7e   :  { %12601 = vmatprep.mubr.msk.bf16.mxu0 %vm397_vm3, %v16886_v30  ;;  %12614 = vmatpush3.bf16.msra.mxu0 %v13668_v20  ;;  %v7438_v20 = vld [vmem:[#allocation3 + $0xd0] sm:$0xff] }
 0xa7f   :  { %12615 = vmatprep.subr.bf16.mxu0 %v13669_v62  ;;  %v16900_v22 = vpack.c.bf16 %v7438_v20, %v7437_v34  ;;  %v7935_v8 = vpack.c.bf16 %v7439_v32, %v7438_v20  ;;  %v8094_v20 = vld [vmem:[#allocation3 + $0x81] sm:$0xff] }
 0xa82   :  { %12616 = vmatpush3.bf16.msra.mxu0 %v13669_v62  ;;  %v7441_v62 = vld [vmem:[#allocation3 + $0x100] sm:$0xff] }
 0xa83   :  { %12633 = vmatprep.subr.bf16.mxu0 %v13670_v61  ;;  %v16908_v36 = vpack.c.bf16 %v7442_v40, %v7441_v62  ;;  %v7936_v15 = vpack.c.bf16 %v7441_v62, %v7440_v2 }
 0xa85   :  { %12602 = vmatmul.mubr.msk.bf16.gmra.mrb[36].mxu0 %vm397_vm3, %v16895_v19 }
 0xa86   :  { %12605 = vmatprep.mubr.msk.bf16.mxu0 %vm397_vm3, %v7447_v53  ;;  %v7757_v53 = vpack.c.bf16 %v16807_v48, %v7741_v25  ;;  %v13672_v25 = vld [vmem:[#allocation25 + $0x40] sm:$0xff]  }
 0xa8d   :  { %12606 = vmatmul.mubr.msk.bf16.gmra.mrb[40].mxu0 %vm397_vm3, %v16900_v22 }
 0xa8e   :  { %12609 = vmatprep.mubr.msk.bf16.mxu0 %vm397_vm3, %v16902_v14 }
 0xa95   :  { %12610 = vmatmul.mubr.msk.bf16.gmra.mrb[44].mxu0 %vm397_vm3, %v16908_v36 }
 0xa96   :  { %12617 = vmatprep.mubr.msk.bf16.mxu0 %vm397_vm3, %v7757_v53  ;;  %v7749_v53 = vld [vmem:[#allocation3 + $0xa2] sm:$0xff] }
 0xa97   :  { %v7761_v26 = vpack.c.bf16 %v16826_v60, %v7749_v53 }
 0xa9d   :  { %12618 = vmatmul.mubr.msk.bf16.vlgmr.msra.gmra.mrb[32].mxu0 %vm397_vm3, %v16916_v1 }
 0xa9e   :  { %12621 = vmatprep.mubr.msk.bf16.mxu0 %vm397_vm3, %v16920_v39  ;;  %12634 = vmatpush3.bf16.msra.mxu0 %v13670_v61  ;;  %v16938_v61 = vpack.c.bf16 %v16834_v51, %v16832_v41 }
 0xa9f   :  { %12635 = vmatprep.subr.bf16.mxu0 %v13671_v52 }
 0xaa0   :  { %17914 = vst [vmem:[#allocation77_spill] sm:$0xff] %v16938_v61 }
 0xaa2   :  { %12636 = vmatpush3.bf16.msra.mxu0 %v13671_v52  ;;  %v16948_v52 = vld [vmem:[#allocation3 + $0x112] sm:$0xff] }
 0xaa3   :  { %12653 = vmatprep.subr.bf16.mxu0 %v13672_v25  ;;  %v16952_v53 = vpack.c.bf16 %v16948_v52, %v16843_v44 }
 0xaa5   :  { %12622 = vmatmul.mubr.msk.bf16.gmra.mrb[36].mxu0 %vm397_vm3, %v16930_v10  ;;  %v7921_v10 = vld [vmem:[#allocation3 + $0x80] sm:$0xff] }
 0xaa6   :  { %12625 = vmatprep.mubr.msk.bf16.mxu0 %vm397_vm3, %v7761_v26  ;;  %v7930_v26 = vpack.c.bf16 %v7429_v63, %v16865_v29  ;;  %v7933_v29 = vpack.c.bf16 %v7921_v10, %v16892_v45  ;;  %v7934_v63 = vpack.c.bf16 %v7437_v34, %v7436_v12  ;;  %v17917_v45 = vpack.c.bf16 %v16765_v23, %v16758_v16  ;;  %v13676_v34 = vld [vmem:[#allocation25 + $0x60] sm:$0xff]  }
 0xaa7   :  { %v17918_v12 = vpack.c.bf16 %v16769_v31, %v16767_v47  ;;  %v17920_v16 = vpack.c.bf16 %v16788_v43, %v16786_v11  ;;  %v17921_v23 = vpack.c.bf16 %v16796_v57, %v16790_v46  ;;  %v8102_v47 = vld [vmem:[#allocation3 + $0x121] sm:$0xff]  ;;  %v17924_v11 = vpack.c.bf16 %v16824_v21, %v16819_v6  ;;  %v13678_v43 = vld [vmem:[#allocation25 + $0x70] sm:$0xff]   ;;  %v13680_v6 = vld [vmem:[#allocation25 + $0x80] sm:$0xff]  }
 0xaa8   :  { %v8110_v31 = vpack.c.bf16 %v8102_v47, %v16863_v13  ;;  %v8267_v46 = vld [vmem:[#allocation3 + $0x82] sm:$0xff]  ;;  %v8440_v21 = vld [vmem:[#allocation3 + $0x90] sm:$0xff]  ;;  %v17932_v13 = vmov 0.0  }
 0xaa9   :  { %v8279_v57 = vpack.c.bf16 %v8267_v46, %v16926_v55 }
 0xaad   :  { %12626 = vmatmul.mubr.msk.bf16.gmra.mrb[40].mxu0 %vm397_vm3, %v16938_v61  ;;  %v7932_v61 = vpack.c.bf16 %v7433_v50, %v16879_v33  ;;  %v13675_v50 = vld [vmem:[#allocation25 + $0x58] sm:$0xff]  }
 0xaae   :  { %12629 = vmatprep.mubr.msk.bf16.mxu0 %vm397_vm3, %v16942_v54  ;;  %v13674_v54 = vld [vmem:[#allocation25 + $0x50] sm:$0xff]  }
 0xab5   :  { %12630 = vmatmul.mubr.msk.bf16.gmra.mrb[44].mxu0 %vm397_vm3, %v16952_v53 }
 0xab6   :  { %12637 = vmatprep.mubr.msk.bf16.mxu0 %vm397_vm3, %v7930_v26 }
 0xabd   :  { %12638 = vmatmul.mubr.msk.bf16.vlgmr.msra.gmra.mrb[32].mxu0 %vm397_vm3, %v7931_v38  ;;  %v7929_v38 = vld [vmem:[#allocation3 + $0x120] sm:$0xff] }
 0xabe   :  { %12641 = vmatprep.mubr.msk.bf16.mxu0 %vm397_vm3, %v7932_v61  ;;  %12654 = vmatpush3.bf16.msra.mxu0 %v13672_v25  ;;  %v7937_v33 = vpack.c.bf16 %v7929_v38, %v7442_v40 }
 0xabf   :  { %12655 = vmatprep.subr.bf16.mxu0 %v13673_v56 }
 0xac2   :  { %12656 = vmatpush3.bf16.msra.mxu0 %v13673_v56  ;;  %v17916_v56 = vpack.c.bf16 %v16756_v9, %v16754_v0  ;;  %v8106_v0 = vpack.c.bf16 %v8094_v20, %v16805_v5  ;;  %v17919_v9 = vpack.c.bf16 %v16775_v58, %v16773_v7  ;;  %v17922_v7 = vpack.c.bf16 %v16809_v59, %v16807_v48  ;;  %v13677_v58 = vld [vmem:[#allocation25 + $0x68] sm:$0xff]  }
 0xac3   :  { %12673 = vmatprep.subr.bf16.mxu0 %v13674_v54  ;;  %v17925_v5 = vpack.c.bf16 %v16832_v41, %v16826_v60  ;;  %v17926_v48 = vpack.c.bf16 %v16836_v18, %v16834_v51  ;;  %v17927_v59 = vpack.c.bf16 %v16843_v44, %v16841_v35  ;;  %v8452_v60 = vpack.c.bf16 %v8440_v21, %v7921_v10  ;;  %v8448_v41 = vld [vmem:[#allocation3 + $0x130] sm:$0xff]  ;;  %v13681_v10 = vld [vmem:[#allocation25 + $0x88] sm:$0xff]  }
 0xac4   :  { %v8456_v51 = vpack.c.bf16 %v8448_v41, %v7929_v38  ;;  %v8613_v18 = vld [vmem:[#allocation3 + $0x91] sm:$0xff] }
 0xac5   :  { %12642 = vmatmul.mubr.msk.bf16.gmra.mrb[36].mxu0 %vm397_vm3, %v7933_v29  ;;  %v8625_v35 = vpack.c.bf16 %v8613_v18, %v8094_v20 }
 0xac6   :  { %12645 = vmatprep.mubr.msk.bf16.mxu0 %vm397_vm3, %v7934_v63 }
 0xacd   :  { %12646 = vmatmul.mubr.msk.bf16.gmra.mrb[40].mxu0 %vm397_vm3, %v7935_v8 }
 0xace   :  { %12649 = vmatprep.mubr.msk.bf16.mxu0 %vm397_vm3, %v7936_v15 }
 0xad5   :  { %12650 = vmatmul.mubr.msk.bf16.gmra.mrb[44].mxu0 %vm397_vm3, %v7937_v33 }
 0xad6   :  { %12657 = vmatprep.mubr.msk.bf16.mxu0 %vm397_vm3, %v17916_v56 }
 0xadd   :  { %12658 = vmatmul.mubr.msk.bf16.vlgmr.msra.gmra.mrb[32].mxu0 %vm397_vm3, %v17917_v45 }
 0xade   :  { %12661 = vmatprep.mubr.msk.bf16.mxu0 %vm397_vm3, %v17918_v12  ;;  %12674 = vmatpush3.bf16.msra.mxu0 %v13674_v54  ;;  %v17923_v54 = vpack.c.bf16 %v16817_v27, %v16815_v24  ;;  %v8275_v24 = vld [vmem:[#allocation3 + $0x122] sm:$0xff]  ;;  %v13679_v27 = vld [vmem:[#allocation25 + $0x78] sm:$0xff]  }
 0xadf   :  { %12675 = vmatprep.subr.bf16.mxu0 %v13675_v50  ;;  %v8283_v55 = vpack.c.bf16 %v8275_v24, %v16948_v52 }
 0xae2   :  { %12676 = vmatpush3.bf16.msra.mxu0 %v13675_v50 }
 0xae3   :  { %12693 = vmatprep.subr.bf16.mxu0 %v13676_v34 }
 0xae5   :  { %12662 = vmatmul.mubr.msk.bf16.gmra.mrb[36].mxu0 %vm397_vm3, %v8106_v0 }
 0xae6   :  { %12665 = vmatprep.mubr.msk.bf16.mxu0 %vm397_vm3, %v17919_v9 }
 0xaed   :  { %12666 = vmatmul.mubr.msk.bf16.gmra.mrb[40].mxu0 %vm397_vm3, %v17920_v16 }
 0xaee   :  { %12669 = vmatprep.mubr.msk.bf16.mxu0 %vm397_vm3, %v17921_v23 }
 0xaf5   :  { %12670 = vmatmul.mubr.msk.bf16.gmra.mrb[44].mxu0 %vm397_vm3, %v8110_v31 }
 0xaf6   :  { %12677 = vmatprep.mubr.msk.bf16.mxu0 %vm397_vm3, %v17922_v7 }
 0xafd   :  { %12678 = vmatmul.mubr.msk.bf16.vlgmr.msra.gmra.mrb[32].mxu0 %vm397_vm3, %v17923_v54 }
 0xafe   :  { %12681 = vmatprep.mubr.msk.bf16.mxu0 %vm397_vm3, %v17924_v11  ;;  %12694 = vmatpush3.bf16.msra.mxu0 %v13676_v34 }
 0xaff   :  { %12695 = vmatprep.subr.bf16.mxu0 %v13677_v58 }
 0xb02   :  { %12696 = vmatpush3.bf16.msra.mxu0 %v13677_v58 }
 0xb03   :  { %12713 = vmatprep.subr.bf16.mxu0 %v13678_v43 }
 0xb05   :  { %12682 = vmatmul.mubr.msk.bf16.gmra.mrb[36].mxu0 %vm397_vm3, %v8279_v57 }
 0xb06   :  { %12685 = vmatprep.mubr.msk.bf16.mxu0 %vm397_vm3, %v17925_v5 }
 0xb0d   :  { %12686 = vmatmul.mubr.msk.bf16.gmra.mrb[40].mxu0 %vm397_vm3, %v17926_v48 }
 0xb0e   :  { %12689 = vmatprep.mubr.msk.bf16.mxu0 %vm397_vm3, %v17927_v59 }
 0xb15   :  { %12690 = vmatmul.mubr.msk.bf16.gmra.mrb[44].mxu0 %vm397_vm3, %v8283_v55 }
 0xb16   :  { %12697 = vmatprep.mubr.msk.bf16.mxu0 %vm397_vm3, %v16882_v28 }
 0xb1d   :  { %12698 = vmatmul.mubr.msk.bf16.vlgmr.msra.gmra.mrb[32].mxu0 %vm397_vm3, %v16886_v30 }
 0xb1e   :  { %12701 = vmatprep.mubr.msk.bf16.mxu0 %vm397_vm3, %v16895_v19  ;;  %12714 = vmatpush3.bf16.msra.mxu0 %v13678_v43 }
 0xb1f   :  { %12715 = vmatprep.subr.bf16.mxu0 %v13679_v27 }
 0xb22   :  { %12716 = vmatpush3.bf16.msra.mxu0 %v13679_v27 }
 0xb23   :  { %12733 = vmatprep.subr.bf16.mxu0 %v13680_v6 }
 0xb25   :  { %12702 = vmatmul.mubr.msk.bf16.gmra.mrb[36].mxu0 %vm397_vm3, %v8452_v60 }
 0xb26   :  { %12705 = vmatprep.mubr.msk.bf16.mxu0 %vm397_vm3, %v16900_v22  ;;  %v17931_v22 = vld [vmem:[#allocation80_spill] sm:$0xff] }
 0xb2d   :  { %12706 = vmatmul.mubr.msk.bf16.gmra.mrb[40].mxu0 %vm397_vm3, %v16902_v14  ;;  %v17930_v14 = vld [vmem:[#allocation77_spill] sm:$0xff] }
 0xb2e   :  { %12709 = vmatprep.mubr.msk.bf16.mxu0 %vm397_vm3, %v16908_v36  ;;  %v8786_v36 = vld [vmem:[#allocation3 + $0x92] sm:$0xff] }
 0xb2f   :  { %v8798_v44 = vpack.c.bf16 %v8786_v36, %v8267_v46 }
 0xb35   :  { %12710 = vmatmul.mubr.msk.bf16.gmra.mrb[44].mxu0 %vm397_vm3, %v8456_v51 }
 0xb36   :  { %12717 = vmatprep.mubr.msk.bf16.mxu0 %vm397_vm3, %v16763_v3  ;;  %v8621_v3 = vld [vmem:[#allocation3 + $0x131] sm:$0xff] }
 0xb3d   :  { %12718 = vmatmul.mubr.msk.bf16.vlgmr.msra.gmra.mrb[32].mxu0 %vm397_vm3, %v16784_v49  ;;  %v8629_v49 = vpack.c.bf16 %v8621_v3, %v8102_v47 }
 0xb3e   :  { %12721 = vmatprep.mubr.msk.bf16.mxu0 %vm397_vm3, %v16813_v17  ;;  %12734 = vmatpush3.bf16.msra.mxu0 %v13680_v6  ;;  %v17929_v17 = vld [vmem:[#allocation76_spill] sm:$0xff] }
 0xb3f   :  { %12735 = vmatprep.subr.bf16.mxu0 %v13681_v10 }
 0xb42   :  { %12736 = vmatpush3.bf16.msra.mxu0 %v13681_v10 }
 0xb45   :  { %12722 = vmatmul.mubr.msk.bf16.gmra.mrb[36].mxu0 %vm397_vm3, %v8625_v35 }
 0xb46   :  { %12725 = vmatprep.mubr.msk.bf16.mxu0 %vm397_vm3, %v16853_v37 }
 0xb4d   :  { %12726 = vmatmul.mubr.msk.bf16.gmra.mrb[40].mxu0 %vm397_vm3, %v16857_v4  ;;  %v13683_v4 = vld [vmem:[%s17928_s1 + $0x8] sm:$0xff]  }
 0xb4e   :  { %12729 = vmatprep.mubr.msk.bf16.mxu0 %vm397_vm3, %v16869_v42 }
 0xb55   :  { %12730 = vmatmul.mubr.msk.bf16.gmra.mrb[44].mxu0 %vm397_vm3, %v8629_v49 }
 0xb56   :  { %12737 = vmatprep.mubr.msk.bf16.mxu0 %vm397_vm3, %v16916_v1  ;;  %v8794_v1 = vld [vmem:[#allocation3 + $0x132] sm:$0xff] }
 0xb57   :  { %v8802_v37 = vpack.c.bf16 %v8794_v1, %v8275_v24 }
 0xb5d   :  { %12738 = vmatmul.mubr.msk.bf16.vlgmr.msra.gmra.mrb[32].mxu0 %vm397_vm3, %v16920_v39  ;;  %v13682_v39 = vld [vmem:[%s17928_s1] sm:$0xff]  }
 0xb5e   :  { %12741 = vmatprep.mubr.msk.bf16.mxu0 %vm397_vm3, %v17929_v17  ;;  %12753 = vmatprep.subr.bf16.mxu1 %v13682_v39 }
 0xb5f   :  { %12754 = vmatpush3.bf16.msra.mxu1 %v13682_v39 }
 0xb60   :  { %12755 = vmatprep.subr.bf16.mxu1 %v13683_v4 }
 0xb63   :  { %12756 = vmatpush3.bf16.msra.mxu1 %v13683_v4 }
 0xb64   :  { %12773 = vmatprep.subr.bf16.mxu1 %v17932_v13 }
 0xb65   :  { %12742 = vmatmul.mubr.msk.bf16.gmra.mrb[36].mxu0 %vm397_vm3, %v8798_v44 }
 0xb66   :  { %12745 = vmatprep.mubr.msk.bf16.mxu0 %vm397_vm3, %v17930_v14 }
 0xb6d   :  { %12746 = vmatmul.mubr.msk.bf16.gmra.mrb[40].mxu0 %vm397_vm3, %v17931_v22 }
 0xb6e   :  { %12749 = vmatprep.mubr.msk.bf16.mxu0 %vm397_vm3, %v16952_v53 }
 0xb75   :  { %12750 = vmatmul.mubr.msk.bf16.gmra.mrb[44].mxu0 %vm397_vm3, %v8802_v37 }
 0xc30   :  { %v17070_v42 = vpop.f32.mrb[32].mxu0 }
 0xc31   :  { %v17072_v28 = vpop.f32.mrb[33].mxu0  ;;  %v8992_v2 = vmul.f32 %v17070_v42, %v17070_v42  ;;  %v8955_v52 = vsel %vm397_vm3, %v17070_v42, 0.0 }
 0xc32   :  { %v8990_v30 = vmul.f32 %v17072_v28, %v17072_v28  ;;  %v17076_v19 = vpop.f32.mrb[34].mxu0  ;;  %v8952_v62 = vsel %vm397_vm3, %v17072_v28, 0.0 }
 0xc33   :  { %v17078_v32 = vpop.f32.mrb[35].mxu0  ;;  %v8993_v26 = vmul.f32 %v17076_v19, %v17076_v19  ;;  %v9009_v15 = vsel %vm397_vm3, %v8992_v2, 0.0  ;;  %v8957_v38 = vsel %vm397_vm3, %v17076_v19, 0.0 }
 0xc34   :  { %v8953_v40 = vsel %vm397_vm3, %v17078_v32, 0.0  ;;  %v8991_v25 = vmul.f32 %v17078_v32, %v17078_v32  ;;  %v9006_v53 = vsel %vm397_vm3, %v8990_v30, 0.0 }
 0xc35   :  { %v8954_v61 = vadd.f32 %v8953_v40, %v8952_v62  ;;  %v9011_v12 = vsel %vm397_vm3, %v8993_v26, 0.0 }
 0xc36   :  { %v9007_v29 = vsel %vm397_vm3, %v8991_v25, 0.0 }
 0xc37   :  { %v8956_v63 = vadd.f32 %v8955_v52, %v8954_v61  ;;  %v9008_v8 = vadd.f32 %v9007_v29, %v9006_v53 }
 0xc38   :  { %v17097_v33 = vpop.f32.mrb[36].mxu0 }
 0xc39   :  { %v9010_v56 = vadd.f32 %v9009_v15, %v9008_v8  ;;  %v17099_v50 = vpop.f32.mrb[37].mxu0  ;;  %v8958_v45 = vadd.f32 %v8957_v38, %v8956_v63  ;;  %v8996_v47 = vmul.f32 %v17097_v33, %v17097_v33  ;;  %v8963_v43 = vsel %vm397_vm3, %v17097_v33, 0.0 }
 0xc3a   :  { %v8959_v34 = vsel %vm397_vm3, %v17099_v50, 0.0  ;;  %v8994_v20 = vmul.f32 %v17099_v50, %v17099_v50  ;;  %v17106_v0 = vpop.f32.mrb[38].mxu0 }
 0xc3b   :  { %v8960_v9 = vadd.f32 %v8959_v34, %v8958_v45  ;;  %v9012_v16 = vadd.f32 %v9011_v12, %v9010_v56  ;;  %v17108_v23 = vpop.f32.mrb[39].mxu0  ;;  %v8997_v46 = vmul.f32 %v17106_v0, %v17106_v0  ;;  %v9017_v59 = vsel %vm397_vm3, %v8996_v47, 0.0 }
 0xc3c   :  { %v9013_v31 = vsel %vm397_vm3, %v8994_v20, 0.0  ;;  %v8961_v7 = vsel %vm397_vm3, %v17108_v23, 0.0  ;;  %v8995_v58 = vmul.f32 %v17108_v23, %v17108_v23  ;;  %v8965_v24 = vsel %vm397_vm3, %v17106_v0, 0.0 }
 0xc3d   :  { %v9014_v54 = vadd.f32 %v9013_v31, %v9012_v16  ;;  %v8962_v11 = vadd.f32 %v8961_v7, %v8960_v9  ;;  %v9019_v60 = vsel %vm397_vm3, %v8997_v46, 0.0 }
 0xc3e   :  { %v9015_v57 = vsel %vm397_vm3, %v8995_v58, 0.0 }
 0xc3f   :  { %v8964_v5 = vadd.f32 %v8963_v43, %v8962_v11  ;;  %v9016_v48 = vadd.f32 %v9015_v57, %v9014_v54 }
 0xc40   :  { %v17125_v55 = vpop.f32.mrb[40].mxu0 }
 0xc41   :  { %v9018_v27 = vadd.f32 %v9017_v59, %v9016_v48  ;;  %v17127_v6 = vpop.f32.mrb[41].mxu0  ;;  %v8966_v21 = vadd.f32 %v8965_v24, %v8964_v5  ;;  %v9000_v49 = vmul.f32 %v17125_v55, %v17125_v55  ;;  %v8971_v1 = vsel %vm397_vm3, %v17125_v55, 0.0 }
 0xc42   :  { %v8967_v41 = vsel %vm397_vm3, %v17127_v6, 0.0  ;;  %v8998_v51 = vmul.f32 %v17127_v6, %v17127_v6  ;;  %v17134_v10 = vpop.f32.mrb[42].mxu0 }
 0xc43   :  { %v8968_v18 = vadd.f32 %v8967_v41, %v8966_v21  ;;  %v9020_v35 = vadd.f32 %v9019_v60, %v9018_v27  ;;  %v17136_v3 = vpop.f32.mrb[43].mxu0  ;;  %v9001_v37 = vmul.f32 %v17134_v10, %v17134_v10  ;;  %v9025_v2 = vsel %vm397_vm3, %v9000_v49, 0.0 }
 0xc44   :  { %v9021_v17 = vsel %vm397_vm3, %v8998_v51, 0.0  ;;  %v8969_v36 = vsel %vm397_vm3, %v17136_v3, 0.0  ;;  %v8999_v44 = vmul.f32 %v17136_v3, %v17136_v3  ;;  %v8973_v62 = vsel %vm397_vm3, %v17134_v10, 0.0 }
 0xc45   :  { %v9022_v14 = vadd.f32 %v9021_v17, %v9020_v35  ;;  %v8970_v22 = vadd.f32 %v8969_v36, %v8968_v18  ;;  %v9027_v53 = vsel %vm397_vm3, %v9001_v37, 0.0  ;;  %v9046_v37 = vld [vmem:[%s17933_s13] sm:$0x1] }
 0xc46   :  { %v9023_v39 = vsel %vm397_vm3, %v8999_v44, 0.0 }
 0xc47   :  { %v8972_v4 = vadd.f32 %v8971_v1, %v8970_v22  ;;  %v9024_v30 = vadd.f32 %v9023_v39, %v9022_v14 }
 0xc48   :  { %v17153_v40 = vpop.f32.mrb[44].mxu0 }
 0xc49   :  { %v9026_v25 = vadd.f32 %v9025_v2, %v9024_v30  ;;  %v17155_v61 = vpop.f32.mrb[45].mxu0  ;;  %v8974_v52 = vadd.f32 %v8973_v62, %v8972_v4  ;;  %v9004_v56 = vmul.f32 %v17153_v40, %v17153_v40  ;;  %v8979_v16 = vsel %vm397_vm3, %v17153_v40, 0.0  ;;  %v9050_v30 = vld [vmem:[#allocation27] sm:$0x1] }
 0xc4a   :  { %v8975_v26 = vsel %vm397_vm3, %v17155_v61, 0.0  ;;  %v9002_v29 = vmul.f32 %v17155_v61, %v17155_v61  ;;  %v17162_v63 = vpop.f32.mrb[46].mxu0  ;;  %v17934_v62 = vld [vmem:[#allocation61_spill] sm:$0xff] }
 0xc4b   :  { %v8976_v8 = vadd.f32 %v8975_v26, %v8974_v52  ;;  %v9028_v15 = vadd.f32 %v9027_v53, %v9026_v25  ;;  %v8924_v38 = vpop.f32.mrb[47].mxu0  ;;  %v9005_v47 = vmul.f32 %v17162_v63, %v17162_v63  ;;  %v9033_v54 = vsel %vm397_vm3, %v9004_v56, 0.0 }
 0xc4c   :  { %v9029_v45 = vsel %vm397_vm3, %v9002_v29, 0.0  ;;  %v8977_v12 = vsel %vm397_vm3, %v8924_v38, 0.0  ;;  %v9003_v34 = vmul.f32 %v8924_v38, %v8924_v38  ;;  %v8981_v11 = vsel %vm397_vm3, %v17162_v63, 0.0 }
 0xc4d   :  { %v9030_v20 = vadd.f32 %v9029_v45, %v9028_v15  ;;  %v8978_v9 = vadd.f32 %v8977_v12, %v8976_v8  ;;  %v9035_v57 = vsel %vm397_vm3, %v9005_v47, 0.0 }
 0xc4e   :  { %v9031_v31 = vsel %vm397_vm3, %v9003_v34, 0.0 }
 0xc4f   :  { %v8980_v7 = vadd.f32 %v8979_v16, %v8978_v9  ;;  %v9032_v58 = vadd.f32 %v9031_v31, %v9030_v20 }
 0xc51   :  { %v8982_v43 = vadd.f32 %v8981_v11, %v8980_v7  ;;  %v9034_v46 = vadd.f32 %v9033_v54, %v9032_v58  ;;  %v17935_v58 = vld [vmem:[#allocation73_spill] sm:$0xff] }
 0xc53   :  { %v8983_v5 = vrot.slane %v8982_v43, 4  ;;  %v9036_v48 = vadd.f32 %v9035_v57, %v9034_v46 }
 0xc55   :  { %v8984_v59 = vadd.f32 %v8983_v5, %v8982_v43  ;;  %v9037_v24 = vrot.slane %v9036_v48, 4  ;;  %v17939_v43 = vld [vmem:[#allocation78_spill] sm:$0xff]  ;;  %v17943_v5 = vld [vmem:[#allocation64_spill] sm:$0xff] }
 0xc57   :  { %v8985_v27 = vrot.slane %v8984_v59, 2  ;;  %v9038_v21 = vadd.f32 %v9037_v24, %v9036_v48  ;;  %v17944_v48 = vmax.f32 %v17943_v5, 0.0  ;;  %v17945_v24 = vld [vmem:[#allocation65_spill] sm:$0xff] }
 0xc59   :  { %v8986_v60 = vadd.f32 %v8985_v27, %v8984_v59  ;;  %v9039_v41 = vrot.slane %v9038_v21, 2  ;;  %v17946_v27 = vmax.f32 %v17945_v24, 0.0 }
 0xc5b   :  { %v8987_v51 = vrot.slane %v8986_v60, 1  ;;  %v9040_v18 = vadd.f32 %v9039_v41, %v9038_v21 }
 0xc5d   :  { %v8988_v35 = vadd.f32 %v8987_v51, %v8986_v60  ;;  %v9041_v49 = vrot.slane %v9040_v18, 1  ;;  %v17947_v60 = vld [vmem:[#allocation66_spill] sm:$0xff] }
 0xc5e   :  { %v17948_v41 = vmax.f32 %v17947_v60, 0.0 }
 0xc5f   :  { %v8989_v17 = vmul.f32 0.0078125, %v8988_v35  ;;  %v9042_v36 = vadd.f32 %v9041_v49, %v9040_v18 }
 0xc61   :  { %v9043_v44 = vmul.f32 0.0078125, %v9042_v36  ;;  %v9044_v14 = vmul.f32 %v8989_v17, %v8989_v17 }
 0xc63   :  { %v9045_v22 = vsub.f32 %v9043_v44, %v9044_v14 }
 0xc65   :  { %v9047_v1 = vadd.f32 1e-05, %v9045_v22 }
 0xc67   :  { %13754 = vrsqrt.f32 %v9047_v1  ;;  %v17949_v1 = vld [vmem:[#allocation67_spill] sm:$0xff] }
 0xc71   :  { %v13755_v39 = vpop.eup %13754 }
 0xc72   :  { %v9049_v4 = vmul.f32 %v13755_v39, %v9046_v37  ;;  %v17950_v37 = vmax.f32 %v17949_v1, 0.0 }
 0xc74   :  { %v9051_v2 = vmul.f32 %v9049_v4, %v8989_v17  ;;  %v9057_v25 = vrot.slane %v9049_v4, %v17934_v62 }
 0xc76   :  { %v9052_v52 = vsub.f32 %v9050_v30, %v9051_v2  ;;  %v9072_v53 = vmul.f32 %v9057_v25, %v8924_v38  ;;  %v9059_v26 = vmul.f32 %v9057_v25, %v17072_v28  ;;  %v9060_v29 = vmul.f32 %v9057_v25, %v17078_v32  ;;  %v17951_v30 = vld [vmem:[#allocation63_spill] sm:$0xff] }
 0xc77   :  { %v9061_v8 = vmul.f32 %v17070_v42, %v9057_v25  ;;  %v9062_v15 = vmul.f32 %v17076_v19, %v9057_v25  ;;  %v9063_v56 = vmul.f32 %v9057_v25, %v17099_v50  ;;  %v9064_v45 = vmul.f32 %v9057_v25, %v17108_v23 }
 0xc78   :  { %v9079_v12 = vrot.slane %v9052_v52, %v17934_v62  ;;  %v9065_v34 = vmul.f32 %v17097_v33, %v9057_v25  ;;  %v9066_v20 = vmul.f32 %v17106_v0, %v9057_v25  ;;  %v9067_v38 = vmul.f32 %v9057_v25, %v17127_v6  ;;  %v17937_v6 = vld [vmem:[#allocation62_spill] sm:$0xff] }
 0xc79   :  { %v9068_v28 = vmul.f32 %v9057_v25, %v17136_v3  ;;  %v9069_v32 = vmul.f32 %v17125_v55, %v9057_v25  ;;  %v9070_v42 = vmul.f32 %v17134_v10, %v9057_v25  ;;  %v9071_v19 = vmul.f32 %v9057_v25, %v17155_v61  ;;  %v17941_v10 = vld [vmem:[#allocation79_spill] sm:$0xff] }
 0xc7a   :  { %v9094_v9 = vadd.f32 %v9079_v12, %v9072_v53  ;;  %v9081_v50 = vadd.f32 %v9079_v12, %v9059_v26  ;;  %v9082_v16 = vadd.f32 %v9079_v12, %v9060_v29  ;;  %v9083_v23 = vadd.f32 %v9079_v12, %v9061_v8 }
 0xc7b   :  { %v9084_v47 = vadd.f32 %v9079_v12, %v9062_v15  ;;  %v9085_v31 = vadd.f32 %v9079_v12, %v9063_v56  ;;  %v9086_v7 = vadd.f32 %v9079_v12, %v9064_v45  ;;  %v9087_v33 = vadd.f32 %v9079_v12, %v9065_v34  ;;  %v17953_v34 = vld [vmem:[#allocation75_spill] sm:$0xff] }
 0xc7c   :  { %v17936_v0 = vmax.f32 %v17935_v58, 0.0  ;;  %v17938_v11 = vmax.f32 %v17937_v6, 0.0  ;;  %v17940_v55 = vmax.f32 %v17939_v43, 0.0  ;;  %v17942_v57 = vmax.f32 %v17941_v10, 0.0  ;;  %v17959_v6 = vld [vmem:[#allocation71_spill] sm:$0xff]  ;;  %v17961_v43 = vld [vmem:[#allocation72_spill] sm:$0xff] }
 0xc7d   :  { %v9100_v59 = vadd.f32 %v9084_v47, %v17944_v48  ;;  %v9101_v21 = vadd.f32 %v9085_v31, %v17946_v27  ;;  %v9102_v51 = vadd.f32 %v9086_v7, %v17948_v41  ;;  %v9088_v18 = vadd.f32 %v9079_v12, %v9066_v20  ;;  %v17965_v48 = vld [vmem:[#allocation70_spill] sm:$0xff] }
 0xc7e   :  { %v9110_v54 = vadd.f32 %v9094_v9, %v17936_v0  ;;  %v9097_v3 = vadd.f32 %v9081_v50, %v17938_v11  ;;  %v9098_v46 = vadd.f32 %v9082_v16, %v17940_v55  ;;  %v9099_v61 = vadd.f32 %v9083_v23, %v17942_v57  ;;  %v17955_v50 = vld [vmem:[#allocation68_spill] sm:$0xff] }
 0xc7f   :  { %v9116_v44 = vmax.f32 %v9100_v59, 0.0  ;;  %v9117_v14 = vmax.f32 %v9101_v21, 0.0  ;;  %v9118_v22 = vmax.f32 %v9102_v51, 0.0  ;;  %v9103_v39 = vadd.f32 %v9087_v33, %v17950_v37 }
 0xc80   :  { %v9126_v35 = vmax.f32 %v9110_v54, 0.0  ;;  %v9113_v49 = vmax.f32 %v9097_v3, 0.0  ;;  %v9114_v17 = vmax.f32 %v9098_v46, 0.0  ;;  %v9115_v36 = vmax.f32 %v9099_v61, 0.0 }
 0xc81   :  { %v17952_v2 = vmax.f32 %v17951_v30, 0.0  ;;  %v9089_v53 = vadd.f32 %v9079_v12, %v9067_v38  ;;  %v9090_v26 = vadd.f32 %v9079_v12, %v9068_v28  ;;  %v17215_v8 = vpack.c.bf16 %v9118_v22, %v9117_v14  ;;  %v17957_v38 = vld [vmem:[#allocation69_spill] sm:$0xff] }
 0xc82   :  { %v17209_v4 = vpack.c.bf16 %v9114_v17, %v9113_v49  ;;  %v17213_v29 = vpack.c.bf16 %v9116_v44, %v9115_v36  ;;  %v9119_v15 = vmax.f32 %v9103_v39, 0.0  ;;  %v9091_v56 = vadd.f32 %v9079_v12, %v9069_v32 }
 0xc83   :  { %v9104_v52 = vadd.f32 %v9088_v18, %v17952_v2  ;;  %v17954_v20 = vmax.f32 %v17953_v34, 0.0  ;;  %v17956_v16 = vmax.f32 %v17955_v50, 0.0  ;;  %v9092_v47 = vadd.f32 %v9079_v12, %v9070_v42 }
 0xc84   :  { %12757 = vmatprep.mubr.msk.bf16.mxu1 %vm397_vm3, %v17209_v4  ;;  %v17958_v28 = vmax.f32 %v17957_v38, 0.0  ;;  %v9093_v7 = vadd.f32 %v9079_v12, %v9071_v19  ;;  %v9073_v32 = vmul.f32 %v17153_v40, %v9057_v25  ;;  %v9074_v33 = vmul.f32 %v17162_v63, %v9057_v25  ;;  %v17963_v25 = vld [vmem:[#allocation74_spill] sm:$0xff] }
 0xc85   :  { %v9120_v45 = vmax.f32 %v9104_v52, 0.0  ;;  %v9105_v9 = vadd.f32 %v9089_v53, %v17954_v20  ;;  %v9106_v23 = vadd.f32 %v9090_v26, %v17956_v16  ;;  %12758 = vmatmul.mubr.msk.bf16.vlgmr.msra.gmra.mrb[48].mxu1 %vm397_vm3, %v17213_v29  ;;  %v17960_v42 = vmax.f32 %v17959_v6, 0.0 }
 0xc86   :  { %v9107_v31 = vadd.f32 %v9091_v56, %v17958_v28  ;;  %12761 = vmatprep.mubr.msk.bf16.mxu1 %vm397_vm3, %v17215_v8  ;;  %v17962_v55 = vmax.f32 %v17961_v43, 0.0  ;;  %v9095_v10 = vadd.f32 %v9079_v12, %v9073_v32  ;;  %v9096_v19 = vadd.f32 %v9079_v12, %v9074_v33 }
 0xc87   :  { %v17231_v58 = vpack.c.bf16 %v9120_v45, %v9119_v15  ;;  %v9121_v0 = vmax.f32 %v9105_v9, 0.0  ;;  %v9122_v54 = vmax.f32 %v9106_v23, 0.0  ;;  %v9108_v11 = vadd.f32 %v9092_v47, %v17960_v42 }
 0xc88   :  { %v9123_v3 = vmax.f32 %v9107_v31, 0.0  ;;  %v9109_v46 = vadd.f32 %v9093_v7, %v17962_v55  ;;  %v17964_v61 = vmax.f32 %v17963_v25, 0.0  ;;  %v17966_v59 = vmax.f32 %v17965_v48, 0.0 }
 0xc89   :  { %v17237_v57 = vpack.c.bf16 %v9122_v54, %v9121_v0  ;;  %v9124_v40 = vmax.f32 %v9108_v11, 0.0  ;;  %v14257_v51 = vmov 0  }
 0xc8a   :  { %v9125_v63 = vmax.f32 %v9109_v46, 0.0  ;;  %v9111_v5 = vadd.f32 %v9095_v10, %v17964_v61  ;;  %v9112_v24 = vadd.f32 %v9096_v19, %v17966_v59  ;;  %13596 = vset.pattern.permute.xlu1 %v14257_v51  ;;  %13595 = vset.pattern.permute.xlu0 %v14257_v51 }
 0xc8b   :  { %v17243_v27 = vpack.c.bf16 %v9124_v40, %v9123_v3 }
 0xc8c   :  { %v17245_v21 = vpack.c.bf16 %v9126_v35, %v9125_v63  ;;  %v9127_v60 = vmax.f32 %v9111_v5, 0.0  ;;  %v9128_v41 = vmax.f32 %v9112_v24, 0.0 }
 0xc8d   :  { %12762 = vmatmul.mubr.msk.bf16.gmra.mrb[52].mxu1 %vm397_vm3, %v17231_v58 }
 0xc8e   :  { %v17249_v12 = vpack.c.bf16 %v9128_v41, %v9127_v60  ;;  %12765 = vmatprep.mubr.msk.bf16.mxu1 %vm397_vm3, %v17237_v57 }
 0xc95   :  { %12766 = vmatmul.mubr.msk.bf16.gmra.mrb[56].mxu1 %vm397_vm3, %v17243_v27 }
 0xc96   :  { %12769 = vmatprep.mubr.msk.bf16.mxu1 %vm397_vm3, %v17245_v21 }
 0xc9d   :  { %12770 = vmatmul.mubr.msk.bf16.gmra.mrb[60].mxu1 %vm397_vm3, %v17249_v12 }
 0xc9e   :  { %12789 = vmatprep.mubr.msk.bf16.mxu1 %vm14259_vm6, %v17932_v13 }
 0xd58   :  { %v17261_v18 = vpop.f32.mrb[48].mxu1 }
 0xd59   :  { %v17263_v35 = vpop.f32.mrb[49].mxu1  ;;  %v9356_v44 = vmul.f32 %v17261_v18, %v17261_v18  ;;  %v9319_v39 = vsel %vm9315_vm5, %v17261_v18, 0.0 }
 0xd5a   :  { %v9354_v49 = vmul.f32 %v17263_v35, %v17263_v35  ;;  %v17267_v17 = vpop.f32.mrb[50].mxu1  ;;  %v9316_v14 = vsel %vm9315_vm5, %v17263_v35, 0.0 }
 0xd5b   :  { %v17269_v36 = vpop.f32.mrb[51].mxu1  ;;  %v9357_v2 = vmul.f32 %v17267_v17, %v17267_v17  ;;  %v9373_v15 = vsel %vm9315_vm5, %v9356_v44, 0.0  ;;  %v9321_v56 = vsel %vm9315_vm5, %v17267_v17, 0.0 }
 0xd5c   :  { %v9317_v22 = vsel %vm9315_vm5, %v17269_v36, 0.0  ;;  %v9355_v1 = vmul.f32 %v17269_v36, %v17269_v36  ;;  %v9370_v30 = vsel %vm9315_vm5, %v9354_v49, 0.0 }
 0xd5d   :  { %v9318_v37 = vadd.f32 %v9317_v22, %v9316_v14  ;;  %v9375_v50 = vsel %vm9315_vm5, %v9357_v2, 0.0 }
 0xd5e   :  { %v9371_v52 = vsel %vm9315_vm5, %v9355_v1, 0.0 }
 0xd5f   :  { %v9320_v53 = vadd.f32 %v9319_v39, %v9318_v37  ;;  %v9372_v26 = vadd.f32 %v9371_v52, %v9370_v30 }
 0xd60   :  { %v17288_v45 = vpop.f32.mrb[52].mxu1 }
 0xd61   :  { %v9374_v34 = vadd.f32 %v9373_v15, %v9372_v26  ;;  %v17290_v20 = vpop.f32.mrb[53].mxu1  ;;  %v9322_v9 = vadd.f32 %v9321_v56, %v9320_v53  ;;  %v9360_v7 = vmul.f32 %v17288_v45, %v17288_v45  ;;  %v9327_v42 = vsel %vm9315_vm5, %v17288_v45, 0.0 }
 0xd62   :  { %v9323_v16 = vsel %vm9315_vm5, %v17290_v20, 0.0  ;;  %v9358_v23 = vmul.f32 %v17290_v20, %v17290_v20  ;;  %v17297_v47 = vpop.f32.mrb[54].mxu1 }
 0xd63   :  { %v9324_v38 = vadd.f32 %v9323_v16, %v9322_v9  ;;  %v9376_v28 = vadd.f32 %v9375_v50, %v9374_v34  ;;  %v17299_v31 = vpop.f32.mrb[55].mxu1  ;;  %v9361_v11 = vmul.f32 %v17297_v47, %v17297_v47  ;;  %v9381_v46 = vsel %vm9315_vm5, %v9360_v7, 0.0 }
 0xd64   :  { %v9377_v32 = vsel %vm9315_vm5, %v9358_v23, 0.0  ;;  %v9325_v33 = vsel %vm9315_vm5, %v17299_v31, 0.0  ;;  %v9359_v0 = vmul.f32 %v17299_v31, %v17299_v31  ;;  %v9329_v10 = vsel %vm9315_vm5, %v17297_v47, 0.0 }
 0xd65   :  { %v9378_v54 = vadd.f32 %v9377_v32, %v9376_v28  ;;  %v9326_v6 = vadd.f32 %v9325_v33, %v9324_v38  ;;  %v9383_v61 = vsel %vm9315_vm5, %v9361_v11, 0.0 }
 0xd66   :  { %v9379_v3 = vsel %vm9315_vm5, %v9359_v0, 0.0 }
 0xd67   :  { %v9328_v43 = vadd.f32 %v9327_v42, %v9326_v6  ;;  %v9380_v55 = vadd.f32 %v9379_v3, %v9378_v54 }
 0xd68   :  { %v17316_v19 = vpop.f32.mrb[56].mxu1 }
 0xd69   :  { %v9382_v40 = vadd.f32 %v9381_v46, %v9380_v55  ;;  %v17318_v63 = vpop.f32.mrb[57].mxu1  ;;  %v9330_v25 = vadd.f32 %v9329_v10, %v9328_v43  ;;  %v9364_v49 = vmul.f32 %v17316_v19, %v17316_v19  ;;  %v9335_v39 = vsel %vm9315_vm5, %v17316_v19, 0.0 }
 0xd6a   :  { %v9331_v5 = vsel %vm9315_vm5, %v17318_v63, 0.0  ;;  %v9362_v48 = vmul.f32 %v17318_v63, %v17318_v63  ;;  %v17325_v59 = vpop.f32.mrb[58].mxu1 }
 0xd6b   :  { %v9332_v24 = vadd.f32 %v9331_v5, %v9330_v25  ;;  %v9384_v60 = vadd.f32 %v9383_v61, %v9382_v40  ;;  %v17327_v41 = vpop.f32.mrb[59].mxu1  ;;  %v9365_v30 = vmul.f32 %v17325_v59, %v17325_v59  ;;  %v9389_v26 = vsel %vm9315_vm5, %v9364_v49, 0.0 }
 0xd6c   :  { %v9385_v44 = vsel %vm9315_vm5, %v9362_v48, 0.0  ;;  %v9333_v14 = vsel %vm9315_vm5, %v17327_v41, 0.0  ;;  %v9363_v22 = vmul.f32 %v17327_v41, %v17327_v41  ;;  %v9337_v15 = vsel %vm9315_vm5, %v17325_v59, 0.0 }
 0xd6d   :  { %v9386_v1 = vadd.f32 %v9385_v44, %v9384_v60  ;;  %v9334_v37 = vadd.f32 %v9333_v14, %v9332_v24  ;;  %v9391_v16 = vsel %vm9315_vm5, %v9365_v30, 0.0 }
 0xd6e   :  { %v9387_v2 = vsel %vm9315_vm5, %v9363_v22, 0.0 }
 0xd6f   :  { %v9336_v52 = vadd.f32 %v9335_v39, %v9334_v37  ;;  %v9388_v53 = vadd.f32 %v9387_v2, %v9386_v1 }
 0xd70   :  { %v17344_v56 = vpop.f32.mrb[60].mxu1 }
 0xd71   :  { %v9390_v34 = vadd.f32 %v9389_v26, %v9388_v53  ;;  %v17346_v9 = vpop.f32.mrb[61].mxu1  ;;  %v9338_v50 = vadd.f32 %v9337_v15, %v9336_v52  ;;  %v9368_v0 = vmul.f32 %v17344_v56, %v17344_v56  ;;  %v9343_v43 = vsel %vm9315_vm5, %v17344_v56, 0.0 }
 0xd72   :  { %v9339_v23 = vsel %vm9315_vm5, %v17346_v9, 0.0  ;;  %v9366_v38 = vmul.f32 %v17346_v9, %v17346_v9  ;;  %v17353_v28 = vpop.f32.mrb[62].mxu1 }
 0xd73   :  { %v9340_v7 = vadd.f32 %v9339_v23, %v9338_v50  ;;  %v9392_v32 = vadd.f32 %v9391_v16, %v9390_v34  ;;  %v9303_v33 = vpop.f32.mrb[63].mxu1  ;;  %v9369_v55 = vmul.f32 %v17353_v28, %v17353_v28  ;;  %v9397_v25 = vsel %vm9315_vm5, %v9368_v0, 0.0  ;;  %v9414_v0 = vld [vmem:[#allocation30] sm:$0x1] }
 0xd74   :  { %v9393_v54 = vsel %vm9315_vm5, %v9366_v38, 0.0  ;;  %v9341_v6 = vsel %vm9315_vm5, %v9303_v33, 0.0  ;;  %v9367_v42 = vmul.f32 %v9303_v33, %v9303_v33  ;;  %v9345_v61 = vsel %vm9315_vm5, %v17353_v28, 0.0  ;;  %v9410_v38 = vld [vmem:[#allocation28] sm:$0x1] }
 0xd75   :  { %v9394_v11 = vadd.f32 %v9393_v54, %v9392_v32  ;;  %v9342_v3 = vadd.f32 %v9341_v6, %v9340_v7  ;;  %v9399_v24 = vsel %vm9315_vm5, %v9369_v55, 0.0 }
 0xd76   :  { %v9395_v46 = vsel %vm9315_vm5, %v9367_v42, 0.0 }
 0xd77   :  { %v9344_v10 = vadd.f32 %v9343_v43, %v9342_v3  ;;  %v9396_v40 = vadd.f32 %v9395_v46, %v9394_v11 }
 0xd79   :  { %v9346_v5 = vadd.f32 %v9345_v61, %v9344_v10  ;;  %v9398_v48 = vadd.f32 %v9397_v25, %v9396_v40 }
 0xd7b   :  { %v9347_v60 = vrot.slane %v9346_v5, 4  ;;  %v9400_v49 = vadd.f32 %v9399_v24, %v9398_v48 }
 0xd7d   :  { %v9348_v44 = vadd.f32 %v9347_v60, %v9346_v5  ;;  %v9401_v14 = vrot.slane %v9400_v49, 4 }
 0xd7f   :  { %v9349_v22 = vrot.slane %v9348_v44, 2  ;;  %v9402_v1 = vadd.f32 %v9401_v14, %v9400_v49 }
 0xd81   :  { %v9350_v37 = vadd.f32 %v9349_v22, %v9348_v44  ;;  %v9403_v39 = vrot.slane %v9402_v1, 2 }
 0xd83   :  { %v9351_v30 = vrot.slane %v9350_v37, 1  ;;  %v9404_v2 = vadd.f32 %v9403_v39, %v9402_v1 }
 0xd85   :  { %v9352_v52 = vadd.f32 %v9351_v30, %v9350_v37  ;;  %v9405_v53 = vrot.slane %v9404_v2, 1 }
 0xd87   :  { %v9353_v26 = vmul.f32 0.0078125, %v9352_v52  ;;  %v9406_v15 = vadd.f32 %v9405_v53, %v9404_v2 }
 0xd89   :  { %v9407_v34 = vmul.f32 0.0078125, %v9406_v15  ;;  %v9408_v50 = vmul.f32 %v9353_v26, %v9353_v26 }
 0xd8b   :  { %v9409_v16 = vsub.f32 %v9407_v34, %v9408_v50 }
 0xd8d   :  { %v9411_v23 = vadd.f32 1e-05, %v9409_v16 }
 0xd8f   :  { %13756 = vrsqrt.f32 %v9411_v23 }
 0xd99   :  { %v13757_v7 = vpop.eup %13756 }
 0xd9a   :  { %v9413_v32 = vmul.f32 %v13757_v7, %v9410_v38 }
 0xd9c   :  { %v9415_v54 = vmul.f32 %v9413_v32, %v9353_v26  ;;  %v9421_v6 = vrot.slane %v9413_v32, %v17934_v62 }
 0xd9e   :  { %v9416_v42 = vsub.f32 %v9414_v0, %v9415_v54  ;;  %v9436_v11 = vmul.f32 %v9421_v6, %v9303_v33  ;;  %v9425_v3 = vmul.f32 %v17261_v18, %v9421_v6  ;;  %v9423_v43 = vmul.f32 %v9421_v6, %v17263_v35 }
 0xd9f   :  { %v9426_v55 = vmul.f32 %v17267_v17, %v9421_v6  ;;  %v9424_v46 = vmul.f32 %v9421_v6, %v17269_v36  ;;  %v9428_v10 = vmul.f32 %v9421_v6, %v17299_v31  ;;  %v9427_v40 = vmul.f32 %v9421_v6, %v17290_v20 }
 0xda0   :  { %v9443_v25 = vrot.slane %v9416_v42, %v17934_v62  ;;  %v9430_v61 = vmul.f32 %v17297_v47, %v9421_v6  ;;  %v9429_v5 = vmul.f32 %v17288_v45, %v9421_v6  ;;  %v9432_v33 = vmul.f32 %v9421_v6, %v17327_v41  ;;  %v17968_v42 = vld [vmem:[#allocation60_spill] sm:$0xff] }
 0xda1   :  { %v9431_v18 = vmul.f32 %v9421_v6, %v17318_v63  ;;  %v9434_v35 = vmul.f32 %v17325_v59, %v9421_v6  ;;  %v9433_v17 = vmul.f32 %v17316_v19, %v9421_v6  ;;  %v9435_v36 = vmul.f32 %v9421_v6, %v17346_v9 }
 0xda2   :  { %v9447_v48 = vadd.f32 %v9443_v25, %v9425_v3  ;;  %v9445_v31 = vadd.f32 %v9443_v25, %v9423_v43  ;;  %v9448_v24 = vadd.f32 %v9443_v25, %v9426_v55  ;;  %v9446_v20 = vadd.f32 %v9443_v25, %v9424_v46 }
 0xda3   :  { %v9450_v60 = vadd.f32 %v9443_v25, %v9428_v10  ;;  %v9449_v49 = vadd.f32 %v9443_v25, %v9427_v40  ;;  %v9452_v44 = vadd.f32 %v9443_v25, %v9430_v61  ;;  %v9451_v47 = vadd.f32 %v9443_v25, %v9429_v5 }
 0xda4   :  { %v9463_v14 = vmax.f32 %v9447_v48, 0.0  ;;  %v9461_v45 = vmax.f32 %v9445_v31, 0.0  ;;  %v9454_v41 = vadd.f32 %v9443_v25, %v9432_v33  ;;  %v9453_v63 = vadd.f32 %v9443_v25, %v9431_v18 }
 0xda5   :  { %v9456_v22 = vadd.f32 %v9443_v25, %v9434_v35  ;;  %v9455_v59 = vadd.f32 %v9443_v25, %v9433_v17  ;;  %v9458_v1 = vadd.f32 %v9443_v25, %v9436_v11  ;;  %v9457_v19 = vadd.f32 %v9443_v25, %v9435_v36 }
 0xda6   :  { %9489 = vperm.xlu1 %13596, %v9463_v14   ;;  %9479 = vperm.xlu0 %13595, %v9461_v45   ;;  %v9438_v9 = vmul.f32 %v17353_v28, %v9421_v6  ;;  %v9464_v37 = vmax.f32 %v9448_v24, 0.0  ;;  %v9462_v39 = vmax.f32 %v9446_v20, 0.0  ;;  %v9437_v30 = vmul.f32 %v17344_v56, %v9421_v6 }
 0xda7   :  { %v9466_v53 = vmax.f32 %v9450_v60, 0.0  ;;  %v9465_v26 = vmax.f32 %v9449_v49, 0.0  ;;  %v9468_v15 = vmax.f32 %v9452_v44, 0.0  ;;  %v9467_v34 = vmax.f32 %v9451_v47, 0.0 }
 0xda8   :  { %v9460_v2 = vadd.f32 %v9443_v25, %v9438_v9  ;;  %v9459_v52 = vadd.f32 %v9443_v25, %v9437_v30  ;;  %v9470_v50 = vmax.f32 %v9454_v41, 0.0  ;;  %v9469_v16 = vmax.f32 %v9453_v63, 0.0 }
 0xda9   :  { %v9472_v28 = vmax.f32 %v9456_v22, 0.0  ;;  %v9471_v23 = vmax.f32 %v9455_v59, 0.0  ;;  %v9474_v56 = vmax.f32 %v9458_v1, 0.0  ;;  %v9473_v38 = vmax.f32 %v9457_v19, 0.0 }
 0xdaa   :  { %9494 = vperm.xlu1 %13596, %v9464_v37   ;;  %9484 = vperm.xlu0 %13595, %v9462_v39   ;;  %v9476_v7 = vmax.f32 %v9460_v2, 0.0  ;;  %v9475_v32 = vmax.f32 %v9459_v52, 0.0  ;;  %v14258_v0 = vmov 1   ;;  %v17967_v54 = vlaneseq }
 0xdab   :  { %v9131_v11 = vadd.s32 8, %v17968_v42  ;;  %v9133_v3 = vadd.s32 24, %v17968_v42  ;;  %v9132_v43 = vadd.s32 16, %v17968_v42  ;;  %v9135_v10 = vadd.s32 40, %v17968_v42 }
 0xdac   :  { %v17390_v6 = vand.u32 127, %v17967_v54  ;;  %v9134_v40 = vadd.s32 32, %v17968_v42  ;;  %v9137_v36 = vadd.s32 56, %v17968_v42  ;;  %v9136_v48 = vadd.s32 48, %v17968_v42 }
 0xdae   :  { %9504 = vperm.xlu1 %13596, %v9466_v53   ;;  %9499 = vperm.xlu0 %13595, %v9465_v26   ;;  %vm9140_vm7 = vcmp.eq.s32.totalorder %v17968_v42, %v17390_v6  ;;  %vm9141_vm8 = vcmp.eq.s32.totalorder %v9131_v11, %v17390_v6  ;;  %vm9143_vm9 = vcmp.eq.s32.totalorder %v9133_v3, %v17390_v6 }
 0xdaf   :  { %v17402_v25 = vsel %vm9140_vm7, 1.0, %v17932_v13  ;;  %v17405_v61 = vsel %vm9141_vm8, 1.0, %v17932_v13  ;;  %vm9142_vm10 = vcmp.eq.s32.totalorder %v9132_v43, %v17390_v6  ;;  %v17409_v5 = vsel %vm9143_vm9, 1.0, %v17932_v13 }
 0xdb0   :  { %vm9145_vm11 = vcmp.eq.s32.totalorder %v9135_v10, %v17390_v6  ;;  %vm9144_vm12 = vcmp.eq.s32.totalorder %v9134_v40, %v17390_v6  ;;  %v17418_v31 = vsel %vm9142_vm10, 1.0, %v17932_v13  ;;  %vm9147_vm13 = vcmp.eq.s32.totalorder %v9137_v36, %v17390_v6 }
 0xdb1   :  { %v17422_v60 = vsel %vm9145_vm11, 1.0, %v17932_v13  ;;  %v17425_v44 = vsel %vm9144_vm12, 1.0, %v17932_v13  ;;  %vm9146_vm14 = vcmp.eq.s32.totalorder %v9136_v48, %v17390_v6  ;;  %v17434_v22 = vsel %vm9147_vm13, 1.0, %v17932_v13 }
 0xdb2   :  { %9514 = vperm.xlu1 %13596, %v9468_v15   ;;  %9509 = vperm.xlu0 %13595, %v9467_v34   ;;  %v17437_v1 = vsel %vm9146_vm14, 1.0, %v17932_v13 }
 0xdb6   :  { %9524 = vperm.xlu1 %13596, %v9470_v50   ;;  %9519 = vperm.xlu0 %13595, %v9469_v16  }
 0xdba   :  { %9534 = vperm.xlu1 %13596, %v9472_v28   ;;  %9529 = vperm.xlu0 %13595, %v9471_v23  }
 0xdbe   :  { %9544 = vperm.xlu1 %13596, %v9474_v56   ;;  %9539 = vperm.xlu0 %13595, %v9473_v38  }
 0xdc2   :  { %9554 = vperm.xlu1 %13596, %v9476_v7   ;;  %9549 = vperm.xlu0 %13595, %v9475_v32  }
 0xdc6   :  { %13598 = vset.pattern.permute.xlu1 %v14258_v0  ;;  %13597 = vset.pattern.permute.xlu0 %v14258_v0 }
 0xdc7   :  { %9629 = vperm.xlu1 %13598, %v9462_v39   ;;  %9625 = vperm.xlu0 %13597, %v9461_v45  }
 0xdcb   :  { %9633 = vperm.xlu1 %13598, %v9463_v14   ;;  %9637 = vperm.xlu0 %13597, %v9464_v37  }
 0xdcf   :  { %9641 = vperm.xlu1 %13598, %v9465_v26   ;;  %9645 = vperm.xlu0 %13597, %v9466_v53  }
 0xdd3   :  { %9649 = vperm.xlu1 %13598, %v9467_v34   ;;  %9653 = vperm.xlu0 %13597, %v9468_v15  }
 0xdd7   :  { %9657 = vperm.xlu1 %13598, %v9469_v16   ;;  %9661 = vperm.xlu0 %13597, %v9470_v50  }
 0xddb   :  { %9665 = vperm.xlu1 %13598, %v9471_v23   ;;  %9669 = vperm.xlu0 %13597, %v9472_v28   ;;  %v9166_v23 = vadd.s32 1, %v17968_v42 }
 0xddd   :  { %v9167_v11 = vmul.u32 64, %v9166_v23 }
 0xddf   :  { %9673 = vperm.xlu1 %13598, %v9473_v38   ;;  %9677 = vperm.xlu0 %13597, %v9474_v56   ;;  %vm9168_vm0 = vcmp.lt.s32.totalorder %v17390_v6, %v9167_v11 }
 0xde3   :  { %9681 = vperm.xlu1 %13598, %v9475_v32   ;;  %9685 = vperm.xlu0 %13597, %v9476_v7   ;;  %v9164_v7 = vmul.u32 64, %v17968_v42 }
 0xde5   :  { %vm17455_vm15 = vcmp.ge.s32.totalorder %v17390_v6, %v9164_v7 }
 0xde6   :  { %vm9169_vm1 = vmand %vm17455_vm15, %vm9168_vm0 }
 0xde7   :  { %13599 = vset.pattern.permute.xlu1 %v14257_v51  ;;  %13600 = vset.pattern.permute.xlu0 %v14257_v51  ;;  %vm17467_vm2 = vmpackc.low %vm9169_vm1, %vm9169_vm1 }
 0xe25   :  { %v9490_v55 = vpop.permute.xlu1 %9489  ;;  %v9480_v46 = vpop.permute.xlu0 %9479 }
 0xe26   :  { %v9557_v35 = vmul.f32 %v17402_v25, %v9480_v46  ;;  %v9559_v14 = vmul.f32 %v17418_v31, %v9490_v55 }
 0xe29   :  { %v9495_v33 = vpop.permute.xlu1 %9494  ;;  %v9485_v18 = vpop.permute.xlu0 %9484 }
 0xe2a   :  { %v9558_v17 = vmul.f32 %v17405_v61, %v9485_v18  ;;  %v9560_v24 = vmul.f32 %v17409_v5, %v9495_v33 }
 0xe2c   :  { %v9576_v20 = vpack.c.bf16 %v9558_v17, %v9557_v35  ;;  %v9577_v45 = vpack.c.bf16 %v9560_v24, %v9559_v14  ;;  %v14260_v14 = vmov 1.0|1.0  }
 0xe2d   :  { %v9505_v49 = vpop.permute.xlu1 %9504  ;;  %v9500_v47 = vpop.permute.xlu0 %9499 }
 0xe2e   :  { %12774 = vmatpush3.bf16.msra.mxu1 %v9576_v20  ;;  %v9562_v41 = vmul.f32 %v17422_v60, %v9505_v49  ;;  %v9561_v63 = vmul.f32 %v17425_v44, %v9500_v47 }
 0xe2f   :  { %12775 = vmatprep.subr.bf16.mxu1 %v17932_v13 }
 0xe30   :  { %v9578_v9 = vpack.c.bf16 %v9562_v41, %v9561_v63 }
 0xe31   :  { %v9515_v59 = vpop.permute.xlu1 %9514  ;;  %v9510_v19 = vpop.permute.xlu0 %9509 }
 0xe32   :  { %12776 = vmatpush3.bf16.msra.mxu1 %v9577_v45  ;;  %v9564_v37 = vmul.f32 %v17434_v22, %v9515_v59  ;;  %v9563_v39 = vmul.f32 %v17437_v1, %v9510_v19 }
 0xe33   :  { %12777 = vmatprep.subr.bf16.mxu1 %v17932_v13 }
 0xe34   :  { %v9579_v52 = vpack.c.bf16 %v9564_v37, %v9563_v39 }
 0xe35   :  { %v9525_v30 = vpop.permute.xlu1 %9524  ;;  %v9520_v2 = vpop.permute.xlu0 %9519 }
 0xe36   :  { %12778 = vmatpush3.bf16.msra.mxu1 %v9578_v9  ;;  %v9566_v53 = vmul.f32 %v17405_v61, %v9525_v30  ;;  %v9565_v26 = vmul.f32 %v17402_v25, %v9520_v2 }
 0xe37   :  { %12779 = vmatprep.subr.bf16.mxu1 %v17932_v13 }
 0xe38   :  { %v9580_v50 = vpack.c.bf16 %v9566_v53, %v9565_v26 }
 0xe39   :  { %v9535_v15 = vpop.permute.xlu1 %9534  ;;  %v9530_v34 = vpop.permute.xlu0 %9529 }
 0xe3a   :  { %12780 = vmatpush3.bf16.msra.mxu1 %v9579_v52  ;;  %v9568_v16 = vmul.f32 %v17409_v5, %v9535_v15  ;;  %v9567_v28 = vmul.f32 %v17418_v31, %v9530_v34 }
 0xe3b   :  { %12781 = vmatprep.subr.bf16.mxu1 %v17932_v13 }
 0xe3c   :  { %v9581_v32 = vpack.c.bf16 %v9568_v16, %v9567_v28 }
 0xe3d   :  { %v9545_v56 = vpop.permute.xlu1 %9544  ;;  %v9540_v38 = vpop.permute.xlu0 %9539 }
 0xe3e   :  { %12782 = vmatpush3.bf16.msra.mxu1 %v9580_v50  ;;  %v9570_v0 = vmul.f32 %v17422_v60, %v9545_v56  ;;  %v9569_v54 = vmul.f32 %v17425_v44, %v9540_v38 }
 0xe3f   :  { %12783 = vmatprep.subr.bf16.mxu1 %v17932_v13 }
 0xe40   :  { %v9582_v46 = vpack.c.bf16 %v9570_v0, %v9569_v54 }
 0xe41   :  { %v9555_v3 = vpop.permute.xlu1 %9554  ;;  %v9550_v43 = vpop.permute.xlu0 %9549 }
 0xe42   :  { %12784 = vmatpush3.bf16.msra.mxu1 %v9581_v32  ;;  %v9572_v10 = vmul.f32 %v17434_v22, %v9555_v3  ;;  %v9571_v40 = vmul.f32 %v17437_v1, %v9550_v43 }
 0xe43   :  { %12785 = vmatprep.subr.bf16.mxu1 %v17932_v13 }
 0xe44   :  { %v9583_v35 = vpack.c.bf16 %v9572_v10, %v9571_v40  ;;  %v13684_v40 = vld [vmem:[#allocation33] ss:$16 sps:$4 sm:$0xff]  }
 0xe46   :  { %v9630_v33 = vpop.permute.xlu1 %9629  ;;  %12786 = vmatpush3.bf16.msra.mxu1 %v9582_v46  ;;  %v9626_v18 = vpop.permute.xlu0 %9625 }
 0xe47   :  { %12787 = vmatprep.subr.bf16.mxu1 %v17932_v13  ;;  %v9689_v17 = vmul.f32 %v17405_v61, %v9630_v33  ;;  %v9688_v36 = vmul.f32 %v17402_v25, %v9626_v18  ;;  %v13686_v33 = vld [vmem:[#allocation33 + $0x4] ss:$16 sps:$4 sm:$0xff]  }
 0xe48   :  { %v13689_v18 = vld [vmem:[#allocation33 + $0x24] ss:$16 sps:$4 sm:$0xff]  }
 0xe49   :  { %v9704_v6 = vpack.c.bf16 %v9689_v17, %v9688_v36  ;;  %v13692_v17 = vld [vmem:[#allocation33 + $0x44] ss:$16 sps:$4 sm:$0xff]   ;;  %v13690_v36 = vld [vmem:[#allocation33 + $0x40] ss:$16 sps:$4 sm:$0xff]  }
 0xe4a   :  { %v9634_v48 = vpop.permute.xlu1 %9633  ;;  %12788 = vmatpush3.bf16.msra.mxu1 %v9583_v35  ;;  %v9638_v24 = vpop.permute.xlu0 %9637  ;;  %v13687_v35 = vld [vmem:[#allocation33 + $0x20] ss:$16 sps:$4 sm:$0xff]  }
 0xe4b   :  { %12793 = vmatprep.subr.bf16.mxu1 %v17932_v13  ;;  %v9690_v49 = vmul.f32 %v17418_v31, %v9634_v48  ;;  %v9691_v47 = vmul.f32 %v17409_v5, %v9638_v24  ;;  %v13695_v48 = vld [vmem:[#allocation33 + $0x64] ss:$16 sps:$4 sm:$0xff]   ;;  %v13693_v24 = vld [vmem:[#allocation33 + $0x60] ss:$16 sps:$4 sm:$0xff]  }
 0xe4d   :  { %12790 = vmatmul.mubr.msk.bf16.vlgmr.msra.gmra.mrb[64].mxu1 %vm17467_vm2, %v14260_v14  ;;  %v9705_v63 = vpack.c.bf16 %v9691_v47, %v9690_v49 }
 0xe4e   :  { %v9642_v45 = vpop.permute.xlu1 %9641  ;;  %12794 = vmatpush3.bf16.msra.mxu1 %v9704_v6  ;;  %v9646_v41 = vpop.permute.xlu0 %9645  ;;  %12809 = vmatprep.mubr.msk.bf16.mxu1 %vm14259_vm6, %v17932_v13  ;;  %v13698_v6 = vld [vmem:[#allocation33 + $0xc] ss:$16 sps:$4 sm:$0xff]  }
 0xe4f   :  { %12795 = vmatprep.subr.bf16.mxu1 %v17932_v13  ;;  %v9692_v59 = vmul.f32 %v17425_v44, %v9642_v45  ;;  %v9693_v19 = vmul.f32 %v17422_v60, %v9646_v41 }
 0xe51   :  { %v9706_v39 = vpack.c.bf16 %v9693_v19, %v9692_v59  ;;  %v13696_v59 = vld [vmem:[#allocation33 + $0x8] ss:$16 sps:$4 sm:$0xff]  }
 0xe52   :  { %v9650_v9 = vpop.permute.xlu1 %9649  ;;  %12796 = vmatpush3.bf16.msra.mxu1 %v9705_v63  ;;  %v9654_v37 = vpop.permute.xlu0 %9653 }
 0xe53   :  { %12797 = vmatprep.subr.bf16.mxu1 %v17932_v13  ;;  %v9694_v30 = vmul.f32 %v17437_v1, %v9650_v9  ;;  %v9695_v2 = vmul.f32 %v17434_v22, %v9654_v37  ;;  %v13701_v37 = vld [vmem:[#allocation33 + $0x2c] ss:$16 sps:$4 sm:$0xff]  }
 0xe55   :  { %v9707_v26 = vpack.c.bf16 %v9695_v2, %v9694_v30  ;;  %v13699_v2 = vld [vmem:[#allocation33 + $0x28] ss:$16 sps:$4 sm:$0xff]  }
 0xe56   :  { %v9658_v52 = vpop.permute.xlu1 %9657  ;;  %12798 = vmatpush3.bf16.msra.mxu1 %v9706_v39  ;;  %v9662_v53 = vpop.permute.xlu0 %9661 }
 0xe57   :  { %12799 = vmatprep.subr.bf16.mxu1 %v17932_v13  ;;  %v9696_v15 = vmul.f32 %v17402_v25, %v9658_v52  ;;  %v9697_v34 = vmul.f32 %v17405_v61, %v9662_v53  ;;  %v13704_v52 = vld [vmem:[#allocation33 + $0x4c] ss:$16 sps:$4 sm:$0xff]   ;;  %v13702_v53 = vld [vmem:[#allocation33 + $0x48] ss:$16 sps:$4 sm:$0xff]  }
 0xe59   :  { %v9708_v28 = vpack.c.bf16 %v9697_v34, %v9696_v15  ;;  %v13705_v15 = vld [vmem:[#allocation33 + $0x68] ss:$16 sps:$4 sm:$0xff]   ;;  %v13710_v34 = vld [vmem:[#allocation31 + $0x4] ss:$16 sps:$4 sm:$0xff]  }
 0xe5a   :  { %v9666_v50 = vpop.permute.xlu1 %9665  ;;  %12800 = vmatpush3.bf16.msra.mxu1 %v9707_v26  ;;  %v9670_v16 = vpop.permute.xlu0 %9669  ;;  %v13707_v26 = vld [vmem:[#allocation33 + $0x6c] ss:$16 sps:$4 sm:$0xff]  }
 0xe5b   :  { %12801 = vmatprep.subr.bf16.mxu1 %v17932_v13  ;;  %v9698_v23 = vmul.f32 %v17418_v31, %v9666_v50  ;;  %v9699_v56 = vmul.f32 %v17409_v5, %v9670_v16  ;;  %v13708_v50 = vld [vmem:[#allocation31] ss:$16 sps:$4 sm:$0xff]   ;;  %v13713_v16 = vld [vmem:[#allocation31 + $0x24] ss:$16 sps:$4 sm:$0xff]  }
 0xe5d   :  { %v9709_v32 = vpack.c.bf16 %v9699_v56, %v9698_v23  ;;  %v13716_v23 = vld [vmem:[#allocation31 + $0x44] ss:$16 sps:$4 sm:$0xff]   ;;  %v13714_v56 = vld [vmem:[#allocation31 + $0x40] ss:$16 sps:$4 sm:$0xff]  }
 0xe5e   :  { %v9674_v38 = vpop.permute.xlu1 %9673  ;;  %12802 = vmatpush3.bf16.msra.mxu1 %v9708_v28  ;;  %v9678_v7 = vpop.permute.xlu0 %9677  ;;  %v13711_v28 = vld [vmem:[#allocation31 + $0x20] ss:$16 sps:$4 sm:$0xff]  }
 0xe5f   :  { %12803 = vmatprep.subr.bf16.mxu1 %v17932_v13  ;;  %v9700_v0 = vmul.f32 %v17425_v44, %v9674_v38  ;;  %v9701_v54 = vmul.f32 %v17422_v60, %v9678_v7  ;;  %v13719_v38 = vld [vmem:[#allocation31 + $0x64] ss:$16 sps:$4 sm:$0xff]   ;;  %v13717_v7 = vld [vmem:[#allocation31 + $0x60] ss:$16 sps:$4 sm:$0xff]  }
 0xe61   :  { %v9710_v43 = vpack.c.bf16 %v9701_v54, %v9700_v0  ;;  %v13720_v0 = vld [vmem:[#allocation31 + $0x8] ss:$16 sps:$4 sm:$0xff]  }
 0xe62   :  { %v9682_v11 = vpop.permute.xlu1 %9681  ;;  %12804 = vmatpush3.bf16.msra.mxu1 %v9709_v32  ;;  %v9686_v3 = vpop.permute.xlu0 %9685  ;;  %v13722_v32 = vld [vmem:[#allocation31 + $0xc] ss:$16 sps:$4 sm:$0xff]  }
 0xe63   :  { %12805 = vmatprep.subr.bf16.mxu1 %v17932_v13  ;;  %v9702_v55 = vmul.f32 %v17437_v1, %v9682_v11  ;;  %v9703_v46 = vmul.f32 %v17434_v22, %v9686_v3  ;;  %v13725_v11 = vld [vmem:[#allocation31 + $0x2c] ss:$16 sps:$4 sm:$0xff]   ;;  %v13723_v3 = vld [vmem:[#allocation31 + $0x28] ss:$16 sps:$4 sm:$0xff]  }
 0xe65   :  { %v9711_v10 = vpack.c.bf16 %v9703_v46, %v9702_v55  ;;  %v13726_v55 = vld [vmem:[#allocation31 + $0x48] ss:$16 sps:$4 sm:$0xff]   ;;  %v13731_v46 = vld [vmem:[#allocation31 + $0x6c] ss:$16 sps:$4 sm:$0xff]  }
 0xe66   :  { %12806 = vmatpush3.bf16.msra.mxu1 %v9710_v43  ;;  %v13728_v43 = vld [vmem:[#allocation31 + $0x4c] ss:$16 sps:$4 sm:$0xff]  }
 0xe67   :  { %12807 = vmatprep.subr.bf16.mxu1 %v17932_v13 }
 0xe6a   :  { %12808 = vmatpush3.bf16.msra.mxu1 %v9711_v10  ;;  %v13729_v10 = vld [vmem:[#allocation31 + $0x68] ss:$16 sps:$4 sm:$0xff]  }
 0xe6b   :  { %9870 = vmatprep.subr.bf16.mxu1 %v13686_v33  ;;  %v13733_v33 = vld [vmem:[%s17973_s14 + $0x8] sm:$0xff]  }
 0xe6d   :  { %12810 = vmatmul.mubr.msk.bf16.vlgmr.msra.gmra.mrb[68].mxu1 %vm17467_vm2, %v14260_v14 }
 0xe6e   :  { %9902 = vmatprep.mubr.bf16.mxu1 %v14257_v51  ;;  %9871 = vmatpush1.bf16.msra.mxu1 %v13684_v40  ;;  %v13732_v40 = vld [vmem:[%s17973_s14] sm:$0xff]  }
 0xe6f   :  { %9872 = vmatprep.subr.bf16.mxu1 %v13689_v18 }
 0xe72   :  { %9873 = vmatpush1.bf16.msra.mxu1 %v13687_v35 }
 0xe73   :  { %9874 = vmatprep.subr.bf16.mxu1 %v13692_v17  ;;  %v10117_v17 = vld [vmem:[#allocation34] sm:$0xf] }
 0xe76   :  { %9875 = vmatpush1.bf16.msra.mxu1 %v13690_v36  ;;  %v10122_v36 = vrot.slane %v10117_v17, %v17934_v62 }
 0xe77   :  { %9876 = vmatprep.subr.bf16.mxu1 %v13695_v48 }
 0xe7a   :  { %9877 = vmatpush1.bf16.msra.mxu1 %v13693_v24 }
 0xe7b   :  { %9911 = vmatprep.subr.bf16.mxu1 %v13698_v6 }
 0xf20   :  { %v9618_v49 = vpop.f32.mrb[64].mxu1 }
 0xf21   :  { %v12791_v47 = vpop.f32.mrb[65].mxu1  ;;  %v9768_v54 = vpack.c.bf16 %v9618_v49, %v9618_v49 }
 0xf22   :  { %v9621_v45 = vpop.f32.mrb[66].mxu1 }
 0xf23   :  { %v12792_v41 = vpop.f32.mrb[67].mxu1 }
 0xf40   :  { %v9746_v63 = vpop.f32.mrb[68].mxu1 }
 0xf41   :  { %v9785_v19 = vpack.c.bf16 %v9746_v63, %v9746_v63  ;;  %v12811_v9 = vpop.f32.mrb[69].mxu1 }
 0xf42   :  { %v9749_v39 = vpop.f32.mrb[70].mxu1  ;;  %v14261_v9 = vmov 1983009808  }
 0xf43   :  { %v12812_v30 = vpop.f32.mrb[71].mxu1  ;;  %11322 = vmatmul.mubr.msk.bf16.vlgmr.msra.gmra.mrb[72].mxu1 %vm9866_vm4, %v9785_v19 }
 0xf44   :  { %9912 = vmatpush1.bf16.msra.mxu1 %v13696_v59  ;;  %9943 = vmatprep.mubr.bf16.mxu1 %v14257_v51  ;;  %v10129_v59 = vsub.s32 2, %v17968_v42 }
 0xf45   :  { %9913 = vmatprep.subr.bf16.mxu1 %v13701_v37  ;;  %v10150_v37 = vunpack.c.l.s4 %v14261_v9 }
 0xf46   :  { %v10130_v39 = vrot.slane %v10117_v17, %v10129_v59 }
 0xf48   :  { %9914 = vmatpush1.bf16.msra.mxu1 %v13699_v2 }
 0xf49   :  { %9915 = vmatprep.subr.bf16.mxu1 %v13704_v52  ;;  %v10151_v52 = vunpack.c.0.s8 %v10150_v37 }
 0xf4c   :  { %9916 = vmatpush1.bf16.msra.mxu1 %v13702_v53 }
 0xf4d   :  { %9917 = vmatprep.subr.bf16.mxu1 %v13707_v26 }
 0xf50   :  { %9918 = vmatpush1.bf16.msra.mxu1 %v13705_v15 }
 0xf51   :  { %10035 = vmatprep.subr.bf16.mxu1 %v13710_v34 }
 0xf53   :  { %11323 = vmatmul.mubr.msk.bf16.vlgmr.msra.gmra.mrb[76].mxu1 %vm9866_vm4, %v9785_v19  ;;  %v10133_v19 = vsub.s32 3, %v17968_v42 }
 0xf54   :  { %10036 = vmatpush1.bf16.msra.mxu1 %v13708_v50  ;;  %10067 = vmatprep.mubr.bf16.mxu1 %v14257_v51 }
 0xf55   :  { %10037 = vmatprep.subr.bf16.mxu1 %v13713_v16  ;;  %v10134_v2 = vrot.slane %v10117_v17, %v10133_v19 }
 0xf58   :  { %10038 = vmatpush1.bf16.msra.mxu1 %v13711_v28 }
 0xf59   :  { %10039 = vmatprep.subr.bf16.mxu1 %v13716_v23  ;;  %v10154_v23 = vsub.s32 %v10151_v52, %v17968_v42 }
 0xf5c   :  { %10040 = vmatpush1.bf16.msra.mxu1 %v13714_v56 }
 0xf5d   :  { %10041 = vmatprep.subr.bf16.mxu1 %v13719_v38 }
 0xf60   :  { %10042 = vmatpush1.bf16.msra.mxu1 %v13717_v7 }
 0xf61   :  { %10076 = vmatprep.subr.bf16.mxu1 %v13722_v32 }
 0xf63   :  { %11340 = vmatmul.mubr.msk.bf16.vlgmr.msra.gmra.mrb[80].mxu1 %vm9866_vm4, %v9768_v54 }
 0xf64   :  { %10077 = vmatpush1.bf16.msra.mxu1 %v13720_v0  ;;  %10108 = vmatprep.mubr.bf16.mxu1 %v14257_v51 }
 0xf65   :  { %10078 = vmatprep.subr.bf16.mxu1 %v13725_v11 }
 0xf68   :  { %10079 = vmatpush1.bf16.msra.mxu1 %v13723_v3 }
 0xf69   :  { %10080 = vmatprep.subr.bf16.mxu1 %v13728_v43 }
 0xf6c   :  { %10081 = vmatpush1.bf16.msra.mxu1 %v13726_v55 }
 0xf6d   :  { %10082 = vmatprep.subr.bf16.mxu1 %v13731_v46 }
 0xf70   :  { %10083 = vmatpush1.bf16.msra.mxu1 %v13729_v10 }
 0xf71   :  { %12813 = vmatprep.subr.bf16.mxu1 %v13732_v40 }
 0xf73   :  { %11341 = vmatmul.mubr.msk.bf16.vlgmr.msra.gmra.mrb[84].mxu1 %vm9866_vm4, %v9768_v54 }
 0xf74   :  { %12814 = vmatpush3.bf16.msra.mxu1 %v13732_v40  ;;  %12817 = vmatprep.mubr.msk.bf16.mxu1 %vm397_vm3, %v17209_v4 }
 0xf75   :  { %12815 = vmatprep.subr.bf16.mxu1 %v13733_v33 }
 0xf78   :  { %12816 = vmatpush3.bf16.msra.mxu1 %v13733_v33 }
 0xf79   :  { %12833 = vmatprep.subr.bf16.mxu1 %v17932_v13 }
 0xf7b   :  { %12818 = vmatmul.mubr.msk.bf16.vlgmr.msra.gmra.mrb[88].mxu1 %vm397_vm3, %v17213_v29 }
 0xf7c   :  { %12821 = vmatprep.mubr.msk.bf16.mxu1 %vm397_vm3, %v17215_v8 }
 0xf83   :  { %12822 = vmatmul.mubr.msk.bf16.gmra.mrb[92].mxu1 %vm397_vm3, %v17231_v58 }
 0xf84   :  { %12825 = vmatprep.mubr.msk.bf16.mxu1 %vm397_vm3, %v17237_v57 }
 0xf8b   :  { %12826 = vmatmul.mubr.msk.bf16.gmra.mrb[96].mxu1 %vm397_vm3, %v17243_v27  ;;  %v10125_v27 = vsub.s32 1, %v17968_v42 }
 0xf8c   :  { %12829 = vmatprep.mubr.msk.bf16.mxu1 %vm397_vm3, %v17245_v21 }
 0xf8d   :  { %v10126_v48 = vrot.slane %v10117_v17, %v10125_v27 }
 0xf93   :  { %12830 = vmatmul.mubr.msk.bf16.gmra.mrb[100].mxu1 %vm397_vm3, %v17249_v12  ;;  %vm10279_vm3 = vcmask 7168  }
 0xf94   :  { %12849 = vmatprep.mubr.msk.bf16.mxu1 %vm14259_vm6, %v17932_v13 }
0x1016   :  { %v9904_v4 = vpop.f32.mrb[72].mxu1 }
0x1017   :  { %v9906_v29 = vpop.f32.mrb[73].mxu1 }
0x1018   :  { %v9908_v8 = vpop.f32.mrb[74].mxu1 }
0x1019   :  { %v9909_v51 = vpop.f32.mrb[75].mxu1 }
0x1026   :  { %v9945_v58 = vpop.f32.mrb[76].mxu1 }
0x1027   :  { %v9947_v18 = vpop.f32.mrb[77].mxu1 }
0x1028   :  { %v9949_v35 = vpop.f32.mrb[78].mxu1 }
0x1029   :  { %v9950_v57 = vpop.f32.mrb[79].mxu1 }
0x1036   :  { %v10069_v21 = vpop.f32.mrb[80].mxu1 }
0x1037   :  { %v10070_v24 = vadd.f32 %v10069_v21, %v9904_v4  ;;  %v10071_v12 = vpop.f32.mrb[81].mxu1 }
0x1038   :  { %v10072_v6 = vadd.f32 %v10071_v12, %v9906_v29  ;;  %v10073_v49 = vpop.f32.mrb[82].mxu1 }
0x1039   :  { %v10139_v47 = vadd.f32 %v10122_v36, %v10070_v24  ;;  %v10074_v45 = vpop.f32.mrb[83].mxu1 }
0x103a   :  { %v10140_v41 = vadd.f32 %v10126_v48, %v10072_v6 }
0x103c   :  { %v10147_v63 = vcombine.low %v10139_v47, %v10140_v41 }
0x103e   :  { %v10155_v7 = vrot.slane %v10147_v63, %v10154_v23 }
0x1046   :  { %v10110_v30 = vpop.f32.mrb[84].mxu1 }
0x1047   :  { %v10111_v53 = vadd.f32 %v10110_v30, %v9945_v58  ;;  %v10112_v26 = vpop.f32.mrb[85].mxu1 }
0x1048   :  { %v10113_v15 = vadd.f32 %v10112_v26, %v9947_v18  ;;  %v10114_v34 = vpop.f32.mrb[86].mxu1 }
0x1049   :  { %v10141_v50 = vadd.f32 %v10130_v39, %v10111_v53  ;;  %v10115_v16 = vpop.f32.mrb[87].mxu1 }
0x104a   :  { %v10142_v28 = vadd.f32 %v10134_v2, %v10113_v15 }
0x104c   :  { %v10148_v56 = vcombine.low %v10141_v50, %v10142_v28 }
0x104e   :  { %v17535_v38 = vpop.f32.mrb[88].mxu1  ;;  %v10162_v32 = vrot.slane %v10148_v56, %v10154_v23 }
0x104f   :  { %v17537_v0 = vpop.f32.mrb[89].mxu1  ;;  %v10320_v55 = vmul.f32 %v17535_v38, %v17535_v38  ;;  %v10283_v33 = vsel %vm10279_vm3, %v17535_v38, 0.0 }
0x1050   :  { %v10318_v54 = vmul.f32 %v17537_v0, %v17537_v0  ;;  %v17541_v11 = vpop.f32.mrb[90].mxu1  ;;  %v10163_v3 = vcombine.low %v10155_v7, %v10162_v32  ;;  %v10280_v42 = vsel %vm10279_vm3, %v17537_v0, 0.0 }
0x1051   :  { %v17543_v43 = vpop.f32.mrb[91].mxu1  ;;  %v10321_v29 = vmul.f32 %v17541_v11, %v17541_v11  ;;  %v10337_v18 = vsel %vm10279_vm3, %v10320_v55, 0.0  ;;  %v10285_v35 = vsel %vm10279_vm3, %v17541_v11, 0.0 }
0x1052   :  { %v10281_v46 = vsel %vm10279_vm3, %v17543_v43, 0.0  ;;  %v10319_v10 = vmul.f32 %v17543_v43, %v17543_v43  ;;  %10165 = vst [vmem:[#allocation36] sm:$0xff] %v10163_v3  ;;  %v10334_v4 = vsel %vm10279_vm3, %v10318_v54, 0.0 }
0x1053   :  { %v10282_v40 = vadd.f32 %v10281_v46, %v10280_v42  ;;  %v10339_v21 = vsel %vm10279_vm3, %v10321_v29, 0.0 }
0x1054   :  { %v10335_v8 = vsel %vm10279_vm3, %v10319_v10, 0.0 }
0x1055   :  { %v10284_v51 = vadd.f32 %v10283_v33, %v10282_v40  ;;  %v10336_v58 = vadd.f32 %v10335_v8, %v10334_v4 }
0x1056   :  { %v17562_v57 = vpop.f32.mrb[92].mxu1 }
0x1057   :  { %v10338_v17 = vadd.f32 %v10337_v18, %v10336_v58  ;;  %v17564_v27 = vpop.f32.mrb[93].mxu1  ;;  %v10286_v36 = vadd.f32 %v10285_v35, %v10284_v51  ;;  %v10324_v45 = vmul.f32 %v17562_v57, %v17562_v57  ;;  %v10291_v37 = vsel %vm10279_vm3, %v17562_v57, 0.0 }
0x1058   :  { %v10287_v48 = vsel %vm10279_vm3, %v17564_v27, 0.0  ;;  %v10322_v24 = vmul.f32 %v17564_v27, %v17564_v27  ;;  %v17571_v12 = vpop.f32.mrb[94].mxu1 }
0x1059   :  { %v10288_v6 = vadd.f32 %v10287_v48, %v10286_v36  ;;  %v10340_v49 = vadd.f32 %v10339_v21, %v10338_v17  ;;  %v17573_v47 = vpop.f32.mrb[95].mxu1  ;;  %v10325_v39 = vmul.f32 %v17571_v12, %v17571_v12  ;;  %v10345_v53 = vsel %vm10279_vm3, %v10324_v45, 0.0 }
0x105a   :  { %v10341_v41 = vsel %vm10279_vm3, %v10322_v24, 0.0  ;;  %v10289_v63 = vsel %vm10279_vm3, %v17573_v47, 0.0  ;;  %v10323_v59 = vmul.f32 %v17573_v47, %v17573_v47  ;;  %v10293_v26 = vsel %vm10279_vm3, %v17571_v12, 0.0 }
0x105b   :  { %v10342_v19 = vadd.f32 %v10341_v41, %v10340_v49  ;;  %v10290_v9 = vadd.f32 %v10289_v63, %v10288_v6  ;;  %v10347_v28 = vsel %vm10279_vm3, %v10325_v39, 0.0 }
0x105c   :  { %v10343_v30 = vsel %vm10279_vm3, %v10323_v59, 0.0 }
0x105d   :  { %v10292_v2 = vadd.f32 %v10291_v37, %v10290_v9  ;;  %v10344_v52 = vadd.f32 %v10343_v30, %v10342_v19 }
0x105e   :  { %v17590_v15 = vpop.f32.mrb[96].mxu1 }
0x105f   :  { %v10346_v34 = vadd.f32 %v10345_v53, %v10344_v52  ;;  %v17592_v50 = vpop.f32.mrb[97].mxu1  ;;  %v10294_v16 = vadd.f32 %v10293_v26, %v10292_v2  ;;  %v10328_v55 = vmul.f32 %v17590_v15, %v17590_v15  ;;  %v10299_v4 = vsel %vm10279_vm3, %v17590_v15, 0.0 }
0x1060   :  { %v10295_v23 = vsel %vm10279_vm3, %v17592_v50, 0.0  ;;  %v10326_v56 = vmul.f32 %v17592_v50, %v17592_v50  ;;  %v17599_v7 = vpop.f32.mrb[98].mxu1 }
0x1061   :  { %v10296_v32 = vadd.f32 %v10295_v23, %v10294_v16  ;;  %v10348_v54 = vadd.f32 %v10347_v28, %v10346_v34  ;;  %v17601_v3 = vpop.f32.mrb[99].mxu1  ;;  %v10329_v29 = vmul.f32 %v17599_v7, %v17599_v7  ;;  %v10353_v18 = vsel %vm10279_vm3, %v10328_v55, 0.0 }
0x1062   :  { %v10349_v42 = vsel %vm10279_vm3, %v10326_v56, 0.0  ;;  %v10297_v46 = vsel %vm10279_vm3, %v17601_v3, 0.0  ;;  %v10327_v10 = vmul.f32 %v17601_v3, %v17601_v3  ;;  %v10301_v35 = vsel %vm10279_vm3, %v17599_v7, 0.0 }
0x1063   :  { %v10350_v40 = vadd.f32 %v10349_v42, %v10348_v54  ;;  %v10298_v33 = vadd.f32 %v10297_v46, %v10296_v32  ;;  %v10355_v24 = vsel %vm10279_vm3, %v10329_v29, 0.0 }
0x1064   :  { %v10351_v8 = vsel %vm10279_vm3, %v10327_v10, 0.0 }
0x1065   :  { %v10300_v51 = vadd.f32 %v10299_v4, %v10298_v33  ;;  %v10352_v58 = vadd.f32 %v10351_v8, %v10350_v40 }
0x1066   :  { %v17618_v17 = vpop.f32.mrb[100].mxu1 }
0x1067   :  { %v10354_v36 = vadd.f32 %v10353_v18, %v10352_v58  ;;  %v17620_v21 = vpop.f32.mrb[101].mxu1  ;;  %v10302_v48 = vadd.f32 %v10301_v35, %v10300_v51  ;;  %v10332_v19 = vmul.f32 %v17618_v17, %v17618_v17  ;;  %v10307_v52 = vsel %vm10279_vm3, %v17618_v17, 0.0 }
0x1068   :  { %v10303_v6 = vsel %vm10279_vm3, %v17620_v21, 0.0  ;;  %v10330_v49 = vmul.f32 %v17620_v21, %v17620_v21  ;;  %v17627_v45 = vpop.f32.mrb[102].mxu1 }
0x1069   :  { %v10304_v41 = vadd.f32 %v10303_v6, %v10302_v48  ;;  %v10356_v63 = vadd.f32 %v10355_v24, %v10354_v36  ;;  %v10267_v59 = vpop.f32.mrb[103].mxu1  ;;  %v10333_v53 = vmul.f32 %v17627_v45, %v17627_v45  ;;  %v10361_v28 = vsel %vm10279_vm3, %v10332_v19, 0.0 }
0x106a   :  { %v10357_v9 = vsel %vm10279_vm3, %v10330_v49, 0.0  ;;  %v10305_v37 = vsel %vm10279_vm3, %v10267_v59, 0.0  ;;  %v10331_v39 = vmul.f32 %v10267_v59, %v10267_v59  ;;  %v10309_v23 = vsel %vm10279_vm3, %v17627_v45, 0.0 }
0x106b   :  { %v10358_v30 = vadd.f32 %v10357_v9, %v10356_v63  ;;  %v10306_v2 = vadd.f32 %v10305_v37, %v10304_v41  ;;  %v10363_v54 = vsel %vm10279_vm3, %v10333_v53, 0.0  ;;  %v10374_v41 = vld [vmem:[#allocation4] sm:$0x1]  ;;  %v10378_v9 = vld [vmem:[#allocation5] sm:$0x1] }
0x106c   :  { %v10359_v26 = vsel %vm10279_vm3, %v10331_v39, 0.0 }
0x106d   :  { %v10308_v34 = vadd.f32 %v10307_v52, %v10306_v2  ;;  %v10360_v16 = vadd.f32 %v10359_v26, %v10358_v30 }
0x106f   :  { %v10310_v56 = vadd.f32 %v10309_v23, %v10308_v34  ;;  %v10362_v32 = vadd.f32 %v10361_v28, %v10360_v16 }
0x1071   :  { %v10311_v55 = vrot.slane %v10310_v56, 4  ;;  %v10364_v42 = vadd.f32 %v10363_v54, %v10362_v32 }
0x1073   :  { %v10312_v46 = vadd.f32 %v10311_v55, %v10310_v56  ;;  %v10365_v10 = vrot.slane %v10364_v42, 4 }
0x1075   :  { %v10313_v40 = vrot.slane %v10312_v46, 2  ;;  %v10366_v33 = vadd.f32 %v10365_v10, %v10364_v42 }
0x1077   :  { %v10314_v4 = vadd.f32 %v10313_v40, %v10312_v46  ;;  %v10367_v29 = vrot.slane %v10366_v33, 2 }
0x1079   :  { %v10315_v8 = vrot.slane %v10314_v4, 1  ;;  %v10368_v51 = vadd.f32 %v10367_v29, %v10366_v33 }
0x107b   :  { %v10316_v58 = vadd.f32 %v10315_v8, %v10314_v4  ;;  %v10369_v18 = vrot.slane %v10368_v51, 1 }
0x107d   :  { %v10317_v35 = vmul.f32 0.0078125, %v10316_v58  ;;  %v10370_v36 = vadd.f32 %v10369_v18, %v10368_v51 }
0x107f   :  { %v10371_v48 = vmul.f32 0.0078125, %v10370_v36  ;;  %v10372_v24 = vmul.f32 %v10317_v35, %v10317_v35 }
0x1081   :  { %v10373_v6 = vsub.f32 %v10371_v48, %v10372_v24 }
0x1083   :  { %v10375_v49 = vadd.f32 1e-05, %v10373_v6 }
0x1085   :  { %13758 = vrsqrt.f32 %v10375_v49 }
0x108f   :  { %v13759_v63 = vpop.eup %13758 }
0x1090   :  { %v10377_v19 = vmul.f32 %v13759_v63, %v10374_v41 }
0x1092   :  { %v10379_v37 = vmul.f32 %v10377_v19, %v10317_v35  ;;  %v10385_v39 = vrot.slane %v10377_v19, %v17934_v62 }
0x1094   :  { %v10380_v30 = vsub.f32 %v10378_v9, %v10379_v37  ;;  %v10400_v2 = vmul.f32 %v10385_v39, %v10267_v59  ;;  %v10388_v52 = vmul.f32 %v10385_v39, %v17543_v43  ;;  %v10387_v53 = vmul.f32 %v10385_v39, %v17537_v0 }
0x1095   :  { %v10391_v26 = vmul.f32 %v10385_v39, %v17564_v27  ;;  %v10389_v34 = vmul.f32 %v17535_v38, %v10385_v39  ;;  %v10393_v16 = vmul.f32 %v17562_v57, %v10385_v39  ;;  %v10390_v28 = vmul.f32 %v17541_v11, %v10385_v39 }
0x1096   :  { %v10407_v23 = vrot.slane %v10380_v30, %v17934_v62  ;;  %v10395_v56 = vmul.f32 %v10385_v39, %v17592_v50  ;;  %v10392_v32 = vmul.f32 %v10385_v39, %v17573_v47  ;;  %v10397_v59 = vmul.f32 %v17590_v15, %v10385_v39 }
0x1097   :  { %v10394_v43 = vmul.f32 %v17571_v12, %v10385_v39  ;;  %v10399_v0 = vmul.f32 %v10385_v39, %v17620_v21  ;;  %v10396_v27 = vmul.f32 %v10385_v39, %v17601_v3  ;;  %v10401_v38 = vmul.f32 %v17618_v17, %v10385_v39 }
0x1098   :  { %v10410_v54 = vadd.f32 %v10407_v23, %v10388_v52  ;;  %v10409_v57 = vadd.f32 %v10407_v23, %v10387_v53  ;;  %v10413_v55 = vadd.f32 %v10407_v23, %v10391_v26  ;;  %v10411_v11 = vadd.f32 %v10407_v23, %v10389_v34 }
0x1099   :  { %v10415_v42 = vadd.f32 %v10407_v23, %v10393_v16  ;;  %v10412_v62 = vadd.f32 %v10407_v23, %v10390_v28  ;;  %v10417_v46 = vadd.f32 %v10407_v23, %v10395_v56  ;;  %v10414_v50 = vadd.f32 %v10407_v23, %v10392_v32 }
0x109a   :  { %v10426_v10 = vmax.f32 %v10410_v54, 0.0  ;;  %v10425_v47 = vmax.f32 %v10409_v57, 0.0  ;;  %v10419_v15 = vadd.f32 %v10407_v23, %v10397_v59  ;;  %v10416_v12 = vadd.f32 %v10407_v23, %v10394_v43 }
0x109b   :  { %v10421_v40 = vadd.f32 %v10407_v23, %v10399_v0  ;;  %v10418_v21 = vadd.f32 %v10407_v23, %v10396_v27  ;;  %v10423_v33 = vadd.f32 %v10407_v23, %v10401_v38  ;;  %v10398_v3 = vmul.f32 %v17599_v7, %v10385_v39 }
0x109c   :  { %10448 = vperm.xlu0 %13600, %v10426_v10   ;;  %10443 = vperm.xlu1 %13599, %v10425_v47   ;;  %v10422_v17 = vadd.f32 %v10407_v23, %v10400_v2  ;;  %v10429_v4 = vmax.f32 %v10413_v55, 0.0  ;;  %v10427_v29 = vmax.f32 %v10411_v11, 0.0  ;;  %v10402_v8 = vmul.f32 %v17627_v45, %v10385_v39 }
0x109d   :  { %v10420_v51 = vadd.f32 %v10407_v23, %v10398_v3  ;;  %v10431_v18 = vmax.f32 %v10415_v42, 0.0  ;;  %v10428_v35 = vmax.f32 %v10412_v62, 0.0  ;;  %v10433_v36 = vmax.f32 %v10417_v46, 0.0 }
0x109e   :  { %v10424_v58 = vadd.f32 %v10407_v23, %v10402_v8  ;;  %v10430_v48 = vmax.f32 %v10414_v50, 0.0  ;;  %v10435_v24 = vmax.f32 %v10419_v15, 0.0  ;;  %v10432_v6 = vmax.f32 %v10416_v12, 0.0 }
0x109f   :  { %v10437_v7 = vmax.f32 %v10421_v40, 0.0  ;;  %v10434_v49 = vmax.f32 %v10418_v21, 0.0  ;;  %v10439_v45 = vmax.f32 %v10423_v33, 0.0  ;;  %v10436_v41 = vmax.f32 %v10420_v51, 0.0 }
0x10a0   :  { %10463 = vperm.xlu0 %13600, %v10429_v4   ;;  %10453 = vperm.xlu1 %13599, %v10427_v29   ;;  %v10438_v63 = vmax.f32 %v10422_v17, 0.0  ;;  %v10440_v19 = vmax.f32 %v10424_v58, 0.0  ;;  %v13739_v58 = vld [vmem:[%s14399_s12 + $0x8] sm:$0xff]  }
0x10a4   :  { %10473 = vperm.xlu0 %13600, %v10431_v18   ;;  %10458 = vperm.xlu1 %13599, %v10428_v35   ;;  %v13740_v18 = vld [vmem:[%s14399_s12 + $0x10] sm:$0xff]   ;;  %v13741_v35 = vld [vmem:[%s14399_s12 + $0x18] sm:$0xff]  }
0x10a8   :  { %10483 = vperm.xlu0 %13600, %v10433_v36   ;;  %10468 = vperm.xlu1 %13599, %v10430_v48   ;;  %v13742_v36 = vld [vmem:[%s14399_s12 + $0x20] sm:$0xff]   ;;  %v13743_v48 = vld [vmem:[%s14399_s12 + $0x28] sm:$0xff]  }
0x10ac   :  { %10493 = vperm.xlu0 %13600, %v10435_v24   ;;  %10478 = vperm.xlu1 %13599, %v10432_v6   ;;  %v13744_v24 = vld [vmem:[%s14399_s12 + $0x30] sm:$0xff]   ;;  %v13745_v6 = vld [vmem:[%s14399_s12 + $0x38] sm:$0xff]  }
0x10b0   :  { %10503 = vperm.xlu0 %13600, %v10437_v7   ;;  %10488 = vperm.xlu1 %13599, %v10434_v49   ;;  %v11354_v7 = vld [vmem:[%s17975_s2] ss:$0 sm:$0xff] }
0x10b4   :  { %10513 = vperm.xlu0 %13600, %v10439_v45   ;;  %10498 = vperm.xlu1 %13599, %v10436_v41  }
0x10b8   :  { %10508 = vperm.xlu1 %13599, %v10438_v63  }
0x10bc   :  { %10518 = vperm.xlu1 %13599, %v10440_v19  }
0x111b   :  { %v10449_v9 = vpop.permute.xlu0 %10448  ;;  %v10444_v37 = vpop.permute.xlu1 %10443 }
0x111c   :  { %v10522_v39 = vmul.f32 %v17405_v61, %v10449_v9  ;;  %v10521_v30 = vmul.f32 %v17402_v25, %v10444_v37 }
0x111e   :  { %v10537_v2 = vpack.c.bf16 %v10522_v39, %v10521_v30 }
0x111f   :  { %v10464_v52 = vpop.permute.xlu0 %10463  ;;  %v10454_v53 = vpop.permute.xlu1 %10453 }
0x1120   :  { %12834 = vmatpush3.bf16.msra.mxu1 %v10537_v2  ;;  %v10523_v16 = vmul.f32 %v17418_v31, %v10454_v53  ;;  %v10525_v59 = vmul.f32 %v17425_v44, %v10464_v52 }
0x1121   :  { %12835 = vmatprep.subr.bf16.mxu1 %v17932_v13 }
0x1123   :  { %v10474_v26 = vpop.permute.xlu0 %10473  ;;  %v10459_v34 = vpop.permute.xlu1 %10458 }
0x1124   :  { %v10524_v28 = vmul.f32 %v17409_v5, %v10459_v34  ;;  %v10527_v38 = vmul.f32 %v17437_v1, %v10474_v26 }
0x1126   :  { %v10538_v23 = vpack.c.bf16 %v10524_v28, %v10523_v16 }
0x1127   :  { %v10484_v56 = vpop.permute.xlu0 %10483  ;;  %v10469_v32 = vpop.permute.xlu1 %10468 }
0x1128   :  { %v10526_v43 = vmul.f32 %v17422_v60, %v10469_v32  ;;  %12836 = vmatpush3.bf16.msra.mxu1 %v10538_v23  ;;  %v10529_v42 = vmul.f32 %v17402_v25, %v10484_v56 }
0x1129   :  { %12837 = vmatprep.subr.bf16.mxu1 %v17932_v13 }
0x112a   :  { %v10539_v0 = vpack.c.bf16 %v10526_v43, %v10525_v59 }
0x112b   :  { %v10479_v27 = vpop.permute.xlu1 %10478  ;;  %v10494_v57 = vpop.permute.xlu0 %10493 }
0x112c   :  { %v10528_v54 = vmul.f32 %v17434_v22, %v10479_v27  ;;  %12838 = vmatpush3.bf16.msra.mxu1 %v10539_v0  ;;  %v10531_v47 = vmul.f32 %v17418_v31, %v10494_v57 }
0x112d   :  { %12839 = vmatprep.subr.bf16.mxu1 %v17932_v13 }
0x112e   :  { %v10540_v55 = vpack.c.bf16 %v10528_v54, %v10527_v38 }
0x112f   :  { %v10489_v11 = vpop.permute.xlu1 %10488  ;;  %v10504_v50 = vpop.permute.xlu0 %10503 }
0x1130   :  { %v10530_v62 = vmul.f32 %v17405_v61, %v10489_v11  ;;  %12840 = vmatpush3.bf16.msra.mxu1 %v10540_v55  ;;  %v10533_v25 = vmul.f32 %v17425_v44, %v10504_v50  ;;  %v13734_v44 = vld [vmem:[%s17974_s28] sm:$0xff]  }
0x1131   :  { %12841 = vmatprep.subr.bf16.mxu1 %v17932_v13 }
0x1132   :  { %v10541_v46 = vpack.c.bf16 %v10530_v62, %v10529_v42 }
0x1133   :  { %v10499_v10 = vpop.permute.xlu1 %10498  ;;  %v10514_v21 = vpop.permute.xlu0 %10513 }
0x1134   :  { %v10532_v15 = vmul.f32 %v17409_v5, %v10499_v10  ;;  %12842 = vmatpush3.bf16.msra.mxu1 %v10541_v46  ;;  %v10535_v5 = vmul.f32 %v17437_v1, %v10514_v21  ;;  %v13737_v1 = vld [vmem:[%s17974_s28 + $0x18] sm:$0xff]  }
0x1135   :  { %12843 = vmatprep.subr.bf16.mxu1 %v17932_v13 }
0x1136   :  { %v10542_v12 = vpack.c.bf16 %v10532_v15, %v10531_v47 }
0x1137   :  { %v10509_v40 = vpop.permute.xlu1 %10508 }
0x1138   :  { %v10534_v61 = vmul.f32 %v17422_v60, %v10509_v40  ;;  %12844 = vmatpush3.bf16.msra.mxu1 %v10542_v12  ;;  %v13735_v60 = vld [vmem:[%s17974_s28 + $0x8] sm:$0xff]  }
0x1139   :  { %12845 = vmatprep.subr.bf16.mxu1 %v17932_v13 }
0x113a   :  { %v10543_v33 = vpack.c.bf16 %v10534_v61, %v10533_v25 }
0x113b   :  { %v10519_v31 = vpop.permute.xlu1 %10518 }
0x113c   :  { %v10536_v3 = vmul.f32 %v17434_v22, %v10519_v31  ;;  %12846 = vmatpush3.bf16.msra.mxu1 %v10543_v33  ;;  %v13736_v22 = vld [vmem:[%s17974_s28 + $0x10] sm:$0xff]  }
0x113d   :  { %12847 = vmatprep.subr.bf16.mxu1 %v17932_v13 }
0x113e   :  { %v10544_v17 = vpack.c.bf16 %v10536_v3, %v10535_v5 }
0x1140   :  { %12848 = vmatpush3.bf16.msra.mxu1 %v10544_v17 }
0x1141   :  { %12853 = vmatprep.subr.bf16.mxu1 %v17932_v13 }
0x1143   :  { %12850 = vmatmul.mubr.msk.bf16.vlgmr.msra.gmra.mrb[104].mxu1 %vm17467_vm2, %v14260_v14  ;;  %v13738_v14 = vld [vmem:[%s14399_s12] sm:$0xff]  }
0x1144   :  { %12854 = vmatpush3.bf16.msra.mxu1 %v13734_v44  ;;  %12861 = vmatprep.mubr.msk.bf16.mxu1 %vm14259_vm6, %v17932_v13 }
0x1145   :  { %12855 = vmatprep.subr.bf16.mxu1 %v17932_v13 }
0x1148   :  { %12856 = vmatpush3.bf16.msra.mxu1 %v13735_v60 }
0x1149   :  { %12857 = vmatprep.subr.bf16.mxu1 %v17932_v13 }
0x114c   :  { %12858 = vmatpush3.bf16.msra.mxu1 %v13736_v22 }
0x114d   :  { %12859 = vmatprep.subr.bf16.mxu1 %v17932_v13 }
0x1150   :  { %12860 = vmatpush3.bf16.msra.mxu1 %v13737_v1 }
0x1151   :  { %12865 = vmatprep.subr.bf16.mxu1 %v17932_v13 }
0x1216   :  { %v10579_v20 = vpop.f32.mrb[104].mxu1 }
0x1217   :  { %v10593_v4 = vpack.c.bf16 %v10579_v20, %v10579_v20  ;;  %v12851_v29 = vpop.f32.mrb[105].mxu1 }
0x1218   :  { %v10582_v8 = vpop.f32.mrb[106].mxu1 }
0x1219   :  { %v12852_v51 = vpop.f32.mrb[107].mxu1  ;;  %12862 = vmatmul.mubr.msk.bf16.vlgmr.msra.gmra.mrb[108].mxu1 %vm9866_vm4, %v10593_v4 }
0x121a   :  { %12866 = vmatpush3.bf16.msra.mxu1 %v13738_v14  ;;  %12881 = vmatprep.mubr.msk.bf16.mxu1 %vm14259_vm6, %v17932_v13 }
0x121b   :  { %12867 = vmatprep.subr.bf16.mxu1 %v17932_v13 }
0x121e   :  { %12868 = vmatpush3.bf16.msra.mxu1 %v13739_v58 }
0x121f   :  { %12869 = vmatprep.subr.bf16.mxu1 %v17932_v13 }
0x1222   :  { %12870 = vmatpush3.bf16.msra.mxu1 %v13740_v18 }
0x1223   :  { %12871 = vmatprep.subr.bf16.mxu1 %v17932_v13 }
0x1226   :  { %12872 = vmatpush3.bf16.msra.mxu1 %v13741_v35 }
0x1227   :  { %12873 = vmatprep.subr.bf16.mxu1 %v17932_v13 }
0x122a   :  { %12874 = vmatpush3.bf16.msra.mxu1 %v13742_v36 }
0x122b   :  { %12875 = vmatprep.subr.bf16.mxu1 %v17932_v13 }
0x122e   :  { %12876 = vmatpush3.bf16.msra.mxu1 %v13743_v48 }
0x122f   :  { %12877 = vmatprep.subr.bf16.mxu1 %v17932_v13 }
0x1232   :  { %12878 = vmatpush3.bf16.msra.mxu1 %v13744_v24 }
0x1233   :  { %12879 = vmatprep.subr.bf16.mxu1 %v17932_v13 }
0x1236   :  { %12880 = vmatpush3.bf16.msra.mxu1 %v13745_v6 }
0x12ec   :  { %v10662_v49 = vpop.f32.mrb[108].mxu1 }
0x12ed   :  { %v10663_v45 = vadd.f32 %v11354_v7, %v10662_v49  ;;  %v12863_v41 = vpop.f32.mrb[109].mxu1 }
0x12ee   :  { %v10665_v63 = vpop.f32.mrb[110].mxu1 }
0x12ef   :  { %v10668_v19 = vmax.f32 %v10663_v45, 0.0  ;;  %v12864_v9 = vpop.f32.mrb[111].mxu1 }
0x12f1   :  { %v10685_v37 = vpack.c.bf16 %v10668_v19, %v10668_v19 }
0x12f3   :  { %12882 = vmatmul.mubr.bf16.vlgmr.msra.gmra.mrb[112].mxu1 %v10685_v37 }
0x12f4   :  { %14169 = shalt.err (!%p14166_p8)
}
0x12f5   :  { %s14170_s12 = scalar_lea.hbm %s14404_s30, 128 }
0x12f6   :  { %p14171_p9 = scmp.ne.s32.totalorder %s14404_s30, %s14170_s12  ;;  %p14174_p10 = scmp.lt.u32.totalorder %s14170_s12, %s14404_s30 }
0x12f8   :  { %p14176_p11 = pnand %p14174_p10, %p14171_p9 }
0x12fa   :  { %14179 = shalt.err (!%p14176_p11)
}
0x12fb   :  { %10793 = dma.vmem_to_hbm [thread:$0]  %s10791_s19, 128, %s14404_s30, [#allocation9]   ;;  %v11360_v13 = vld [vmem:[#allocation6] ss:$0 sm:$0xff]  ;;  %vm10782_vm5 = vcmask 1024  }
0x13c6   :  { %v10775_v39 = vpop.f32.mrb[112].mxu1 }
0x13c7   :  { %v10776_v30 = vadd.f32 %v11360_v13, %v10775_v39  ;;  %v12883_v2 = vpop.f32.mrb[113].mxu1 }
0x13c8   :  { %v10778_v52 = vpop.f32.mrb[114].mxu1 }
0x13c9   :  { %13760 = vtanh.f32 %v10776_v30  ;;  %v12884_v53 = vpop.f32.mrb[115].mxu1 }
0x13d3   :  { %v13761_v26 = vpop.eup %13760 }
0x13d4   :  { %10783 = vst.msk [vmem:[%s14409_s27] sm:$0x3] %vm10782_vm5, %v13761_v26 }
0x13d5   :  { %14200 = dma.done.wait [#allocation9], 128  }
0x13d6   :  { %14201 = vsyncadd [#allocation9], 4294967168 }
0x13d7   :  { %10801 = vsyncpa [#allocation8], 1 }
0x13d8   :  { %10802 = vsyncpa [#allocation11], 1 }
0x13d9   :  { %10803 = vsyncpa [#allocation14], 1 }
0x13da   :  { %10804 = vsyncpa [#allocation17], 1 }
0x13db   :  { %10805 = vsyncpa [#allocation20], 1 }
0x13dc   :  { %10806 = vsyncpa [#allocation23], 1 }
0x13dd   :  { %10807 = vsyncpa [#allocation26], 1 }
0x13de   :  { %10808 = vsyncpa [#allocation29], 1 }
0x13df   :  { %10809 = vsyncpa [#allocation32], 1 }
0x13e0   :  { %10810 = vsyncpa [#allocation35], 1 }
0x13e1   :  { %10811 = vsyncpa [#allocation9], 1 }

</bundles_post_ra>
